<compile_context>
chip_gen: v7x
topology: tpu7x:2x2x1
jax: 0.10.0
libtpu: 0.0.40
codegen_flags: <defaults>
</compile_context>

<pallas_src>
import functools

import jax
import jax.numpy as jnp
from jax import lax
from jax.experimental import pallas as pl
from jax.experimental.pallas import tpu as pltpu


# ----------------------------------------------------------------------------
# Pallas kernel: 2-tap implicit-GEMM conv + InstanceNorm + LeakyReLU (fused epilogue)
# ----------------------------------------------------------------------------
def _conv_in_lrelu_kernel(x_ref, w_ref, o_ref, *, wb_pad, wo, valid_count, eps,
                          neg_slope):
    """One (sample, C_out-tile) per grid step.

    x_ref : (1, P, 8*C_in) bf16   column-neighbour-packed space-to-depth input,
                                  flat row p = hb*wb_pad + wb, with wb_pad % 16 == 0.
    w_ref : (2, 8*C_in, Ct) bf16  weights for the two row taps ti = 0, 1.
    o_ref : (1, Q, Ct) bf16       Q = Ho*wb_pad; junk columns sliced off by the wrapper.
    """
    q = o_ref.shape[1]

    # Two tile-aligned taps (static sublane offsets 0 and wb_pad, both multiples of 16):
    # no relayout copies; dots summed as values — no scratch read-modify-write.
    acc = jnp.dot(x_ref[0, :q, :], w_ref[0], preferred_element_type=jnp.float32)
    acc = acc + jnp.dot(x_ref[0, wb_pad:wb_pad + q, :], w_ref[1],
                        preferred_element_type=jnp.float32)

    # Validity mask built in-kernel: columns >= wo of each output row are alignment junk.
    col = lax.broadcasted_iota(jnp.int32, (q, 1), 0) % wb_pad
    mask = (col < wo).astype(jnp.float32)                    # (Q, 1)

    # Single-pass InstanceNorm2d (affine=False) statistics over the valid positions.
    # (Conv bias cancels exactly under InstanceNorm, so it is never added.)
    ym = acc * mask
    inv_n = 1.0 / valid_count
    mean = jnp.sum(ym, axis=0, keepdims=True) * inv_n
    var = jnp.sum(ym * acc, axis=0, keepdims=True) * inv_n - mean * mean
    var = jnp.maximum(var, 0.0)                              # guard round-off
    y = (acc - mean) * lax.rsqrt(var + eps)

    # LeakyReLU(0.2) + bf16 cast, single store.
    o_ref[0] = jnp.where(y >= 0.0, y, neg_slope * y).astype(o_ref.dtype)


# ----------------------------------------------------------------------------
# Wrapper glue (space-to-depth + neighbour packing, weight packing, pallas_call)
# ----------------------------------------------------------------------------
@functools.lru_cache(maxsize=None)
def _vmem_limit_bytes():
    """3/4 of the chip's physical VMEM (per-generation gate; safe fallback 48 MiB)."""
    cap = 64 * 1024 * 1024
    try:
        cap = int(getattr(pltpu.get_tpu_info(), "vmem_capacity_bytes", cap))
    except Exception:
        pass
    return (cap * 3) // 4


def _pack_weight_2tap(w):
    """PyTorch OIHW (C_out, C_in, 4, 4) -> (2, 8*C_in, C_out).

    Row tap ti in {0,1}; contraction index k8 = tj*4*C_in + (di*2 + dj)*C_in + c,
    matching the column-neighbour-packed space-to-depth layout built below.
    """
    cout, cin, _, _ = w.shape
    w6 = w.reshape(cout, cin, 2, 2, 2, 2)         # (co, c, ti, di, tj, dj)
    w6 = w6.transpose(2, 4, 3, 5, 1, 0)           # (ti, tj, di, dj, c, co)
    return w6.reshape(2, 8 * cin, cout)


def conv_in_lrelu_pallas(x_nhwc, w, b, *, eps=1e-5, neg_slope=0.2):
    """Fused Conv2d(4, stride=2, pad=1) + InstanceNorm2d(affine=False) + LeakyReLU(0.2).

    x_nhwc: (N, H, W, C_in) with H, W even; w: (C_out, C_in, 4, 4); b: (C_out,).
    Returns (N, H/2, W/2, C_out) bf16.

    Note: the conv bias `b` is a per-channel constant and InstanceNorm subtracts the
    per-channel spatial mean, so it cancels exactly in the normalized output; it is
    therefore not used here (also avoids the E[y^2]-E[y]^2 cancellation it would add).
    """
    del b
    n, h, w_sp, cin = x_nhwc.shape
    cout = w.shape[0]

    # Zero-pad (conv padding=1) and 2x2 space-to-depth: 4x4/s2 conv -> 2x2/s1 conv.
    xp = jnp.pad(x_nhwc.astype(jnp.bfloat16), ((0, 0), (1, 1), (1, 1), (0, 0)))
    hb, wb = (h + 2) // 2, (w_sp + 2) // 2
    ho, wo = hb - 1, wb - 1
    s2d = (xp.reshape(n, hb, 2, wb, 2, cin)
             .transpose(0, 1, 3, 2, 4, 5)
             .reshape(n, hb, wb, 4 * cin))

    # Pack the column neighbour into the contraction axis (K -> 8*C_in) so only the two
    # row taps remain, and pad the row pitch to the bf16 sublane tile (16) so both tap
    # offsets {0, wb_pad} are tile-aligned inside the kernel.
    x8 = jnp.concatenate([s2d[:, :, :wo, :], s2d[:, :, 1:wo + 1, :]], axis=-1)
    wb_pad = -(-wo // 16) * 16
    x8 = jnp.pad(x8, ((0, 0), (0, 0), (0, wb_pad - wo), (0, 0)))
    k8 = 8 * cin
    p = hb * wb_pad
    x_flat = x8.reshape(n, p, k8)

    w_taps = _pack_weight_2tap(w).astype(jnp.bfloat16)        # (2, 8*C_in, C_out)

    q = ho * wb_pad
    c_tile = min(cout, 256)    # 256 matches v6e/v7x MXU width; also fine on v5e (2 passes)
    c_steps = cout // c_tile

    kernel = functools.partial(_conv_in_lrelu_kernel, wb_pad=wb_pad, wo=wo,
                               valid_count=float(ho * wo), eps=eps,
                               neg_slope=neg_slope)

    y = pl.pallas_call(
        kernel,
        out_shape=jax.ShapeDtypeStruct((n, q, cout), jnp.bfloat16),
        grid=(n, c_steps),
        in_specs=[
            # s2d slab: block index invariant along the inner C axis -> one DMA per sample.
            pl.BlockSpec((1, p, k8), lambda i, c: (i, 0, 0)),
            pl.BlockSpec((2, k8, c_tile), lambda i, c: (0, 0, c)),
        ],
        out_specs=pl.BlockSpec((1, q, c_tile), lambda i, c: (i, 0, c)),
        compiler_params=pltpu.CompilerParams(
            dimension_semantics=("parallel", "parallel"),
            vmem_limit_bytes=_vmem_limit_bytes(),
        ),
    )(x_flat, w_taps)

    # Drop the alignment-junk columns, back to NHWC.
    # Note: this slice + the next block's pad/space-to-depth are left to XLA fusion.
    return y.reshape(n, ho, wb_pad, cout)[:, :, :wo, :]


# ----------------------------------------------------------------------------
# Full forward (NHWC throughout; layer 1 and the C_out=1 final conv via XLA)
# ----------------------------------------------------------------------------
_DN_NHWC = ("NHWC", "OIHW", "NHWC")


def discriminator_forward(img_A, img_B, params):
    (w1, b1), pallas_blocks, w_final = params
    x = jnp.concatenate([img_A, img_B], axis=1)                # (N, 2*in_ch, H, W) NCHW
    x = x.transpose(0, 2, 3, 1)                                # NHWC from here on

    # Block 1: Conv(4,s2,p1)+LeakyReLU, no norm. K=32, C_out=64 -> lane/depth-sparse on
    # the MXU, tiny FLOPs: left to XLA.
    x = lax.conv_general_dilated(x, w1, (2, 2), ((1, 1), (1, 1)),
                                 dimension_numbers=_DN_NHWC)
    x = x + b1.reshape(1, 1, 1, -1)
    x = jnp.where(x >= 0.0, x, 0.2 * x)
    x = x.astype(jnp.bfloat16)

    # Blocks 2-4: fused Pallas implicit-GEMM conv + InstanceNorm + LeakyReLU.
    for w, b in pallas_blocks:
        x = conv_in_lrelu_pallas(x, w, b)

    # ZeroPad2d((1,0,1,0)) + Conv2d(512, 1, 4, pad=1, bias=False) => pad ((2,1),(2,1)).
    # C_out = 1 (1/128 lanes) -> plain XLA conv.
    x = x.astype(jnp.float32)
    y = lax.conv_general_dilated(x, w_final, (1, 1), ((2, 1), (2, 1)),
                                 dimension_numbers=_DN_NHWC)
    return y.transpose(0, 3, 1, 2)                             # back to NCHW


# ----------------------------------------------------------------------------
# Deterministic parameter init (PyTorch Conv2d default-style uniform bounds)
# ----------------------------------------------------------------------------
def init_params(key, in_channels=1):
    plan = [(in_channels * 2, 64), (64, 128), (128, 256), (256, 512)]
    ws = []
    for cin, cout in plan:
        key, k1, k2 = jax.random.split(key, 3)
        bound = 1.0 / (cin * 16) ** 0.5
        w = jax.random.uniform(k1, (cout, cin, 4, 4), jnp.float32, -bound, bound)
        b = jax.random.uniform(k2, (cout,), jnp.float32, -bound, bound)
        ws.append((w, b))
    key, k1 = jax.random.split(key)
    bound = 1.0 / (512 * 16) ** 0.5
    w_final = jax.random.uniform(k1, (1, 512, 4, 4), jnp.float32, -bound, bound)
    return (ws[0], tuple(ws[1:]), w_final)


# ----------------------------------------------------------------------------
# Pure-JAX f32 reference (lax.conv, NCHW) for validation
# ----------------------------------------------------------------------------
def reference_forward(img_A, img_B, params):
    (w1, b1), blocks, w_final = params
    dn = ("NCHW", "OIHW", "NCHW")

    def block(x, w, b, norm):
        x = lax.conv_general_dilated(x, w, (2, 2), ((1, 1), (1, 1)),
                                     dimension_numbers=dn)
        x = x + b.reshape(1, -1, 1, 1)
        if norm:
            mean = x.mean(axis=(2, 3), keepdims=True)
            var = jnp.square(x - mean).mean(axis=(2, 3), keepdims=True)
            x = (x - mean) * lax.rsqrt(var + 1e-5)
        return jnp.where(x >= 0.0, x, 0.2 * x)

    x = jnp.concatenate([img_A, img_B], axis=1)
    x = block(x, w1, b1, False)
    for w, b in blocks:
        x = block(x, w, b, True)
    return lax.conv_general_dilated(x, w_final, (1, 1), ((2, 1), (2, 1)),
                                    dimension_numbers=dn)


if __name__ == "__main__":
    key = jax.random.PRNGKey(0)
    kA, kB, kP = jax.random.split(key, 3)
    # small shapes: batch=2, in_channels=1, spatial=32 -> output (2, 1, 2, 2)
    img_A = jax.random.normal(kA, (2, 1, 32, 32), jnp.float32)
    img_B = jax.random.normal(kB, (2, 1, 32, 32), jnp.float32)
    params = init_params(kP, in_channels=1)

    fwd = jax.jit(discriminator_forward)
    out = jax.block_until_ready(fwd(img_A, img_B, params))

    ref = reference_forward(img_A, img_B, params)
    assert out.shape == ref.shape == (2, 1, 2, 2), (out.shape, ref.shape)
    err = jnp.max(jnp.abs(out.astype(jnp.float32) - ref))
    assert jnp.allclose(out.astype(jnp.float32), ref, rtol=5e-2, atol=5e-2), err
    print("KERNEL_OK")
</pallas_src>

<mosaic_0001>
module attributes {stable_mosaic.version = 11 : i64} {
  func.func @_conv_in_lrelu_kernel(%arg0: i32, %arg1: i32, %arg2: memref<1x144x512xbf16, #tpu.memory_space<vmem>>, %arg3: memref<2x512x128xbf16, #tpu.memory_space<vmem>>, %arg4: memref<1x128x128xbf16, #tpu.memory_space<vmem>>) attributes {dimension_semantics = [#tpu.dimension_semantics<parallel>, #tpu.dimension_semantics<parallel>], iteration_bounds = array<i64: 2, 1>, scalar_prefetch = 0 : i64, scratch_operands = 0 : i64, tpu.core_type = #tpu.core_type<tc>, window_params = [{transform_indices = @transform_0, window_bounds = array<i64: 1, 144, 512>}, {transform_indices = @transform_1, window_bounds = array<i64: 2, 512, 128>}, {transform_indices = @transform_2, window_bounds = array<i64: 1, 128, 128>}]} {
    %c0 = arith.constant 0 : index
    %c0_0 = arith.constant 0 : index
    %c0_1 = arith.constant 0 : index
    %0 = vector.load %arg2[%c0, %c0_0, %c0_1] : memref<1x144x512xbf16, #tpu.memory_space<vmem>>, vector<1x128x512xbf16>
    %1 = vector.shape_cast %0 : vector<1x128x512xbf16> to vector<128x512xbf16>
    %c0_2 = arith.constant 0 : index
    %c0_3 = arith.constant 0 : index
    %c0_4 = arith.constant 0 : index
    %2 = vector.load %arg3[%c0_2, %c0_3, %c0_4] : memref<2x512x128xbf16, #tpu.memory_space<vmem>>, vector<1x512x128xbf16>
    %3 = vector.shape_cast %2 : vector<1x512x128xbf16> to vector<512x128xbf16>
    %cst = arith.constant dense<0.000000e+00> : vector<128x128xf32>
    %4 = tpu.matmul %1, %3, %cst {dimension_numbers = #tpu.dot_dimension_numbers<[1], [0], [0], [1], [0, 0, 1, 1], [], []>} : vector<128x512xbf16>, vector<512x128xbf16>, vector<128x128xf32> -> vector<128x128xf32>
    %c0_5 = arith.constant 0 : index
    %c16 = arith.constant 16 : index
    %c0_6 = arith.constant 0 : index
    %5 = vector.load %arg2[%c0_5, %c16, %c0_6] : memref<1x144x512xbf16, #tpu.memory_space<vmem>>, vector<1x128x512xbf16>
    %6 = vector.shape_cast %5 : vector<1x128x512xbf16> to vector<128x512xbf16>
    %c1 = arith.constant 1 : index
    %c0_7 = arith.constant 0 : index
    %c0_8 = arith.constant 0 : index
    %7 = vector.load %arg3[%c1, %c0_7, %c0_8] : memref<2x512x128xbf16, #tpu.memory_space<vmem>>, vector<1x512x128xbf16>
    %8 = vector.shape_cast %7 : vector<1x512x128xbf16> to vector<512x128xbf16>
    %cst_9 = arith.constant dense<0.000000e+00> : vector<128x128xf32>
    %9 = tpu.matmul %6, %8, %cst_9 {dimension_numbers = #tpu.dot_dimension_numbers<[1], [0], [0], [1], [0, 0, 1, 1], [], []>} : vector<128x512xbf16>, vector<512x128xbf16>, vector<128x128xf32> -> vector<128x128xf32>
    %10 = arith.addf %4, %9 : vector<128x128xf32>
    %11 = tpu.iota {dimensions = array<i32: 0>} : vector<128x1xi32>
    %c16_i32 = arith.constant 16 : i32
    %c0_i32 = arith.constant 0 : i32
    %12 = arith.cmpi eq, %c16_i32, %c0_i32 : i32
    %c1_i32 = arith.constant 1 : i32
    %13 = arith.select %12, %c1_i32, %c16_i32 : i32
    %14 = vector.broadcast %13 : i32 to vector<128x1xi32>
    %15 = arith.remsi %11, %14 : vector<128x1xi32>
    %c0_i32_10 = arith.constant 0 : i32
    %16 = vector.broadcast %c0_i32_10 : i32 to vector<128x1xi32>
    %17 = arith.cmpi ne, %15, %16 : vector<128x1xi32>
    %c0_i32_11 = arith.constant 0 : i32
    %18 = vector.broadcast %c0_i32_11 : i32 to vector<128x1xi32>
    %19 = arith.cmpi slt, %15, %18 : vector<128x1xi32>
    %c0_i32_12 = arith.constant 0 : i32
    %20 = arith.cmpi slt, %13, %c0_i32_12 : i32
    %21 = vector.broadcast %20 : i1 to vector<128x1xi1>
    %22 = vector.broadcast %21 : vector<128x1xi1> to vector<128x1xi1>
    %23 = arith.xori %19, %22 : vector<128x1xi1>
    %24 = arith.andi %23, %17 : vector<128x1xi1>
    %25 = vector.broadcast %13 : i32 to vector<128x1xi32>
    %26 = arith.addi %15, %25 : vector<128x1xi32>
    %27 = arith.select %24, %26, %15 : vector<128x1xi1>, vector<128x1xi32>
    %c8_i32 = arith.constant 8 : i32
    %28 = vector.broadcast %c8_i32 : i32 to vector<128x1xi32>
    %29 = arith.cmpi slt, %27, %28 : vector<128x1xi32>
    %30 = arith.extui %29 : vector<128x1xi1> to vector<128x1xi32>
    %31 = arith.sitofp %30 : vector<128x1xi32> to vector<128x1xf32>
    %32 = vector.broadcast %31 : vector<128x1xf32> to vector<128x128xf32>
    %33 = arith.mulf %10, %32 : vector<128x128xf32>
    %cst_13 = arith.constant dense<0.000000e+00> : vector<128xf32>
    %34 = vector.multi_reduction <add>, %33, %cst_13 [0] : vector<128x128xf32> to vector<128xf32>
    %35 = vector.shape_cast %34 : vector<128xf32> to vector<1x128xf32>
    %cst_14 = arith.constant 1.562500e-02 : f32
    %36 = vector.broadcast %cst_14 : f32 to vector<1x128xf32>
    %37 = arith.mulf %35, %36 : vector<1x128xf32>
    %38 = arith.mulf %33, %10 : vector<128x128xf32>
    %cst_15 = arith.constant dense<0.000000e+00> : vector<128xf32>
    %39 = vector.multi_reduction <add>, %38, %cst_15 [0] : vector<128x128xf32> to vector<128xf32>
    %40 = vector.shape_cast %39 : vector<128xf32> to vector<1x128xf32>
    %cst_16 = arith.constant 1.562500e-02 : f32
    %41 = vector.broadcast %cst_16 : f32 to vector<1x128xf32>
    %42 = arith.mulf %40, %41 : vector<1x128xf32>
    %43 = arith.mulf %37, %37 : vector<1x128xf32>
    %44 = arith.subf %42, %43 : vector<1x128xf32>
    %cst_17 = arith.constant 0.000000e+00 : f32
    %45 = vector.broadcast %cst_17 : f32 to vector<1x128xf32>
    %46 = arith.maximumf %44, %45 : vector<1x128xf32>
    %47 = vector.broadcast %37 : vector<1x128xf32> to vector<128x128xf32>
    %48 = arith.subf %10, %47 : vector<128x128xf32>
    %cst_18 = arith.constant 9.99999974E-6 : f32
    %49 = vector.broadcast %cst_18 : f32 to vector<1x128xf32>
    %50 = arith.addf %46, %49 : vector<1x128xf32>
    %51 = math.rsqrt %50 : vector<1x128xf32>
    %52 = vector.broadcast %51 : vector<1x128xf32> to vector<128x128xf32>
    %53 = arith.mulf %48, %52 : vector<128x128xf32>
    %cst_19 = arith.constant 0.000000e+00 : f32
    %54 = vector.broadcast %cst_19 : f32 to vector<128x128xf32>
    %55 = arith.cmpf oge, %53, %54 : vector<128x128xf32>
    %cst_20 = arith.constant 2.000000e-01 : f32
    %56 = vector.broadcast %cst_20 : f32 to vector<128x128xf32>
    %57 = arith.mulf %56, %53 : vector<128x128xf32>
    %58 = arith.select %55, %53, %57 : vector<128x128xi1>, vector<128x128xf32>
    %59 = arith.truncf %58 : vector<128x128xf32> to vector<128x128xbf16>
    %c0_21 = arith.constant 0 : index
    %c0_22 = arith.constant 0 : index
    %c0_23 = arith.constant 0 : index
    %60 = vector.load %arg4[%c0_21, %c0_22, %c0_23] : memref<1x128x128xbf16, #tpu.memory_space<vmem>>, vector<1x128x128xbf16>
    %61 = vector.shape_cast %60 : vector<1x128x128xbf16> to vector<128x128xbf16>
    %62 = vector.shape_cast %59 : vector<128x128xbf16> to vector<1x128x128xbf16>
    tpu.vector_store %arg4[%c0_21, %c0_22, %c0_23], %62 {strides = array<i32>} : memref<1x128x128xbf16, #tpu.memory_space<vmem>>, vector<1x128x128xbf16>,
    return
  }
  func.func @transform_0(%arg0: i32, %arg1: i32) -> (i32, i32, i32) {
    %c0_i32 = arith.constant 0 : i32
    %c0_i32_0 = arith.constant 0 : i32
    %c0_i32_1 = arith.constant 0 : i32
    return %arg0, %c0_i32, %c0_i32_0 : i32, i32, i32
  }
  func.func @transform_1(%arg0: i32, %arg1: i32) -> (i32, i32, i32) {
    %c0_i32 = arith.constant 0 : i32
    %c0_i32_0 = arith.constant 0 : i32
    %c0_i32_1 = arith.constant 0 : i32
    return %c0_i32, %c0_i32_0, %arg1 : i32, i32, i32
  }
  func.func @transform_2(%arg0: i32, %arg1: i32) -> (i32, i32, i32) {
    %c0_i32 = arith.constant 0 : i32
    %c0_i32_0 = arith.constant 0 : i32
    return %arg0, %c0_i32, %arg1 : i32, i32, i32
  }
}

module attributes {stable_mosaic.version = 11 : i64} {
  func.func @_conv_in_lrelu_kernel(%arg0: i32, %arg1: i32, %arg2: memref<1x80x1024xbf16, #tpu.memory_space<vmem>>, %arg3: memref<2x1024x256xbf16, #tpu.memory_space<vmem>>, %arg4: memref<1x64x256xbf16, #tpu.memory_space<vmem>>) attributes {dimension_semantics = [#tpu.dimension_semantics<parallel>, #tpu.dimension_semantics<parallel>], iteration_bounds = array<i64: 2, 1>, scalar_prefetch = 0 : i64, scratch_operands = 0 : i64, tpu.core_type = #tpu.core_type<tc>, window_params = [{transform_indices = @transform_0, window_bounds = array<i64: 1, 80, 1024>}, {transform_indices = @transform_1, window_bounds = array<i64: 2, 1024, 256>}, {transform_indices = @transform_2, window_bounds = array<i64: 1, 64, 256>}]} {
    %c0 = arith.constant 0 : index
    %c0_0 = arith.constant 0 : index
    %c0_1 = arith.constant 0 : index
    %0 = vector.load %arg2[%c0, %c0_0, %c0_1] : memref<1x80x1024xbf16, #tpu.memory_space<vmem>>, vector<1x64x1024xbf16>
    %1 = vector.shape_cast %0 : vector<1x64x1024xbf16> to vector<64x1024xbf16>
    %c0_2 = arith.constant 0 : index
    %c0_3 = arith.constant 0 : index
    %c0_4 = arith.constant 0 : index
    %2 = vector.load %arg3[%c0_2, %c0_3, %c0_4] : memref<2x1024x256xbf16, #tpu.memory_space<vmem>>, vector<1x1024x256xbf16>
    %3 = vector.shape_cast %2 : vector<1x1024x256xbf16> to vector<1024x256xbf16>
    %cst = arith.constant dense<0.000000e+00> : vector<64x256xf32>
    %4 = tpu.matmul %1, %3, %cst {dimension_numbers = #tpu.dot_dimension_numbers<[1], [0], [0], [1], [0, 0, 1, 1], [], []>} : vector<64x1024xbf16>, vector<1024x256xbf16>, vector<64x256xf32> -> vector<64x256xf32>
    %c0_5 = arith.constant 0 : index
    %c16 = arith.constant 16 : index
    %c0_6 = arith.constant 0 : index
    %5 = vector.load %arg2[%c0_5, %c16, %c0_6] : memref<1x80x1024xbf16, #tpu.memory_space<vmem>>, vector<1x64x1024xbf16>
    %6 = vector.shape_cast %5 : vector<1x64x1024xbf16> to vector<64x1024xbf16>
    %c1 = arith.constant 1 : index
    %c0_7 = arith.constant 0 : index
    %c0_8 = arith.constant 0 : index
    %7 = vector.load %arg3[%c1, %c0_7, %c0_8] : memref<2x1024x256xbf16, #tpu.memory_space<vmem>>, vector<1x1024x256xbf16>
    %8 = vector.shape_cast %7 : vector<1x1024x256xbf16> to vector<1024x256xbf16>
    %cst_9 = arith.constant dense<0.000000e+00> : vector<64x256xf32>
    %9 = tpu.matmul %6, %8, %cst_9 {dimension_numbers = #tpu.dot_dimension_numbers<[1], [0], [0], [1], [0, 0, 1, 1], [], []>} : vector<64x1024xbf16>, vector<1024x256xbf16>, vector<64x256xf32> -> vector<64x256xf32>
    %10 = arith.addf %4, %9 : vector<64x256xf32>
    %11 = tpu.iota {dimensions = array<i32: 0>} : vector<64x1xi32>
    %c16_i32 = arith.constant 16 : i32
    %c0_i32 = arith.constant 0 : i32
    %12 = arith.cmpi eq, %c16_i32, %c0_i32 : i32
    %c1_i32 = arith.constant 1 : i32
    %13 = arith.select %12, %c1_i32, %c16_i32 : i32
    %14 = vector.broadcast %13 : i32 to vector<64x1xi32>
    %15 = arith.remsi %11, %14 : vector<64x1xi32>
    %c0_i32_10 = arith.constant 0 : i32
    %16 = vector.broadcast %c0_i32_10 : i32 to vector<64x1xi32>
    %17 = arith.cmpi ne, %15, %16 : vector<64x1xi32>
    %c0_i32_11 = arith.constant 0 : i32
    %18 = vector.broadcast %c0_i32_11 : i32 to vector<64x1xi32>
    %19 = arith.cmpi slt, %15, %18 : vector<64x1xi32>
    %c0_i32_12 = arith.constant 0 : i32
    %20 = arith.cmpi slt, %13, %c0_i32_12 : i32
    %21 = vector.broadcast %20 : i1 to vector<64x1xi1>
    %22 = vector.broadcast %21 : vector<64x1xi1> to vector<64x1xi1>
    %23 = arith.xori %19, %22 : vector<64x1xi1>
    %24 = arith.andi %23, %17 : vector<64x1xi1>
    %25 = vector.broadcast %13 : i32 to vector<64x1xi32>
    %26 = arith.addi %15, %25 : vector<64x1xi32>
    %27 = arith.select %24, %26, %15 : vector<64x1xi1>, vector<64x1xi32>
    %c4_i32 = arith.constant 4 : i32
    %28 = vector.broadcast %c4_i32 : i32 to vector<64x1xi32>
    %29 = arith.cmpi slt, %27, %28 : vector<64x1xi32>
    %30 = arith.extui %29 : vector<64x1xi1> to vector<64x1xi32>
    %31 = arith.sitofp %30 : vector<64x1xi32> to vector<64x1xf32>
    %32 = vector.broadcast %31 : vector<64x1xf32> to vector<64x256xf32>
    %33 = arith.mulf %10, %32 : vector<64x256xf32>
    %cst_13 = arith.constant dense<0.000000e+00> : vector<256xf32>
    %34 = vector.multi_reduction <add>, %33, %cst_13 [0] : vector<64x256xf32> to vector<256xf32>
    %35 = vector.shape_cast %34 : vector<256xf32> to vector<1x256xf32>
    %cst_14 = arith.constant 6.250000e-02 : f32
    %36 = vector.broadcast %cst_14 : f32 to vector<1x256xf32>
    %37 = arith.mulf %35, %36 : vector<1x256xf32>
    %38 = arith.mulf %33, %10 : vector<64x256xf32>
    %cst_15 = arith.constant dense<0.000000e+00> : vector<256xf32>
    %39 = vector.multi_reduction <add>, %38, %cst_15 [0] : vector<64x256xf32> to vector<256xf32>
    %40 = vector.shape_cast %39 : vector<256xf32> to vector<1x256xf32>
    %cst_16 = arith.constant 6.250000e-02 : f32
    %41 = vector.broadcast %cst_16 : f32 to vector<1x256xf32>
    %42 = arith.mulf %40, %41 : vector<1x256xf32>
    %43 = arith.mulf %37, %37 : vector<1x256xf32>
    %44 = arith.subf %42, %43 : vector<1x256xf32>
    %cst_17 = arith.constant 0.000000e+00 : f32
    %45 = vector.broadcast %cst_17 : f32 to vector<1x256xf32>
    %46 = arith.maximumf %44, %45 : vector<1x256xf32>
    %47 = vector.broadcast %37 : vector<1x256xf32> to vector<64x256xf32>
    %48 = arith.subf %10, %47 : vector<64x256xf32>
    %cst_18 = arith.constant 9.99999974E-6 : f32
    %49 = vector.broadcast %cst_18 : f32 to vector<1x256xf32>
    %50 = arith.addf %46, %49 : vector<1x256xf32>
    %51 = math.rsqrt %50 : vector<1x256xf32>
    %52 = vector.broadcast %51 : vector<1x256xf32> to vector<64x256xf32>
    %53 = arith.mulf %48, %52 : vector<64x256xf32>
    %cst_19 = arith.constant 0.000000e+00 : f32
    %54 = vector.broadcast %cst_19 : f32 to vector<64x256xf32>
    %55 = arith.cmpf oge, %53, %54 : vector<64x256xf32>
    %cst_20 = arith.constant 2.000000e-01 : f32
    %56 = vector.broadcast %cst_20 : f32 to vector<64x256xf32>
    %57 = arith.mulf %56, %53 : vector<64x256xf32>
    %58 = arith.select %55, %53, %57 : vector<64x256xi1>, vector<64x256xf32>
    %59 = arith.truncf %58 : vector<64x256xf32> to vector<64x256xbf16>
    %c0_21 = arith.constant 0 : index
    %c0_22 = arith.constant 0 : index
    %c0_23 = arith.constant 0 : index
    %60 = vector.load %arg4[%c0_21, %c0_22, %c0_23] : memref<1x64x256xbf16, #tpu.memory_space<vmem>>, vector<1x64x256xbf16>
    %61 = vector.shape_cast %60 : vector<1x64x256xbf16> to vector<64x256xbf16>
    %62 = vector.shape_cast %59 : vector<64x256xbf16> to vector<1x64x256xbf16>
    tpu.vector_store %arg4[%c0_21, %c0_22, %c0_23], %62 {strides = array<i32>} : memref<1x64x256xbf16, #tpu.memory_space<vmem>>, vector<1x64x256xbf16>,
    return
  }
  func.func @transform_0(%arg0: i32, %arg1: i32) -> (i32, i32, i32) {
    %c0_i32 = arith.constant 0 : i32
    %c0_i32_0 = arith.constant 0 : i32
    %c0_i32_1 = arith.constant 0 : i32
    return %arg0, %c0_i32, %c0_i32_0 : i32, i32, i32
  }
  func.func @transform_1(%arg0: i32, %arg1: i32) -> (i32, i32, i32) {
    %c0_i32 = arith.constant 0 : i32
    %c0_i32_0 = arith.constant 0 : i32
    %c0_i32_1 = arith.constant 0 : i32
    return %c0_i32, %c0_i32_0, %arg1 : i32, i32, i32
  }
  func.func @transform_2(%arg0: i32, %arg1: i32) -> (i32, i32, i32) {
    %c0_i32 = arith.constant 0 : i32
    %c0_i32_0 = arith.constant 0 : i32
    return %arg0, %c0_i32, %arg1 : i32, i32, i32
  }
}

module attributes {stable_mosaic.version = 11 : i64} {
  func.func @_conv_in_lrelu_kernel(%arg0: i32, %arg1: i32, %arg2: memref<1x48x2048xbf16, #tpu.memory_space<vmem>>, %arg3: memref<2x2048x256xbf16, #tpu.memory_space<vmem>>, %arg4: memref<1x32x256xbf16, #tpu.memory_space<vmem>>) attributes {dimension_semantics = [#tpu.dimension_semantics<parallel>, #tpu.dimension_semantics<parallel>], iteration_bounds = array<i64: 2, 2>, scalar_prefetch = 0 : i64, scratch_operands = 0 : i64, tpu.core_type = #tpu.core_type<tc>, window_params = [{transform_indices = @transform_0, window_bounds = array<i64: 1, 48, 2048>}, {transform_indices = @transform_1, window_bounds = array<i64: 2, 2048, 256>}, {transform_indices = @transform_2, window_bounds = array<i64: 1, 32, 256>}]} {
    %c0 = arith.constant 0 : index
    %c0_0 = arith.constant 0 : index
    %c0_1 = arith.constant 0 : index
    %0 = vector.load %arg2[%c0, %c0_0, %c0_1] : memref<1x48x2048xbf16, #tpu.memory_space<vmem>>, vector<1x32x2048xbf16>
    %1 = vector.shape_cast %0 : vector<1x32x2048xbf16> to vector<32x2048xbf16>
    %c0_2 = arith.constant 0 : index
    %c0_3 = arith.constant 0 : index
    %c0_4 = arith.constant 0 : index
    %2 = vector.load %arg3[%c0_2, %c0_3, %c0_4] : memref<2x2048x256xbf16, #tpu.memory_space<vmem>>, vector<1x2048x256xbf16>
    %3 = vector.shape_cast %2 : vector<1x2048x256xbf16> to vector<2048x256xbf16>
    %cst = arith.constant dense<0.000000e+00> : vector<32x256xf32>
    %4 = tpu.matmul %1, %3, %cst {dimension_numbers = #tpu.dot_dimension_numbers<[1], [0], [0], [1], [0, 0, 1, 1], [], []>} : vector<32x2048xbf16>, vector<2048x256xbf16>, vector<32x256xf32> -> vector<32x256xf32>
    %c0_5 = arith.constant 0 : index
    %c16 = arith.constant 16 : index
    %c0_6 = arith.constant 0 : index
    %5 = vector.load %arg2[%c0_5, %c16, %c0_6] : memref<1x48x2048xbf16, #tpu.memory_space<vmem>>, vector<1x32x2048xbf16>
    %6 = vector.shape_cast %5 : vector<1x32x2048xbf16> to vector<32x2048xbf16>
    %c1 = arith.constant 1 : index
    %c0_7 = arith.constant 0 : index
    %c0_8 = arith.constant 0 : index
    %7 = vector.load %arg3[%c1, %c0_7, %c0_8] : memref<2x2048x256xbf16, #tpu.memory_space<vmem>>, vector<1x2048x256xbf16>
    %8 = vector.shape_cast %7 : vector<1x2048x256xbf16> to vector<2048x256xbf16>
    %cst_9 = arith.constant dense<0.000000e+00> : vector<32x256xf32>
    %9 = tpu.matmul %6, %8, %cst_9 {dimension_numbers = #tpu.dot_dimension_numbers<[1], [0], [0], [1], [0, 0, 1, 1], [], []>} : vector<32x2048xbf16>, vector<2048x256xbf16>, vector<32x256xf32> -> vector<32x256xf32>
    %10 = arith.addf %4, %9 : vector<32x256xf32>
    %11 = tpu.iota {dimensions = array<i32: 0>} : vector<32x1xi32>
    %c16_i32 = arith.constant 16 : i32
    %c0_i32 = arith.constant 0 : i32
    %12 = arith.cmpi eq, %c16_i32, %c0_i32 : i32
    %c1_i32 = arith.constant 1 : i32
    %13 = arith.select %12, %c1_i32, %c16_i32 : i32
    %14 = vector.broadcast %13 : i32 to vector<32x1xi32>
    %15 = arith.remsi %11, %14 : vector<32x1xi32>
    %c0_i32_10 = arith.constant 0 : i32
    %16 = vector.broadcast %c0_i32_10 : i32 to vector<32x1xi32>
    %17 = arith.cmpi ne, %15, %16 : vector<32x1xi32>
    %c0_i32_11 = arith.constant 0 : i32
    %18 = vector.broadcast %c0_i32_11 : i32 to vector<32x1xi32>
    %19 = arith.cmpi slt, %15, %18 : vector<32x1xi32>
    %c0_i32_12 = arith.constant 0 : i32
    %20 = arith.cmpi slt, %13, %c0_i32_12 : i32
    %21 = vector.broadcast %20 : i1 to vector<32x1xi1>
    %22 = vector.broadcast %21 : vector<32x1xi1> to vector<32x1xi1>
    %23 = arith.xori %19, %22 : vector<32x1xi1>
    %24 = arith.andi %23, %17 : vector<32x1xi1>
    %25 = vector.broadcast %13 : i32 to vector<32x1xi32>
    %26 = arith.addi %15, %25 : vector<32x1xi32>
    %27 = arith.select %24, %26, %15 : vector<32x1xi1>, vector<32x1xi32>
    %c2_i32 = arith.constant 2 : i32
    %28 = vector.broadcast %c2_i32 : i32 to vector<32x1xi32>
    %29 = arith.cmpi slt, %27, %28 : vector<32x1xi32>
    %30 = arith.extui %29 : vector<32x1xi1> to vector<32x1xi32>
    %31 = arith.sitofp %30 : vector<32x1xi32> to vector<32x1xf32>
    %32 = vector.broadcast %31 : vector<32x1xf32> to vector<32x256xf32>
    %33 = arith.mulf %10, %32 : vector<32x256xf32>
    %cst_13 = arith.constant dense<0.000000e+00> : vector<256xf32>
    %34 = vector.multi_reduction <add>, %33, %cst_13 [0] : vector<32x256xf32> to vector<256xf32>
    %35 = vector.shape_cast %34 : vector<256xf32> to vector<1x256xf32>
    %cst_14 = arith.constant 2.500000e-01 : f32
    %36 = vector.broadcast %cst_14 : f32 to vector<1x256xf32>
    %37 = arith.mulf %35, %36 : vector<1x256xf32>
    %38 = arith.mulf %33, %10 : vector<32x256xf32>
    %cst_15 = arith.constant dense<0.000000e+00> : vector<256xf32>
    %39 = vector.multi_reduction <add>, %38, %cst_15 [0] : vector<32x256xf32> to vector<256xf32>
    %40 = vector.shape_cast %39 : vector<256xf32> to vector<1x256xf32>
    %cst_16 = arith.constant 2.500000e-01 : f32
    %41 = vector.broadcast %cst_16 : f32 to vector<1x256xf32>
    %42 = arith.mulf %40, %41 : vector<1x256xf32>
    %43 = arith.mulf %37, %37 : vector<1x256xf32>
    %44 = arith.subf %42, %43 : vector<1x256xf32>
    %cst_17 = arith.constant 0.000000e+00 : f32
    %45 = vector.broadcast %cst_17 : f32 to vector<1x256xf32>
    %46 = arith.maximumf %44, %45 : vector<1x256xf32>
    %47 = vector.broadcast %37 : vector<1x256xf32> to vector<32x256xf32>
    %48 = arith.subf %10, %47 : vector<32x256xf32>
    %cst_18 = arith.constant 9.99999974E-6 : f32
    %49 = vector.broadcast %cst_18 : f32 to vector<1x256xf32>
    %50 = arith.addf %46, %49 : vector<1x256xf32>
    %51 = math.rsqrt %50 : vector<1x256xf32>
    %52 = vector.broadcast %51 : vector<1x256xf32> to vector<32x256xf32>
    %53 = arith.mulf %48, %52 : vector<32x256xf32>
    %cst_19 = arith.constant 0.000000e+00 : f32
    %54 = vector.broadcast %cst_19 : f32 to vector<32x256xf32>
    %55 = arith.cmpf oge, %53, %54 : vector<32x256xf32>
    %cst_20 = arith.constant 2.000000e-01 : f32
    %56 = vector.broadcast %cst_20 : f32 to vector<32x256xf32>
    %57 = arith.mulf %56, %53 : vector<32x256xf32>
    %58 = arith.select %55, %53, %57 : vector<32x256xi1>, vector<32x256xf32>
    %59 = arith.truncf %58 : vector<32x256xf32> to vector<32x256xbf16>
    %c0_21 = arith.constant 0 : index
    %c0_22 = arith.constant 0 : index
    %c0_23 = arith.constant 0 : index
    %60 = vector.load %arg4[%c0_21, %c0_22, %c0_23] : memref<1x32x256xbf16, #tpu.memory_space<vmem>>, vector<1x32x256xbf16>
    %61 = vector.shape_cast %60 : vector<1x32x256xbf16> to vector<32x256xbf16>
    %62 = vector.shape_cast %59 : vector<32x256xbf16> to vector<1x32x256xbf16>
    tpu.vector_store %arg4[%c0_21, %c0_22, %c0_23], %62 {strides = array<i32>} : memref<1x32x256xbf16, #tpu.memory_space<vmem>>, vector<1x32x256xbf16>,
    return
  }
  func.func @transform_0(%arg0: i32, %arg1: i32) -> (i32, i32, i32) {
    %c0_i32 = arith.constant 0 : i32
    %c0_i32_0 = arith.constant 0 : i32
    %c0_i32_1 = arith.constant 0 : i32
    return %arg0, %c0_i32, %c0_i32_0 : i32, i32, i32
  }
  func.func @transform_1(%arg0: i32, %arg1: i32) -> (i32, i32, i32) {
    %c0_i32 = arith.constant 0 : i32
    %c0_i32_0 = arith.constant 0 : i32
    %c0_i32_1 = arith.constant 0 : i32
    return %c0_i32, %c0_i32_0, %arg1 : i32, i32, i32
  }
  func.func @transform_2(%arg0: i32, %arg1: i32) -> (i32, i32, i32) {
    %c0_i32 = arith.constant 0 : i32
    %c0_i32_0 = arith.constant 0 : i32
    return %arg0, %c0_i32, %arg1 : i32, i32, i32
  }
}

</mosaic_0001>

<bundles_post_ra>
// kernel: discriminator_forward.3
= control target key start
LH: loop header
LB: loop body
LE: loop exit
PB: predicated region body
PF: predicated region fallthrough
CT: control target
= control target key end

     0   :  { %s2781_s9 = smov 0   ;;  %s2783_s10 = smov 0   ;;  %s3299_s0 = inlined_call_operand.vmem [shape: bf16[2,144,512], index: 0, kind: input, shape index: {}]   ;;  %s3300_s1 = inlined_call_operand.vmem [shape: bf16[2,512,128], index: 1, kind: input, shape index: {}]   ;;  %s3301_s2 = inlined_call_operand.vmem [shape: bf16[2,128,128], index: 2, kind: output, shape index: {}]  }
   0x1   :  { %s2785_s11 = smov 0  }
   0x2 LB: > { %s24_s12 = sadd.s32 1, %s2760_s10  ;;  %p2063_p0 = scmp.ge.s32.totalorder %s2764_s11, 1  ;;  %s2764_s11 = sphi %s2785_s11, %s12_s11   ;;  %s2760_s10 = sphi %s2783_s10, %s3303_s10   ;;  %s2756_s9 = sphi %s2781_s9, %s3302_s9  }
   0x3   : > { %p26_p1 = scmp.ge.s32.totalorder %s24_s12, 2  ;;  %p135_p2 = scmp.lt.s32.totalorder %s2764_s11, 3 }
   0x5   : > { %s3305_s12 = smov (%p26_p1, %s24_s12), 0  ;;  %p136_p3 = pnand %p2063_p0, %p135_p2 }
   0x6   : > { %v2622_v0 = vld [vmem:[%s3300_s1 + $0x140] sm:$0xff] (!%p136_p3)   ;;  %v2626_v4 = vld [vmem:[%s3300_s1 + $0x148] sm:$0xff] (!%p136_p3)   ;;  %v2630_v8 = vld [vmem:[%s3300_s1 + $0x150] sm:$0xff] (!%p136_p3)   ;;  %p164_p4 = scmp.lt.s32.totalorder (!%p136_p3), %s2756_s9, 1 }
   0x7   : > { %139 = sbr.rel (%p136_p3) target bundleno = 440 (0x1b8), region = 28  ;;  %v2623_v1 = vld [vmem:[%s3300_s1 + $0x1c0] sm:$0xff] (!%p136_p3)   ;;  %2341 = vmatprep.subr.bf16.mxu0 (!%p136_p3), %v2622_v0  ;;  %v2627_v5 = vld [vmem:[%s3300_s1 + $0x1c8] sm:$0xff] (!%p136_p3)   ;;  %v2631_v9 = vld [vmem:[%s3300_s1 + $0x1d0] sm:$0xff] (!%p136_p3)  }
   0x8   : > { %v2624_v2 = vld [vmem:[%s3300_s1 + $0x100] sm:$0xff] (!%p136_p3)   ;;  %2405 = vmatprep.subr.bf16.mxu1 (!%p136_p3), %v2623_v1  ;;  %v2628_v6 = vld [vmem:[%s3300_s1 + $0x108] sm:$0xff] (!%p136_p3)   ;;  %v2632_v10 = vld [vmem:[%s3300_s1 + $0x110] sm:$0xff] (!%p136_p3)  }
   0x9   : > { %v2625_v3 = vld [vmem:[%s3300_s1 + $0x180] sm:$0xff] (!%p136_p3)   ;;  %2342 = vmatpush3.bf16.msra.mxu0 (!%p136_p3), %v2624_v2  ;;  %v2629_v7 = vld [vmem:[%s3300_s1 + $0x188] sm:$0xff] (!%p136_p3)   ;;  %v2633_v11 = vld [vmem:[%s3300_s1 + $0x190] sm:$0xff] (!%p136_p3)  }
   0xa   : > { %2406 = vmatpush3.bf16.msra.mxu1 (!%p136_p3), %v2625_v3  ;;  %2343 = vmatprep.subr.bf16.mxu0 (!%p136_p3), %v2626_v4  ;;  %v2634_v12 = vld [vmem:[%s3300_s1 + $0x158] sm:$0xff] (!%p136_p3)   ;;  %v2638_v16 = vld [vmem:[%s3300_s1 + $0x160] sm:$0xff] (!%p136_p3)   ;;  %v2642_v20 = vld [vmem:[%s3300_s1 + $0x168] sm:$0xff] (!%p136_p3)  }
   0xb   : > { %2407 = vmatprep.subr.bf16.mxu1 (!%p136_p3), %v2627_v5  ;;  %v2635_v13 = vld [vmem:[%s3300_s1 + $0x1d8] sm:$0xff] (!%p136_p3)   ;;  %v2639_v17 = vld [vmem:[%s3300_s1 + $0x1e0] sm:$0xff] (!%p136_p3)   ;;  %v2643_v21 = vld [vmem:[%s3300_s1 + $0x1e8] sm:$0xff] (!%p136_p3)  }
   0xc   : > { %v2636_v14 = vld [vmem:[%s3300_s1 + $0x118] sm:$0xff] (!%p136_p3)   ;;  %v2640_v18 = vld [vmem:[%s3300_s1 + $0x120] sm:$0xff] (!%p136_p3)   ;;  %v2644_v22 = vld [vmem:[%s3300_s1 + $0x128] sm:$0xff] (!%p136_p3)  }
   0xd   : > { %2344 = vmatpush3.bf16.msra.mxu0 (!%p136_p3), %v2628_v6  ;;  %v2637_v15 = vld [vmem:[%s3300_s1 + $0x198] sm:$0xff] (!%p136_p3)   ;;  %v2641_v19 = vld [vmem:[%s3300_s1 + $0x1a0] sm:$0xff] (!%p136_p3)   ;;  %v2645_v23 = vld [vmem:[%s3300_s1 + $0x1a8] sm:$0xff] (!%p136_p3)  }
   0xe   : > { %2408 = vmatpush3.bf16.msra.mxu1 %v2629_v7  ;;  %2345 = vmatprep.subr.bf16.mxu0 %v2630_v8  ;;  %s3307_s9 = smov (!%p164_p4, %s2756_s9), 1  ;;  %v2646_v24 = vld [vmem:[%s3300_s1 + $0x170] sm:$0xff]   ;;  %v2650_v28 = vld [vmem:[%s3300_s1 + $0x178] sm:$0xff]   ;;  %v2660_v36 = vld [vmem:[%s3300_s1 + $0x40] sm:$0xff]  }
   0xf   : > { %2409 = vmatprep.subr.bf16.mxu1 %v2631_v9  ;;  %v2647_v25 = vld [vmem:[%s3300_s1 + $0x1f0] sm:$0xff]   ;;  %s2597_s17 = smul.u32 288, %s3307_s9  ;;  %v2651_v29 = vld [vmem:[%s3300_s1 + $0x1f8] sm:$0xff]   ;;  %v2661_v37 = vld [vmem:[%s3300_s1] sm:$0xff]  }
  0x10   : > { %v2648_v26 = vld [vmem:[%s3300_s1 + $0x130] sm:$0xff]   ;;  %v2652_v30 = vld [vmem:[%s3300_s1 + $0x138] sm:$0xff]   ;;  %v2662_v38 = vld [vmem:[%s3300_s1 + $0xc0] sm:$0xff]  }
  0x11   : > { %2346 = vmatpush3.bf16.msra.mxu0 %v2632_v10  ;;  %v2649_v27 = vld [vmem:[%s3300_s1 + $0x1b0] sm:$0xff]   ;;  %s2899_s28 = scalar_lea.vmem %s3299_s0, %s2597_s17  ;;  %v2653_v31 = vld [vmem:[%s3300_s1 + $0x1b8] sm:$0xff]   ;;  %v2663_v39 = vld [vmem:[%s3300_s1 + $0x80] sm:$0xff]  }
  0x12   : > { %2410 = vmatpush3.bf16.msra.mxu1 %v2633_v11  ;;  %2347 = vmatprep.subr.bf16.mxu0 %v2634_v12  ;;  %v2908_v32 = vld [vmem:[%s2899_s28 + $0x20] ss:$16 sps:$4 sm:$0xff]   ;;  %v2911_v33 = vld [vmem:[%s2899_s28 + $0x24] ss:$16 sps:$4 sm:$0xff]   ;;  %v2914_v34 = vld [vmem:[%s2899_s28 + $0x28] ss:$16 sps:$4 sm:$0xff]  }
  0x13   : > { %2411 = vmatprep.subr.bf16.mxu1 %v2635_v13  ;;  %v2917_v35 = vld [vmem:[%s2899_s28 + $0x2c] ss:$16 sps:$4 sm:$0xff]   ;;  %759 = vmatprep.mubr.bf16.mxu0 %v2911_v33  ;;  %v2936_v40 = vld [vmem:[%s2899_s28 + $0x44] ss:$16 sps:$4 sm:$0xff]   ;;  %v2942_v42 = vld [vmem:[%s2899_s28 + $0x40] ss:$16 sps:$4 sm:$0xff]  }
  0x14   : > { %856 = vmatprep.mubr.bf16.mxu1 %v2917_v35  ;;  %v2939_v41 = vld [vmem:[%s2899_s28 + $0x4c] ss:$16 sps:$4 sm:$0xff]   ;;  %v2946_v43 = vld [vmem:[%s2899_s28 + $0x48] ss:$16 sps:$4 sm:$0xff]   ;;  %v2964_v48 = vld [vmem:[%s2899_s28 + $0x64] ss:$16 sps:$4 sm:$0xff]  }
  0x15   : > { %2348 = vmatpush3.bf16.msra.mxu0 %v2636_v14  ;;  %v2670_v44 = vld [vmem:[%s3300_s1 + $0x48] sm:$0xff]   ;;  %v2970_v50 = vld [vmem:[%s2899_s28 + $0x60] ss:$16 sps:$4 sm:$0xff]   ;;  %v2991_v56 = vld [vmem:[%s2899_s28 + $0x84] ss:$16 sps:$4 sm:$0xff]  }
  0x16   : > { %2412 = vmatpush3.bf16.msra.mxu1 %v2637_v15  ;;  %2349 = vmatprep.subr.bf16.mxu0 %v2638_v16  ;;  %v2671_v45 = vld [vmem:[%s3300_s1 + $0x8] sm:$0xff]   ;;  %v2680_v52 = vld [vmem:[%s3300_s1 + $0x50] sm:$0xff]   ;;  %v2690_v60 = vld [vmem:[%s3300_s1 + $0x58] sm:$0xff]  }
  0x17   : > { %2413 = vmatprep.subr.bf16.mxu1 %v2639_v17  ;;  %v2672_v46 = vld [vmem:[%s3300_s1 + $0xc8] sm:$0xff]   ;;  %v2681_v53 = vld [vmem:[%s3300_s1 + $0x10] sm:$0xff]   ;;  %v2691_v61 = vld [vmem:[%s3300_s1 + $0x18] sm:$0xff]  }
  0x18   : > { %v2673_v47 = vld [vmem:[%s3300_s1 + $0x88] sm:$0xff]   ;;  %v2682_v54 = vld [vmem:[%s3300_s1 + $0xd0] sm:$0xff]   ;;  %v2692_v62 = vld [vmem:[%s3300_s1 + $0xd8] sm:$0xff]  }
  0x19   : > { %2350 = vmatpush3.bf16.msra.mxu0 %v2640_v18  ;;  %v2967_v49 = vld [vmem:[%s2899_s28 + $0x6c] ss:$16 sps:$4 sm:$0xff]   ;;  %v2973_v51 = vld [vmem:[%s2899_s28 + $0x68] ss:$16 sps:$4 sm:$0xff]   ;;  %v2683_v55 = vld [vmem:[%s3300_s1 + $0x90] sm:$0xff]  }
  0x1a   : > { %2414 = vmatpush3.bf16.msra.mxu1 %v2641_v19  ;;  %2351 = vmatprep.subr.bf16.mxu0 %v2642_v20  ;;  %v2995_v57 = vld [vmem:[%s2899_s28 + $0x8c] ss:$16 sps:$4 sm:$0xff]   ;;  %v2999_v58 = vld [vmem:[%s2899_s28 + $0x80] ss:$16 sps:$4 sm:$0xff]   ;;  %v3003_v59 = vld [vmem:[%s2899_s28 + $0x88] ss:$16 sps:$4 sm:$0xff]  }
  0x1b   : > { %2415 = vmatprep.subr.bf16.mxu1 %v2643_v21  ;;  %v2693_v63 = vld [vmem:[%s3300_s1 + $0x98] sm:$0xff]   ;;  %v3018_v0 = vld [vmem:[%s2899_s28 + $0xa4] ss:$16 sps:$4 sm:$0xff]   ;;  %v3028_v2 = vld [vmem:[%s2899_s28 + $0xa0] ss:$16 sps:$4 sm:$0xff]  }
  0x1c   : > { %v3022_v1 = vld [vmem:[%s2899_s28 + $0xac] ss:$16 sps:$4 sm:$0xff]   ;;  %v2700_v3 = vld [vmem:[%s3300_s1 + $0x60] sm:$0xff]   ;;  %v3034_v4 = vld [vmem:[%s2899_s28 + $0xa8] ss:$16 sps:$4 sm:$0xff]  }
  0x1d   : > { %2352 = vmatpush3.bf16.msra.mxu0 %v2644_v22  ;;  %v2701_v5 = vld [vmem:[%s3300_s1 + $0x20] sm:$0xff]   ;;  %v3049_v9 = vld [vmem:[%s2899_s28 + $0xcc] ss:$16 sps:$4 sm:$0xff]   ;;  %v3071_v15 = vld [vmem:[%s2899_s28 + $0xc8] ss:$16 sps:$4 sm:$0xff]  }
  0x1e   : > { %2416 = vmatpush3.bf16.msra.mxu1 %v2645_v23  ;;  %2353 = vmatprep.subr.bf16.mxu0 %v2646_v24  ;;  %v2702_v6 = vld [vmem:[%s3300_s1 + $0xe0] sm:$0xff]   ;;  %v2710_v10 = vld [vmem:[%s3300_s1 + $0x68] sm:$0xff]   ;;  %v2720_v18 = vld [vmem:[%s3300_s1 + $0x70] sm:$0xff]  }
  0x1f   : > { %2417 = vmatprep.subr.bf16.mxu1 %v2647_v25  ;;  %v2703_v7 = vld [vmem:[%s3300_s1 + $0xa0] sm:$0xff]   ;;  %v2711_v11 = vld [vmem:[%s3300_s1 + $0x28] sm:$0xff]   ;;  %v2721_v19 = vld [vmem:[%s3300_s1 + $0x30] sm:$0xff]  }
  0x20   : > { %v3046_v8 = vld [vmem:[%s2899_s28 + $0xc4] ss:$16 sps:$4 sm:$0xff]   ;;  %v3062_v12 = vld [vmem:[%s2899_s28 + $0xc0] ss:$16 sps:$4 sm:$0xff]   ;;  %v2712_v13 = vld [vmem:[%s3300_s1 + $0xe8] sm:$0xff]  }
  0x21   : > { %2354 = vmatpush3.bf16.msra.mxu0 %v2648_v26  ;;  %v2713_v14 = vld [vmem:[%s3300_s1 + $0xa8] sm:$0xff]   ;;  %v3074_v16 = vld [vmem:[%s2899_s28 + $0xe4] ss:$16 sps:$4 sm:$0xff]   ;;  %v2718_v22 = vld [vmem:[%s2899_s28 + $0xe0] ss:$16 sps:$4 sm:$0xff]  }
  0x22   : > { %2418 = vmatpush3.bf16.msra.mxu1 %v2649_v27  ;;  %2355 = vmatprep.subr.bf16.mxu0 %v2650_v28  ;;  %v3077_v17 = vld [vmem:[%s2899_s28 + $0xec] ss:$16 sps:$4 sm:$0xff]   ;;  %v2722_v20 = vld [vmem:[%s3300_s1 + $0xf0] sm:$0xff]   ;;  %v2719_v23 = vld [vmem:[%s2899_s28 + $0xe8] ss:$16 sps:$4 sm:$0xff]  }
  0x23   : > { %2419 = vmatprep.subr.bf16.mxu1 %v2651_v29  ;;  %v2723_v21 = vld [vmem:[%s3300_s1 + $0xb0] sm:$0xff]   ;;  %v2726_v25 = vld [vmem:[%s2899_s28 + $0x10c] ss:$16 sps:$4 sm:$0xff]  }
  0x24   : > { %v2724_v24 = vld [vmem:[%s2899_s28 + $0x104] ss:$16 sps:$4 sm:$0xff]   ;;  %v2730_v26 = vld [vmem:[%s3300_s1 + $0x78] sm:$0xff]  }
  0x25   : > { %2356 = vmatpush3.bf16.msra.mxu0 %v2652_v30  ;;  %v2731_v27 = vld [vmem:[%s3300_s1 + $0x38] sm:$0xff]   ;;  %v2728_v30 = vld [vmem:[%s2899_s28 + $0x100] ss:$16 sps:$4 sm:$0xff]  }
  0x26   : > { %2420 = vmatpush3.bf16.msra.mxu1 %v2653_v31  ;;  %2469 = vmatprep.subr.bf16.mxu0 %v2660_v36  ;;  %v2732_v28 = vld [vmem:[%s3300_s1 + $0xf8] sm:$0xff]   ;;  %v2736_v36 = vld [vmem:[%s2899_s28 + $0x4] ss:$16 sps:$4 sm:$0xff]  }
  0x27   : > { %2533 = vmatprep.subr.bf16.mxu1 %v2662_v38  ;;  %v2733_v29 = vld [vmem:[%s3300_s1 + $0xb8] sm:$0xff]   ;;  %v2734_v38 = vld [vmem:[%s2899_s28] ss:$16 sps:$4 sm:$0xff]  }
  0x28   : > { %760 = vmatmul.mubr.bf16.vlgmr.msra.gmra.mrb[0].mxu0 %v2908_v32  ;;  %v2729_v31 = vld [vmem:[%s2899_s28 + $0x108] ss:$16 sps:$4 sm:$0xff]  }
  0x29   : > { %857 = vmatmul.mubr.bf16.vlgmr.msra.gmra.mrb[0].mxu1 %v2914_v34  ;;  %2470 = vmatpush3.bf16.msra.mxu0 %v2661_v37  ;;  %v2739_v37 = vld [vmem:[%s2899_s28 + $0xc] ss:$16 sps:$4 sm:$0xff]  }
  0x2a   : > { %2534 = vmatpush3.bf16.msra.mxu1 %v2663_v39  ;;  %767 = vmatprep.mubr.bf16.mxu0 %v2936_v40  ;;  %v2737_v39 = vld [vmem:[%s2899_s28 + $0x8] ss:$16 sps:$4 sm:$0xff]   ;;  %s2277_s28 = sshll.u32 %s3307_s9, 6 }
  0x2b   : > { %864 = vmatprep.mubr.bf16.mxu1 %v2939_v41  ;;  %2471 = vmatprep.subr.bf16.mxu0 %v2670_v44  ;;  %s180_s30 = scalar_lea.vmem %s3301_s2, %s2277_s28 }
  0x2c   : > { %2535 = vmatprep.subr.bf16.mxu1 %v2672_v46 }
  0x2d   : > { %2472 = vmatpush3.bf16.msra.mxu0 %v2671_v45 }
  0x2e   : > { %2536 = vmatpush3.bf16.msra.mxu1 %v2673_v47  ;;  %2473 = vmatprep.subr.bf16.mxu0 %v2680_v52 }
  0x2f   : > { %2537 = vmatprep.subr.bf16.mxu1 %v2682_v54 }
  0x30   : > { %768 = vmatmul.mubr.bf16.gmra.mrb[4].mxu0 %v2942_v42 }
  0x31   : > { %865 = vmatmul.mubr.bf16.gmra.mrb[4].mxu1 %v2946_v43  ;;  %775 = vmatprep.mubr.bf16.mxu0 %v2964_v48 }
  0x32   : > { %872 = vmatprep.mubr.bf16.mxu1 %v2967_v49  ;;  %2474 = vmatpush3.bf16.msra.mxu0 %v2681_v53 }
  0x33   : > { %2538 = vmatpush3.bf16.msra.mxu1 %v2683_v55  ;;  %2475 = vmatprep.subr.bf16.mxu0 %v2690_v60 }
  0x34   : > { %2539 = vmatprep.subr.bf16.mxu1 %v2692_v62 }
  0x36   : > { %2476 = vmatpush3.bf16.msra.mxu0 %v2691_v61 }
  0x37   : > { %2540 = vmatpush3.bf16.msra.mxu1 %v2693_v63  ;;  %2477 = vmatprep.subr.bf16.mxu0 %v2700_v3 }
  0x38   : > { %776 = vmatmul.mubr.bf16.gmra.mrb[8].mxu0 %v2970_v50  ;;  %2541 = vmatprep.subr.bf16.mxu1 %v2702_v6 }
  0x39   : > { %873 = vmatmul.mubr.bf16.gmra.mrb[8].mxu1 %v2973_v51  ;;  %783 = vmatprep.mubr.bf16.mxu0 %v2991_v56 }
  0x3a   : > { %880 = vmatprep.mubr.bf16.mxu1 %v2995_v57  ;;  %2478 = vmatpush3.bf16.msra.mxu0 %v2701_v5 }
  0x3b   : > { %2542 = vmatpush3.bf16.msra.mxu1 %v2703_v7  ;;  %2479 = vmatprep.subr.bf16.mxu0 %v2710_v10 }
  0x3c   : > { %2543 = vmatprep.subr.bf16.mxu1 %v2712_v13 }
  0x3e   : > { %2480 = vmatpush3.bf16.msra.mxu0 %v2711_v11 }
  0x3f   : > { %2544 = vmatpush3.bf16.msra.mxu1 %v2713_v14  ;;  %2481 = vmatprep.subr.bf16.mxu0 %v2720_v18 }
  0x40   : > { %784 = vmatmul.mubr.bf16.gmra.mrb[12].mxu0 %v2999_v58  ;;  %2545 = vmatprep.subr.bf16.mxu1 %v2722_v20 }
  0x41   : > { %881 = vmatmul.mubr.bf16.gmra.mrb[12].mxu1 %v3003_v59  ;;  %791 = vmatprep.mubr.bf16.mxu0 %v3018_v0 }
  0x42   : > { %888 = vmatprep.mubr.bf16.mxu1 %v3022_v1  ;;  %2482 = vmatpush3.bf16.msra.mxu0 %v2721_v19 }
  0x43   : > { %2546 = vmatpush3.bf16.msra.mxu1 %v2723_v21  ;;  %2483 = vmatprep.subr.bf16.mxu0 %v2730_v26 }
  0x44   : > { %2547 = vmatprep.subr.bf16.mxu1 %v2732_v28 }
  0x46   : > { %2484 = vmatpush3.bf16.msra.mxu0 %v2731_v27 }
  0x47   : > { %2548 = vmatpush3.bf16.msra.mxu1 %v2733_v29 }
  0x48   : > { %792 = vmatmul.mubr.bf16.gmra.mrb[16].mxu0 %v3028_v2 }
  0x49   : > { %889 = vmatmul.mubr.bf16.gmra.mrb[16].mxu1 %v3034_v4  ;;  %799 = vmatprep.mubr.bf16.mxu0 %v3046_v8 }
  0x4a   : > { %896 = vmatprep.mubr.bf16.mxu1 %v3049_v9 }
  0x50   : > { %800 = vmatmul.mubr.bf16.gmra.mrb[20].mxu0 %v3062_v12 }
  0x51   : > { %897 = vmatmul.mubr.bf16.gmra.mrb[20].mxu1 %v3071_v15  ;;  %807 = vmatprep.mubr.bf16.mxu0 %v3074_v16 }
  0x52   : > { %904 = vmatprep.mubr.bf16.mxu1 %v3077_v17 }
  0x58   : > { %808 = vmatmul.mubr.bf16.gmra.mrb[24].mxu0 %v2718_v22 }
  0x59   : > { %905 = vmatmul.mubr.bf16.gmra.mrb[24].mxu1 %v2719_v23  ;;  %815 = vmatprep.mubr.bf16.mxu0 %v2724_v24 }
  0x5a   : > { %912 = vmatprep.mubr.bf16.mxu1 %v2726_v25 }
  0x60   : > { %816 = vmatmul.mubr.bf16.gmra.mrb[28].mxu0 %v2728_v30 }
  0x61   : > { %913 = vmatmul.mubr.bf16.gmra.mrb[28].mxu1 %v2729_v31  ;;  %1305 = vmatprep.mubr.bf16.mxu0 %v2736_v36 }
  0x62   : > { %1402 = vmatprep.mubr.bf16.mxu1 %v2739_v37 }
  0x68   : > { %1306 = vmatmul.mubr.bf16.vlgmr.msra.gmra.mrb[32].mxu0 %v2734_v38 }
  0x69   : > { %1403 = vmatmul.mubr.bf16.vlgmr.msra.gmra.mrb[32].mxu1 %v2737_v39  ;;  %1313 = vmatprep.mubr.bf16.mxu0 %v2911_v33 }
  0x6a   : > { %1410 = vmatprep.mubr.bf16.mxu1 %v2917_v35 }
  0x70   : > { %1314 = vmatmul.mubr.bf16.gmra.mrb[36].mxu0 %v2908_v32 }
  0x71   : > { %1411 = vmatmul.mubr.bf16.gmra.mrb[36].mxu1 %v2914_v34  ;;  %1321 = vmatprep.mubr.bf16.mxu0 %v2936_v40 }
  0x72   : > { %1418 = vmatprep.mubr.bf16.mxu1 %v2939_v41 }
  0x78   : > { %1322 = vmatmul.mubr.bf16.gmra.mrb[40].mxu0 %v2942_v42 }
  0x79   : > { %1419 = vmatmul.mubr.bf16.gmra.mrb[40].mxu1 %v2946_v43  ;;  %1329 = vmatprep.mubr.bf16.mxu0 %v2964_v48 }
  0x7a   : > { %1426 = vmatprep.mubr.bf16.mxu1 %v2967_v49 }
  0x80   : > { %1330 = vmatmul.mubr.bf16.gmra.mrb[44].mxu0 %v2970_v50 }
  0x81   : > { %1427 = vmatmul.mubr.bf16.gmra.mrb[44].mxu1 %v2973_v51  ;;  %1337 = vmatprep.mubr.bf16.mxu0 %v2991_v56 }
  0x82   : > { %1434 = vmatprep.mubr.bf16.mxu1 %v2995_v57 }
  0x88   : > { %1338 = vmatmul.mubr.bf16.gmra.mrb[48].mxu0 %v2999_v58 }
  0x89   : > { %1435 = vmatmul.mubr.bf16.gmra.mrb[48].mxu1 %v3003_v59  ;;  %1345 = vmatprep.mubr.bf16.mxu0 %v3018_v0 }
  0x8a   : > { %1442 = vmatprep.mubr.bf16.mxu1 %v3022_v1 }
  0x90   : > { %1346 = vmatmul.mubr.bf16.gmra.mrb[52].mxu0 %v3028_v2 }
  0x91   : > { %1443 = vmatmul.mubr.bf16.gmra.mrb[52].mxu1 %v3034_v4  ;;  %1353 = vmatprep.mubr.bf16.mxu0 %v3046_v8 }
  0x92   : > { %1450 = vmatprep.mubr.bf16.mxu1 %v3049_v9 }
  0x98   : > { %1354 = vmatmul.mubr.bf16.gmra.mrb[56].mxu0 %v3062_v12 }
  0x99   : > { %1451 = vmatmul.mubr.bf16.gmra.mrb[56].mxu1 %v3071_v15  ;;  %1361 = vmatprep.mubr.bf16.mxu0 %v3074_v16 }
  0x9a   : > { %1458 = vmatprep.mubr.bf16.mxu1 %v3077_v17 }
  0xa0   : > { %1362 = vmatmul.mubr.bf16.gmra.mrb[60].mxu0 %v2718_v22 }
  0xa1   : > { %1459 = vmatmul.mubr.bf16.gmra.mrb[60].mxu1 %v2719_v23 }
  0xfb   : > { %v2357_v32 = vpop.f32.mrb[0].mxu0 }
  0xfc   : > { %v2421_v33 = vpop.f32.mrb[0].mxu1  ;;  %v2358_v34 = vpop.f32.mrb[1].mxu0 }
  0xfd   : > { %v2359_v35 = vadd.f32 %v2358_v34, %v2357_v32  ;;  %v2422_v40 = vpop.f32.mrb[1].mxu1  ;;  %v2360_v41 = vpop.f32.mrb[2].mxu0 }
  0xfe   : > { %v2423_v42 = vadd.f32 %v2422_v40, %v2421_v33  ;;  %v2424_v43 = vpop.f32.mrb[2].mxu1  ;;  %v2361_v44 = vpop.f32.mrb[3].mxu0 }
  0xff   : > { %v2362_v45 = vadd.f32 %v2361_v44, %v2360_v41  ;;  %v2425_v46 = vpop.f32.mrb[3].mxu1 }
 0x100   : > { %v3143_v47 = vadd.f32 %v2423_v42, %v2359_v35  ;;  %v2426_v48 = vadd.f32 %v2425_v46, %v2424_v43 }
 0x102   : > { %v3145_v49 = vadd.f32 %v2426_v48, %v2362_v45 }
 0x103   : > { %v2363_v50 = vpop.f32.mrb[4].mxu0 }
 0x104   : > { %v2427_v51 = vpop.f32.mrb[4].mxu1  ;;  %v2364_v52 = vpop.f32.mrb[5].mxu0 }
 0x105   : > { %v2365_v53 = vadd.f32 %v2364_v52, %v2363_v50  ;;  %v2428_v54 = vpop.f32.mrb[5].mxu1  ;;  %v2366_v55 = vpop.f32.mrb[6].mxu0 }
 0x106   : > { %v2429_v56 = vadd.f32 %v2428_v54, %v2427_v51  ;;  %v2430_v57 = vpop.f32.mrb[6].mxu1  ;;  %v2367_v58 = vpop.f32.mrb[7].mxu0 }
 0x107   : > { %v2368_v59 = vadd.f32 %v2367_v58, %v2366_v55  ;;  %v2431_v60 = vpop.f32.mrb[7].mxu1 }
 0x108   : > { %v3147_v61 = vadd.f32 %v2429_v56, %v2365_v53  ;;  %v2432_v62 = vadd.f32 %v2431_v60, %v2430_v57 }
 0x10a   : > { %v3149_v63 = vadd.f32 %v2432_v62, %v2368_v59 }
 0x10b   : > { %v2369_v0 = vpop.f32.mrb[8].mxu0 }
 0x10c   : > { %v2433_v1 = vpop.f32.mrb[8].mxu1  ;;  %v2370_v2 = vpop.f32.mrb[9].mxu0 }
 0x10d   : > { %v2371_v3 = vadd.f32 %v2370_v2, %v2369_v0  ;;  %v2434_v4 = vpop.f32.mrb[9].mxu1  ;;  %v2372_v5 = vpop.f32.mrb[10].mxu0 }
 0x10e   : > { %v2435_v6 = vadd.f32 %v2434_v4, %v2433_v1  ;;  %v2436_v7 = vpop.f32.mrb[10].mxu1  ;;  %v2373_v8 = vpop.f32.mrb[11].mxu0 }
 0x10f   : > { %v2374_v9 = vadd.f32 %v2373_v8, %v2372_v5  ;;  %v2437_v10 = vpop.f32.mrb[11].mxu1 }
 0x110   : > { %v3151_v11 = vadd.f32 %v2435_v6, %v2371_v3  ;;  %v2438_v12 = vadd.f32 %v2437_v10, %v2436_v7 }
 0x112   : > { %v3153_v13 = vadd.f32 %v2438_v12, %v2374_v9 }
 0x113   : > { %v2375_v14 = vpop.f32.mrb[12].mxu0 }
 0x114   : > { %v2439_v15 = vpop.f32.mrb[12].mxu1  ;;  %v2376_v16 = vpop.f32.mrb[13].mxu0 }
 0x115   : > { %v2377_v17 = vadd.f32 %v2376_v16, %v2375_v14  ;;  %v2440_v18 = vpop.f32.mrb[13].mxu1  ;;  %v2378_v19 = vpop.f32.mrb[14].mxu0 }
 0x116   : > { %v2441_v20 = vadd.f32 %v2440_v18, %v2439_v15  ;;  %v2442_v21 = vpop.f32.mrb[14].mxu1  ;;  %v2379_v22 = vpop.f32.mrb[15].mxu0 }
 0x117   : > { %v2380_v23 = vadd.f32 %v2379_v22, %v2378_v19  ;;  %v2443_v24 = vpop.f32.mrb[15].mxu1 }
 0x118   : > { %v3155_v25 = vadd.f32 %v2441_v20, %v2377_v17  ;;  %v2444_v26 = vadd.f32 %v2443_v24, %v2442_v21 }
 0x11a   : > { %v3157_v27 = vadd.f32 %v2444_v26, %v2380_v23 }
 0x11b   : > { %v2381_v28 = vpop.f32.mrb[16].mxu0 }
 0x11c   : > { %v2445_v29 = vpop.f32.mrb[16].mxu1  ;;  %v2382_v30 = vpop.f32.mrb[17].mxu0 }
 0x11d   : > { %v2383_v31 = vadd.f32 %v2382_v30, %v2381_v28  ;;  %v2446_v36 = vpop.f32.mrb[17].mxu1  ;;  %v2384_v37 = vpop.f32.mrb[18].mxu0 }
 0x11e   : > { %v2447_v38 = vadd.f32 %v2446_v36, %v2445_v29  ;;  %v2448_v39 = vpop.f32.mrb[18].mxu1  ;;  %v2385_v32 = vpop.f32.mrb[19].mxu0 }
 0x11f   : > { %v2386_v33 = vadd.f32 %v2385_v32, %v2384_v37  ;;  %v2449_v34 = vpop.f32.mrb[19].mxu1 }
 0x120   : > { %v3159_v35 = vadd.f32 %v2447_v38, %v2383_v31  ;;  %v2450_v40 = vadd.f32 %v2449_v34, %v2448_v39 }
 0x122   : > { %v3161_v41 = vadd.f32 %v2450_v40, %v2386_v33 }
 0x123   : > { %v2387_v42 = vpop.f32.mrb[20].mxu0 }
 0x124   : > { %v2451_v43 = vpop.f32.mrb[20].mxu1  ;;  %v2388_v44 = vpop.f32.mrb[21].mxu0 }
 0x125   : > { %v2389_v45 = vadd.f32 %v2388_v44, %v2387_v42  ;;  %v2452_v46 = vpop.f32.mrb[21].mxu1  ;;  %v2390_v48 = vpop.f32.mrb[22].mxu0 }
 0x126   : > { %v2453_v50 = vadd.f32 %v2452_v46, %v2451_v43  ;;  %v2454_v51 = vpop.f32.mrb[22].mxu1  ;;  %v2391_v52 = vpop.f32.mrb[23].mxu0 }
 0x127   : > { %v2392_v53 = vadd.f32 %v2391_v52, %v2390_v48  ;;  %v2455_v54 = vpop.f32.mrb[23].mxu1 }
 0x128   : > { %v3163_v55 = vadd.f32 %v2453_v50, %v2389_v45  ;;  %v2456_v56 = vadd.f32 %v2455_v54, %v2454_v51 }
 0x12a   : > { %v3165_v57 = vadd.f32 %v2456_v56, %v2392_v53 }
 0x12b   : > { %v2393_v58 = vpop.f32.mrb[24].mxu0 }
 0x12c   : > { %v2457_v59 = vpop.f32.mrb[24].mxu1  ;;  %v2394_v60 = vpop.f32.mrb[25].mxu0 }
 0x12d   : > { %v2395_v62 = vadd.f32 %v2394_v60, %v2393_v58  ;;  %v2458_v0 = vpop.f32.mrb[25].mxu1  ;;  %v2396_v1 = vpop.f32.mrb[26].mxu0 }
 0x12e   : > { %v2459_v2 = vadd.f32 %v2458_v0, %v2457_v59  ;;  %v2460_v3 = vpop.f32.mrb[26].mxu1  ;;  %v2397_v4 = vpop.f32.mrb[27].mxu0 }
 0x12f   : > { %v2398_v5 = vadd.f32 %v2397_v4, %v2396_v1  ;;  %v2461_v6 = vpop.f32.mrb[27].mxu1 }
 0x130   : > { %v3167_v7 = vadd.f32 %v2459_v2, %v2395_v62  ;;  %v2462_v8 = vadd.f32 %v2461_v6, %v2460_v3 }
 0x132   : > { %v3169_v9 = vadd.f32 %v2462_v8, %v2398_v5 }
 0x133   : > { %v2399_v10 = vpop.f32.mrb[28].mxu0 }
 0x134   : > { %v2463_v12 = vpop.f32.mrb[28].mxu1  ;;  %v2400_v14 = vpop.f32.mrb[29].mxu0 }
 0x135   : > { %v2401_v15 = vadd.f32 %v2400_v14, %v2399_v10  ;;  %v2464_v16 = vpop.f32.mrb[29].mxu1  ;;  %v2402_v17 = vpop.f32.mrb[30].mxu0 }
 0x136   : > { %v2465_v18 = vadd.f32 %v2464_v16, %v2463_v12  ;;  %v2466_v19 = vpop.f32.mrb[30].mxu1  ;;  %v2403_v20 = vpop.f32.mrb[31].mxu0 }
 0x137   : > { %v2404_v21 = vadd.f32 %v2403_v20, %v2402_v17  ;;  %v2467_v22 = vpop.f32.mrb[31].mxu1 }
 0x138   : > { %v3171_v23 = vadd.f32 %v2465_v18, %v2401_v15  ;;  %v2468_v24 = vadd.f32 %v2467_v22, %v2466_v19 }
 0x13a   : > { %v3173_v26 = vadd.f32 %v2468_v24, %v2404_v21 }
 0x13b   : > { %v2485_v28 = vpop.f32.mrb[32].mxu0 }
 0x13c   : > { %v2549_v29 = vpop.f32.mrb[32].mxu1  ;;  %v2486_v30 = vpop.f32.mrb[33].mxu0 }
 0x13d   : > { %v2487_v31 = vadd.f32 %v2486_v30, %v2485_v28  ;;  %v2550_v36 = vpop.f32.mrb[33].mxu1  ;;  %v2488_v37 = vpop.f32.mrb[34].mxu0 }
 0x13e   : > { %v2551_v38 = vadd.f32 %v2550_v36, %v2549_v29  ;;  %v2552_v39 = vpop.f32.mrb[34].mxu1  ;;  %v2489_v32 = vpop.f32.mrb[35].mxu0 }
 0x13f   : > { %v1308_v33 = vadd.f32 %v2487_v31, %v3143_v47  ;;  %v2490_v34 = vadd.f32 %v2489_v32, %v2488_v37  ;;  %v2553_v40 = vpop.f32.mrb[35].mxu1 }
 0x140   : > { %v2554_v42 = vadd.f32 %v2553_v40, %v2552_v39 }
 0x141   : > { %v3176_v43 = vadd.f32 %v2551_v38, %v1308_v33  ;;  %v1311_v44 = vadd.f32 %v2490_v34, %v3145_v49 }
 0x143   : > { %v3179_v45 = vadd.f32 %v2554_v42, %v1311_v44  ;;  %v2491_v46 = vpop.f32.mrb[36].mxu0  ;;  %v1762_v47 = vmul.f32 %v3176_v43, %v3176_v43 }
 0x144   : > { %v2555_v48 = vpop.f32.mrb[36].mxu1  ;;  %v2492_v50 = vpop.f32.mrb[37].mxu0 }
 0x145   : > { %v1725_v51 = vmul.f32 0.0, %v3179_v45  ;;  %v2493_v52 = vadd.f32 %v2492_v50, %v2491_v46  ;;  %v2556_v53 = vpop.f32.mrb[37].mxu1  ;;  %v2494_v54 = vpop.f32.mrb[38].mxu0 }
 0x146   : > { %v2557_v56 = vadd.f32 %v2556_v53, %v2555_v48  ;;  %v2558_v58 = vpop.f32.mrb[38].mxu1  ;;  %v2495_v59 = vpop.f32.mrb[39].mxu0 }
 0x147   : > { %v1763_v60 = vmul.f32 %v1725_v51, %v3179_v45  ;;  %v1316_v49 = vadd.f32 %v2493_v52, %v3147_v61  ;;  %v1740_v62 = vadd.f32 %v1725_v51, %v3176_v43  ;;  %v2496_v0 = vadd.f32 %v2495_v59, %v2494_v54  ;;  %v2559_v1 = vpop.f32.mrb[39].mxu1 }
 0x148   : > { %v2560_v2 = vadd.f32 %v2559_v1, %v2558_v58 }
 0x149   : > { %v1778_v3 = vadd.f32 %v1763_v60, %v1762_v47  ;;  %v3187_v4 = vadd.f32 %v2557_v56, %v1316_v49  ;;  %v1319_v5 = vadd.f32 %v2496_v0, %v3149_v63 }
 0x14b   : > { %v1741_v6 = vadd.f32 %v1740_v62, %v3187_v4  ;;  %v1764_v8 = vmul.f32 %v3187_v4, %v3187_v4  ;;  %v3193_v10 = vadd.f32 %v2560_v2, %v1319_v5  ;;  %v2497_v12 = vpop.f32.mrb[40].mxu0 }
 0x14c   : > { %v2561_v14 = vpop.f32.mrb[40].mxu1  ;;  %v2498_v61 = vpop.f32.mrb[41].mxu0 }
 0x14d   : > { %v1779_v15 = vadd.f32 %v1778_v3, %v1764_v8  ;;  %v1727_v16 = vmul.f32 0.0, %v3193_v10  ;;  %v2499_v17 = vadd.f32 %v2498_v61, %v2497_v12  ;;  %v2562_v18 = vpop.f32.mrb[41].mxu1  ;;  %v2500_v19 = vpop.f32.mrb[42].mxu0 }
 0x14e   : > { %v2563_v20 = vadd.f32 %v2562_v18, %v2561_v14  ;;  %v2564_v21 = vpop.f32.mrb[42].mxu1  ;;  %v2501_v22 = vpop.f32.mrb[43].mxu0 }
 0x14f   : > { %v1765_v63 = vmul.f32 %v1727_v16, %v3193_v10  ;;  %v1324_v24 = vadd.f32 %v2499_v17, %v3151_v11  ;;  %v1742_v28 = vadd.f32 %v1741_v6, %v1727_v16  ;;  %v2502_v29 = vadd.f32 %v2501_v22, %v2500_v19  ;;  %v2565_v30 = vpop.f32.mrb[43].mxu1 }
 0x150   : > { %v2566_v31 = vadd.f32 %v2565_v30, %v2564_v21 }
 0x151   : > { %v1780_v36 = vadd.f32 %v1779_v15, %v1765_v63  ;;  %v3198_v37 = vadd.f32 %v2563_v20, %v1324_v24  ;;  %v1327_v38 = vadd.f32 %v2502_v29, %v3153_v13 }
 0x153   : > { %v1743_v39 = vadd.f32 %v1742_v28, %v3198_v37  ;;  %v1766_v32 = vmul.f32 %v3198_v37, %v3198_v37  ;;  %v3204_v33 = vadd.f32 %v2566_v31, %v1327_v38  ;;  %v2503_v34 = vpop.f32.mrb[44].mxu0 }
 0x154   : > { %v2567_v40 = vpop.f32.mrb[44].mxu1  ;;  %v2504_v42 = vpop.f32.mrb[45].mxu0 }
 0x155   : > { %v1781_v11 = vadd.f32 %v1780_v36, %v1766_v32  ;;  %v1729_v44 = vmul.f32 0.0, %v3204_v33  ;;  %v2505_v46 = vadd.f32 %v2504_v42, %v2503_v34  ;;  %v2568_v48 = vpop.f32.mrb[45].mxu1  ;;  %v2506_v50 = vpop.f32.mrb[46].mxu0 }
 0x156   : > { %v2569_v51 = vadd.f32 %v2568_v48, %v2567_v40  ;;  %v2570_v52 = vpop.f32.mrb[46].mxu1  ;;  %v2507_v53 = vpop.f32.mrb[47].mxu0 }
 0x157   : > { %v1767_v13 = vmul.f32 %v1729_v44, %v3204_v33  ;;  %v1332_v54 = vadd.f32 %v2505_v46, %v3155_v25  ;;  %v1744_v47 = vadd.f32 %v1743_v39, %v1729_v44  ;;  %v2508_v56 = vadd.f32 %v2507_v53, %v2506_v50  ;;  %v2571_v58 = vpop.f32.mrb[47].mxu1 }
 0x158   : > { %v2572_v59 = vadd.f32 %v2571_v58, %v2570_v52 }
 0x159   : > { %v1782_v60 = vadd.f32 %v1781_v11, %v1767_v13  ;;  %v3209_v49 = vadd.f32 %v2569_v51, %v1332_v54  ;;  %v1335_v62 = vadd.f32 %v2508_v56, %v3157_v27 }
 0x15b   : > { %v1745_v0 = vadd.f32 %v1744_v47, %v3209_v49  ;;  %v1768_v1 = vmul.f32 %v3209_v49, %v3209_v49  ;;  %v3215_v2 = vadd.f32 %v2572_v59, %v1335_v62  ;;  %v2509_v3 = vpop.f32.mrb[48].mxu0 }
 0x15c   : > { %v2573_v5 = vpop.f32.mrb[48].mxu1  ;;  %v2510_v6 = vpop.f32.mrb[49].mxu0 }
 0x15d   : > { %v1783_v25 = vadd.f32 %v1782_v60, %v1768_v1  ;;  %v1731_v8 = vmul.f32 0.0, %v3215_v2  ;;  %v2511_v12 = vadd.f32 %v2510_v6, %v2509_v3  ;;  %v2574_v14 = vpop.f32.mrb[49].mxu1  ;;  %v2512_v61 = vpop.f32.mrb[50].mxu0 }
 0x15e   : > { %v2575_v15 = vadd.f32 %v2574_v14, %v2573_v5  ;;  %v2576_v16 = vpop.f32.mrb[50].mxu1  ;;  %v2513_v17 = vpop.f32.mrb[51].mxu0 }
 0x15f   : > { %v1769_v27 = vmul.f32 %v1731_v8, %v3215_v2  ;;  %v1340_v18 = vadd.f32 %v2511_v12, %v3159_v35  ;;  %v1746_v19 = vadd.f32 %v1745_v0, %v1731_v8  ;;  %v2514_v20 = vadd.f32 %v2513_v17, %v2512_v61  ;;  %v2577_v21 = vpop.f32.mrb[51].mxu1 }
 0x160   : > { %v2578_v22 = vadd.f32 %v2577_v21, %v2576_v16 }
 0x161   : > { %v1784_v63 = vadd.f32 %v1783_v25, %v1769_v27  ;;  %v3220_v24 = vadd.f32 %v2575_v15, %v1340_v18  ;;  %v1343_v28 = vadd.f32 %v2514_v20, %v3161_v41 }
 0x163   : > { %v1747_v29 = vadd.f32 %v1746_v19, %v3220_v24  ;;  %v1770_v30 = vmul.f32 %v3220_v24, %v3220_v24  ;;  %v3226_v31 = vadd.f32 %v2578_v22, %v1343_v28  ;;  %v2515_v36 = vpop.f32.mrb[52].mxu0 }
 0x164   : > { %v2579_v38 = vpop.f32.mrb[52].mxu1  ;;  %v2516_v39 = vpop.f32.mrb[53].mxu0 }
 0x165   : > { %v1785_v35 = vadd.f32 %v1784_v63, %v1770_v30  ;;  %v1733_v32 = vmul.f32 0.0, %v3226_v31  ;;  %v2517_v34 = vadd.f32 %v2516_v39, %v2515_v36  ;;  %v2580_v40 = vpop.f32.mrb[53].mxu1  ;;  %v2518_v42 = vpop.f32.mrb[54].mxu0 }
 0x166   : > { %v2581_v11 = vadd.f32 %v2580_v40, %v2579_v38  ;;  %v2582_v44 = vpop.f32.mrb[54].mxu1  ;;  %v2519_v46 = vpop.f32.mrb[55].mxu0 }
 0x167   : > { %v1771_v41 = vmul.f32 %v1733_v32, %v3226_v31  ;;  %v1348_v48 = vadd.f32 %v2517_v34, %v3163_v55  ;;  %v1748_v50 = vadd.f32 %v1747_v29, %v1733_v32  ;;  %v2520_v51 = vadd.f32 %v2519_v46, %v2518_v42  ;;  %v2583_v52 = vpop.f32.mrb[55].mxu1 }
 0x168   : > { %v2584_v53 = vadd.f32 %v2583_v52, %v2582_v44 }
 0x169   : > { %v1786_v13 = vadd.f32 %v1785_v35, %v1771_v41  ;;  %v3231_v54 = vadd.f32 %v2581_v11, %v1348_v48  ;;  %v1351_v47 = vadd.f32 %v2520_v51, %v3165_v57 }
 0x16b   : > { %v1749_v56 = vadd.f32 %v1748_v50, %v3231_v54  ;;  %v1772_v58 = vmul.f32 %v3231_v54, %v3231_v54  ;;  %v3237_v59 = vadd.f32 %v2584_v53, %v1351_v47  ;;  %v2521_v60 = vpop.f32.mrb[56].mxu0 }
 0x16c   : > { %v2585_v62 = vpop.f32.mrb[56].mxu1  ;;  %v2522_v0 = vpop.f32.mrb[57].mxu0 }
 0x16d   : > { %v1787_v55 = vadd.f32 %v1786_v13, %v1772_v58  ;;  %v1735_v1 = vmul.f32 0.0, %v3237_v59  ;;  %v2523_v3 = vadd.f32 %v2522_v0, %v2521_v60  ;;  %v2586_v5 = vpop.f32.mrb[57].mxu1  ;;  %v2524_v6 = vpop.f32.mrb[58].mxu0 }
 0x16e   : > { %v2587_v25 = vadd.f32 %v2586_v5, %v2585_v62  ;;  %v2588_v8 = vpop.f32.mrb[58].mxu1  ;;  %v2525_v12 = vpop.f32.mrb[59].mxu0 }
 0x16f   : > { %v1773_v57 = vmul.f32 %v1735_v1, %v3237_v59  ;;  %v1356_v14 = vadd.f32 %v2523_v3, %v3167_v7  ;;  %v1750_v61 = vadd.f32 %v1749_v56, %v1735_v1  ;;  %v2526_v15 = vadd.f32 %v2525_v12, %v2524_v6  ;;  %v2589_v16 = vpop.f32.mrb[59].mxu1 }
 0x170   : > { %v2590_v17 = vadd.f32 %v2589_v16, %v2588_v8 }
 0x171   : > { %v1788_v27 = vadd.f32 %v1787_v55, %v1773_v57  ;;  %v3242_v18 = vadd.f32 %v2587_v25, %v1356_v14  ;;  %v1359_v19 = vadd.f32 %v2526_v15, %v3169_v9 }
 0x173   : > { %v1751_v20 = vadd.f32 %v1750_v61, %v3242_v18  ;;  %v1774_v21 = vmul.f32 %v3242_v18, %v3242_v18  ;;  %v3248_v22 = vadd.f32 %v2590_v17, %v1359_v19  ;;  %v2527_v63 = vpop.f32.mrb[60].mxu0 }
 0x174   : > { %v2591_v28 = vpop.f32.mrb[60].mxu1  ;;  %v2528_v29 = vpop.f32.mrb[61].mxu0 }
 0x175   : > { %v1789_v7 = vadd.f32 %v1788_v27, %v1774_v21  ;;  %v1737_v30 = vmul.f32 0.0, %v3248_v22  ;;  %v2529_v36 = vadd.f32 %v2528_v29, %v2527_v63  ;;  %v2592_v38 = vpop.f32.mrb[61].mxu1  ;;  %v2530_v39 = vpop.f32.mrb[62].mxu0 }
 0x176   : > { %v2593_v35 = vadd.f32 %v2592_v38, %v2591_v28  ;;  %v2594_v32 = vpop.f32.mrb[62].mxu1  ;;  %v2531_v34 = vpop.f32.mrb[63].mxu0 }
 0x177   : > { %v1775_v9 = vmul.f32 %v1737_v30, %v3248_v22  ;;  %v1364_v40 = vadd.f32 %v2529_v36, %v3171_v23  ;;  %v1752_v42 = vadd.f32 %v1751_v20, %v1737_v30  ;;  %v2532_v11 = vadd.f32 %v2531_v34, %v2530_v39  ;;  %v2595_v44 = vpop.f32.mrb[63].mxu1 }
 0x178   : > { %v2596_v46 = vadd.f32 %v2595_v44, %v2594_v32 }
 0x179   : > { %v1790_v41 = vadd.f32 %v1789_v7, %v1775_v9  ;;  %v1461_v48 = vadd.f32 %v2593_v35, %v1364_v40  ;;  %v1367_v50 = vadd.f32 %v2532_v11, %v3173_v26 }
 0x17b   : > { %v1753_v51 = vadd.f32 %v1752_v42, %v1461_v48  ;;  %v1776_v52 = vmul.f32 %v1461_v48, %v1461_v48  ;;  %v1464_v53 = vadd.f32 %v2596_v46, %v1367_v50 }
 0x17d   : > { %v1791_v13 = vadd.f32 %v1790_v41, %v1776_v52  ;;  %v1739_v47 = vmul.f32 0.0, %v1464_v53 }
 0x17f   : > { %v1754_v56 = vadd.f32 %v1753_v51, %v1739_v47  ;;  %v1777_v58 = vmul.f32 %v1739_v47, %v1464_v53 }
 0x181   : > { %v1755_v60 = vrot.slane %v1754_v56, 4  ;;  %v1792_v62 = vadd.f32 %v1791_v13, %v1777_v58 }
 0x183   : > { %v1756_v0 = vadd.f32 %v1755_v60, %v1754_v56  ;;  %v1793_v55 = vrot.slane %v1792_v62, 4 }
 0x185   : > { %v1757_v23 = vrot.slane %v1756_v0, 2  ;;  %v1794_v1 = vadd.f32 %v1793_v55, %v1792_v62 }
 0x187   : > { %v1758_v3 = vadd.f32 %v1757_v23, %v1756_v0  ;;  %v1795_v5 = vrot.slane %v1794_v1, 2 }
 0x189   : > { %v1759_v6 = vrot.slane %v1758_v3, 1  ;;  %v1796_v25 = vadd.f32 %v1795_v5, %v1794_v1 }
 0x18b   : > { %v1760_v8 = vadd.f32 %v1759_v6, %v1758_v3  ;;  %v1797_v12 = vrot.slane %v1796_v25, 1 }
 0x18d   : > { %v1761_v26 = vmul.f32 0.015625, %v1760_v8  ;;  %v1798_v57 = vadd.f32 %v1797_v12, %v1796_v25 }
 0x18f   : > { %v1799_v14 = vmul.f32 0.015625, %v1798_v57  ;;  %v1800_v61 = vmul.f32 %v1761_v26, %v1761_v26  ;;  %v1803_v15 = vsub.f32 %v3176_v43, %v1761_v26  ;;  %v1804_v16 = vsub.f32 %v3179_v45, %v1761_v26 }
 0x190   : > { %v1805_v17 = vsub.f32 %v3187_v4, %v1761_v26  ;;  %v1806_v27 = vsub.f32 %v3193_v10, %v1761_v26  ;;  %v1807_v19 = vsub.f32 %v3198_v37, %v1761_v26  ;;  %v1808_v20 = vsub.f32 %v3204_v33, %v1761_v26 }
 0x191   : > { %v1801_v21 = vsub.f32 %v1799_v14, %v1800_v61  ;;  %v1809_v63 = vsub.f32 %v3209_v49, %v1761_v26  ;;  %v1810_v28 = vsub.f32 %v3215_v2, %v1761_v26  ;;  %v1811_v29 = vsub.f32 %v3220_v24, %v1761_v26 }
 0x192   : > { %v1812_v7 = vsub.f32 %v3226_v31, %v1761_v26  ;;  %v1813_v43 = vsub.f32 %v3231_v54, %v1761_v26  ;;  %v1814_v45 = vsub.f32 %v3237_v59, %v1761_v26  ;;  %v1815_v4 = vsub.f32 %v3242_v18, %v1761_v26 }
 0x193   : > { %v1802_v10 = vmax.f32 %v1801_v21, 0.0  ;;  %v1816_v37 = vsub.f32 %v3248_v22, %v1761_v26  ;;  %v1817_v30 = vsub.f32 %v1461_v48, %v1761_v26  ;;  %v1818_v33 = vsub.f32 %v1464_v53, %v1761_v26 }
 0x195   : > { %v1819_v36 = vadd.f32 1e-05, %v1802_v10 }
 0x197   : > { %2740 = vrsqrt.f32 %v1819_v36 }
 0x1a1   : > { %v2741_v49 = vpop.eup %2740 }
 0x1a2   : > { %v1821_v38 = vmul.f32 %v2741_v49, %v1803_v15  ;;  %v1822_v2 = vmul.f32 %v2741_v49, %v1804_v16  ;;  %v1823_v39 = vmul.f32 %v2741_v49, %v1805_v17  ;;  %v1824_v24 = vmul.f32 %v2741_v49, %v1806_v27 }
 0x1a3   : > { %v1825_v35 = vmul.f32 %v2741_v49, %v1807_v19  ;;  %v1826_v31 = vmul.f32 %v2741_v49, %v1808_v20  ;;  %v1827_v32 = vmul.f32 %v2741_v49, %v1809_v63  ;;  %v1828_v54 = vmul.f32 %v2741_v49, %v1810_v28 }
 0x1a4   : > { %v1829_v34 = vmul.f32 %v2741_v49, %v1811_v29  ;;  %v1830_v59 = vmul.f32 %v2741_v49, %v1812_v7  ;;  %v1831_v9 = vmul.f32 %v2741_v49, %v1813_v43  ;;  %v1832_v18 = vmul.f32 %v2741_v49, %v1814_v45 }
 0x1a5   : > { %v1833_v40 = vmul.f32 %v2741_v49, %v1815_v4  ;;  %v1834_v22 = vmul.f32 %v2741_v49, %v1816_v37  ;;  %v1835_v42 = vmul.f32 %v2741_v49, %v1817_v30  ;;  %v1836_v11 = vmul.f32 %v2741_v49, %v1818_v33 }
 0x1a6   : > { %vm1837_vm0 = vcmp.ge.f32.partialorder %v1821_v38, 0.0  ;;  %vm1838_vm1 = vcmp.ge.f32.partialorder %v1822_v2, 0.0  ;;  %vm1839_vm2 = vcmp.ge.f32.partialorder %v1823_v39, 0.0  ;;  %vm1840_vm3 = vcmp.ge.f32.partialorder %v1824_v24, 0.0 }
 0x1a7   : > { %vm1841_vm4 = vcmp.ge.f32.partialorder %v1825_v35, 0.0  ;;  %vm1842_vm5 = vcmp.ge.f32.partialorder %v1826_v31, 0.0  ;;  %vm1843_vm6 = vcmp.ge.f32.partialorder %v1827_v32, 0.0  ;;  %vm1844_vm7 = vcmp.ge.f32.partialorder %v1828_v54, 0.0 }
 0x1a8   : > { %vm1845_vm8 = vcmp.ge.f32.partialorder %v1829_v34, 0.0  ;;  %vm1846_vm9 = vcmp.ge.f32.partialorder %v1830_v59, 0.0  ;;  %vm1847_vm10 = vcmp.ge.f32.partialorder %v1831_v9, 0.0  ;;  %vm1848_vm11 = vcmp.ge.f32.partialorder %v1832_v18, 0.0 }
 0x1a9   : > { %vm1849_vm12 = vcmp.ge.f32.partialorder %v1833_v40, 0.0  ;;  %vm1850_vm13 = vcmp.ge.f32.partialorder %v1834_v22, 0.0  ;;  %vm1851_vm14 = vcmp.ge.f32.partialorder %v1835_v42, 0.0  ;;  %vm1852_vm15 = vcmp.ge.f32.partialorder %v1836_v11, 0.0 }
 0x1aa   : > { %v1853_v44 = vmul.f32 0.2, %v1821_v38  ;;  %v1854_v46 = vmul.f32 0.2, %v1822_v2  ;;  %v1855_v41 = vmul.f32 0.2, %v1823_v39 }
 0x1ab   : > { %v1856_v48 = vmul.f32 0.2, %v1824_v24  ;;  %v1857_v50 = vmul.f32 0.2, %v1825_v35  ;;  %v1858_v51 = vmul.f32 0.2, %v1826_v31 }
 0x1ac   : > { %v1859_v52 = vmul.f32 0.2, %v1827_v32  ;;  %v1860_v53 = vmul.f32 0.2, %v1828_v54  ;;  %v1861_v13 = vmul.f32 0.2, %v1829_v34  ;;  %v1869_v47 = vsel %vm1837_vm0, %v1821_v38, %v1853_v44 }
 0x1ad   : > { %v1862_v56 = vmul.f32 0.2, %v1830_v59  ;;  %v1863_v58 = vmul.f32 0.2, %v1831_v9  ;;  %v1864_v60 = vmul.f32 0.2, %v1832_v18  ;;  %v1870_v62 = vsel %vm1838_vm1, %v1822_v2, %v1854_v46 }
 0x1ae   : > { %v1865_v0 = vmul.f32 0.2, %v1833_v40  ;;  %v1866_v55 = vmul.f32 0.2, %v1834_v22  ;;  %v1867_v23 = vmul.f32 0.2, %v1835_v42  ;;  %v1871_v1 = vsel %vm1839_vm2, %v1823_v39, %v1855_v41 }
 0x1af   : > { %v1868_v3 = vmul.f32 0.2, %v1836_v11  ;;  %v1872_v5 = vsel %vm1840_vm3, %v1824_v24, %v1856_v48  ;;  %v1873_v6 = vsel %vm1841_vm4, %v1825_v35, %v1857_v50  ;;  %v1874_v25 = vsel %vm1842_vm5, %v1826_v31, %v1858_v51 }
 0x1b0   : > { %v1875_v8 = vsel %vm1843_vm6, %v1827_v32, %v1859_v52  ;;  %v1876_v12 = vsel %vm1844_vm7, %v1828_v54, %v1860_v53  ;;  %v1877_v26 = vsel %vm1845_vm8, %v1829_v34, %v1861_v13  ;;  %v1878_v57 = vsel %vm1846_vm9, %v1830_v59, %v1862_v56 }
 0x1b1   : > { %v1879_v14 = vsel %vm1847_vm10, %v1831_v9, %v1863_v58  ;;  %v1880_v61 = vsel %vm1848_vm11, %v1832_v18, %v1864_v60  ;;  %v1881_v15 = vsel %vm1849_vm12, %v1833_v40, %v1865_v0  ;;  %v1882_v16 = vsel %vm1850_vm13, %v1834_v22, %v1866_v55 }
 0x1b2   : > { %v1883_v17 = vsel %vm1851_vm14, %v1835_v42, %v1867_v23  ;;  %v1884_v27 = vsel %vm1852_vm15, %v1836_v11, %v1868_v3  ;;  %v2297_v19 = vpack.c.bf16 %v1870_v62, %v1869_v47  ;;  %v2302_v20 = vpack.c.bf16 %v1872_v5, %v1871_v1 }
 0x1b3   : > { %v2307_v21 = vpack.c.bf16 %v1874_v25, %v1873_v6  ;;  %v2312_v63 = vpack.c.bf16 %v1876_v12, %v1875_v8  ;;  %v2317_v28 = vpack.c.bf16 %v1878_v57, %v1877_v26  ;;  %v2322_v29 = vpack.c.bf16 %v1880_v61, %v1879_v14 }
 0x1b4   : > { %2298 = vst [vmem:[%s180_s30] sm:$0xff] %v2297_v19   ;;  %2334 = vst [vmem:[%s180_s30 + $0x8] sm:$0xff] %v2302_v20   ;;  %v2327_v7 = vpack.c.bf16 %v1882_v16, %v1881_v15  ;;  %v2332_v43 = vpack.c.bf16 %v1884_v27, %v1883_v17 }
 0x1b5   : > { %2335 = vst [vmem:[%s180_s30 + $0x10] sm:$0xff] %v2307_v21   ;;  %2336 = vst [vmem:[%s180_s30 + $0x18] sm:$0xff] %v2312_v63  }
 0x1b6   : > { %2337 = vst [vmem:[%s180_s30 + $0x20] sm:$0xff] %v2317_v28   ;;  %2338 = vst [vmem:[%s180_s30 + $0x28] sm:$0xff] %v2322_v29  }
 0x1b7   : > { %2339 = vst [vmem:[%s180_s30 + $0x30] sm:$0xff] %v2327_v7   ;;  %2340 = vst [vmem:[%s180_s30 + $0x38] sm:$0xff] %v2332_v43  }
 0x1b8 PF: > { %s12_s11 = sadd.s32 1, %s2764_s11   ;;  %s3302_s9 = smov %s2760_s10 }
 0x1b9   : > { %p9_p5 = scmp.ge.s32.totalorder %s12_s11, 4   ;;  %s3303_s10 = smov %s3305_s12 }
 0x1bb   :  { %11 = sbr.rel (!%p9_p5) target bundleno = 2 (0x2), region = 62 }

// kernel: discriminator_forward.4
= control target key start
LH: loop header
LB: loop body
LE: loop exit
PB: predicated region body
PF: predicated region fallthrough
CT: control target
= control target key end

     0   :  { %s4199_s9 = smov 0   ;;  %s4201_s10 = smov 0   ;;  %s5218_s0 = inlined_call_operand.vmem [shape: bf16[2,80,1024], index: 0, kind: input, shape index: {}]   ;;  %s5219_s1 = inlined_call_operand.vmem [shape: bf16[2,1024,256], index: 1, kind: input, shape index: {}]   ;;  %s5220_s2 = inlined_call_operand.vmem [shape: bf16[2,64,256], index: 2, kind: output, shape index: {}]  }
   0x1   :  { %s4203_s11 = smov 0  }
   0x2 LB: > { %s24_s12 = sadd.s32 1, %s4177_s10  ;;  %p3158_p0 = scmp.ge.s32.totalorder %s4181_s11, 1  ;;  %s4181_s11 = sphi %s4203_s11, %s12_s11   ;;  %s4177_s10 = sphi %s4201_s10, %s5224_s10   ;;  %s4173_s9 = sphi %s4199_s9, %s5223_s9  }
   0x3   : > { %p26_p1 = scmp.ge.s32.totalorder %s24_s12, 2  ;;  %p137_p2 = scmp.lt.s32.totalorder %s4181_s11, 3 }
   0x5   : > { %s5226_s12 = smov (%p26_p1, %s24_s12), 0  ;;  %p138_p3 = pnand %p3158_p0, %p137_p2 }
   0x6   : > { %v3771_v0 = vld [vmem:[%s5219_s1 + $0x404] ss:$8 sps:$4 sm:$0xff] (!%p138_p3)   ;;  %v3775_v2 = vld [vmem:[%s5219_s1 + $0x400] ss:$8 sps:$4 sm:$0xff] (!%p138_p3)   ;;  %v3777_v4 = vld [vmem:[%s5219_s1 + $0x414] ss:$8 sps:$4 sm:$0xff] (!%p138_p3)  }
   0x7   : > { %141 = sbr.rel (%p138_p3) target bundleno = 563 (0x233), region = 28  ;;  %v3773_v1 = vld [vmem:[%s5219_s1 + $0x4] ss:$8 sps:$4 sm:$0xff] (!%p138_p3)   ;;  %1310 = vmatprep.subr.bf16.mxu1 (!%p138_p3), %v3771_v0  ;;  %v3776_v3 = vld [vmem:[%s5219_s1] ss:$8 sps:$4 sm:$0xff] (!%p138_p3)   ;;  %p168_p4 = scmp.lt.s32.totalorder (!%p138_p3), %s4173_s9, 1 }
   0x8   : > { %2402 = vmatprep.subr.bf16.mxu0 (!%p138_p3), %v3773_v1  ;;  %1311 = vmatpush1.bf16.msra.mxu1 (!%p138_p3), %v3775_v2  ;;  %v3779_v5 = vld [vmem:[%s5219_s1 + $0x14] ss:$8 sps:$4 sm:$0xff] (!%p138_p3)   ;;  %v3781_v6 = vld [vmem:[%s5219_s1 + $0x410] ss:$8 sps:$4 sm:$0xff] (!%p138_p3)   ;;  %v3783_v8 = vld [vmem:[%s5219_s1 + $0x424] ss:$8 sps:$4 sm:$0xff] (!%p138_p3)  }
   0x9   : > { %2403 = vmatpush1.bf16.msra.mxu0 (!%p138_p3), %v3776_v3  ;;  %1312 = vmatprep.subr.bf16.mxu1 (!%p138_p3), %v3777_v4  ;;  %v3782_v7 = vld [vmem:[%s5219_s1 + $0x10] ss:$8 sps:$4 sm:$0xff] (!%p138_p3)   ;;  %v3785_v9 = vld [vmem:[%s5219_s1 + $0x24] ss:$8 sps:$4 sm:$0xff] (!%p138_p3)   ;;  %v3787_v10 = vld [vmem:[%s5219_s1 + $0x420] ss:$8 sps:$4 sm:$0xff] (!%p138_p3)  }
   0xa   : > { %2404 = vmatprep.subr.bf16.mxu0 (!%p138_p3), %v3779_v5  ;;  %v3788_v11 = vld [vmem:[%s5219_s1 + $0x20] ss:$8 sps:$4 sm:$0xff] (!%p138_p3)   ;;  %v3789_v12 = vld [vmem:[%s5219_s1 + $0x434] ss:$8 sps:$4 sm:$0xff] (!%p138_p3)   ;;  %v3793_v14 = vld [vmem:[%s5219_s1 + $0x430] ss:$8 sps:$4 sm:$0xff] (!%p138_p3)  }
   0xb   : > { %v3791_v13 = vld [vmem:[%s5219_s1 + $0x34] ss:$8 sps:$4 sm:$0xff] (!%p138_p3)   ;;  %v3794_v15 = vld [vmem:[%s5219_s1 + $0x30] ss:$8 sps:$4 sm:$0xff] (!%p138_p3)   ;;  %v3795_v16 = vld [vmem:[%s5219_s1 + $0x444] ss:$8 sps:$4 sm:$0xff] (!%p138_p3)  }
   0xc   : > { %1313 = vmatpush1.bf16.msra.mxu1 (!%p138_p3), %v3781_v6  ;;  %v3797_v17 = vld [vmem:[%s5219_s1 + $0x44] ss:$8 sps:$4 sm:$0xff] (!%p138_p3)   ;;  %v3799_v18 = vld [vmem:[%s5219_s1 + $0x440] ss:$8 sps:$4 sm:$0xff] (!%p138_p3)   ;;  %v3801_v20 = vld [vmem:[%s5219_s1 + $0x454] ss:$8 sps:$4 sm:$0xff] (!%p138_p3)  }
   0xd   : > { %2405 = vmatpush1.bf16.msra.mxu0 (!%p138_p3), %v3782_v7  ;;  %1314 = vmatprep.subr.bf16.mxu1 (!%p138_p3), %v3783_v8  ;;  %v3800_v19 = vld [vmem:[%s5219_s1 + $0x40] ss:$8 sps:$4 sm:$0xff] (!%p138_p3)   ;;  %v3803_v21 = vld [vmem:[%s5219_s1 + $0x54] ss:$8 sps:$4 sm:$0xff] (!%p138_p3)   ;;  %v3805_v22 = vld [vmem:[%s5219_s1 + $0x450] ss:$8 sps:$4 sm:$0xff] (!%p138_p3)  }
   0xe   : > { %2406 = vmatprep.subr.bf16.mxu0 %v3785_v9  ;;  %v3806_v23 = vld [vmem:[%s5219_s1 + $0x50] ss:$8 sps:$4 sm:$0xff]   ;;  %v3807_v24 = vld [vmem:[%s5219_s1 + $0x464] ss:$8 sps:$4 sm:$0xff]   ;;  %v3811_v26 = vld [vmem:[%s5219_s1 + $0x460] ss:$8 sps:$4 sm:$0xff]  }
   0xf   : > { %v3809_v25 = vld [vmem:[%s5219_s1 + $0x64] ss:$8 sps:$4 sm:$0xff]   ;;  %v3812_v27 = vld [vmem:[%s5219_s1 + $0x60] ss:$8 sps:$4 sm:$0xff]   ;;  %v3813_v28 = vld [vmem:[%s5219_s1 + $0x474] ss:$8 sps:$4 sm:$0xff]  }
  0x10   : > { %1315 = vmatpush1.bf16.msra.mxu1 %v3787_v10  ;;  %v3815_v29 = vld [vmem:[%s5219_s1 + $0x74] ss:$8 sps:$4 sm:$0xff]   ;;  %v3817_v30 = vld [vmem:[%s5219_s1 + $0x470] ss:$8 sps:$4 sm:$0xff]   ;;  %v3819_v32 = vld [vmem:[%s5219_s1 + $0x484] ss:$8 sps:$4 sm:$0xff]  }
  0x11   : > { %2407 = vmatpush1.bf16.msra.mxu0 %v3788_v11  ;;  %1316 = vmatprep.subr.bf16.mxu1 %v3789_v12  ;;  %v3818_v31 = vld [vmem:[%s5219_s1 + $0x70] ss:$8 sps:$4 sm:$0xff]   ;;  %v3821_v33 = vld [vmem:[%s5219_s1 + $0x84] ss:$8 sps:$4 sm:$0xff]   ;;  %v3823_v34 = vld [vmem:[%s5219_s1 + $0x480] ss:$8 sps:$4 sm:$0xff]  }
  0x12   : > { %2408 = vmatprep.subr.bf16.mxu0 %v3791_v13  ;;  %v3824_v35 = vld [vmem:[%s5219_s1 + $0x80] ss:$8 sps:$4 sm:$0xff]   ;;  %s5228_s9 = smov (!%p168_p4, %s4173_s9), 1  ;;  %v3825_v36 = vld [vmem:[%s5219_s1 + $0x494] ss:$8 sps:$4 sm:$0xff]  }
  0x13   : > { %v3827_v37 = vld [vmem:[%s5219_s1 + $0x94] ss:$8 sps:$4 sm:$0xff]   ;;  %v3829_v38 = vld [vmem:[%s5219_s1 + $0x490] ss:$8 sps:$4 sm:$0xff]   ;;  %s3745_s19 = smul.u32 320, %s5228_s9 }
  0x14   : > { %1317 = vmatpush1.bf16.msra.mxu1 %v3793_v14  ;;  %v3830_v39 = vld [vmem:[%s5219_s1 + $0x90] ss:$8 sps:$4 sm:$0xff]   ;;  %v3831_v40 = vld [vmem:[%s5219_s1 + $0x4a4] ss:$8 sps:$4 sm:$0xff]   ;;  %v3835_v42 = vld [vmem:[%s5219_s1 + $0x4a0] ss:$8 sps:$4 sm:$0xff]  }
  0x15   : > { %2409 = vmatpush1.bf16.msra.mxu0 %v3794_v15  ;;  %1318 = vmatprep.subr.bf16.mxu1 %v3795_v16  ;;  %v3833_v41 = vld [vmem:[%s5219_s1 + $0xa4] ss:$8 sps:$4 sm:$0xff]   ;;  %v3836_v43 = vld [vmem:[%s5219_s1 + $0xa0] ss:$8 sps:$4 sm:$0xff]   ;;  %s4359_s4 = scalar_lea.vmem %s5218_s0, %s3745_s19  ;;  %v3837_v44 = vld [vmem:[%s5219_s1 + $0x4b4] ss:$8 sps:$4 sm:$0xff]  }
  0x16   : > { %2410 = vmatprep.subr.bf16.mxu0 %v3797_v17  ;;  %v3839_v45 = vld [vmem:[%s5219_s1 + $0xb4] ss:$8 sps:$4 sm:$0xff]   ;;  %v3841_v46 = vld [vmem:[%s5219_s1 + $0x4b0] ss:$8 sps:$4 sm:$0xff]   ;;  %v349_v48 = vld [vmem:[%s4359_s4 + $0x40] sm:$0xff] }
  0x17   : > { %v3842_v47 = vld [vmem:[%s5219_s1 + $0xb0] ss:$8 sps:$4 sm:$0xff]   ;;  %v353_v49 = vld [vmem:[%s4359_s4 + $0x60] sm:$0xff]  ;;  %v3849_v58 = vld [vmem:[%s5219_s1 + $0x4d4] ss:$8 sps:$4 sm:$0xff]  }
  0x18   : > { %1319 = vmatpush1.bf16.msra.mxu1 %v3799_v18  ;;  %v3843_v50 = vld [vmem:[%s5219_s1 + $0x4c4] ss:$8 sps:$4 sm:$0xff]   ;;  %v3291_v52 = vcombine.high %v349_v48, %v353_v49  ;;  %v3847_v56 = vld [vmem:[%s5219_s1 + $0x4c0] ss:$8 sps:$4 sm:$0xff]   ;;  %v3851_v59 = vld [vmem:[%s5219_s1 + $0xd4] ss:$8 sps:$4 sm:$0xff]   ;;  %v3290_v8 = vcombine.low %v349_v48, %v353_v49 }
  0x19   : > { %2411 = vmatpush1.bf16.msra.mxu0 %v3800_v19  ;;  %1320 = vmatprep.subr.bf16.mxu1 %v3801_v20  ;;  %v3845_v51 = vld [vmem:[%s5219_s1 + $0xc4] ss:$8 sps:$4 sm:$0xff]   ;;  %v3848_v57 = vld [vmem:[%s5219_s1 + $0xc0] ss:$8 sps:$4 sm:$0xff]   ;;  %v3853_v60 = vld [vmem:[%s5219_s1 + $0x4d0] ss:$8 sps:$4 sm:$0xff]  }
  0x1a   : > { %2412 = vmatprep.subr.bf16.mxu0 %v3803_v21  ;;  %v189_v53 = vld [vmem:[%s4359_s4] sm:$0xff]  ;;  %1342 = vmatprep.mubr.bf16.mxu1 %v3291_v52  ;;  %v3854_v61 = vld [vmem:[%s5219_s1 + $0xd0] ss:$8 sps:$4 sm:$0xff]   ;;  %v3861_v2 = vld [vmem:[%s5219_s1 + $0x4f4] ss:$8 sps:$4 sm:$0xff]  }
  0x1b   : > { %v193_v54 = vld [vmem:[%s4359_s4 + $0x20] sm:$0xff]  ;;  %v3863_v3 = vld [vmem:[%s5219_s1 + $0xf4] ss:$8 sps:$4 sm:$0xff]   ;;  %v3865_v4 = vld [vmem:[%s5219_s1 + $0x4f0] ss:$8 sps:$4 sm:$0xff]  }
  0x1c   : > { %1321 = vmatpush1.bf16.msra.mxu1 %v3805_v22  ;;  %v3451_v55 = vcombine.high %v189_v53, %v193_v54  ;;  %v3855_v62 = vld [vmem:[%s5219_s1 + $0x4e4] ss:$8 sps:$4 sm:$0xff]   ;;  %v3859_v0 = vld [vmem:[%s5219_s1 + $0x4e0] ss:$8 sps:$4 sm:$0xff]   ;;  %v3866_v5 = vld [vmem:[%s5219_s1 + $0xf0] ss:$8 sps:$4 sm:$0xff]   ;;  %v3450_v10 = vcombine.low %v189_v53, %v193_v54 }
  0x1d   : > { %2413 = vmatpush1.bf16.msra.mxu0 %v3806_v23  ;;  %1322 = vmatprep.subr.bf16.mxu1 %v3807_v24  ;;  %v3857_v63 = vld [vmem:[%s5219_s1 + $0xe4] ss:$8 sps:$4 sm:$0xff]   ;;  %v3860_v1 = vld [vmem:[%s5219_s1 + $0xe0] ss:$8 sps:$4 sm:$0xff]   ;;  %v3875_v12 = vld [vmem:[%s5219_s1 + $0x514] ss:$8 sps:$4 sm:$0xff]  }
  0x1e   : > { %2414 = vmatprep.subr.bf16.mxu0 %v3809_v25  ;;  %2434 = vmatprep.mubr.bf16.mxu0 %v3451_v55  ;;  %v3869_v6 = vld [vmem:[%s5219_s1 + $0x504] ss:$8 sps:$4 sm:$0xff]   ;;  %v3867_v9 = vld [vmem:[%s5219_s1 + $0x500] ss:$8 sps:$4 sm:$0xff]   ;;  %v3878_v13 = vld [vmem:[%s5219_s1 + $0x114] ss:$8 sps:$4 sm:$0xff]  }
  0x1f   : > { %v3872_v7 = vld [vmem:[%s5219_s1 + $0x104] ss:$8 sps:$4 sm:$0xff]   ;;  %v3870_v11 = vld [vmem:[%s5219_s1 + $0x100] ss:$8 sps:$4 sm:$0xff]   ;;  %v3873_v14 = vld [vmem:[%s5219_s1 + $0x510] ss:$8 sps:$4 sm:$0xff]  }
  0x20   : > { %1323 = vmatpush1.bf16.msra.mxu1 %v3811_v26  ;;  %v3876_v15 = vld [vmem:[%s5219_s1 + $0x110] ss:$8 sps:$4 sm:$0xff]   ;;  %v3881_v16 = vld [vmem:[%s5219_s1 + $0x524] ss:$8 sps:$4 sm:$0xff]   ;;  %v3879_v20 = vld [vmem:[%s5219_s1 + $0x520] ss:$8 sps:$4 sm:$0xff]  }
  0x21   : > { %2415 = vmatpush1.bf16.msra.mxu0 %v3812_v27  ;;  %1324 = vmatprep.subr.bf16.mxu1 %v3813_v28  ;;  %v3884_v17 = vld [vmem:[%s5219_s1 + $0x124] ss:$8 sps:$4 sm:$0xff]   ;;  %v3882_v21 = vld [vmem:[%s5219_s1 + $0x120] ss:$8 sps:$4 sm:$0xff]   ;;  %v3887_v24 = vld [vmem:[%s5219_s1 + $0x534] ss:$8 sps:$4 sm:$0xff]  }
  0x22   : > { %2416 = vmatprep.subr.bf16.mxu0 %v3815_v29  ;;  %v357_v18 = vld [vmem:[%s4359_s4 + $0x80] sm:$0xff]  ;;  %v3890_v25 = vld [vmem:[%s5219_s1 + $0x134] ss:$8 sps:$4 sm:$0xff]   ;;  %v3885_v26 = vld [vmem:[%s5219_s1 + $0x530] ss:$8 sps:$4 sm:$0xff]  }
  0x23   : > { %v361_v19 = vld [vmem:[%s4359_s4 + $0xa0] sm:$0xff]  ;;  %v3888_v27 = vld [vmem:[%s5219_s1 + $0x130] ss:$8 sps:$4 sm:$0xff]   ;;  %v3911_v48 = vld [vmem:[%s5219_s1 + $0x574] ss:$8 sps:$4 sm:$0xff]  }
  0x24   : > { %1325 = vmatpush1.bf16.msra.mxu1 %v3817_v30  ;;  %v3299_v22 = vcombine.high %v357_v18, %v361_v19  ;;  %v3298_v23 = vcombine.low %v357_v18, %v361_v19  ;;  %v3893_v28 = vld [vmem:[%s5219_s1 + $0x544] ss:$8 sps:$4 sm:$0xff]   ;;  %v3914_v49 = vld [vmem:[%s5219_s1 + $0x174] ss:$8 sps:$4 sm:$0xff]   ;;  %v3909_v55 = vld [vmem:[%s5219_s1 + $0x570] ss:$8 sps:$4 sm:$0xff]  }
  0x25   : > { %2417 = vmatpush1.bf16.msra.mxu0 %v3818_v31  ;;  %1326 = vmatprep.subr.bf16.mxu1 %v3819_v32  ;;  %v3896_v29 = vld [vmem:[%s5219_s1 + $0x144] ss:$8 sps:$4 sm:$0xff]  }
  0x26   : > { %2418 = vmatprep.subr.bf16.mxu0 %v3821_v33  ;;  %v365_v30 = vld [vmem:[%s4359_s4 + $0xc0] sm:$0xff]  ;;  %v4532_v53 = vld [vmem:[%s4359_s4 + $0x8] sm:$0xff] }
  0x27   : > { %v369_v31 = vld [vmem:[%s4359_s4 + $0xe0] sm:$0xff]  ;;  %v4535_v54 = vld [vmem:[%s4359_s4 + $0x28] sm:$0xff] }
  0x28   : > { %1327 = vmatpush1.bf16.msra.mxu1 %v3823_v34  ;;  %v3307_v32 = vcombine.high %v365_v30, %v369_v31  ;;  %v3891_v33 = vld [vmem:[%s5219_s1 + $0x540] ss:$8 sps:$4 sm:$0xff]   ;;  %v3953_v18 = vld [vmem:[%s5219_s1 + $0x5e4] ss:$8 sps:$4 sm:$0xff]  }
  0x29   : > { %2419 = vmatpush1.bf16.msra.mxu0 %v3824_v35  ;;  %1328 = vmatprep.subr.bf16.mxu1 %v3825_v36  ;;  %v3894_v34 = vld [vmem:[%s5219_s1 + $0x140] ss:$8 sps:$4 sm:$0xff]   ;;  %v3306_v35 = vcombine.low %v365_v30, %v369_v31  ;;  %v3899_v36 = vld [vmem:[%s5219_s1 + $0x554] ss:$8 sps:$4 sm:$0xff]   ;;  %v3956_v19 = vld [vmem:[%s5219_s1 + $0x1e4] ss:$8 sps:$4 sm:$0xff]   ;;  %v3452_v30 = vcombine.low %v4532_v53, %v4535_v54 }
  0x2a   : > { %2420 = vmatprep.subr.bf16.mxu0 %v3827_v37  ;;  %v3902_v37 = vld [vmem:[%s5219_s1 + $0x154] ss:$8 sps:$4 sm:$0xff]   ;;  %v362_v31 = vld [vmem:[%s4359_s4 + $0xa8] sm:$0xff] }
  0x2c   : > { %1329 = vmatpush1.bf16.msra.mxu1 %v3829_v38  ;;  %v373_v38 = vld [vmem:[%s4359_s4 + $0x100] sm:$0xff] }
  0x2d   : > { %2421 = vmatpush1.bf16.msra.mxu0 %v3830_v39  ;;  %1330 = vmatprep.subr.bf16.mxu1 %v3831_v40  ;;  %v377_v39 = vld [vmem:[%s4359_s4 + $0x120] sm:$0xff]  ;;  %v3897_v40 = vld [vmem:[%s5219_s1 + $0x550] ss:$8 sps:$4 sm:$0xff]  }
  0x2e   : > { %2422 = vmatprep.subr.bf16.mxu0 %v3833_v41  ;;  %v3900_v41 = vld [vmem:[%s5219_s1 + $0x150] ss:$8 sps:$4 sm:$0xff]  }
  0x30   : > { %1331 = vmatpush1.bf16.msra.mxu1 %v3835_v42  ;;  %v3315_v42 = vcombine.high %v373_v38, %v377_v39 }
  0x31   : > { %2423 = vmatpush1.bf16.msra.mxu0 %v3836_v43  ;;  %1332 = vmatprep.subr.bf16.mxu1 %v3837_v44  ;;  %v3905_v43 = vld [vmem:[%s5219_s1 + $0x564] ss:$8 sps:$4 sm:$0xff]  }
  0x32   : > { %2424 = vmatprep.subr.bf16.mxu0 %v3839_v45  ;;  %v3908_v44 = vld [vmem:[%s5219_s1 + $0x164] ss:$8 sps:$4 sm:$0xff]   ;;  %v3903_v45 = vld [vmem:[%s5219_s1 + $0x560] ss:$8 sps:$4 sm:$0xff]  }
  0x34   : > { %1333 = vmatpush1.bf16.msra.mxu1 %v3841_v46  ;;  %v3906_v46 = vld [vmem:[%s5219_s1 + $0x160] ss:$8 sps:$4 sm:$0xff]  }
  0x35   : > { %2425 = vmatpush1.bf16.msra.mxu0 %v3842_v47  ;;  %1334 = vmatprep.subr.bf16.mxu1 %v3843_v50  ;;  %v3314_v47 = vcombine.low %v373_v38, %v377_v39  ;;  %v4522_v50 = vld [vmem:[%s4359_s4 + $0x48] sm:$0xff]  ;;  %v3972_v38 = vld [vmem:[%s5219_s1 + $0x210] ss:$8 sps:$4 sm:$0xff]  }
  0x36   : > { %2426 = vmatprep.subr.bf16.mxu0 %v3845_v51  ;;  %v4525_v51 = vld [vmem:[%s4359_s4 + $0x68] sm:$0xff] }
  0x37   : > { %v3977_v39 = vld [vmem:[%s5219_s1 + $0x624] ss:$8 sps:$4 sm:$0xff]  }
  0x38   : > { %1335 = vmatpush1.bf16.msra.mxu1 %v3847_v56  ;;  %v3912_v56 = vld [vmem:[%s5219_s1 + $0x170] ss:$8 sps:$4 sm:$0xff]  }
  0x39   : > { %2427 = vmatpush1.bf16.msra.mxu0 %v3848_v57  ;;  %1336 = vmatprep.subr.bf16.mxu1 %v3849_v58  ;;  %v3453_v57 = vcombine.high %v4532_v53, %v4535_v54  ;;  %v3917_v58 = vld [vmem:[%s5219_s1 + $0x584] ss:$8 sps:$4 sm:$0xff]   ;;  %v3987_v53 = vld [vmem:[%s5219_s1 + $0x640] ss:$8 sps:$4 sm:$0xff]  }
  0x3a   : > { %2428 = vmatprep.subr.bf16.mxu0 %v3851_v59  ;;  %v3920_v59 = vld [vmem:[%s5219_s1 + $0x184] ss:$8 sps:$4 sm:$0xff]   ;;  %v3990_v54 = vld [vmem:[%s5219_s1 + $0x240] ss:$8 sps:$4 sm:$0xff]  }
  0x3c   : > { %1337 = vmatpush1.bf16.msra.mxu1 %v3853_v60  ;;  %v3915_v60 = vld [vmem:[%s5219_s1 + $0x580] ss:$8 sps:$4 sm:$0xff]  }
  0x3d   : > { %2429 = vmatpush1.bf16.msra.mxu0 %v3854_v61  ;;  %1338 = vmatprep.subr.bf16.mxu1 %v3855_v62  ;;  %v3918_v61 = vld [vmem:[%s5219_s1 + $0x180] ss:$8 sps:$4 sm:$0xff]   ;;  %v3923_v62 = vld [vmem:[%s5219_s1 + $0x594] ss:$8 sps:$4 sm:$0xff]  }
  0x3e   : > { %2430 = vmatprep.subr.bf16.mxu0 %v3857_v63  ;;  %v3926_v63 = vld [vmem:[%s5219_s1 + $0x194] ss:$8 sps:$4 sm:$0xff]  }
  0x40   : > { %1339 = vmatpush1.bf16.msra.mxu1 %v3859_v0  ;;  %v3921_v0 = vld [vmem:[%s5219_s1 + $0x590] ss:$8 sps:$4 sm:$0xff]  }
  0x41   : > { %2431 = vmatpush1.bf16.msra.mxu0 %v3860_v1  ;;  %1340 = vmatprep.subr.bf16.mxu1 %v3861_v2  ;;  %v3924_v1 = vld [vmem:[%s5219_s1 + $0x190] ss:$8 sps:$4 sm:$0xff]   ;;  %v3929_v2 = vld [vmem:[%s5219_s1 + $0x5a4] ss:$8 sps:$4 sm:$0xff]  }
  0x42   : > { %2432 = vmatprep.subr.bf16.mxu0 %v3863_v3  ;;  %v3932_v3 = vld [vmem:[%s5219_s1 + $0x1a4] ss:$8 sps:$4 sm:$0xff]  }
  0x44   : > { %1341 = vmatpush1.bf16.msra.mxu1 %v3865_v4  ;;  %v3927_v4 = vld [vmem:[%s5219_s1 + $0x5a0] ss:$8 sps:$4 sm:$0xff]  }
  0x45   : > { %2433 = vmatpush1.bf16.msra.mxu0 %v3866_v5  ;;  %1383 = vmatprep.subr.bf16.mxu1 %v3869_v6  ;;  %v3930_v5 = vld [vmem:[%s5219_s1 + $0x1a0] ss:$8 sps:$4 sm:$0xff]   ;;  %v3935_v6 = vld [vmem:[%s5219_s1 + $0x5b4] ss:$8 sps:$4 sm:$0xff]  }
  0x46   : > { %2475 = vmatprep.subr.bf16.mxu0 %v3872_v7  ;;  %v3938_v7 = vld [vmem:[%s5219_s1 + $0x1b4] ss:$8 sps:$4 sm:$0xff]  }
  0x47   : > { %1343 = vmatmul.mubr.bf16.vlgmr.msra.gmra.mrb[0].mxu1 %v3290_v8 }
  0x48   : > { %2435 = vmatmul.mubr.bf16.vlgmr.msra.gmra.mrb[0].mxu0 %v3450_v10  ;;  %1384 = vmatpush1.bf16.msra.mxu1 %v3867_v9  ;;  %v3936_v9 = vld [vmem:[%s5219_s1 + $0x1b0] ss:$8 sps:$4 sm:$0xff]   ;;  %v3941_v10 = vld [vmem:[%s5219_s1 + $0x5c4] ss:$8 sps:$4 sm:$0xff]  }
  0x49   : > { %2476 = vmatpush1.bf16.msra.mxu0 %v3870_v11  ;;  %1385 = vmatprep.subr.bf16.mxu1 %v3875_v12  ;;  %v3944_v11 = vld [vmem:[%s5219_s1 + $0x1c4] ss:$8 sps:$4 sm:$0xff]   ;;  %v3939_v12 = vld [vmem:[%s5219_s1 + $0x5c0] ss:$8 sps:$4 sm:$0xff]  }
  0x4a   : > { %2477 = vmatprep.subr.bf16.mxu0 %v3878_v13  ;;  %2444 = vmatprep.mubr.bf16.mxu0 %v3291_v52  ;;  %v4529_v52 = vcombine.high %v4522_v50, %v4525_v51  ;;  %v3942_v13 = vld [vmem:[%s5219_s1 + $0x1c0] ss:$8 sps:$4 sm:$0xff]  }
  0x4b   : > { %1352 = vmatprep.mubr.bf16.mxu1 %v3299_v22 }
  0x4c   : > { %1386 = vmatpush1.bf16.msra.mxu1 %v3873_v14  ;;  %v3947_v14 = vld [vmem:[%s5219_s1 + $0x5d4] ss:$8 sps:$4 sm:$0xff]  }
  0x4d   : > { %2478 = vmatpush1.bf16.msra.mxu0 %v3876_v15  ;;  %1387 = vmatprep.subr.bf16.mxu1 %v3881_v16  ;;  %v3950_v15 = vld [vmem:[%s5219_s1 + $0x1d4] ss:$8 sps:$4 sm:$0xff]   ;;  %v3945_v16 = vld [vmem:[%s5219_s1 + $0x5d0] ss:$8 sps:$4 sm:$0xff]  }
  0x4e   : > { %2479 = vmatprep.subr.bf16.mxu0 %v3884_v17  ;;  %v3948_v17 = vld [vmem:[%s5219_s1 + $0x1d0] ss:$8 sps:$4 sm:$0xff]  }
  0x4f   : > { %1353 = vmatmul.mubr.bf16.gmra.mrb[4].mxu1 %v3298_v23 }
  0x50   : > { %2445 = vmatmul.mubr.bf16.gmra.mrb[4].mxu0 %v3290_v8  ;;  %1388 = vmatpush1.bf16.msra.mxu1 %v3879_v20  ;;  %v3933_v8 = vld [vmem:[%s5219_s1 + $0x5b0] ss:$8 sps:$4 sm:$0xff]   ;;  %v3951_v20 = vld [vmem:[%s5219_s1 + $0x5e0] ss:$8 sps:$4 sm:$0xff]  }
  0x51   : > { %2480 = vmatpush1.bf16.msra.mxu0 %v3882_v21  ;;  %1389 = vmatprep.subr.bf16.mxu1 %v3887_v24  ;;  %v3954_v21 = vld [vmem:[%s5219_s1 + $0x1e0] ss:$8 sps:$4 sm:$0xff]   ;;  %v3957_v24 = vld [vmem:[%s5219_s1 + $0x5f0] ss:$8 sps:$4 sm:$0xff]  }
  0x52   : > { %2481 = vmatprep.subr.bf16.mxu0 %v3890_v25  ;;  %2454 = vmatprep.mubr.bf16.mxu0 %v3299_v22  ;;  %v3959_v22 = vld [vmem:[%s5219_s1 + $0x5f4] ss:$8 sps:$4 sm:$0xff]   ;;  %v3960_v25 = vld [vmem:[%s5219_s1 + $0x1f0] ss:$8 sps:$4 sm:$0xff]  }
  0x53   : > { %1362 = vmatprep.mubr.bf16.mxu1 %v3307_v32 }
  0x54   : > { %1390 = vmatpush1.bf16.msra.mxu1 %v3885_v26  ;;  %v3965_v26 = vld [vmem:[%s5219_s1 + $0x604] ss:$8 sps:$4 sm:$0xff]  }
  0x55   : > { %2482 = vmatpush1.bf16.msra.mxu0 %v3888_v27  ;;  %1391 = vmatprep.subr.bf16.mxu1 %v3893_v28  ;;  %v3968_v27 = vld [vmem:[%s5219_s1 + $0x204] ss:$8 sps:$4 sm:$0xff]  }
  0x56   : > { %2483 = vmatprep.subr.bf16.mxu0 %v3896_v29  ;;  %v358_v28 = vld [vmem:[%s4359_s4 + $0x88] sm:$0xff]  ;;  %v3292_v29 = vcombine.low %v4522_v50, %v4525_v51  ;;  %v3984_v50 = vld [vmem:[%s5219_s1 + $0x230] ss:$8 sps:$4 sm:$0xff]  }
  0x57   : > { %1363 = vmatmul.mubr.bf16.gmra.mrb[8].mxu1 %v3306_v35  ;;  %v3989_v51 = vld [vmem:[%s5219_s1 + $0x644] ss:$8 sps:$4 sm:$0xff]  }
  0x58   : > { %2455 = vmatmul.mubr.bf16.gmra.mrb[8].mxu0 %v3298_v23  ;;  %1392 = vmatpush1.bf16.msra.mxu1 %v3891_v33  ;;  %v3962_v23 = vld [vmem:[%s5219_s1 + $0x1f4] ss:$8 sps:$4 sm:$0xff]   ;;  %v3966_v33 = vld [vmem:[%s5219_s1 + $0x200] ss:$8 sps:$4 sm:$0xff]  }
  0x59   : > { %2484 = vmatpush1.bf16.msra.mxu0 %v3894_v34  ;;  %1393 = vmatprep.subr.bf16.mxu1 %v3899_v36  ;;  %v3971_v34 = vld [vmem:[%s5219_s1 + $0x614] ss:$8 sps:$4 sm:$0xff]   ;;  %v3301_v36 = vcombine.high %v358_v28, %v362_v31 }
  0x5a   : > { %2485 = vmatprep.subr.bf16.mxu0 %v3902_v37  ;;  %1372 = vmatprep.mubr.bf16.mxu1 %v3315_v42  ;;  %v3969_v37 = vld [vmem:[%s5219_s1 + $0x610] ss:$8 sps:$4 sm:$0xff]   ;;  %v3300_v42 = vcombine.low %v358_v28, %v362_v31  ;;  %v4040_v31 = vld [vmem:[%s5219_s1 + $0x2c4] ss:$8 sps:$4 sm:$0xff]  }
  0x5b   : > { %2464 = vmatprep.mubr.bf16.mxu0 %v3307_v32  ;;  %v3963_v32 = vld [vmem:[%s5219_s1 + $0x600] ss:$8 sps:$4 sm:$0xff]   ;;  %v4029_v28 = vld [vmem:[%s5219_s1 + $0x6b0] ss:$8 sps:$4 sm:$0xff]  }
  0x5c   : > { %1394 = vmatpush1.bf16.msra.mxu1 %v3897_v40  ;;  %v3980_v40 = vld [vmem:[%s5219_s1 + $0x224] ss:$8 sps:$4 sm:$0xff]  }
  0x5d   : > { %2486 = vmatpush1.bf16.msra.mxu0 %v3900_v41  ;;  %1395 = vmatprep.subr.bf16.mxu1 %v3905_v43  ;;  %v366_v41 = vld [vmem:[%s4359_s4 + $0xc8] sm:$0xff] }
  0x5e   : > { %2487 = vmatprep.subr.bf16.mxu0 %v3908_v44  ;;  %v370_v43 = vld [vmem:[%s4359_s4 + $0xe8] sm:$0xff] }
  0x5f   : > { %1373 = vmatmul.mubr.bf16.gmra.mrb[12].mxu1 %v3314_v47  ;;  %v3975_v44 = vld [vmem:[%s5219_s1 + $0x620] ss:$8 sps:$4 sm:$0xff]   ;;  %v3986_v47 = vld [vmem:[%s5219_s1 + $0x234] ss:$8 sps:$4 sm:$0xff]  }
  0x60   : > { %2465 = vmatmul.mubr.bf16.gmra.mrb[12].mxu0 %v3306_v35  ;;  %1396 = vmatpush1.bf16.msra.mxu1 %v3903_v45  ;;  %v3974_v35 = vld [vmem:[%s5219_s1 + $0x214] ss:$8 sps:$4 sm:$0xff]   ;;  %v3978_v45 = vld [vmem:[%s5219_s1 + $0x220] ss:$8 sps:$4 sm:$0xff]  }
  0x61   : > { %2488 = vmatpush1.bf16.msra.mxu0 %v3906_v46  ;;  %1397 = vmatprep.subr.bf16.mxu1 %v3911_v48  ;;  %v3983_v46 = vld [vmem:[%s5219_s1 + $0x634] ss:$8 sps:$4 sm:$0xff]   ;;  %v3309_v48 = vcombine.high %v366_v41, %v370_v43 }
  0x62   : > { %2489 = vmatprep.subr.bf16.mxu0 %v3914_v49  ;;  %1415 = vmatprep.mubr.bf16.mxu1 %v4529_v52  ;;  %v3981_v49 = vld [vmem:[%s5219_s1 + $0x630] ss:$8 sps:$4 sm:$0xff]  }
  0x63   : > { %2507 = vmatprep.mubr.bf16.mxu0 %v3453_v57  ;;  %v378_v57 = vld [vmem:[%s4359_s4 + $0x128] sm:$0xff] }
  0x64   : > { %1398 = vmatpush1.bf16.msra.mxu1 %v3909_v55  ;;  %v3308_v55 = vcombine.low %v366_v41, %v370_v43  ;;  %v4050_v41 = vld [vmem:[%s5219_s1 + $0x2e0] ss:$8 sps:$4 sm:$0xff]   ;;  %v4058_v43 = vld [vmem:[%s5219_s1 + $0x2f4] ss:$8 sps:$4 sm:$0xff]  }
  0x65   : > { %2490 = vmatpush1.bf16.msra.mxu0 %v3912_v56  ;;  %1399 = vmatprep.subr.bf16.mxu1 %v3917_v58  ;;  %v374_v56 = vld [vmem:[%s4359_s4 + $0x108] sm:$0xff]  ;;  %v3995_v58 = vld [vmem:[%s5219_s1 + $0x654] ss:$8 sps:$4 sm:$0xff]  }
  0x66   : > { %2491 = vmatprep.subr.bf16.mxu0 %v3920_v59  ;;  %v3998_v59 = vld [vmem:[%s5219_s1 + $0x254] ss:$8 sps:$4 sm:$0xff]  }
  0x68   : > { %1400 = vmatpush1.bf16.msra.mxu1 %v3915_v60  ;;  %v3317_v60 = vcombine.high %v374_v56, %v378_v57 }
  0x69   : > { %2492 = vmatpush1.bf16.msra.mxu0 %v3918_v61  ;;  %1401 = vmatprep.subr.bf16.mxu1 %v3923_v62  ;;  %v3993_v61 = vld [vmem:[%s5219_s1 + $0x650] ss:$8 sps:$4 sm:$0xff]  }
  0x6a   : > { %2493 = vmatprep.subr.bf16.mxu0 %v3926_v63  ;;  %v3996_v62 = vld [vmem:[%s5219_s1 + $0x250] ss:$8 sps:$4 sm:$0xff]   ;;  %v4001_v63 = vld [vmem:[%s5219_s1 + $0x664] ss:$8 sps:$4 sm:$0xff]  }
  0x6c   : > { %1402 = vmatpush1.bf16.msra.mxu1 %v3921_v0  ;;  %v4004_v0 = vld [vmem:[%s5219_s1 + $0x264] ss:$8 sps:$4 sm:$0xff]  }
  0x6d   : > { %2494 = vmatpush1.bf16.msra.mxu0 %v3924_v1  ;;  %1403 = vmatprep.subr.bf16.mxu1 %v3929_v2  ;;  %v3999_v1 = vld [vmem:[%s5219_s1 + $0x660] ss:$8 sps:$4 sm:$0xff]  }
  0x6e   : > { %2495 = vmatprep.subr.bf16.mxu0 %v3932_v3  ;;  %v4002_v2 = vld [vmem:[%s5219_s1 + $0x260] ss:$8 sps:$4 sm:$0xff]   ;;  %v4738_v3 = vld [vmem:[%s4359_s4 + $0x50] sm:$0xff] }
  0x70   : > { %1404 = vmatpush1.bf16.msra.mxu1 %v3927_v4  ;;  %v4741_v4 = vld [vmem:[%s4359_s4 + $0x70] sm:$0xff] }
  0x71   : > { %2496 = vmatpush1.bf16.msra.mxu0 %v3930_v5  ;;  %1405 = vmatprep.subr.bf16.mxu1 %v3935_v6  ;;  %v3316_v5 = vcombine.low %v374_v56, %v378_v57  ;;  %v4744_v6 = vld [vmem:[%s4359_s4 + $0x10] sm:$0xff] }
  0x72   : > { %2497 = vmatprep.subr.bf16.mxu0 %v3938_v7  ;;  %v4747_v7 = vld [vmem:[%s4359_s4 + $0x30] sm:$0xff] }
  0x73   : > { %v4065_v57 = vld [vmem:[%s5219_s1 + $0x710] ss:$8 sps:$4 sm:$0xff]  }
  0x74   : > { %1406 = vmatpush1.bf16.msra.mxu1 %v3933_v8  ;;  %v4007_v8 = vld [vmem:[%s5219_s1 + $0x674] ss:$8 sps:$4 sm:$0xff]  }
  0x75   : > { %2498 = vmatpush1.bf16.msra.mxu0 %v3936_v9  ;;  %1407 = vmatprep.subr.bf16.mxu1 %v3941_v10  ;;  %v4010_v9 = vld [vmem:[%s5219_s1 + $0x274] ss:$8 sps:$4 sm:$0xff]   ;;  %v4757_v10 = vcombine.high %v4738_v3, %v4741_v4 }
  0x76   : > { %2499 = vmatprep.subr.bf16.mxu0 %v3944_v11  ;;  %v3455_v11 = vcombine.high %v4744_v6, %v4747_v7 }
  0x78   : > { %1408 = vmatpush1.bf16.msra.mxu1 %v3939_v12  ;;  %v4005_v12 = vld [vmem:[%s5219_s1 + $0x670] ss:$8 sps:$4 sm:$0xff]  }
  0x79   : > { %2500 = vmatpush1.bf16.msra.mxu0 %v3942_v13  ;;  %1409 = vmatprep.subr.bf16.mxu1 %v3947_v14  ;;  %v4008_v13 = vld [vmem:[%s5219_s1 + $0x270] ss:$8 sps:$4 sm:$0xff]   ;;  %v4013_v14 = vld [vmem:[%s5219_s1 + $0x684] ss:$8 sps:$4 sm:$0xff]  }
  0x7a   : > { %2501 = vmatprep.subr.bf16.mxu0 %v3950_v15  ;;  %v4016_v15 = vld [vmem:[%s5219_s1 + $0x284] ss:$8 sps:$4 sm:$0xff]  }
  0x7c   : > { %1410 = vmatpush1.bf16.msra.mxu1 %v3945_v16  ;;  %v4011_v16 = vld [vmem:[%s5219_s1 + $0x680] ss:$8 sps:$4 sm:$0xff]  }
  0x7d   : > { %2502 = vmatpush1.bf16.msra.mxu0 %v3948_v17  ;;  %1411 = vmatprep.subr.bf16.mxu1 %v3953_v18  ;;  %v4014_v17 = vld [vmem:[%s5219_s1 + $0x280] ss:$8 sps:$4 sm:$0xff]   ;;  %v4019_v18 = vld [vmem:[%s5219_s1 + $0x694] ss:$8 sps:$4 sm:$0xff]  }
  0x7e   : > { %2503 = vmatprep.subr.bf16.mxu0 %v3956_v19  ;;  %v4022_v19 = vld [vmem:[%s5219_s1 + $0x294] ss:$8 sps:$4 sm:$0xff]  }
  0x80   : > { %1412 = vmatpush1.bf16.msra.mxu1 %v3951_v20  ;;  %v4017_v20 = vld [vmem:[%s5219_s1 + $0x690] ss:$8 sps:$4 sm:$0xff]  }
  0x81   : > { %2504 = vmatpush1.bf16.msra.mxu0 %v3954_v21  ;;  %1413 = vmatprep.subr.bf16.mxu1 %v3959_v22  ;;  %v4020_v21 = vld [vmem:[%s5219_s1 + $0x290] ss:$8 sps:$4 sm:$0xff]   ;;  %v4025_v22 = vld [vmem:[%s5219_s1 + $0x6a4] ss:$8 sps:$4 sm:$0xff]  }
  0x82   : > { %2505 = vmatprep.subr.bf16.mxu0 %v3962_v23  ;;  %v4028_v23 = vld [vmem:[%s5219_s1 + $0x2a4] ss:$8 sps:$4 sm:$0xff]  }
  0x84   : > { %1414 = vmatpush1.bf16.msra.mxu1 %v3957_v24  ;;  %v4023_v24 = vld [vmem:[%s5219_s1 + $0x6a0] ss:$8 sps:$4 sm:$0xff]  }
  0x85   : > { %2506 = vmatpush1.bf16.msra.mxu0 %v3960_v25  ;;  %1456 = vmatprep.subr.bf16.mxu1 %v3965_v26  ;;  %v4026_v25 = vld [vmem:[%s5219_s1 + $0x2a0] ss:$8 sps:$4 sm:$0xff]   ;;  %v4031_v26 = vld [vmem:[%s5219_s1 + $0x6b4] ss:$8 sps:$4 sm:$0xff]  }
  0x86   : > { %2548 = vmatprep.subr.bf16.mxu0 %v3968_v27  ;;  %v4034_v27 = vld [vmem:[%s5219_s1 + $0x2b4] ss:$8 sps:$4 sm:$0xff]  }
  0x87   : > { %1416 = vmatmul.mubr.bf16.vlgmr.msra.gmra.mrb[0].mxu1 %v3292_v29 }
  0x88   : > { %2508 = vmatmul.mubr.bf16.vlgmr.msra.gmra.mrb[0].mxu0 %v3452_v30  ;;  %1457 = vmatpush1.bf16.msra.mxu1 %v3963_v32  ;;  %v4037_v30 = vld [vmem:[%s5219_s1 + $0x6c4] ss:$8 sps:$4 sm:$0xff]   ;;  %v4035_v32 = vld [vmem:[%s5219_s1 + $0x6c0] ss:$8 sps:$4 sm:$0xff]  }
  0x89   : > { %2549 = vmatpush1.bf16.msra.mxu0 %v3966_v33  ;;  %1458 = vmatprep.subr.bf16.mxu1 %v3971_v34  ;;  %v4038_v33 = vld [vmem:[%s5219_s1 + $0x2c0] ss:$8 sps:$4 sm:$0xff]   ;;  %v4043_v34 = vld [vmem:[%s5219_s1 + $0x6d4] ss:$8 sps:$4 sm:$0xff]  }
  0x8a   : > { %2550 = vmatprep.subr.bf16.mxu0 %v3974_v35  ;;  %1425 = vmatprep.mubr.bf16.mxu1 %v3301_v36  ;;  %v4046_v35 = vld [vmem:[%s5219_s1 + $0x2d4] ss:$8 sps:$4 sm:$0xff]  }
  0x8b   : > { %2517 = vmatprep.mubr.bf16.mxu0 %v4529_v52  ;;  %v3992_v52 = vld [vmem:[%s5219_s1 + $0x244] ss:$8 sps:$4 sm:$0xff]  }
  0x8c   : > { %1459 = vmatpush1.bf16.msra.mxu1 %v3969_v37  ;;  %v4044_v37 = vld [vmem:[%s5219_s1 + $0x2d0] ss:$8 sps:$4 sm:$0xff]  }
  0x8d   : > { %2551 = vmatpush1.bf16.msra.mxu0 %v3972_v38  ;;  %1460 = vmatprep.subr.bf16.mxu1 %v3977_v39  ;;  %v4049_v38 = vld [vmem:[%s5219_s1 + $0x6e4] ss:$8 sps:$4 sm:$0xff]  }
  0x8e   : > { %2552 = vmatprep.subr.bf16.mxu0 %v3980_v40  ;;  %v4052_v39 = vld [vmem:[%s5219_s1 + $0x2e4] ss:$8 sps:$4 sm:$0xff]   ;;  %v4047_v40 = vld [vmem:[%s5219_s1 + $0x6e0] ss:$8 sps:$4 sm:$0xff]  }
  0x8f   : > { %1426 = vmatmul.mubr.bf16.gmra.mrb[4].mxu1 %v3300_v42 }
  0x90   : > { %2518 = vmatmul.mubr.bf16.gmra.mrb[4].mxu0 %v3292_v29  ;;  %1461 = vmatpush1.bf16.msra.mxu1 %v3975_v44  ;;  %v4032_v29 = vld [vmem:[%s5219_s1 + $0x2b0] ss:$8 sps:$4 sm:$0xff]  }
  0x91   : > { %2553 = vmatpush1.bf16.msra.mxu0 %v3978_v45  ;;  %1462 = vmatprep.subr.bf16.mxu1 %v3983_v46  ;;  %v4053_v44 = vld [vmem:[%s5219_s1 + $0x6f0] ss:$8 sps:$4 sm:$0xff]   ;;  %v4061_v46 = vld [vmem:[%s5219_s1 + $0x704] ss:$8 sps:$4 sm:$0xff]  }
  0x92   : > { %2554 = vmatprep.subr.bf16.mxu0 %v3986_v47  ;;  %1435 = vmatprep.mubr.bf16.mxu1 %v3309_v48  ;;  %v4056_v45 = vld [vmem:[%s5219_s1 + $0x2f0] ss:$8 sps:$4 sm:$0xff]   ;;  %v4064_v47 = vld [vmem:[%s5219_s1 + $0x304] ss:$8 sps:$4 sm:$0xff]  }
  0x93   : > { %2527 = vmatprep.mubr.bf16.mxu0 %v3301_v36  ;;  %v4041_v36 = vld [vmem:[%s5219_s1 + $0x6d0] ss:$8 sps:$4 sm:$0xff]  }
  0x94   : > { %1463 = vmatpush1.bf16.msra.mxu1 %v3981_v49  ;;  %v3454_v49 = vcombine.low %v4744_v6, %v4747_v7  ;;  %v4080_v6 = vld [vmem:[%s5219_s1 + $0x330] ss:$8 sps:$4 sm:$0xff]   ;;  %v4085_v7 = vld [vmem:[%s5219_s1 + $0x744] ss:$8 sps:$4 sm:$0xff]  }
  0x95   : > { %2555 = vmatpush1.bf16.msra.mxu0 %v3984_v50  ;;  %1464 = vmatprep.subr.bf16.mxu1 %v3989_v51  ;;  %v359_v50 = vld [vmem:[%s4359_s4 + $0x90] sm:$0xff] }
  0x96   : > { %2556 = vmatprep.subr.bf16.mxu0 %v3992_v52  ;;  %v363_v51 = vld [vmem:[%s4359_s4 + $0xb0] sm:$0xff]  ;;  %v4059_v52 = vld [vmem:[%s5219_s1 + $0x700] ss:$8 sps:$4 sm:$0xff]  }
  0x97   : > { %1436 = vmatmul.mubr.bf16.gmra.mrb[8].mxu1 %v3308_v55  ;;  %v3303_v56 = vcombine.high %v359_v50, %v363_v51 }
  0x98   : > { %2528 = vmatmul.mubr.bf16.gmra.mrb[8].mxu0 %v3300_v42  ;;  %1465 = vmatpush1.bf16.msra.mxu1 %v3987_v53  ;;  %v4055_v42 = vld [vmem:[%s5219_s1 + $0x6f4] ss:$8 sps:$4 sm:$0xff]   ;;  %v4062_v53 = vld [vmem:[%s5219_s1 + $0x300] ss:$8 sps:$4 sm:$0xff]  }
  0x99   : > { %2557 = vmatpush1.bf16.msra.mxu0 %v3990_v54  ;;  %1466 = vmatprep.subr.bf16.mxu1 %v3995_v58  ;;  %v4067_v54 = vld [vmem:[%s5219_s1 + $0x714] ss:$8 sps:$4 sm:$0xff]   ;;  %v4068_v58 = vld [vmem:[%s5219_s1 + $0x310] ss:$8 sps:$4 sm:$0xff]  }
  0x9a   : > { %2558 = vmatprep.subr.bf16.mxu0 %v3998_v59  ;;  %1445 = vmatprep.mubr.bf16.mxu1 %v3317_v60  ;;  %v4073_v59 = vld [vmem:[%s5219_s1 + $0x724] ss:$8 sps:$4 sm:$0xff]  }
  0x9b   : > { %2537 = vmatprep.mubr.bf16.mxu0 %v3309_v48  ;;  %v3294_v48 = vcombine.low %v4738_v3, %v4741_v4  ;;  %v4076_v60 = vld [vmem:[%s5219_s1 + $0x324] ss:$8 sps:$4 sm:$0xff]   ;;  %v4082_v3 = vld [vmem:[%s5219_s1 + $0x334] ss:$8 sps:$4 sm:$0xff]  }
  0x9c   : > { %1467 = vmatpush1.bf16.msra.mxu1 %v3993_v61  ;;  %v3302_v61 = vcombine.low %v359_v50, %v363_v51  ;;  %v4133_v50 = vld [vmem:[%s5219_s1 + $0x7c4] ss:$8 sps:$4 sm:$0xff]  }
  0x9d   : > { %2559 = vmatpush1.bf16.msra.mxu0 %v3996_v62  ;;  %1468 = vmatprep.subr.bf16.mxu1 %v4001_v63  ;;  %v367_v62 = vld [vmem:[%s4359_s4 + $0xd0] sm:$0xff]  ;;  %v4136_v51 = vld [vmem:[%s5219_s1 + $0x3c4] ss:$8 sps:$4 sm:$0xff]  }
  0x9e   : > { %2560 = vmatprep.subr.bf16.mxu0 %v4004_v0  ;;  %v371_v63 = vld [vmem:[%s4359_s4 + $0xf0] sm:$0xff]  ;;  %v4071_v0 = vld [vmem:[%s5219_s1 + $0x720] ss:$8 sps:$4 sm:$0xff]  }
  0x9f   : > { %1446 = vmatmul.mubr.bf16.gmra.mrb[12].mxu1 %v3316_v5  ;;  %v3311_v4 = vcombine.high %v367_v62, %v371_v63  ;;  %v4077_v5 = vld [vmem:[%s5219_s1 + $0x730] ss:$8 sps:$4 sm:$0xff]  }
  0xa0   : > { %2538 = vmatmul.mubr.bf16.gmra.mrb[12].mxu0 %v3308_v55  ;;  %1469 = vmatpush1.bf16.msra.mxu1 %v3999_v1  ;;  %v4070_v55 = vld [vmem:[%s5219_s1 + $0x314] ss:$8 sps:$4 sm:$0xff]   ;;  %v4074_v1 = vld [vmem:[%s5219_s1 + $0x320] ss:$8 sps:$4 sm:$0xff]  }
  0xa1   : > { %2561 = vmatpush1.bf16.msra.mxu0 %v4002_v2  ;;  %1470 = vmatprep.subr.bf16.mxu1 %v4007_v8  ;;  %v4079_v2 = vld [vmem:[%s5219_s1 + $0x734] ss:$8 sps:$4 sm:$0xff]   ;;  %v4088_v8 = vld [vmem:[%s5219_s1 + $0x344] ss:$8 sps:$4 sm:$0xff]  }
  0xa2   : > { %2562 = vmatprep.subr.bf16.mxu0 %v4010_v9  ;;  %1488 = vmatprep.mubr.bf16.mxu1 %v4757_v10  ;;  %v3310_v9 = vcombine.low %v367_v62, %v371_v63  ;;  %v4151_v62 = vld [vmem:[%s5219_s1 + $0x7f4] ss:$8 sps:$4 sm:$0xff]  }
  0xa3   : > { %2580 = vmatprep.mubr.bf16.mxu0 %v3455_v11  ;;  %v379_v11 = vld [vmem:[%s4359_s4 + $0x130] sm:$0xff] }
  0xa4   : > { %1471 = vmatpush1.bf16.msra.mxu1 %v4005_v12  ;;  %v4083_v12 = vld [vmem:[%s5219_s1 + $0x740] ss:$8 sps:$4 sm:$0xff]   ;;  %v4154_v63 = vld [vmem:[%s5219_s1 + $0x3f4] ss:$8 sps:$4 sm:$0xff]  }
  0xa5   : > { %2563 = vmatpush1.bf16.msra.mxu0 %v4008_v13  ;;  %1472 = vmatprep.subr.bf16.mxu1 %v4013_v14  ;;  %v4086_v13 = vld [vmem:[%s5219_s1 + $0x340] ss:$8 sps:$4 sm:$0xff]   ;;  %v4091_v14 = vld [vmem:[%s5219_s1 + $0x754] ss:$8 sps:$4 sm:$0xff]  }
  0xa6   : > { %2564 = vmatprep.subr.bf16.mxu0 %v4016_v15  ;;  %v4094_v15 = vld [vmem:[%s5219_s1 + $0x354] ss:$8 sps:$4 sm:$0xff]  }
  0xa8   : > { %1473 = vmatpush1.bf16.msra.mxu1 %v4011_v16 }
  0xa9   : > { %2565 = vmatpush1.bf16.msra.mxu0 %v4014_v17  ;;  %1474 = vmatprep.subr.bf16.mxu1 %v4019_v18  ;;  %v4089_v17 = vld [vmem:[%s5219_s1 + $0x750] ss:$8 sps:$4 sm:$0xff]  }
  0xaa   : > { %2566 = vmatprep.subr.bf16.mxu0 %v4022_v19  ;;  %v4092_v18 = vld [vmem:[%s5219_s1 + $0x350] ss:$8 sps:$4 sm:$0xff]   ;;  %v4097_v19 = vld [vmem:[%s5219_s1 + $0x764] ss:$8 sps:$4 sm:$0xff]  }
  0xac   : > { %1475 = vmatpush1.bf16.msra.mxu1 %v4017_v20  ;;  %v4100_v20 = vld [vmem:[%s5219_s1 + $0x364] ss:$8 sps:$4 sm:$0xff]  }
  0xad   : > { %2567 = vmatpush1.bf16.msra.mxu0 %v4020_v21  ;;  %1476 = vmatprep.subr.bf16.mxu1 %v4025_v22  ;;  %v4954_v21 = vld [vmem:[%s4359_s4 + $0x58] sm:$0xff] }
  0xae   : > { %2568 = vmatprep.subr.bf16.mxu0 %v4028_v23  ;;  %v4957_v23 = vld [vmem:[%s4359_s4 + $0x78] sm:$0xff] }
  0xb0   : > { %1477 = vmatpush1.bf16.msra.mxu1 %v4023_v24  ;;  %v4960_v24 = vld [vmem:[%s4359_s4 + $0x18] sm:$0xff] }
  0xb1   : > { %2569 = vmatpush1.bf16.msra.mxu0 %v4026_v25  ;;  %1478 = vmatprep.subr.bf16.mxu1 %v4031_v26  ;;  %v4963_v25 = vld [vmem:[%s4359_s4 + $0x38] sm:$0xff]  ;;  %v4095_v26 = vld [vmem:[%s5219_s1 + $0x760] ss:$8 sps:$4 sm:$0xff]  }
  0xb2   : > { %2570 = vmatprep.subr.bf16.mxu0 %v4034_v27  ;;  %v4098_v27 = vld [vmem:[%s5219_s1 + $0x360] ss:$8 sps:$4 sm:$0xff]  }
  0xb4   : > { %1479 = vmatpush1.bf16.msra.mxu1 %v4029_v28  ;;  %v4103_v28 = vld [vmem:[%s5219_s1 + $0x774] ss:$8 sps:$4 sm:$0xff]  }
  0xb5   : > { %2571 = vmatpush1.bf16.msra.mxu0 %v4032_v29  ;;  %1480 = vmatprep.subr.bf16.mxu1 %v4037_v30  ;;  %v4106_v29 = vld [vmem:[%s5219_s1 + $0x374] ss:$8 sps:$4 sm:$0xff]   ;;  %v4979_v30 = vcombine.high %v4954_v21, %v4957_v23 }
  0xb6   : > { %2572 = vmatprep.subr.bf16.mxu0 %v4040_v31  ;;  %v3457_v31 = vcombine.high %v4960_v24, %v4963_v25 }
  0xb8   : > { %1481 = vmatpush1.bf16.msra.mxu1 %v4035_v32  ;;  %v4101_v32 = vld [vmem:[%s5219_s1 + $0x770] ss:$8 sps:$4 sm:$0xff]  }
  0xb9   : > { %2573 = vmatpush1.bf16.msra.mxu0 %v4038_v33  ;;  %1482 = vmatprep.subr.bf16.mxu1 %v4043_v34  ;;  %v4104_v33 = vld [vmem:[%s5219_s1 + $0x370] ss:$8 sps:$4 sm:$0xff]   ;;  %v4109_v34 = vld [vmem:[%s5219_s1 + $0x784] ss:$8 sps:$4 sm:$0xff]  }
  0xba   : > { %2574 = vmatprep.subr.bf16.mxu0 %v4046_v35  ;;  %v4112_v35 = vld [vmem:[%s5219_s1 + $0x384] ss:$8 sps:$4 sm:$0xff]  }
  0xbc   : > { %1483 = vmatpush1.bf16.msra.mxu1 %v4041_v36  ;;  %v4107_v36 = vld [vmem:[%s5219_s1 + $0x780] ss:$8 sps:$4 sm:$0xff]  }
  0xbd   : > { %2575 = vmatpush1.bf16.msra.mxu0 %v4044_v37  ;;  %1484 = vmatprep.subr.bf16.mxu1 %v4049_v38  ;;  %v4110_v37 = vld [vmem:[%s5219_s1 + $0x380] ss:$8 sps:$4 sm:$0xff]   ;;  %v4115_v38 = vld [vmem:[%s5219_s1 + $0x794] ss:$8 sps:$4 sm:$0xff]  }
  0xbe   : > { %2576 = vmatprep.subr.bf16.mxu0 %v4052_v39  ;;  %v4118_v39 = vld [vmem:[%s5219_s1 + $0x394] ss:$8 sps:$4 sm:$0xff]  }
  0xc0   : > { %1485 = vmatpush1.bf16.msra.mxu1 %v4047_v40  ;;  %v4113_v40 = vld [vmem:[%s5219_s1 + $0x790] ss:$8 sps:$4 sm:$0xff]  }
  0xc1   : > { %2577 = vmatpush1.bf16.msra.mxu0 %v4050_v41  ;;  %1486 = vmatprep.subr.bf16.mxu1 %v4055_v42  ;;  %v4116_v41 = vld [vmem:[%s5219_s1 + $0x390] ss:$8 sps:$4 sm:$0xff]   ;;  %v4121_v42 = vld [vmem:[%s5219_s1 + $0x7a4] ss:$8 sps:$4 sm:$0xff]  }
  0xc2   : > { %2578 = vmatprep.subr.bf16.mxu0 %v4058_v43  ;;  %v4124_v43 = vld [vmem:[%s5219_s1 + $0x3a4] ss:$8 sps:$4 sm:$0xff]  }
  0xc4   : > { %1487 = vmatpush1.bf16.msra.mxu1 %v4053_v44  ;;  %v4119_v44 = vld [vmem:[%s5219_s1 + $0x7a0] ss:$8 sps:$4 sm:$0xff]  }
  0xc5   : > { %2579 = vmatpush1.bf16.msra.mxu0 %v4056_v45  ;;  %1529 = vmatprep.subr.bf16.mxu1 %v4061_v46  ;;  %v4122_v45 = vld [vmem:[%s5219_s1 + $0x3a0] ss:$8 sps:$4 sm:$0xff]   ;;  %v4127_v46 = vld [vmem:[%s5219_s1 + $0x7b4] ss:$8 sps:$4 sm:$0xff]  }
  0xc6   : > { %2621 = vmatprep.subr.bf16.mxu0 %v4064_v47  ;;  %v4130_v47 = vld [vmem:[%s5219_s1 + $0x3b4] ss:$8 sps:$4 sm:$0xff]  }
  0xc7   : > { %1489 = vmatmul.mubr.bf16.vlgmr.msra.gmra.mrb[0].mxu1 %v3294_v48 }
  0xc8   : > { %2581 = vmatmul.mubr.bf16.vlgmr.msra.gmra.mrb[0].mxu0 %v3454_v49  ;;  %1530 = vmatpush1.bf16.msra.mxu1 %v4059_v52  ;;  %v4128_v49 = vld [vmem:[%s5219_s1 + $0x3b0] ss:$8 sps:$4 sm:$0xff]   ;;  %v4131_v52 = vld [vmem:[%s5219_s1 + $0x7c0] ss:$8 sps:$4 sm:$0xff]  }
  0xc9   : > { %2622 = vmatpush1.bf16.msra.mxu0 %v4062_v53  ;;  %1531 = vmatprep.subr.bf16.mxu1 %v4067_v54  ;;  %v4134_v53 = vld [vmem:[%s5219_s1 + $0x3c0] ss:$8 sps:$4 sm:$0xff]   ;;  %v4139_v54 = vld [vmem:[%s5219_s1 + $0x7d4] ss:$8 sps:$4 sm:$0xff]  }
  0xca   : > { %2623 = vmatprep.subr.bf16.mxu0 %v4070_v55  ;;  %1498 = vmatprep.mubr.bf16.mxu1 %v3303_v56  ;;  %v4142_v55 = vld [vmem:[%s5219_s1 + $0x3d4] ss:$8 sps:$4 sm:$0xff]  }
  0xcb   : > { %2590 = vmatprep.mubr.bf16.mxu0 %v4757_v10  ;;  %v375_v10 = vld [vmem:[%s4359_s4 + $0x110] sm:$0xff] }
  0xcc   : > { %1532 = vmatpush1.bf16.msra.mxu1 %v4065_v57  ;;  %v3319_v16 = vcombine.high %v375_v10, %v379_v11  ;;  %v3318_v22 = vcombine.low %v375_v10, %v379_v11  ;;  %v4140_v57 = vld [vmem:[%s5219_s1 + $0x3d0] ss:$8 sps:$4 sm:$0xff]  }
  0xcd   : > { %2624 = vmatpush1.bf16.msra.mxu0 %v4068_v58  ;;  %1533 = vmatprep.subr.bf16.mxu1 %v4073_v59  ;;  %v4145_v58 = vld [vmem:[%s5219_s1 + $0x7e4] ss:$8 sps:$4 sm:$0xff]   ;;  %v376_v11 = vld [vmem:[%s4359_s4 + $0x118] sm:$0xff] }
  0xce   : > { %2625 = vmatprep.subr.bf16.mxu0 %v4076_v60  ;;  %v4148_v59 = vld [vmem:[%s5219_s1 + $0x3e4] ss:$8 sps:$4 sm:$0xff]   ;;  %v4143_v60 = vld [vmem:[%s5219_s1 + $0x7e0] ss:$8 sps:$4 sm:$0xff]  }
  0xcf   : > { %1499 = vmatmul.mubr.bf16.gmra.mrb[4].mxu1 %v3302_v61 }
  0xd0   : > { %2591 = vmatmul.mubr.bf16.gmra.mrb[4].mxu0 %v3294_v48  ;;  %1534 = vmatpush1.bf16.msra.mxu1 %v4071_v0  ;;  %v4125_v48 = vld [vmem:[%s5219_s1 + $0x7b0] ss:$8 sps:$4 sm:$0xff]  }
  0xd1   : > { %2626 = vmatpush1.bf16.msra.mxu0 %v4074_v1  ;;  %1535 = vmatprep.subr.bf16.mxu1 %v4079_v2  ;;  %v4149_v0 = vld [vmem:[%s5219_s1 + $0x7f0] ss:$8 sps:$4 sm:$0xff]  }
  0xd2   : > { %2627 = vmatprep.subr.bf16.mxu0 %v4082_v3  ;;  %1508 = vmatprep.mubr.bf16.mxu1 %v3311_v4  ;;  %v4152_v1 = vld [vmem:[%s5219_s1 + $0x3f0] ss:$8 sps:$4 sm:$0xff]  }
  0xd3   : > { %2600 = vmatprep.mubr.bf16.mxu0 %v3303_v56  ;;  %v4137_v56 = vld [vmem:[%s5219_s1 + $0x7d0] ss:$8 sps:$4 sm:$0xff]  }
  0xd4   : > { %1536 = vmatpush1.bf16.msra.mxu1 %v4077_v5  ;;  %v360_v2 = vld [vmem:[%s4359_s4 + $0x98] sm:$0xff]  ;;  %v3456_v5 = vcombine.low %v4960_v24, %v4963_v25 }
  0xd5   : > { %2628 = vmatpush1.bf16.msra.mxu0 %v4080_v6  ;;  %1537 = vmatprep.subr.bf16.mxu1 %v4085_v7  ;;  %v364_v3 = vld [vmem:[%s4359_s4 + $0xb8] sm:$0xff] }
  0xd6   : > { %2629 = vmatprep.subr.bf16.mxu0 %v4088_v8  ;;  %v3305_v6 = vcombine.high %v360_v2, %v364_v3  ;;  %v368_v7 = vld [vmem:[%s4359_s4 + $0xd8] sm:$0xff] }
  0xd7   : > { %1509 = vmatmul.mubr.bf16.gmra.mrb[8].mxu1 %v3310_v9  ;;  %v372_v8 = vld [vmem:[%s4359_s4 + $0xf8] sm:$0xff] }
  0xd8   : > { %2601 = vmatmul.mubr.bf16.gmra.mrb[8].mxu0 %v3302_v61  ;;  %1538 = vmatpush1.bf16.msra.mxu1 %v4083_v12  ;;  %v4146_v61 = vld [vmem:[%s5219_s1 + $0x3e0] ss:$8 sps:$4 sm:$0xff]   ;;  %v3313_v10 = vcombine.high %v368_v7, %v372_v8  ;;  %v380_v12 = vld [vmem:[%s4359_s4 + $0x138] sm:$0xff]  ;;  %s3624_s4 = sshll.u32 %s5228_s9, 6 }
  0xd9   : > { %2630 = vmatpush1.bf16.msra.mxu0 %v4086_v13  ;;  %1539 = vmatprep.subr.bf16.mxu1 %v4091_v14  ;;  %v3312_v13 = vcombine.low %v368_v7, %v372_v8  ;;  %v3321_v14 = vcombine.high %v376_v11, %v380_v12  ;;  %s187_s21 = scalar_lea.vmem %s5220_s2, %s3624_s4 }
  0xda   : > { %2631 = vmatprep.subr.bf16.mxu0 %v4094_v15  ;;  %1518 = vmatprep.mubr.bf16.mxu1 %v3319_v16  ;;  %v3320_v15 = vcombine.low %v376_v11, %v380_v12  ;;  %v2694_v16 = vlaneseq }
  0xdb   : > { %2610 = vmatprep.mubr.bf16.mxu0 %v3311_v4  ;;  %v3296_v4 = vcombine.low %v4954_v21, %v4957_v23 }
  0xdc   : > { %1540 = vmatpush1.bf16.msra.mxu1 %v4089_v17  ;;  %v2695_v17 = vshrl.u32 %v2694_v16, 7 }
  0xdd   : > { %2632 = vmatpush1.bf16.msra.mxu0 %v4092_v18  ;;  %1541 = vmatprep.subr.bf16.mxu1 %v4097_v19 }
  0xde   : > { %2633 = vmatprep.subr.bf16.mxu0 %v4100_v20  ;;  %v2707_v18 = vand.u32 15, %v2695_v17  ;;  %v2697_v19 = vadd.s32 16, %v2695_v17 }
  0xdf   : > { %1519 = vmatmul.mubr.bf16.gmra.mrb[12].mxu1 %v3318_v22  ;;  %v4183_v22 = vmov 0.0  }
  0xe0   : > { %2611 = vmatmul.mubr.bf16.gmra.mrb[12].mxu0 %v3310_v9  ;;  %1542 = vmatpush1.bf16.msra.mxu1 %v4095_v26  ;;  %v3304_v9 = vcombine.low %v360_v2, %v364_v3  ;;  %vm2799_vm0 = vcmp.lt.s32.totalorder %v2707_v18, 4  ;;  %v2721_v24 = vand.u32 15, %v2697_v19 }
  0xe1   : > { %2634 = vmatpush1.bf16.msra.mxu0 %v4098_v27  ;;  %1543 = vmatprep.subr.bf16.mxu1 %v4103_v28  ;;  %v3610_v23 = vsel %vm2799_vm0, 1.0, %v4183_v22 }
  0xe2   : > { %2635 = vmatprep.subr.bf16.mxu0 %v4106_v29  ;;  %1561 = vmatprep.mubr.bf16.mxu1 %v4979_v30  ;;  %vm2801_vm1 = vcmp.lt.s32.totalorder %v2721_v24, 4 }
  0xe3   : > { %2653 = vmatprep.mubr.bf16.mxu0 %v3457_v31 }
  0xe4   : > { %1544 = vmatpush1.bf16.msra.mxu1 %v4101_v32 }
  0xe5   : > { %2636 = vmatpush1.bf16.msra.mxu0 %v4104_v33  ;;  %1545 = vmatprep.subr.bf16.mxu1 %v4109_v34 }
  0xe6   : > { %2637 = vmatprep.subr.bf16.mxu0 %v4112_v35 }
  0xe8   : > { %1546 = vmatpush1.bf16.msra.mxu1 %v4107_v36 }
  0xe9   : > { %2638 = vmatpush1.bf16.msra.mxu0 %v4110_v37  ;;  %1547 = vmatprep.subr.bf16.mxu1 %v4115_v38  ;;  %v2699_v37 = vadd.s32 32, %v2695_v17 }
  0xea   : > { %2639 = vmatprep.subr.bf16.mxu0 %v4118_v39 }
  0xec   : > { %1548 = vmatpush1.bf16.msra.mxu1 %v4113_v40 }
  0xed   : > { %2640 = vmatpush1.bf16.msra.mxu0 %v4116_v41  ;;  %1549 = vmatprep.subr.bf16.mxu1 %v4121_v42 }
  0xee   : > { %2641 = vmatprep.subr.bf16.mxu0 %v4124_v43  ;;  %v3611_v43 = vsel %vm2801_vm1, 1.0, %v4183_v22 }
  0xf0   : > { %1550 = vmatpush1.bf16.msra.mxu1 %v4119_v44 }
  0xf1   : > { %2642 = vmatpush1.bf16.msra.mxu0 %v4122_v45  ;;  %1551 = vmatprep.subr.bf16.mxu1 %v4127_v46 }
  0xf2   : > { %2643 = vmatprep.subr.bf16.mxu0 %v4130_v47 }
  0xf4   : > { %1552 = vmatpush1.bf16.msra.mxu1 %v4125_v48 }
  0xf5   : > { %2644 = vmatpush1.bf16.msra.mxu0 %v4128_v49  ;;  %1553 = vmatprep.subr.bf16.mxu1 %v4133_v50  ;;  %v2735_v49 = vand.u32 15, %v2699_v37 }
  0xf6   : > { %2645 = vmatprep.subr.bf16.mxu0 %v4136_v51 }
  0xf7   : > { %vm5125_vm2 = vcmp.lt.s32.totalorder %v2735_v49, 4 }
  0xf8   : > { %1554 = vmatpush1.bf16.msra.mxu1 %v4131_v52  ;;  %v3612_v16 = vsel %vm5125_vm2, 1.0, %v4183_v22 }
  0xf9   : > { %2646 = vmatpush1.bf16.msra.mxu0 %v4134_v53  ;;  %1555 = vmatprep.subr.bf16.mxu1 %v4139_v54 }
  0xfa   : > { %2647 = vmatprep.subr.bf16.mxu0 %v4142_v55 }
  0xfc   : > { %1556 = vmatpush1.bf16.msra.mxu1 %v4137_v56 }
  0xfd   : > { %2648 = vmatpush1.bf16.msra.mxu0 %v4140_v57  ;;  %1557 = vmatprep.subr.bf16.mxu1 %v4145_v58 }
  0xfe   : > { %2649 = vmatprep.subr.bf16.mxu0 %v4148_v59 }
 0x100   : > { %1558 = vmatpush1.bf16.msra.mxu1 %v4143_v60 }
 0x101   : > { %2650 = vmatpush1.bf16.msra.mxu0 %v4146_v61  ;;  %1559 = vmatprep.subr.bf16.mxu1 %v4151_v62 }
 0x102   : > { %2651 = vmatprep.subr.bf16.mxu0 %v4154_v63 }
 0x104   : > { %1560 = vmatpush1.bf16.msra.mxu1 %v4149_v0 }
 0x105   : > { %2652 = vmatpush1.bf16.msra.mxu0 %v4152_v1 }
 0x107   : > { %1562 = vmatmul.mubr.bf16.vlgmr.msra.gmra.mrb[0].mxu1 %v3296_v4 }
 0x108   : > { %2654 = vmatmul.mubr.bf16.vlgmr.msra.gmra.mrb[0].mxu0 %v3456_v5  ;;  %1571 = vmatprep.mubr.bf16.mxu1 %v3305_v6 }
 0x109   : > { %2663 = vmatprep.mubr.bf16.mxu0 %v4979_v30 }
 0x10f   : > { %1572 = vmatmul.mubr.bf16.gmra.mrb[4].mxu1 %v3304_v9 }
 0x110   : > { %2664 = vmatmul.mubr.bf16.gmra.mrb[4].mxu0 %v3296_v4  ;;  %1581 = vmatprep.mubr.bf16.mxu1 %v3313_v10  ;;  %v2701_v4 = vadd.s32 48, %v2695_v17 }
 0x111   : > { %2673 = vmatprep.mubr.bf16.mxu0 %v3305_v6 }
 0x117   : > { %1582 = vmatmul.mubr.bf16.gmra.mrb[8].mxu1 %v3312_v13 }
 0x118   : > { %2674 = vmatmul.mubr.bf16.gmra.mrb[8].mxu0 %v3304_v9  ;;  %1591 = vmatprep.mubr.bf16.mxu1 %v3321_v14 }
 0x119   : > { %2683 = vmatprep.mubr.bf16.mxu0 %v3313_v10 }
 0x11f   : > { %1592 = vmatmul.mubr.bf16.gmra.mrb[12].mxu1 %v3320_v15 }
 0x120   : > { %2684 = vmatmul.mubr.bf16.gmra.mrb[12].mxu0 %v3312_v13 }
 0x1da   : > { %v1563_v20 = vpop.f32.mrb[0].mxu1 }
 0x1db   : > { %v2655_v21 = vpop.f32.mrb[0].mxu0  ;;  %v1565_v26 = vpop.f32.mrb[1].mxu1 }
 0x1dc   : > { %v5098_v25 = vadd.f32 %v2655_v21, %v1563_v20  ;;  %v2657_v27 = vpop.f32.mrb[1].mxu0  ;;  %v1567_v29 = vpop.f32.mrb[2].mxu1  ;;  %v2749_v21 = vand.u32 15, %v2701_v4 }
 0x1dd   : > { %v5100_v28 = vadd.f32 %v2657_v27, %v1565_v26  ;;  %v2659_v30 = vpop.f32.mrb[2].mxu0  ;;  %v1569_v33 = vpop.f32.mrb[3].mxu1 }
 0x1de   : > { %v2823_v31 = vmul.f32 %v5098_v25, %v3610_v23  ;;  %v5103_v32 = vadd.f32 %v2659_v30, %v1567_v29  ;;  %v2661_v34 = vpop.f32.mrb[3].mxu0  ;;  %vm2805_vm3 = vcmp.lt.s32.totalorder %v2749_v21, 4 }
 0x1df   : > { %v2824_v35 = vmul.f32 %v5100_v28, %v3610_v23  ;;  %v5106_v36 = vadd.f32 %v2661_v34, %v1569_v33 }
 0x1e0   : > { %v2825_v38 = vmul.f32 0.0, %v5103_v32  ;;  %v2867_v40 = vmul.f32 %v5098_v25, %v2823_v31 }
 0x1e1   : > { %v2826_v39 = vmul.f32 0.0, %v5106_v36  ;;  %v2868_v44 = vmul.f32 %v5100_v28, %v2824_v35 }
 0x1e2   : > { %v2839_v41 = vadd.f32 %v2825_v38, %v2823_v31  ;;  %v2869_v42 = vmul.f32 %v5103_v32, %v2825_v38  ;;  %v1573_v47 = vpop.f32.mrb[4].mxu1 }
 0x1e3   : > { %v2852_v45 = vadd.f32 %v2826_v39, %v2824_v35  ;;  %v2870_v46 = vmul.f32 %v5106_v36, %v2826_v39  ;;  %v2665_v48 = vpop.f32.mrb[4].mxu0  ;;  %v1575_v52 = vpop.f32.mrb[5].mxu1 }
 0x1e4   : > { %v2883_v50 = vadd.f32 %v2869_v42, %v2867_v40  ;;  %v5115_v51 = vadd.f32 %v2665_v48, %v1573_v47  ;;  %v2667_v53 = vpop.f32.mrb[5].mxu0  ;;  %v1577_v56 = vpop.f32.mrb[6].mxu1 }
 0x1e5   : > { %v2896_v54 = vadd.f32 %v2870_v46, %v2868_v44  ;;  %v5117_v55 = vadd.f32 %v2667_v53, %v1575_v52  ;;  %v2669_v57 = vpop.f32.mrb[6].mxu0  ;;  %v1579_v60 = vpop.f32.mrb[7].mxu1  ;;  %v3613_v52 = vsel %vm2805_vm3, 1.0, %v4183_v22 }
 0x1e6   : > { %v2827_v58 = vmul.f32 %v5115_v51, %v3611_v43  ;;  %v5120_v59 = vadd.f32 %v2669_v57, %v1577_v56  ;;  %v2671_v61 = vpop.f32.mrb[7].mxu0 }
 0x1e7   : > { %v2828_v62 = vmul.f32 %v5117_v55, %v3611_v43  ;;  %v5123_v63 = vadd.f32 %v2671_v61, %v1579_v60 }
 0x1e8   : > { %v2840_v1 = vadd.f32 %v2839_v41, %v2827_v58  ;;  %v2871_v2 = vmul.f32 %v5115_v51, %v2827_v58  ;;  %v2829_v3 = vmul.f32 0.0, %v5120_v59 }
 0x1e9   : > { %v2853_v5 = vadd.f32 %v2852_v45, %v2828_v62  ;;  %v2872_v6 = vmul.f32 %v5117_v55, %v2828_v62  ;;  %v2830_v7 = vmul.f32 0.0, %v5123_v63 }
 0x1ea   : > { %v2884_v8 = vadd.f32 %v2883_v50, %v2871_v2  ;;  %v2841_v9 = vadd.f32 %v2840_v1, %v2829_v3  ;;  %v2873_v10 = vmul.f32 %v5120_v59, %v2829_v3  ;;  %v1583_v14 = vpop.f32.mrb[8].mxu1 }
 0x1eb   : > { %v2897_v11 = vadd.f32 %v2896_v54, %v2872_v6  ;;  %v2854_v12 = vadd.f32 %v2853_v5, %v2830_v7  ;;  %v2874_v13 = vmul.f32 %v5123_v63, %v2830_v7  ;;  %v2675_v15 = vpop.f32.mrb[8].mxu0  ;;  %v1585_v19 = vpop.f32.mrb[9].mxu1 }
 0x1ec   : > { %v2885_v17 = vadd.f32 %v2884_v8, %v2873_v10  ;;  %v5138_v18 = vadd.f32 %v2675_v15, %v1583_v14  ;;  %v2677_v20 = vpop.f32.mrb[9].mxu0  ;;  %v1587_v26 = vpop.f32.mrb[10].mxu1 }
 0x1ed   : > { %v2898_v23 = vadd.f32 %v2897_v11, %v2874_v13  ;;  %v5140_v24 = vadd.f32 %v2677_v20, %v1585_v19  ;;  %v2679_v27 = vpop.f32.mrb[10].mxu0  ;;  %v1589_v31 = vpop.f32.mrb[11].mxu1 }
 0x1ee   : > { %v2831_v29 = vmul.f32 %v5138_v18, %v3612_v16  ;;  %v5143_v30 = vadd.f32 %v2679_v27, %v1587_v26  ;;  %v2681_v33 = vpop.f32.mrb[11].mxu0 }
 0x1ef   : > { %v2832_v34 = vmul.f32 %v5140_v24, %v3612_v16  ;;  %v5146_v35 = vadd.f32 %v2681_v33, %v1589_v31 }
 0x1f0   : > { %v2842_v37 = vadd.f32 %v2841_v9, %v2831_v29  ;;  %v2875_v38 = vmul.f32 %v5138_v18, %v2831_v29  ;;  %v2833_v39 = vmul.f32 0.0, %v5143_v30 }
 0x1f1   : > { %v2855_v40 = vadd.f32 %v2854_v12, %v2832_v34  ;;  %v2876_v41 = vmul.f32 %v5140_v24, %v2832_v34  ;;  %v2834_v42 = vmul.f32 0.0, %v5146_v35 }
 0x1f2   : > { %v2886_v43 = vadd.f32 %v2885_v17, %v2875_v38  ;;  %v2843_v44 = vadd.f32 %v2842_v37, %v2833_v39  ;;  %v2877_v45 = vmul.f32 %v5143_v30, %v2833_v39  ;;  %v1593_v49 = vpop.f32.mrb[12].mxu1 }
 0x1f3   : > { %v2899_v46 = vadd.f32 %v2898_v23, %v2876_v41  ;;  %v2856_v47 = vadd.f32 %v2855_v40, %v2834_v42  ;;  %v2878_v48 = vmul.f32 %v5146_v35, %v2834_v42  ;;  %v2685_v50 = vpop.f32.mrb[12].mxu0  ;;  %v1595_v56 = vpop.f32.mrb[13].mxu1 }
 0x1f4   : > { %v2887_v53 = vadd.f32 %v2886_v43, %v2877_v45  ;;  %v5155_v54 = vadd.f32 %v2685_v50, %v1593_v49  ;;  %v2687_v57 = vpop.f32.mrb[13].mxu0  ;;  %v1597_v61 = vpop.f32.mrb[14].mxu1 }
 0x1f5   : > { %v2900_v58 = vadd.f32 %v2899_v46, %v2878_v48  ;;  %v5157_v60 = vadd.f32 %v2687_v57, %v1595_v56  ;;  %v2689_v62 = vpop.f32.mrb[14].mxu0  ;;  %v1599_v2 = vpop.f32.mrb[15].mxu1 }
 0x1f6   : > { %v2835_v0 = vmul.f32 %v5155_v54, %v3613_v52  ;;  %v5160_v1 = vadd.f32 %v2689_v62, %v1597_v61  ;;  %v2691_v3 = vpop.f32.mrb[15].mxu0 }
 0x1f7   : > { %v2836_v4 = vmul.f32 %v5157_v60, %v3613_v52  ;;  %v5163_v5 = vadd.f32 %v2691_v3, %v1599_v2 }
 0x1f8   : > { %v2844_v22 = vadd.f32 %v2843_v44, %v2835_v0  ;;  %v2879_v6 = vmul.f32 %v5155_v54, %v2835_v0  ;;  %v2837_v7 = vmul.f32 0.0, %v5160_v1 }
 0x1f9   : > { %v2857_v8 = vadd.f32 %v2856_v47, %v2836_v4  ;;  %v2880_v9 = vmul.f32 %v5157_v60, %v2836_v4  ;;  %v2838_v10 = vmul.f32 0.0, %v5163_v5 }
 0x1fa   : > { %v2888_v11 = vadd.f32 %v2887_v53, %v2879_v6  ;;  %v2845_v12 = vadd.f32 %v2844_v22, %v2837_v7  ;;  %v2881_v13 = vmul.f32 %v5160_v1, %v2837_v7 }
 0x1fb   : > { %v2901_v14 = vadd.f32 %v2900_v58, %v2880_v9  ;;  %v2858_v15 = vadd.f32 %v2857_v8, %v2838_v10  ;;  %v2882_v16 = vmul.f32 %v5163_v5, %v2838_v10 }
 0x1fc   : > { %v2846_v17 = vrot.slane %v2845_v12, 4  ;;  %v2889_v19 = vadd.f32 %v2888_v11, %v2881_v13 }
 0x1fd   : > { %v2859_v20 = vrot.slane %v2858_v15, 4  ;;  %v2902_v21 = vadd.f32 %v2901_v14, %v2882_v16 }
 0x1fe   : > { %v2847_v23 = vadd.f32 %v2846_v17, %v2845_v12  ;;  %v2890_v26 = vrot.slane %v2889_v19, 4 }
 0x1ff   : > { %v2860_v27 = vadd.f32 %v2859_v20, %v2858_v15  ;;  %v2903_v29 = vrot.slane %v2902_v21, 4 }
 0x200   : > { %v2848_v31 = vrot.slane %v2847_v23, 2  ;;  %v2891_v33 = vadd.f32 %v2890_v26, %v2889_v19 }
 0x201   : > { %v2861_v34 = vrot.slane %v2860_v27, 2  ;;  %v2904_v37 = vadd.f32 %v2903_v29, %v2902_v21 }
 0x202   : > { %v2849_v38 = vadd.f32 %v2848_v31, %v2847_v23  ;;  %v2892_v39 = vrot.slane %v2891_v33, 2 }
 0x203   : > { %v2862_v40 = vadd.f32 %v2861_v34, %v2860_v27  ;;  %v2905_v41 = vrot.slane %v2904_v37, 2 }
 0x204   : > { %v2850_v42 = vrot.slane %v2849_v38, 1  ;;  %v2893_v43 = vadd.f32 %v2892_v39, %v2891_v33 }
 0x205   : > { %v2863_v44 = vrot.slane %v2862_v40, 1  ;;  %v2906_v45 = vadd.f32 %v2905_v41, %v2904_v37 }
 0x206   : > { %v2851_v46 = vadd.f32 %v2850_v42, %v2849_v38  ;;  %v2894_v47 = vrot.slane %v2893_v43, 1 }
 0x207   : > { %v2864_v48 = vadd.f32 %v2863_v44, %v2862_v40  ;;  %v2907_v49 = vrot.slane %v2906_v45, 1 }
 0x208   : > { %v2865_v50 = vmul.f32 0.0625, %v2851_v46  ;;  %v2895_v52 = vadd.f32 %v2894_v47, %v2893_v43 }
 0x209   : > { %v2866_v53 = vmul.f32 0.0625, %v2864_v48  ;;  %v2908_v56 = vadd.f32 %v2907_v49, %v2906_v45 }
 0x20a   : > { %v2909_v57 = vmul.f32 0.0625, %v2895_v52  ;;  %v2911_v58 = vmul.f32 %v2865_v50, %v2865_v50  ;;  %v2917_v61 = vsub.f32 %v5098_v25, %v2865_v50  ;;  %v2919_v62 = vsub.f32 %v5103_v32, %v2865_v50 }
 0x20b   : > { %v2921_v0 = vsub.f32 %v5115_v51, %v2865_v50  ;;  %v2923_v2 = vsub.f32 %v5120_v59, %v2865_v50  ;;  %v2925_v3 = vsub.f32 %v5138_v18, %v2865_v50  ;;  %v2927_v4 = vsub.f32 %v5143_v30, %v2865_v50 }
 0x20c   : > { %v2913_v22 = vsub.f32 %v2909_v57, %v2911_v58  ;;  %v2929_v6 = vsub.f32 %v5155_v54, %v2865_v50  ;;  %v2931_v7 = vsub.f32 %v5160_v1, %v2865_v50  ;;  %v2910_v8 = vmul.f32 0.0625, %v2908_v56 }
 0x20d   : > { %v2912_v9 = vmul.f32 %v2866_v53, %v2866_v53  ;;  %v2918_v10 = vsub.f32 %v5100_v28, %v2866_v53  ;;  %v2920_v25 = vsub.f32 %v5106_v36, %v2866_v53  ;;  %v2922_v32 = vsub.f32 %v5117_v55, %v2866_v53 }
 0x20e   : > { %v2915_v51 = vmax.f32 %v2913_v22, 0.0  ;;  %v2924_v59 = vsub.f32 %v5123_v63, %v2866_v53  ;;  %v2926_v18 = vsub.f32 %v5140_v24, %v2866_v53  ;;  %v2928_v30 = vsub.f32 %v5146_v35, %v2866_v53 }
 0x20f   : > { %v2914_v11 = vsub.f32 %v2910_v8, %v2912_v9  ;;  %v2930_v54 = vsub.f32 %v5157_v60, %v2866_v53  ;;  %v2932_v1 = vsub.f32 %v5163_v5, %v2866_v53 }
 0x210   : > { %v2933_v12 = vadd.f32 1e-05, %v2915_v51 }
 0x211   : > { %v2916_v13 = vmax.f32 %v2914_v11, 0.0 }
 0x212   : > { %4155 = vrsqrt.f32 %v2933_v12 }
 0x213   : > { %v2934_v28 = vadd.f32 1e-05, %v2916_v13 }
 0x215   : > { %4157 = vrsqrt.f32 %v2934_v28 }
 0x21c   : > { %v4156_v36 = vpop.eup %4155 }
 0x21d   : > { %v2951_v14 = vmul.f32 %v4156_v36, %v2931_v7  ;;  %v2937_v55 = vmul.f32 %v4156_v36, %v2917_v61  ;;  %v2939_v15 = vmul.f32 %v4156_v36, %v2919_v62  ;;  %v2941_v16 = vmul.f32 %v4156_v36, %v2921_v0 }
 0x21e   : > { %v2943_v63 = vmul.f32 %v4156_v36, %v2923_v2  ;;  %v2945_v17 = vmul.f32 %v4156_v36, %v2925_v3  ;;  %v2947_v24 = vmul.f32 %v4156_v36, %v2927_v4  ;;  %v2949_v19 = vmul.f32 %v4156_v36, %v2929_v6 }
 0x21f   : > { %v4158_v35 = vpop.eup %4157  ;;  %vm2967_vm4 = vcmp.ge.f32.partialorder %v2951_v14, 0.0  ;;  %v2983_v20 = vmul.f32 0.2, %v2951_v14  ;;  %vm2953_vm5 = vcmp.ge.f32.partialorder %v2937_v55, 0.0  ;;  %vm2955_vm6 = vcmp.ge.f32.partialorder %v2939_v15, 0.0 }
 0x220   : > { %v2938_v60 = vmul.f32 %v4158_v35, %v2918_v10  ;;  %v2940_v5 = vmul.f32 %v4158_v35, %v2920_v25  ;;  %v2942_v21 = vmul.f32 %v4158_v35, %v2922_v32  ;;  %v2944_v23 = vmul.f32 %v4158_v35, %v2924_v59 }
 0x221   : > { %v2946_v26 = vmul.f32 %v4158_v35, %v2926_v18  ;;  %v2948_v27 = vmul.f32 %v4158_v35, %v2928_v30  ;;  %v2950_v29 = vmul.f32 %v4158_v35, %v2930_v54  ;;  %v2952_v31 = vmul.f32 %v4158_v35, %v2932_v1 }
 0x222   : > { %vm2954_vm7 = vcmp.ge.f32.partialorder %v2938_v60, 0.0  ;;  %vm2956_vm8 = vcmp.ge.f32.partialorder %v2940_v5, 0.0  ;;  %vm2957_vm9 = vcmp.ge.f32.partialorder %v2941_v16, 0.0  ;;  %vm2958_vm10 = vcmp.ge.f32.partialorder %v2942_v21, 0.0 }
 0x223   : > { %vm2959_vm11 = vcmp.ge.f32.partialorder %v2943_v63, 0.0  ;;  %vm2960_vm12 = vcmp.ge.f32.partialorder %v2944_v23, 0.0  ;;  %vm2961_vm13 = vcmp.ge.f32.partialorder %v2945_v17, 0.0  ;;  %vm2962_vm14 = vcmp.ge.f32.partialorder %v2946_v26, 0.0 }
 0x224   : > { %vm2963_vm15 = vcmp.ge.f32.partialorder %v2947_v24, 0.0  ;;  %vm2964_vm0 = vcmp.ge.f32.partialorder %v2948_v27, 0.0  ;;  %vm2965_vm1 = vcmp.ge.f32.partialorder %v2949_v19, 0.0  ;;  %vm2966_vm2 = vcmp.ge.f32.partialorder %v2950_v29, 0.0 }
 0x225   : > { %vm2968_vm3 = vcmp.ge.f32.partialorder %v2952_v31, 0.0  ;;  %v2969_v33 = vmul.f32 0.2, %v2937_v55  ;;  %v2970_v34 = vmul.f32 0.2, %v2938_v60  ;;  %v2999_v37 = vsel %vm2967_vm4, %v2951_v14, %v2983_v20 }
 0x226   : > { %v2971_v38 = vmul.f32 0.2, %v2939_v15  ;;  %v2972_v39 = vmul.f32 0.2, %v2940_v5  ;;  %v2973_v40 = vmul.f32 0.2, %v2941_v16 }
 0x227   : > { %v2974_v41 = vmul.f32 0.2, %v2942_v21  ;;  %v2975_v42 = vmul.f32 0.2, %v2943_v63  ;;  %v2976_v43 = vmul.f32 0.2, %v2944_v23  ;;  %v2985_v44 = vsel %vm2953_vm5, %v2937_v55, %v2969_v33 }
 0x228   : > { %v2977_v45 = vmul.f32 0.2, %v2945_v17  ;;  %v2978_v46 = vmul.f32 0.2, %v2946_v26  ;;  %v2979_v47 = vmul.f32 0.2, %v2947_v24  ;;  %v2986_v48 = vsel %vm2954_vm7, %v2938_v60, %v2970_v34 }
 0x229   : > { %v2980_v49 = vmul.f32 0.2, %v2948_v27  ;;  %v2981_v50 = vmul.f32 0.2, %v2949_v19  ;;  %v2982_v52 = vmul.f32 0.2, %v2950_v29  ;;  %v2987_v53 = vsel %vm2955_vm6, %v2939_v15, %v2971_v38 }
 0x22a   : > { %v2984_v56 = vmul.f32 0.2, %v2952_v31  ;;  %v2988_v57 = vsel %vm2956_vm8, %v2940_v5, %v2972_v39  ;;  %v2989_v58 = vsel %vm2957_vm9, %v2941_v16, %v2973_v40  ;;  %v2990_v61 = vsel %vm2958_vm10, %v2942_v21, %v2974_v41 }
 0x22b   : > { %v2991_v62 = vsel %vm2959_vm11, %v2943_v63, %v2975_v42  ;;  %v2992_v0 = vsel %vm2960_vm12, %v2944_v23, %v2976_v43  ;;  %v2993_v2 = vsel %vm2961_vm13, %v2945_v17, %v2977_v45  ;;  %v2994_v3 = vsel %vm2962_vm14, %v2946_v26, %v2978_v46 }
 0x22c   : > { %v2995_v4 = vsel %vm2963_vm15, %v2947_v24, %v2979_v47  ;;  %v2996_v22 = vsel %vm2964_vm0, %v2948_v27, %v2980_v49  ;;  %v2997_v6 = vsel %vm2965_vm1, %v2949_v19, %v2981_v50  ;;  %v2998_v7 = vsel %vm2966_vm2, %v2950_v29, %v2982_v52 }
 0x22d   : > { %v3000_v8 = vsel %vm2968_vm3, %v2952_v31, %v2984_v56  ;;  %v3625_v9 = vpack.c.bf16 %v2986_v48, %v2985_v44  ;;  %v3626_v10 = vpack.c.bf16 %v2988_v57, %v2987_v53  ;;  %v3627_v25 = vpack.c.bf16 %v2990_v61, %v2989_v58 }
 0x22e   : > { %v3628_v32 = vpack.c.bf16 %v2992_v0, %v2991_v62  ;;  %v3629_v51 = vpack.c.bf16 %v2994_v3, %v2993_v2  ;;  %v3630_v59 = vpack.c.bf16 %v2996_v22, %v2995_v4  ;;  %v3631_v18 = vpack.c.bf16 %v2998_v7, %v2997_v6 }
 0x22f   : > { %v3632_v30 = vpack.c.bf16 %v3000_v8, %v2999_v37  ;;  %3049 = vst [vmem:[%s187_s21] sm:$0xff] %v3625_v9  ;;  %3050 = vst [vmem:[%s187_s21 + $0x8] sm:$0xff] %v3626_v10 }
 0x230   : > { %3051 = vst [vmem:[%s187_s21 + $0x10] sm:$0xff] %v3627_v25  ;;  %3052 = vst [vmem:[%s187_s21 + $0x18] sm:$0xff] %v3628_v32 }
 0x231   : > { %3053 = vst [vmem:[%s187_s21 + $0x20] sm:$0xff] %v3629_v51  ;;  %3054 = vst [vmem:[%s187_s21 + $0x28] sm:$0xff] %v3630_v59 }
 0x232   : > { %3055 = vst [vmem:[%s187_s21 + $0x30] sm:$0xff] %v3631_v18  ;;  %3056 = vst [vmem:[%s187_s21 + $0x38] sm:$0xff] %v3632_v30 }
 0x233 PF: > { %s12_s11 = sadd.s32 1, %s4181_s11   ;;  %s5223_s9 = smov %s4177_s10 }
 0x234   : > { %p9_p5 = scmp.ge.s32.totalorder %s12_s11, 4   ;;  %s5224_s10 = smov %s5226_s12 }
 0x236   :  { %11 = sbr.rel (!%p9_p5) target bundleno = 2 (0x2), region = 62 }

// kernel: reverse
= control target key start
LH: loop header
LB: loop body
LE: loop exit
PB: predicated region body
PF: predicated region fallthrough
CT: control target
= control target key end

     0   :  { %s607_s6 = smov 0   ;;  %s609_s7 = smov 0   ;;  %s657_s0 = inlined_call_operand.vmem [shape: f32[1,512,4,4], index: 0, kind: input, shape index: {}]   ;;  %s658_s1 = inlined_call_operand.vmem [shape: bf16[1,512,4,4], index: 1, kind: output, shape index: {}]  }
   0x1   :  { %s611_s8 = smov 0  }
   0x2 LB: > { %s465_s9 = sadd.s32 4294967295, %s586_s8   ;;  %s22_s10 = sadd.s32 1, %s582_s7  ;;  %s586_s8 = sphi %s611_s8, %s7_s8   ;;  %s582_s7 = sphi %s609_s7, %s660_s7   ;;  %s578_s6 = sphi %s607_s6, %s659_s6  }
   0x3   : > { %p23_p0 = scmp.ge.s32.totalorder %s22_s10, 4  ;;  %p467_p1 = scmp.ge.s32.totalorder %s586_s8, 4 }
   0x4   : > { %s49_s11 = sand.u32 (!%p467_p1), 1, %s586_s8   ;;  %s469_s12 = sshll.u32 (!%p467_p1), %s582_s7, 2 }
   0x5   : > { %s662_s10 = smov (%p23_p0, %s22_s10), 0  ;;  %47 = sbr.rel (%p467_p1) target bundleno = 22 (0x16), region = 16 }
   0x6   : > { %s468_s13 = sshll.u32 (!%p467_p1), %s49_s11, 5  ;;  %s68_s16 = scalar_lea.vmem (!%p467_p1), %s657_s0, %s469_s12  }
   0x7   : > { %s51_s17 = scalar_lea.vmem (!%p467_p1), [#allocation1], %s468_s13  ;;  %s592_s20 = smov (!%p467_p1), 0  }
   0x8   : > { %s70_s18 = scalar_lea.vmem (!%p467_p1), %s51_s17, 4 [#allocation1]  }
   0x9   : > { %s588_s19 = smov (!%p467_p1), %s70_s18  }
   0xc LB: >> { %v89_v0 = vld [vmem:[%s68_s16] sm:$0xf]  ;;  %v91_v1 = vld [vmem:[%s68_s16 + $0x10] sm:$0xf]  ;;  %s83_s20 = sadd.s32 1, %s594_s20   ;;  %s594_s20 = sphi %s592_s20, %s83_s20   ;;  %s590_s19 = sphi %s588_s19, %s589_s19  }
   0xd   : >> { %v93_v2 = vld [vmem:[%s68_s16 + $0x20] sm:$0xf]  ;;  %90 = vst [vmem:[%s590_s19] sm:$0xf] %v89_v0  ;;  %92 = vst [vmem:[%s590_s19 + $0x8] sm:$0xf] %v91_v1  ;;  %p82_p2 = scmp.ge.s32.totalorder %s83_s20, 1 }
   0xe   : >> { %94 = vst [vmem:[%s590_s19 + $0x10] sm:$0xf] %v93_v2  ;;  %v95_v3 = vld [vmem:[%s68_s16 + $0x30] sm:$0xf] }
   0xf   : >> { %96 = vst [vmem:[%s590_s19 + $0x18] sm:$0xf] %v95_v3  ;;  %s589_s19 = smov %s70_s18   ;;  %85 = sbr.rel (!%p82_p2) target bundleno = 12 (0xc), region = 165 }
  0x16 PF: > { %p474_p3 = scmp.ge.s32.totalorder %s586_s8, 1  ;;  %p149_p4 = scmp.lt.s32.totalorder %s586_s8, 5 }
  0x18   : > { %p150_p5 = pnand %p474_p3, %p149_p4 }
  0x19   : > { %s636_s21 = sand.u32 (!%p150_p5), 1, %s465_s9   ;;  %v221_v10 = vlaneseq (!%p150_p5)  ;;  %v596_v31 = vmov (!%p150_p5), 0.0   ;;  %s488_s26 = sshll.u32 (!%p150_p5), %s578_s6, 1 }
  0x1a   : > { %153 = sbr.rel (%p150_p5) target bundleno = 63 (0x3f), region = 57  ;;  %s475_s22 = sshll.u32 (!%p150_p5), %s636_s21, 5 }
  0x1b   : > { %s162_s23 = scalar_lea.vmem (!%p150_p5), [#allocation1], %s475_s22  ;;  %v222_v13 = vshrl.u32 (!%p150_p5), %v221_v10, 7  ;;  %s476_s24 = sshll.u32 (!%p150_p5), %s636_s21, 3 }
  0x1c   : > { %v477_v4 = vld [vmem:[%s162_s23 + $0x1c] sm:$0xf] (!%p150_p5)  ;;  %v478_v5 = vld [vmem:[%s162_s23 + $0x18] sm:$0xf] (!%p150_p5)  ;;  %v479_v6 = vld [vmem:[%s162_s23 + $0x14] sm:$0xf] (!%p150_p5)  ;;  %s306_s29 = scalar_lea.vmem (!%p150_p5), %s658_s1, %s488_s26 }
  0x1d   : > { %173 = vst [vmem:[#allocation0 + $0x38] sm:$0xf] (!%p150_p5), %v477_v4  ;;  %178 = vst [vmem:[#allocation0 + $0x30] sm:$0xf] (!%p150_p5), %v478_v5  ;;  %v480_v7 = vld [vmem:[%s162_s23 + $0x10] sm:$0xf] (!%p150_p5) }
  0x1e   : > { %183 = vst [vmem:[#allocation0 + $0x28] sm:$0xf] (!%p150_p5), %v479_v6  ;;  %v481_v8 = vld [vmem:[%s162_s23 + $0xc] sm:$0xf] (!%p150_p5)  ;;  %v482_v9 = vld [vmem:[%s162_s23 + $0x8] sm:$0xf] (!%p150_p5) }
  0x1f   : > { %188 = vst [vmem:[#allocation0 + $0x20] sm:$0xf] (!%p150_p5), %v480_v7  ;;  %193 = vst [vmem:[#allocation0 + $0x18] sm:$0xf] (!%p150_p5), %v481_v8  ;;  %v483_v11 = vld [vmem:[%s162_s23 + $0x4] sm:$0xf] (!%p150_p5) }
  0x20   : > { %198 = vst [vmem:[#allocation0 + $0x10] sm:$0xf] (!%p150_p5), %v482_v9  ;;  %v203_v12 = vld [vmem:[%s162_s23] sm:$0xf] (!%p150_p5)  ;;  %202 = vst [vmem:[#allocation0 + $0x8] sm:$0xf] (!%p150_p5), %v483_v11 }
  0x21   : > { %204 = vst [vmem:[#allocation0] sm:$0xf] %v203_v12  ;;  %vm223_vm0 = vcmp.lt.s32.totalorder %v222_v13, 4  ;;  %s166_s25 = scalar_lea.vmem [#allocation3], %s476_s24 }
  0x24   : > { %v214_v14 = vld [vmem:[#allocation0 + $0x37] ss:$-1 sm:$0xff]  ;;  %v219_v15 = vld [vmem:[#allocation0 + $0x3f] ss:$-1 sm:$0xff] }
  0x25   : > { %v233_v16 = vld [vmem:[#allocation0 + $0x2f] ss:$-1 sm:$0xff]  ;;  %v215_v17 = vrot.slane %v214_v14, 4  ;;  %v220_v18 = vrot.slane %v219_v15, 4 }
  0x26   : > { %v228_v19 = vld [vmem:[#allocation0 + $0x27] ss:$-1 sm:$0xff]  ;;  %v234_v20 = vrot.slane %v233_v16, 4  ;;  %v247_v23 = vld [vmem:[#allocation0 + $0x1f] ss:$-1 sm:$0xff] }
  0x27   : > { %v229_v21 = vrot.slane %v228_v19, 4  ;;  %v242_v22 = vld [vmem:[#allocation0 + $0x17] ss:$-1 sm:$0xff]  ;;  %216 = vst [vmem:[#allocation2] sm:$0xff] %v215_v17  ;;  %v248_v25 = vrot.slane %v247_v23, 4 }
  0x28   : > { %v243_v24 = vrot.slane %v242_v22, 4  ;;  %v255_v26 = vld [vmem:[#allocation0 + $0x7] ss:$-1 sm:$0xff]  ;;  %v260_v27 = vld [vmem:[#allocation0 + $0xf] ss:$-1 sm:$0xff]  ;;  %224 = vst.msk [vmem:[#allocation2] sm:$0xff] %vm223_vm0, %v220_v18 }
  0x29   : > { %230 = vst [vmem:[#allocation2 + $0x8] sm:$0xff] %v229_v21  ;;  %v256_v28 = vrot.slane %v255_v26, 4  ;;  %v261_v29 = vrot.slane %v260_v27, 4 }
  0x2a   : > { %238 = vst.msk [vmem:[#allocation2 + $0x8] sm:$0xff] %vm223_vm0, %v234_v20  ;;  %244 = vst [vmem:[#allocation2 + $0x10] sm:$0xff] %v243_v24 }
  0x2b   : > { %252 = vst.msk [vmem:[#allocation2 + $0x10] sm:$0xff] %vm223_vm0, %v248_v25  ;;  %257 = vst [vmem:[#allocation2 + $0x18] sm:$0xff] %v256_v28 }
  0x2c   : > { %265 = vst.msk [vmem:[#allocation2 + $0x18] sm:$0xff] %vm223_vm0, %v261_v29 }
  0x2f   : > { %v270_v30 = vld [vmem:[#allocation2] sm:$0xf] }
  0x30   : > { %v271_v32 = vpack.c.bf16 %v596_v31, %v270_v30 }
  0x31   : > { %v275_v33 = vld [vmem:[#allocation2 + $0x8] sm:$0xf] }
  0x32   : > { %v276_v34 = vpack.c.bf16 %v596_v31, %v275_v33  ;;  %v281_v35 = vld [vmem:[#allocation2 + $0x10] sm:$0xf]  ;;  %273 = vst [vmem:[%s166_s25] sm:$0x3] %v271_v32 }
  0x33   : > { %v282_v36 = vpack.c.bf16 %v596_v31, %v281_v35  ;;  %v288_v37 = vld [vmem:[#allocation2 + $0x18] sm:$0xf] }
  0x34   : > { %484 = vst [vmem:[%s166_s25 + $0x2] sm:$0x3] %v276_v34  ;;  %v289_v38 = vpack.c.bf16 %v596_v31, %v288_v37 }
  0x35   : > { %485 = vst [vmem:[%s166_s25 + $0x4] sm:$0x3] %v282_v36 }
  0x36   : > { %486 = vst [vmem:[%s166_s25 + $0x6] sm:$0x3] %v289_v38 }
  0x39   : > { %v322_v39 = vld [vmem:[%s166_s25] sm:$0x3] }
  0x3a   : > { %323 = vst [vmem:[%s306_s29] sm:$0x3] %v322_v39 }
  0x3b   : > { %v324_v40 = vld [vmem:[%s166_s25 + $0x2] sm:$0x3] }
  0x3c   : > { %325 = vst [vmem:[%s306_s29 + $0x8] sm:$0x3] %v324_v40  ;;  %v326_v41 = vld [vmem:[%s166_s25 + $0x4] sm:$0x3] }
  0x3d   : > { %327 = vst [vmem:[%s306_s29 + $0x10] sm:$0x3] %v326_v41  ;;  %v328_v42 = vld [vmem:[%s166_s25 + $0x6] sm:$0x3] }
  0x3e   : > { %329 = vst [vmem:[%s306_s29 + $0x18] sm:$0x3] %v328_v42 }
  0x3f PF: > { %s7_s8 = sadd.s32 1, %s586_s8   ;;  %s659_s6 = smov %s582_s7 }
  0x40   : > { %p4_p6 = scmp.ge.s32.totalorder %s7_s8, 6   ;;  %s660_s7 = smov %s662_s10 }
  0x42   :  { %6 = sbr.rel (!%p4_p6) target bundleno = 2 (0x2), region = 176 }

// kernel: discriminator_forward.5
= control target key start
LH: loop header
LB: loop body
LE: loop exit
PB: predicated region body
PF: predicated region fallthrough
CT: control target
= control target key end

     0   :  { %s10906_s9 = smov 0   ;;  %s10908_s10 = smov 0   ;;  %s12804_s0 = inlined_call_operand.vmem [shape: bf16[2,48,2048], index: 0, kind: input, shape index: {}]   ;;  %s12805_s1 = inlined_call_operand.vmem [shape: bf16[2,2048,512], index: 1, kind: input, shape index: {}]   ;;  %s12806_s2 = inlined_call_operand.vmem [shape: bf16[2,32,512], index: 2, kind: output, shape index: {}]  }
   0x1   :  { %s10910_s11 = smov 0   ;;  %s10912_s12 = smov 0  }
   0x2   :  { %s10914_s13 = smov 0   ;;  %s10916_s14 = smov 0  }
   0x3   :  { %s10918_s15 = smov 0   ;;  %s10920_s16 = smov 0  }
   0x4   :  { %s10922_s17 = smov 0  }
   0x5 LB: > { %s8992_s18 = sadd.s32 4294967295, %s10888_s17   ;;  %s21_s19 = sadd.s32 1, %s10880_s15  ;;  %s10888_s17 = sphi %s10922_s17, %s12_s17   ;;  %s10884_s16 = sphi %s10920_s16, %s12815_s16   ;;  %s10880_s15 = sphi %s10918_s15, %s12814_s15   ;;  %s10876_s14 = sphi %s10916_s14, %s12813_s14   ;;  %s10872_s13 = sphi %s10914_s13, %s12812_s13   ;;  %s10868_s12 = sphi %s10912_s12, %s12811_s12   ;;  %s10864_s11 = sphi %s10910_s11, %s12810_s11   ;;  %s10860_s10 = sphi %s10908_s10, %s12809_s10   ;;  %s10856_s9 = sphi %s10906_s9, %s12808_s9  }
   0x6   : > { %p22_p0 = scmp.ge.s32.totalorder %s21_s19, 2  ;;  %s24_s20 = sadd.s32 1, %s10884_s16 }
   0x7   : > { %s57_s21 = sadd.s32 1, %s10868_s12  ;;  %p64_p1 = scmp.ne.s32.totalorder %s10868_s12, %s10864_s11 }
   0x8   : > { %s12817_s19 = smov (%p22_p0, %s21_s19), 0  ;;  %s12819_s20 = smov (!%p22_p0, %s24_s20), %s10884_s16 }
   0x9   : > { %s54_s22 = ssub.s32 %s10880_s15, %s12817_s19  ;;  %p65_p2 = scmp.eq.s32.totalorder %s10888_s17, 0 }
   0xa   : > { %p26_p3 = scmp.ge.s32.totalorder %s12819_s20, 2  ;;  %p55_p4 = scmp.eq.s32.totalorder %s54_s22, 0 }
   0xb   : > { %p66_p5 = por %p65_p2, %p64_p1  ;;  %s85_s23 = sadd.s32 1, %s10860_s10 }
   0xc   : > { %s12821_s20 = smov (%p26_p3, %s12819_s20), 0  ;;  %p95_p6 = scmp.ne.s32.totalorder %s10860_s10, %s10856_s9 }
   0xd   : > { %s10967_s24 = scalar_select %p55_p4, %s10868_s12, %s57_s21  }
   0xe   : > { %s80_s25 = ssub.s32 %s10884_s16, %s12821_s20  ;;  %p96_p7 = scmp.eq.s32.totalorder %s8992_s18, 3 }
   0xf   : > { %s82_s26 = sor.u32 %s80_s25, %s54_s22  ;;  %p8995_p10 = scmp.ge.s32.totalorder %s10888_s17, 4 }
  0x10   : > { %p83_p8 = scmp.eq.s32.totalorder %s82_s26, 0  ;;  %p10973_p9 = por %p96_p7, %p95_p6 }
  0x11   : > { %118 = sbr.rel (%p8995_p10) target bundleno = 284 (0x11c), region = 16 }
  0x12   : > { %s10978_s28 = scalar_select %p83_p8, %s10860_s10, %s85_s23  }
  0x18   : > { %129 = sbr.rel (!%p66_p5) target bundleno = 284 (0x11c), region = 24  ;;  %s131_s29 = sand.u32 (%p66_p5), 1, %s10868_s12  }
  0x19   : > { %s9847_s30 = sshll.u32 (%p66_p5), %s10880_s15, 3  ;;  %s8996_s3 = sshll.u32 (%p66_p5), %s131_s29, 12 }
  0x1a   : > { %s10986_s6 = scalar_lea.vmem (%p66_p5), %s12805_s1, %s9847_s30  ;;  %s10991_s7 = scalar_lea.vmem (%p66_p5), [#allocation2], %s8996_s3 }
  0x1b   : > { %v1189_v0 = vld [vmem:[%s10986_s6] sm:$0xff] (%p66_p5)  ;;  %v1191_v1 = vld [vmem:[%s10986_s6 + $0x10] sm:$0xff] (%p66_p5) }
  0x1c   : > { %v1193_v2 = vld [vmem:[%s10986_s6 + $0x20] sm:$0xff] (%p66_p5)  ;;  %1190 = vst [vmem:[%s10991_s7] sm:$0xff] (%p66_p5), %v1189_v0  ;;  %1192 = vst [vmem:[%s10991_s7 + $0x8] sm:$0xff] (%p66_p5), %v1191_v1  ;;  %v1195_v3 = vld [vmem:[%s10986_s6 + $0x30] sm:$0xff] (%p66_p5) }
  0x1d   : > { %1194 = vst [vmem:[%s10991_s7 + $0x10] sm:$0xff] (%p66_p5), %v1193_v2  ;;  %v1197_v4 = vld [vmem:[%s10986_s6 + $0x40] sm:$0xff] (%p66_p5)  ;;  %v1199_v5 = vld [vmem:[%s10986_s6 + $0x50] sm:$0xff] (%p66_p5)  ;;  %1196 = vst [vmem:[%s10991_s7 + $0x18] sm:$0xff] (%p66_p5), %v1195_v3 }
  0x1e   : > { %1198 = vst [vmem:[%s10991_s7 + $0x20] sm:$0xff] (%p66_p5), %v1197_v4  ;;  %1200 = vst [vmem:[%s10991_s7 + $0x28] sm:$0xff] (%p66_p5), %v1199_v5  ;;  %v1201_v6 = vld [vmem:[%s10986_s6 + $0x60] sm:$0xff] (%p66_p5)  ;;  %v1203_v7 = vld [vmem:[%s10986_s6 + $0x70] sm:$0xff] (%p66_p5) }
  0x1f   : > { %v1205_v8 = vld [vmem:[%s10986_s6 + $0x80] sm:$0xff]  ;;  %1202 = vst [vmem:[%s10991_s7 + $0x30] sm:$0xff] %v1201_v6  ;;  %1204 = vst [vmem:[%s10991_s7 + $0x38] sm:$0xff] %v1203_v7  ;;  %v1207_v9 = vld [vmem:[%s10986_s6 + $0x90] sm:$0xff] }
  0x20   : > { %1206 = vst [vmem:[%s10991_s7 + $0x40] sm:$0xff] %v1205_v8  ;;  %v1209_v10 = vld [vmem:[%s10986_s6 + $0xa0] sm:$0xff]  ;;  %v1211_v11 = vld [vmem:[%s10986_s6 + $0xb0] sm:$0xff]  ;;  %1208 = vst [vmem:[%s10991_s7 + $0x48] sm:$0xff] %v1207_v9 }
  0x21   : > { %1210 = vst [vmem:[%s10991_s7 + $0x50] sm:$0xff] %v1209_v10  ;;  %1212 = vst [vmem:[%s10991_s7 + $0x58] sm:$0xff] %v1211_v11  ;;  %v1213_v12 = vld [vmem:[%s10986_s6 + $0xc0] sm:$0xff]  ;;  %v1215_v13 = vld [vmem:[%s10986_s6 + $0xd0] sm:$0xff] }
  0x22   : > { %v1217_v14 = vld [vmem:[%s10986_s6 + $0xe0] sm:$0xff]  ;;  %1214 = vst [vmem:[%s10991_s7 + $0x60] sm:$0xff] %v1213_v12  ;;  %1216 = vst [vmem:[%s10991_s7 + $0x68] sm:$0xff] %v1215_v13  ;;  %v1219_v15 = vld [vmem:[%s10986_s6 + $0xf0] sm:$0xff] }
  0x23   : > { %1218 = vst [vmem:[%s10991_s7 + $0x70] sm:$0xff] %v1217_v14  ;;  %v1221_v16 = vld [vmem:[%s10986_s6 + $0x100] sm:$0xff]  ;;  %v1223_v17 = vld [vmem:[%s10986_s6 + $0x110] sm:$0xff]  ;;  %1220 = vst [vmem:[%s10991_s7 + $0x78] sm:$0xff] %v1219_v15 }
  0x24   : > { %1222 = vst [vmem:[%s10991_s7 + $0x80] sm:$0xff] %v1221_v16  ;;  %1224 = vst [vmem:[%s10991_s7 + $0x88] sm:$0xff] %v1223_v17  ;;  %v1225_v18 = vld [vmem:[%s10986_s6 + $0x120] sm:$0xff]  ;;  %v1227_v19 = vld [vmem:[%s10986_s6 + $0x130] sm:$0xff] }
  0x25   : > { %v1229_v20 = vld [vmem:[%s10986_s6 + $0x140] sm:$0xff]  ;;  %1226 = vst [vmem:[%s10991_s7 + $0x90] sm:$0xff] %v1225_v18  ;;  %1228 = vst [vmem:[%s10991_s7 + $0x98] sm:$0xff] %v1227_v19  ;;  %v1231_v21 = vld [vmem:[%s10986_s6 + $0x150] sm:$0xff] }
  0x26   : > { %1230 = vst [vmem:[%s10991_s7 + $0xa0] sm:$0xff] %v1229_v20  ;;  %v1233_v22 = vld [vmem:[%s10986_s6 + $0x160] sm:$0xff]  ;;  %v1235_v23 = vld [vmem:[%s10986_s6 + $0x170] sm:$0xff]  ;;  %1232 = vst [vmem:[%s10991_s7 + $0xa8] sm:$0xff] %v1231_v21 }
  0x27   : > { %1234 = vst [vmem:[%s10991_s7 + $0xb0] sm:$0xff] %v1233_v22  ;;  %1236 = vst [vmem:[%s10991_s7 + $0xb8] sm:$0xff] %v1235_v23  ;;  %v1237_v24 = vld [vmem:[%s10986_s6 + $0x180] sm:$0xff]  ;;  %v1239_v25 = vld [vmem:[%s10986_s6 + $0x190] sm:$0xff] }
  0x28   : > { %v1241_v26 = vld [vmem:[%s10986_s6 + $0x1a0] sm:$0xff]  ;;  %1238 = vst [vmem:[%s10991_s7 + $0xc0] sm:$0xff] %v1237_v24  ;;  %1240 = vst [vmem:[%s10991_s7 + $0xc8] sm:$0xff] %v1239_v25  ;;  %v1243_v27 = vld [vmem:[%s10986_s6 + $0x1b0] sm:$0xff] }
  0x29   : > { %1242 = vst [vmem:[%s10991_s7 + $0xd0] sm:$0xff] %v1241_v26  ;;  %v1245_v28 = vld [vmem:[%s10986_s6 + $0x1c0] sm:$0xff]  ;;  %v1247_v29 = vld [vmem:[%s10986_s6 + $0x1d0] sm:$0xff]  ;;  %1244 = vst [vmem:[%s10991_s7 + $0xd8] sm:$0xff] %v1243_v27 }
  0x2a   : > { %1246 = vst [vmem:[%s10991_s7 + $0xe0] sm:$0xff] %v1245_v28  ;;  %1248 = vst [vmem:[%s10991_s7 + $0xe8] sm:$0xff] %v1247_v29  ;;  %v1249_v30 = vld [vmem:[%s10986_s6 + $0x1e0] sm:$0xff]  ;;  %v1251_v31 = vld [vmem:[%s10986_s6 + $0x1f0] sm:$0xff] }
  0x2b   : > { %v1253_v32 = vld [vmem:[%s10986_s6 + $0x200] sm:$0xff]  ;;  %1250 = vst [vmem:[%s10991_s7 + $0xf0] sm:$0xff] %v1249_v30  ;;  %1252 = vst [vmem:[%s10991_s7 + $0xf8] sm:$0xff] %v1251_v31  ;;  %v1255_v33 = vld [vmem:[%s10986_s6 + $0x210] sm:$0xff] }
  0x2c   : > { %1254 = vst [vmem:[%s10991_s7 + $0x100] sm:$0xff] %v1253_v32  ;;  %v1257_v34 = vld [vmem:[%s10986_s6 + $0x220] sm:$0xff]  ;;  %v1259_v35 = vld [vmem:[%s10986_s6 + $0x230] sm:$0xff]  ;;  %1256 = vst [vmem:[%s10991_s7 + $0x108] sm:$0xff] %v1255_v33 }
  0x2d   : > { %1258 = vst [vmem:[%s10991_s7 + $0x110] sm:$0xff] %v1257_v34  ;;  %1260 = vst [vmem:[%s10991_s7 + $0x118] sm:$0xff] %v1259_v35  ;;  %v1261_v36 = vld [vmem:[%s10986_s6 + $0x240] sm:$0xff]  ;;  %v1263_v37 = vld [vmem:[%s10986_s6 + $0x250] sm:$0xff] }
  0x2e   : > { %v1265_v38 = vld [vmem:[%s10986_s6 + $0x260] sm:$0xff]  ;;  %1262 = vst [vmem:[%s10991_s7 + $0x120] sm:$0xff] %v1261_v36  ;;  %1264 = vst [vmem:[%s10991_s7 + $0x128] sm:$0xff] %v1263_v37  ;;  %v1267_v39 = vld [vmem:[%s10986_s6 + $0x270] sm:$0xff] }
  0x2f   : > { %1266 = vst [vmem:[%s10991_s7 + $0x130] sm:$0xff] %v1265_v38  ;;  %v1269_v40 = vld [vmem:[%s10986_s6 + $0x280] sm:$0xff]  ;;  %v1271_v41 = vld [vmem:[%s10986_s6 + $0x290] sm:$0xff]  ;;  %1268 = vst [vmem:[%s10991_s7 + $0x138] sm:$0xff] %v1267_v39 }
  0x30   : > { %1270 = vst [vmem:[%s10991_s7 + $0x140] sm:$0xff] %v1269_v40  ;;  %1272 = vst [vmem:[%s10991_s7 + $0x148] sm:$0xff] %v1271_v41  ;;  %v1273_v42 = vld [vmem:[%s10986_s6 + $0x2a0] sm:$0xff]  ;;  %v1275_v43 = vld [vmem:[%s10986_s6 + $0x2b0] sm:$0xff] }
  0x31   : > { %v1277_v44 = vld [vmem:[%s10986_s6 + $0x2c0] sm:$0xff]  ;;  %1274 = vst [vmem:[%s10991_s7 + $0x150] sm:$0xff] %v1273_v42  ;;  %1276 = vst [vmem:[%s10991_s7 + $0x158] sm:$0xff] %v1275_v43  ;;  %v1279_v45 = vld [vmem:[%s10986_s6 + $0x2d0] sm:$0xff] }
  0x32   : > { %1278 = vst [vmem:[%s10991_s7 + $0x160] sm:$0xff] %v1277_v44  ;;  %v1281_v46 = vld [vmem:[%s10986_s6 + $0x2e0] sm:$0xff]  ;;  %v1283_v47 = vld [vmem:[%s10986_s6 + $0x2f0] sm:$0xff]  ;;  %1280 = vst [vmem:[%s10991_s7 + $0x168] sm:$0xff] %v1279_v45 }
  0x33   : > { %1282 = vst [vmem:[%s10991_s7 + $0x170] sm:$0xff] %v1281_v46  ;;  %1284 = vst [vmem:[%s10991_s7 + $0x178] sm:$0xff] %v1283_v47  ;;  %v1285_v48 = vld [vmem:[%s10986_s6 + $0x300] sm:$0xff]  ;;  %v1287_v49 = vld [vmem:[%s10986_s6 + $0x310] sm:$0xff] }
  0x34   : > { %v1289_v50 = vld [vmem:[%s10986_s6 + $0x320] sm:$0xff]  ;;  %1286 = vst [vmem:[%s10991_s7 + $0x180] sm:$0xff] %v1285_v48  ;;  %1288 = vst [vmem:[%s10991_s7 + $0x188] sm:$0xff] %v1287_v49  ;;  %v1291_v51 = vld [vmem:[%s10986_s6 + $0x330] sm:$0xff] }
  0x35   : > { %1290 = vst [vmem:[%s10991_s7 + $0x190] sm:$0xff] %v1289_v50  ;;  %v1293_v52 = vld [vmem:[%s10986_s6 + $0x340] sm:$0xff]  ;;  %v1295_v53 = vld [vmem:[%s10986_s6 + $0x350] sm:$0xff]  ;;  %1292 = vst [vmem:[%s10991_s7 + $0x198] sm:$0xff] %v1291_v51 }
  0x36   : > { %1294 = vst [vmem:[%s10991_s7 + $0x1a0] sm:$0xff] %v1293_v52  ;;  %1296 = vst [vmem:[%s10991_s7 + $0x1a8] sm:$0xff] %v1295_v53  ;;  %v1297_v54 = vld [vmem:[%s10986_s6 + $0x360] sm:$0xff]  ;;  %v1299_v55 = vld [vmem:[%s10986_s6 + $0x370] sm:$0xff] }
  0x37   : > { %v1301_v56 = vld [vmem:[%s10986_s6 + $0x380] sm:$0xff]  ;;  %1298 = vst [vmem:[%s10991_s7 + $0x1b0] sm:$0xff] %v1297_v54  ;;  %1300 = vst [vmem:[%s10991_s7 + $0x1b8] sm:$0xff] %v1299_v55  ;;  %v1303_v57 = vld [vmem:[%s10986_s6 + $0x390] sm:$0xff] }
  0x38   : > { %1302 = vst [vmem:[%s10991_s7 + $0x1c0] sm:$0xff] %v1301_v56  ;;  %v1305_v58 = vld [vmem:[%s10986_s6 + $0x3a0] sm:$0xff]  ;;  %v1307_v59 = vld [vmem:[%s10986_s6 + $0x3b0] sm:$0xff]  ;;  %1304 = vst [vmem:[%s10991_s7 + $0x1c8] sm:$0xff] %v1303_v57 }
  0x39   : > { %1306 = vst [vmem:[%s10991_s7 + $0x1d0] sm:$0xff] %v1305_v58  ;;  %1308 = vst [vmem:[%s10991_s7 + $0x1d8] sm:$0xff] %v1307_v59  ;;  %v1309_v60 = vld [vmem:[%s10986_s6 + $0x3c0] sm:$0xff]  ;;  %v1311_v61 = vld [vmem:[%s10986_s6 + $0x3d0] sm:$0xff] }
  0x3a   : > { %v1313_v62 = vld [vmem:[%s10986_s6 + $0x3e0] sm:$0xff]  ;;  %1310 = vst [vmem:[%s10991_s7 + $0x1e0] sm:$0xff] %v1309_v60  ;;  %1312 = vst [vmem:[%s10991_s7 + $0x1e8] sm:$0xff] %v1311_v61  ;;  %v1315_v63 = vld [vmem:[%s10986_s6 + $0x3f0] sm:$0xff] }
  0x3b   : > { %1314 = vst [vmem:[%s10991_s7 + $0x1f0] sm:$0xff] %v1313_v62  ;;  %v1317_v0 = vld [vmem:[%s10986_s6 + $0x400] sm:$0xff]  ;;  %v1319_v1 = vld [vmem:[%s10986_s6 + $0x410] sm:$0xff]  ;;  %1316 = vst [vmem:[%s10991_s7 + $0x1f8] sm:$0xff] %v1315_v63 }
  0x3c   : > { %1318 = vst [vmem:[%s10991_s7 + $0x200] sm:$0xff] %v1317_v0  ;;  %1320 = vst [vmem:[%s10991_s7 + $0x208] sm:$0xff] %v1319_v1  ;;  %v1321_v2 = vld [vmem:[%s10986_s6 + $0x420] sm:$0xff]  ;;  %v1323_v3 = vld [vmem:[%s10986_s6 + $0x430] sm:$0xff] }
  0x3d   : > { %v1325_v4 = vld [vmem:[%s10986_s6 + $0x440] sm:$0xff]  ;;  %1322 = vst [vmem:[%s10991_s7 + $0x210] sm:$0xff] %v1321_v2  ;;  %1324 = vst [vmem:[%s10991_s7 + $0x218] sm:$0xff] %v1323_v3  ;;  %v1327_v5 = vld [vmem:[%s10986_s6 + $0x450] sm:$0xff] }
  0x3e   : > { %1326 = vst [vmem:[%s10991_s7 + $0x220] sm:$0xff] %v1325_v4  ;;  %v1329_v6 = vld [vmem:[%s10986_s6 + $0x460] sm:$0xff]  ;;  %v1331_v7 = vld [vmem:[%s10986_s6 + $0x470] sm:$0xff]  ;;  %1328 = vst [vmem:[%s10991_s7 + $0x228] sm:$0xff] %v1327_v5 }
  0x3f   : > { %1330 = vst [vmem:[%s10991_s7 + $0x230] sm:$0xff] %v1329_v6  ;;  %1332 = vst [vmem:[%s10991_s7 + $0x238] sm:$0xff] %v1331_v7  ;;  %v1333_v8 = vld [vmem:[%s10986_s6 + $0x480] sm:$0xff]  ;;  %v1335_v9 = vld [vmem:[%s10986_s6 + $0x490] sm:$0xff] }
  0x40   : > { %v1337_v10 = vld [vmem:[%s10986_s6 + $0x4a0] sm:$0xff]  ;;  %1334 = vst [vmem:[%s10991_s7 + $0x240] sm:$0xff] %v1333_v8  ;;  %1336 = vst [vmem:[%s10991_s7 + $0x248] sm:$0xff] %v1335_v9  ;;  %v1339_v11 = vld [vmem:[%s10986_s6 + $0x4b0] sm:$0xff] }
  0x41   : > { %1338 = vst [vmem:[%s10991_s7 + $0x250] sm:$0xff] %v1337_v10  ;;  %v1341_v12 = vld [vmem:[%s10986_s6 + $0x4c0] sm:$0xff]  ;;  %v1343_v13 = vld [vmem:[%s10986_s6 + $0x4d0] sm:$0xff]  ;;  %1340 = vst [vmem:[%s10991_s7 + $0x258] sm:$0xff] %v1339_v11 }
  0x42   : > { %1342 = vst [vmem:[%s10991_s7 + $0x260] sm:$0xff] %v1341_v12  ;;  %1344 = vst [vmem:[%s10991_s7 + $0x268] sm:$0xff] %v1343_v13  ;;  %v1345_v14 = vld [vmem:[%s10986_s6 + $0x4e0] sm:$0xff]  ;;  %v1347_v15 = vld [vmem:[%s10986_s6 + $0x4f0] sm:$0xff] }
  0x43   : > { %v1349_v16 = vld [vmem:[%s10986_s6 + $0x500] sm:$0xff]  ;;  %1346 = vst [vmem:[%s10991_s7 + $0x270] sm:$0xff] %v1345_v14  ;;  %1348 = vst [vmem:[%s10991_s7 + $0x278] sm:$0xff] %v1347_v15  ;;  %v1351_v17 = vld [vmem:[%s10986_s6 + $0x510] sm:$0xff] }
  0x44   : > { %1350 = vst [vmem:[%s10991_s7 + $0x280] sm:$0xff] %v1349_v16  ;;  %v1353_v18 = vld [vmem:[%s10986_s6 + $0x520] sm:$0xff]  ;;  %v1355_v19 = vld [vmem:[%s10986_s6 + $0x530] sm:$0xff]  ;;  %1352 = vst [vmem:[%s10991_s7 + $0x288] sm:$0xff] %v1351_v17 }
  0x45   : > { %1354 = vst [vmem:[%s10991_s7 + $0x290] sm:$0xff] %v1353_v18  ;;  %1356 = vst [vmem:[%s10991_s7 + $0x298] sm:$0xff] %v1355_v19  ;;  %v1357_v20 = vld [vmem:[%s10986_s6 + $0x540] sm:$0xff]  ;;  %v1359_v21 = vld [vmem:[%s10986_s6 + $0x550] sm:$0xff] }
  0x46   : > { %v1361_v22 = vld [vmem:[%s10986_s6 + $0x560] sm:$0xff]  ;;  %1358 = vst [vmem:[%s10991_s7 + $0x2a0] sm:$0xff] %v1357_v20  ;;  %1360 = vst [vmem:[%s10991_s7 + $0x2a8] sm:$0xff] %v1359_v21  ;;  %v1363_v23 = vld [vmem:[%s10986_s6 + $0x570] sm:$0xff] }
  0x47   : > { %1362 = vst [vmem:[%s10991_s7 + $0x2b0] sm:$0xff] %v1361_v22  ;;  %v1365_v24 = vld [vmem:[%s10986_s6 + $0x580] sm:$0xff]  ;;  %v1367_v25 = vld [vmem:[%s10986_s6 + $0x590] sm:$0xff]  ;;  %1364 = vst [vmem:[%s10991_s7 + $0x2b8] sm:$0xff] %v1363_v23 }
  0x48   : > { %1366 = vst [vmem:[%s10991_s7 + $0x2c0] sm:$0xff] %v1365_v24  ;;  %1368 = vst [vmem:[%s10991_s7 + $0x2c8] sm:$0xff] %v1367_v25  ;;  %v1369_v26 = vld [vmem:[%s10986_s6 + $0x5a0] sm:$0xff]  ;;  %v1371_v27 = vld [vmem:[%s10986_s6 + $0x5b0] sm:$0xff] }
  0x49   : > { %v1373_v28 = vld [vmem:[%s10986_s6 + $0x5c0] sm:$0xff]  ;;  %1370 = vst [vmem:[%s10991_s7 + $0x2d0] sm:$0xff] %v1369_v26  ;;  %1372 = vst [vmem:[%s10991_s7 + $0x2d8] sm:$0xff] %v1371_v27  ;;  %v1375_v29 = vld [vmem:[%s10986_s6 + $0x5d0] sm:$0xff] }
  0x4a   : > { %1374 = vst [vmem:[%s10991_s7 + $0x2e0] sm:$0xff] %v1373_v28  ;;  %v1377_v30 = vld [vmem:[%s10986_s6 + $0x5e0] sm:$0xff]  ;;  %v1379_v31 = vld [vmem:[%s10986_s6 + $0x5f0] sm:$0xff]  ;;  %1376 = vst [vmem:[%s10991_s7 + $0x2e8] sm:$0xff] %v1375_v29 }
  0x4b   : > { %1378 = vst [vmem:[%s10991_s7 + $0x2f0] sm:$0xff] %v1377_v30  ;;  %1380 = vst [vmem:[%s10991_s7 + $0x2f8] sm:$0xff] %v1379_v31  ;;  %v1381_v32 = vld [vmem:[%s10986_s6 + $0x600] sm:$0xff]  ;;  %v1383_v33 = vld [vmem:[%s10986_s6 + $0x610] sm:$0xff] }
  0x4c   : > { %v1385_v34 = vld [vmem:[%s10986_s6 + $0x620] sm:$0xff]  ;;  %1382 = vst [vmem:[%s10991_s7 + $0x300] sm:$0xff] %v1381_v32  ;;  %1384 = vst [vmem:[%s10991_s7 + $0x308] sm:$0xff] %v1383_v33  ;;  %v1387_v35 = vld [vmem:[%s10986_s6 + $0x630] sm:$0xff] }
  0x4d   : > { %1386 = vst [vmem:[%s10991_s7 + $0x310] sm:$0xff] %v1385_v34  ;;  %v1389_v36 = vld [vmem:[%s10986_s6 + $0x640] sm:$0xff]  ;;  %v1391_v37 = vld [vmem:[%s10986_s6 + $0x650] sm:$0xff]  ;;  %1388 = vst [vmem:[%s10991_s7 + $0x318] sm:$0xff] %v1387_v35 }
  0x4e   : > { %1390 = vst [vmem:[%s10991_s7 + $0x320] sm:$0xff] %v1389_v36  ;;  %1392 = vst [vmem:[%s10991_s7 + $0x328] sm:$0xff] %v1391_v37  ;;  %v1393_v38 = vld [vmem:[%s10986_s6 + $0x660] sm:$0xff]  ;;  %v1395_v39 = vld [vmem:[%s10986_s6 + $0x670] sm:$0xff] }
  0x4f   : > { %v1397_v40 = vld [vmem:[%s10986_s6 + $0x680] sm:$0xff]  ;;  %1394 = vst [vmem:[%s10991_s7 + $0x330] sm:$0xff] %v1393_v38  ;;  %1396 = vst [vmem:[%s10991_s7 + $0x338] sm:$0xff] %v1395_v39  ;;  %v1399_v41 = vld [vmem:[%s10986_s6 + $0x690] sm:$0xff] }
  0x50   : > { %1398 = vst [vmem:[%s10991_s7 + $0x340] sm:$0xff] %v1397_v40  ;;  %v1401_v42 = vld [vmem:[%s10986_s6 + $0x6a0] sm:$0xff]  ;;  %v1403_v43 = vld [vmem:[%s10986_s6 + $0x6b0] sm:$0xff]  ;;  %1400 = vst [vmem:[%s10991_s7 + $0x348] sm:$0xff] %v1399_v41 }
  0x51   : > { %1402 = vst [vmem:[%s10991_s7 + $0x350] sm:$0xff] %v1401_v42  ;;  %1404 = vst [vmem:[%s10991_s7 + $0x358] sm:$0xff] %v1403_v43  ;;  %v1405_v44 = vld [vmem:[%s10986_s6 + $0x6c0] sm:$0xff]  ;;  %v1407_v45 = vld [vmem:[%s10986_s6 + $0x6d0] sm:$0xff] }
  0x52   : > { %v1409_v46 = vld [vmem:[%s10986_s6 + $0x6e0] sm:$0xff]  ;;  %1406 = vst [vmem:[%s10991_s7 + $0x360] sm:$0xff] %v1405_v44  ;;  %1408 = vst [vmem:[%s10991_s7 + $0x368] sm:$0xff] %v1407_v45  ;;  %v1411_v47 = vld [vmem:[%s10986_s6 + $0x6f0] sm:$0xff] }
  0x53   : > { %1410 = vst [vmem:[%s10991_s7 + $0x370] sm:$0xff] %v1409_v46  ;;  %v1413_v48 = vld [vmem:[%s10986_s6 + $0x700] sm:$0xff]  ;;  %v1415_v49 = vld [vmem:[%s10986_s6 + $0x710] sm:$0xff]  ;;  %1412 = vst [vmem:[%s10991_s7 + $0x378] sm:$0xff] %v1411_v47 }
  0x54   : > { %1414 = vst [vmem:[%s10991_s7 + $0x380] sm:$0xff] %v1413_v48  ;;  %1416 = vst [vmem:[%s10991_s7 + $0x388] sm:$0xff] %v1415_v49  ;;  %v1417_v50 = vld [vmem:[%s10986_s6 + $0x720] sm:$0xff]  ;;  %v1419_v51 = vld [vmem:[%s10986_s6 + $0x730] sm:$0xff] }
  0x55   : > { %v1421_v52 = vld [vmem:[%s10986_s6 + $0x740] sm:$0xff]  ;;  %1418 = vst [vmem:[%s10991_s7 + $0x390] sm:$0xff] %v1417_v50  ;;  %1420 = vst [vmem:[%s10991_s7 + $0x398] sm:$0xff] %v1419_v51  ;;  %v1423_v53 = vld [vmem:[%s10986_s6 + $0x750] sm:$0xff] }
  0x56   : > { %1422 = vst [vmem:[%s10991_s7 + $0x3a0] sm:$0xff] %v1421_v52  ;;  %v1425_v54 = vld [vmem:[%s10986_s6 + $0x760] sm:$0xff]  ;;  %v1427_v55 = vld [vmem:[%s10986_s6 + $0x770] sm:$0xff]  ;;  %1424 = vst [vmem:[%s10991_s7 + $0x3a8] sm:$0xff] %v1423_v53 }
  0x57   : > { %1426 = vst [vmem:[%s10991_s7 + $0x3b0] sm:$0xff] %v1425_v54  ;;  %1428 = vst [vmem:[%s10991_s7 + $0x3b8] sm:$0xff] %v1427_v55  ;;  %v1429_v56 = vld [vmem:[%s10986_s6 + $0x780] sm:$0xff]  ;;  %v1431_v57 = vld [vmem:[%s10986_s6 + $0x790] sm:$0xff] }
  0x58   : > { %v1433_v58 = vld [vmem:[%s10986_s6 + $0x7a0] sm:$0xff]  ;;  %1430 = vst [vmem:[%s10991_s7 + $0x3c0] sm:$0xff] %v1429_v56  ;;  %1432 = vst [vmem:[%s10991_s7 + $0x3c8] sm:$0xff] %v1431_v57  ;;  %v1435_v59 = vld [vmem:[%s10986_s6 + $0x7b0] sm:$0xff] }
  0x59   : > { %1434 = vst [vmem:[%s10991_s7 + $0x3d0] sm:$0xff] %v1433_v58  ;;  %v1437_v60 = vld [vmem:[%s10986_s6 + $0x7c0] sm:$0xff]  ;;  %v1439_v61 = vld [vmem:[%s10986_s6 + $0x7d0] sm:$0xff]  ;;  %1436 = vst [vmem:[%s10991_s7 + $0x3d8] sm:$0xff] %v1435_v59 }
  0x5a   : > { %1438 = vst [vmem:[%s10991_s7 + $0x3e0] sm:$0xff] %v1437_v60  ;;  %1440 = vst [vmem:[%s10991_s7 + $0x3e8] sm:$0xff] %v1439_v61  ;;  %v1441_v62 = vld [vmem:[%s10986_s6 + $0x7e0] sm:$0xff]  ;;  %v1443_v63 = vld [vmem:[%s10986_s6 + $0x7f0] sm:$0xff] }
  0x5b   : > { %v1445_v0 = vld [vmem:[%s10986_s6 + $0x800] sm:$0xff]  ;;  %1442 = vst [vmem:[%s10991_s7 + $0x3f0] sm:$0xff] %v1441_v62  ;;  %1444 = vst [vmem:[%s10991_s7 + $0x3f8] sm:$0xff] %v1443_v63  ;;  %v1447_v1 = vld [vmem:[%s10986_s6 + $0x810] sm:$0xff] }
  0x5c   : > { %1446 = vst [vmem:[%s10991_s7 + $0x400] sm:$0xff] %v1445_v0  ;;  %v1449_v2 = vld [vmem:[%s10986_s6 + $0x820] sm:$0xff]  ;;  %v1451_v3 = vld [vmem:[%s10986_s6 + $0x830] sm:$0xff]  ;;  %1448 = vst [vmem:[%s10991_s7 + $0x408] sm:$0xff] %v1447_v1 }
  0x5d   : > { %1450 = vst [vmem:[%s10991_s7 + $0x410] sm:$0xff] %v1449_v2  ;;  %1452 = vst [vmem:[%s10991_s7 + $0x418] sm:$0xff] %v1451_v3  ;;  %v1453_v4 = vld [vmem:[%s10986_s6 + $0x840] sm:$0xff]  ;;  %v1455_v5 = vld [vmem:[%s10986_s6 + $0x850] sm:$0xff] }
  0x5e   : > { %v1457_v6 = vld [vmem:[%s10986_s6 + $0x860] sm:$0xff]  ;;  %1454 = vst [vmem:[%s10991_s7 + $0x420] sm:$0xff] %v1453_v4  ;;  %1456 = vst [vmem:[%s10991_s7 + $0x428] sm:$0xff] %v1455_v5  ;;  %v1459_v7 = vld [vmem:[%s10986_s6 + $0x870] sm:$0xff] }
  0x5f   : > { %1458 = vst [vmem:[%s10991_s7 + $0x430] sm:$0xff] %v1457_v6  ;;  %v1461_v8 = vld [vmem:[%s10986_s6 + $0x880] sm:$0xff]  ;;  %v1463_v9 = vld [vmem:[%s10986_s6 + $0x890] sm:$0xff]  ;;  %1460 = vst [vmem:[%s10991_s7 + $0x438] sm:$0xff] %v1459_v7 }
  0x60   : > { %1462 = vst [vmem:[%s10991_s7 + $0x440] sm:$0xff] %v1461_v8  ;;  %1464 = vst [vmem:[%s10991_s7 + $0x448] sm:$0xff] %v1463_v9  ;;  %v1465_v10 = vld [vmem:[%s10986_s6 + $0x8a0] sm:$0xff]  ;;  %v1467_v11 = vld [vmem:[%s10986_s6 + $0x8b0] sm:$0xff] }
  0x61   : > { %v1469_v12 = vld [vmem:[%s10986_s6 + $0x8c0] sm:$0xff]  ;;  %1466 = vst [vmem:[%s10991_s7 + $0x450] sm:$0xff] %v1465_v10  ;;  %1468 = vst [vmem:[%s10991_s7 + $0x458] sm:$0xff] %v1467_v11  ;;  %v1471_v13 = vld [vmem:[%s10986_s6 + $0x8d0] sm:$0xff] }
  0x62   : > { %1470 = vst [vmem:[%s10991_s7 + $0x460] sm:$0xff] %v1469_v12  ;;  %v1473_v14 = vld [vmem:[%s10986_s6 + $0x8e0] sm:$0xff]  ;;  %v1475_v15 = vld [vmem:[%s10986_s6 + $0x8f0] sm:$0xff]  ;;  %1472 = vst [vmem:[%s10991_s7 + $0x468] sm:$0xff] %v1471_v13 }
  0x63   : > { %1474 = vst [vmem:[%s10991_s7 + $0x470] sm:$0xff] %v1473_v14  ;;  %1476 = vst [vmem:[%s10991_s7 + $0x478] sm:$0xff] %v1475_v15  ;;  %v1477_v16 = vld [vmem:[%s10986_s6 + $0x900] sm:$0xff]  ;;  %v1479_v17 = vld [vmem:[%s10986_s6 + $0x910] sm:$0xff] }
  0x64   : > { %v1481_v18 = vld [vmem:[%s10986_s6 + $0x920] sm:$0xff]  ;;  %1478 = vst [vmem:[%s10991_s7 + $0x480] sm:$0xff] %v1477_v16  ;;  %1480 = vst [vmem:[%s10991_s7 + $0x488] sm:$0xff] %v1479_v17  ;;  %v1483_v19 = vld [vmem:[%s10986_s6 + $0x930] sm:$0xff] }
  0x65   : > { %1482 = vst [vmem:[%s10991_s7 + $0x490] sm:$0xff] %v1481_v18  ;;  %v1485_v20 = vld [vmem:[%s10986_s6 + $0x940] sm:$0xff]  ;;  %v1487_v21 = vld [vmem:[%s10986_s6 + $0x950] sm:$0xff]  ;;  %1484 = vst [vmem:[%s10991_s7 + $0x498] sm:$0xff] %v1483_v19 }
  0x66   : > { %1486 = vst [vmem:[%s10991_s7 + $0x4a0] sm:$0xff] %v1485_v20  ;;  %1488 = vst [vmem:[%s10991_s7 + $0x4a8] sm:$0xff] %v1487_v21  ;;  %v1489_v22 = vld [vmem:[%s10986_s6 + $0x960] sm:$0xff]  ;;  %v1491_v23 = vld [vmem:[%s10986_s6 + $0x970] sm:$0xff] }
  0x67   : > { %v1493_v24 = vld [vmem:[%s10986_s6 + $0x980] sm:$0xff]  ;;  %1490 = vst [vmem:[%s10991_s7 + $0x4b0] sm:$0xff] %v1489_v22  ;;  %1492 = vst [vmem:[%s10991_s7 + $0x4b8] sm:$0xff] %v1491_v23  ;;  %v1495_v25 = vld [vmem:[%s10986_s6 + $0x990] sm:$0xff] }
  0x68   : > { %1494 = vst [vmem:[%s10991_s7 + $0x4c0] sm:$0xff] %v1493_v24  ;;  %v1497_v26 = vld [vmem:[%s10986_s6 + $0x9a0] sm:$0xff]  ;;  %v1499_v27 = vld [vmem:[%s10986_s6 + $0x9b0] sm:$0xff]  ;;  %1496 = vst [vmem:[%s10991_s7 + $0x4c8] sm:$0xff] %v1495_v25 }
  0x69   : > { %1498 = vst [vmem:[%s10991_s7 + $0x4d0] sm:$0xff] %v1497_v26  ;;  %1500 = vst [vmem:[%s10991_s7 + $0x4d8] sm:$0xff] %v1499_v27  ;;  %v1501_v28 = vld [vmem:[%s10986_s6 + $0x9c0] sm:$0xff]  ;;  %v1503_v29 = vld [vmem:[%s10986_s6 + $0x9d0] sm:$0xff] }
  0x6a   : > { %v1505_v30 = vld [vmem:[%s10986_s6 + $0x9e0] sm:$0xff]  ;;  %1502 = vst [vmem:[%s10991_s7 + $0x4e0] sm:$0xff] %v1501_v28  ;;  %1504 = vst [vmem:[%s10991_s7 + $0x4e8] sm:$0xff] %v1503_v29  ;;  %v1507_v31 = vld [vmem:[%s10986_s6 + $0x9f0] sm:$0xff] }
  0x6b   : > { %1506 = vst [vmem:[%s10991_s7 + $0x4f0] sm:$0xff] %v1505_v30  ;;  %v1509_v32 = vld [vmem:[%s10986_s6 + $0xa00] sm:$0xff]  ;;  %v1511_v33 = vld [vmem:[%s10986_s6 + $0xa10] sm:$0xff]  ;;  %1508 = vst [vmem:[%s10991_s7 + $0x4f8] sm:$0xff] %v1507_v31 }
  0x6c   : > { %1510 = vst [vmem:[%s10991_s7 + $0x500] sm:$0xff] %v1509_v32  ;;  %1512 = vst [vmem:[%s10991_s7 + $0x508] sm:$0xff] %v1511_v33  ;;  %v1513_v34 = vld [vmem:[%s10986_s6 + $0xa20] sm:$0xff]  ;;  %v1515_v35 = vld [vmem:[%s10986_s6 + $0xa30] sm:$0xff] }
  0x6d   : > { %v1517_v36 = vld [vmem:[%s10986_s6 + $0xa40] sm:$0xff]  ;;  %1514 = vst [vmem:[%s10991_s7 + $0x510] sm:$0xff] %v1513_v34  ;;  %1516 = vst [vmem:[%s10991_s7 + $0x518] sm:$0xff] %v1515_v35  ;;  %v1519_v37 = vld [vmem:[%s10986_s6 + $0xa50] sm:$0xff] }
  0x6e   : > { %1518 = vst [vmem:[%s10991_s7 + $0x520] sm:$0xff] %v1517_v36  ;;  %v1521_v38 = vld [vmem:[%s10986_s6 + $0xa60] sm:$0xff]  ;;  %v1523_v39 = vld [vmem:[%s10986_s6 + $0xa70] sm:$0xff]  ;;  %1520 = vst [vmem:[%s10991_s7 + $0x528] sm:$0xff] %v1519_v37 }
  0x6f   : > { %1522 = vst [vmem:[%s10991_s7 + $0x530] sm:$0xff] %v1521_v38  ;;  %1524 = vst [vmem:[%s10991_s7 + $0x538] sm:$0xff] %v1523_v39  ;;  %v1525_v40 = vld [vmem:[%s10986_s6 + $0xa80] sm:$0xff]  ;;  %v1527_v41 = vld [vmem:[%s10986_s6 + $0xa90] sm:$0xff] }
  0x70   : > { %v1529_v42 = vld [vmem:[%s10986_s6 + $0xaa0] sm:$0xff]  ;;  %1526 = vst [vmem:[%s10991_s7 + $0x540] sm:$0xff] %v1525_v40  ;;  %1528 = vst [vmem:[%s10991_s7 + $0x548] sm:$0xff] %v1527_v41  ;;  %v1531_v43 = vld [vmem:[%s10986_s6 + $0xab0] sm:$0xff] }
  0x71   : > { %1530 = vst [vmem:[%s10991_s7 + $0x550] sm:$0xff] %v1529_v42  ;;  %v1533_v44 = vld [vmem:[%s10986_s6 + $0xac0] sm:$0xff]  ;;  %v1535_v45 = vld [vmem:[%s10986_s6 + $0xad0] sm:$0xff]  ;;  %1532 = vst [vmem:[%s10991_s7 + $0x558] sm:$0xff] %v1531_v43 }
  0x72   : > { %1534 = vst [vmem:[%s10991_s7 + $0x560] sm:$0xff] %v1533_v44  ;;  %1536 = vst [vmem:[%s10991_s7 + $0x568] sm:$0xff] %v1535_v45  ;;  %v1537_v46 = vld [vmem:[%s10986_s6 + $0xae0] sm:$0xff]  ;;  %v1539_v47 = vld [vmem:[%s10986_s6 + $0xaf0] sm:$0xff] }
  0x73   : > { %v1541_v48 = vld [vmem:[%s10986_s6 + $0xb00] sm:$0xff]  ;;  %1538 = vst [vmem:[%s10991_s7 + $0x570] sm:$0xff] %v1537_v46  ;;  %1540 = vst [vmem:[%s10991_s7 + $0x578] sm:$0xff] %v1539_v47  ;;  %v1543_v49 = vld [vmem:[%s10986_s6 + $0xb10] sm:$0xff] }
  0x74   : > { %1542 = vst [vmem:[%s10991_s7 + $0x580] sm:$0xff] %v1541_v48  ;;  %v1545_v50 = vld [vmem:[%s10986_s6 + $0xb20] sm:$0xff]  ;;  %v1547_v51 = vld [vmem:[%s10986_s6 + $0xb30] sm:$0xff]  ;;  %1544 = vst [vmem:[%s10991_s7 + $0x588] sm:$0xff] %v1543_v49 }
  0x75   : > { %1546 = vst [vmem:[%s10991_s7 + $0x590] sm:$0xff] %v1545_v50  ;;  %1548 = vst [vmem:[%s10991_s7 + $0x598] sm:$0xff] %v1547_v51  ;;  %v1549_v52 = vld [vmem:[%s10986_s6 + $0xb40] sm:$0xff]  ;;  %v1551_v53 = vld [vmem:[%s10986_s6 + $0xb50] sm:$0xff] }
  0x76   : > { %v1553_v54 = vld [vmem:[%s10986_s6 + $0xb60] sm:$0xff]  ;;  %1550 = vst [vmem:[%s10991_s7 + $0x5a0] sm:$0xff] %v1549_v52  ;;  %1552 = vst [vmem:[%s10991_s7 + $0x5a8] sm:$0xff] %v1551_v53  ;;  %v1555_v55 = vld [vmem:[%s10986_s6 + $0xb70] sm:$0xff] }
  0x77   : > { %1554 = vst [vmem:[%s10991_s7 + $0x5b0] sm:$0xff] %v1553_v54  ;;  %v1557_v56 = vld [vmem:[%s10986_s6 + $0xb80] sm:$0xff]  ;;  %v1559_v57 = vld [vmem:[%s10986_s6 + $0xb90] sm:$0xff]  ;;  %1556 = vst [vmem:[%s10991_s7 + $0x5b8] sm:$0xff] %v1555_v55 }
  0x78   : > { %1558 = vst [vmem:[%s10991_s7 + $0x5c0] sm:$0xff] %v1557_v56  ;;  %1560 = vst [vmem:[%s10991_s7 + $0x5c8] sm:$0xff] %v1559_v57  ;;  %v1561_v58 = vld [vmem:[%s10986_s6 + $0xba0] sm:$0xff]  ;;  %v1563_v59 = vld [vmem:[%s10986_s6 + $0xbb0] sm:$0xff] }
  0x79   : > { %v1565_v60 = vld [vmem:[%s10986_s6 + $0xbc0] sm:$0xff]  ;;  %1562 = vst [vmem:[%s10991_s7 + $0x5d0] sm:$0xff] %v1561_v58  ;;  %1564 = vst [vmem:[%s10991_s7 + $0x5d8] sm:$0xff] %v1563_v59  ;;  %v1567_v61 = vld [vmem:[%s10986_s6 + $0xbd0] sm:$0xff] }
  0x7a   : > { %1566 = vst [vmem:[%s10991_s7 + $0x5e0] sm:$0xff] %v1565_v60  ;;  %v1569_v62 = vld [vmem:[%s10986_s6 + $0xbe0] sm:$0xff]  ;;  %v1571_v63 = vld [vmem:[%s10986_s6 + $0xbf0] sm:$0xff]  ;;  %1568 = vst [vmem:[%s10991_s7 + $0x5e8] sm:$0xff] %v1567_v61 }
  0x7b   : > { %1570 = vst [vmem:[%s10991_s7 + $0x5f0] sm:$0xff] %v1569_v62  ;;  %1572 = vst [vmem:[%s10991_s7 + $0x5f8] sm:$0xff] %v1571_v63  ;;  %v1573_v0 = vld [vmem:[%s10986_s6 + $0xc00] sm:$0xff]  ;;  %v1575_v1 = vld [vmem:[%s10986_s6 + $0xc10] sm:$0xff] }
  0x7c   : > { %v1577_v2 = vld [vmem:[%s10986_s6 + $0xc20] sm:$0xff]  ;;  %1574 = vst [vmem:[%s10991_s7 + $0x600] sm:$0xff] %v1573_v0  ;;  %1576 = vst [vmem:[%s10991_s7 + $0x608] sm:$0xff] %v1575_v1  ;;  %v1579_v3 = vld [vmem:[%s10986_s6 + $0xc30] sm:$0xff] }
  0x7d   : > { %1578 = vst [vmem:[%s10991_s7 + $0x610] sm:$0xff] %v1577_v2  ;;  %v1581_v4 = vld [vmem:[%s10986_s6 + $0xc40] sm:$0xff]  ;;  %v1583_v5 = vld [vmem:[%s10986_s6 + $0xc50] sm:$0xff]  ;;  %1580 = vst [vmem:[%s10991_s7 + $0x618] sm:$0xff] %v1579_v3 }
  0x7e   : > { %1582 = vst [vmem:[%s10991_s7 + $0x620] sm:$0xff] %v1581_v4  ;;  %1584 = vst [vmem:[%s10991_s7 + $0x628] sm:$0xff] %v1583_v5  ;;  %v1585_v6 = vld [vmem:[%s10986_s6 + $0xc60] sm:$0xff]  ;;  %v1587_v7 = vld [vmem:[%s10986_s6 + $0xc70] sm:$0xff] }
  0x7f   : > { %v1589_v8 = vld [vmem:[%s10986_s6 + $0xc80] sm:$0xff]  ;;  %1586 = vst [vmem:[%s10991_s7 + $0x630] sm:$0xff] %v1585_v6  ;;  %1588 = vst [vmem:[%s10991_s7 + $0x638] sm:$0xff] %v1587_v7  ;;  %v1591_v9 = vld [vmem:[%s10986_s6 + $0xc90] sm:$0xff] }
  0x80   : > { %1590 = vst [vmem:[%s10991_s7 + $0x640] sm:$0xff] %v1589_v8  ;;  %v1593_v10 = vld [vmem:[%s10986_s6 + $0xca0] sm:$0xff]  ;;  %v1595_v11 = vld [vmem:[%s10986_s6 + $0xcb0] sm:$0xff]  ;;  %1592 = vst [vmem:[%s10991_s7 + $0x648] sm:$0xff] %v1591_v9 }
  0x81   : > { %1594 = vst [vmem:[%s10991_s7 + $0x650] sm:$0xff] %v1593_v10  ;;  %1596 = vst [vmem:[%s10991_s7 + $0x658] sm:$0xff] %v1595_v11  ;;  %v1597_v12 = vld [vmem:[%s10986_s6 + $0xcc0] sm:$0xff]  ;;  %v1599_v13 = vld [vmem:[%s10986_s6 + $0xcd0] sm:$0xff] }
  0x82   : > { %v1601_v14 = vld [vmem:[%s10986_s6 + $0xce0] sm:$0xff]  ;;  %1598 = vst [vmem:[%s10991_s7 + $0x660] sm:$0xff] %v1597_v12  ;;  %1600 = vst [vmem:[%s10991_s7 + $0x668] sm:$0xff] %v1599_v13  ;;  %v1603_v15 = vld [vmem:[%s10986_s6 + $0xcf0] sm:$0xff] }
  0x83   : > { %1602 = vst [vmem:[%s10991_s7 + $0x670] sm:$0xff] %v1601_v14  ;;  %v1605_v16 = vld [vmem:[%s10986_s6 + $0xd00] sm:$0xff]  ;;  %v1607_v17 = vld [vmem:[%s10986_s6 + $0xd10] sm:$0xff]  ;;  %1604 = vst [vmem:[%s10991_s7 + $0x678] sm:$0xff] %v1603_v15 }
  0x84   : > { %1606 = vst [vmem:[%s10991_s7 + $0x680] sm:$0xff] %v1605_v16  ;;  %1608 = vst [vmem:[%s10991_s7 + $0x688] sm:$0xff] %v1607_v17  ;;  %v1609_v18 = vld [vmem:[%s10986_s6 + $0xd20] sm:$0xff]  ;;  %v1611_v19 = vld [vmem:[%s10986_s6 + $0xd30] sm:$0xff] }
  0x85   : > { %v1613_v20 = vld [vmem:[%s10986_s6 + $0xd40] sm:$0xff]  ;;  %1610 = vst [vmem:[%s10991_s7 + $0x690] sm:$0xff] %v1609_v18  ;;  %1612 = vst [vmem:[%s10991_s7 + $0x698] sm:$0xff] %v1611_v19  ;;  %v1615_v21 = vld [vmem:[%s10986_s6 + $0xd50] sm:$0xff] }
  0x86   : > { %1614 = vst [vmem:[%s10991_s7 + $0x6a0] sm:$0xff] %v1613_v20  ;;  %v1617_v22 = vld [vmem:[%s10986_s6 + $0xd60] sm:$0xff]  ;;  %v1619_v23 = vld [vmem:[%s10986_s6 + $0xd70] sm:$0xff]  ;;  %1616 = vst [vmem:[%s10991_s7 + $0x6a8] sm:$0xff] %v1615_v21 }
  0x87   : > { %1618 = vst [vmem:[%s10991_s7 + $0x6b0] sm:$0xff] %v1617_v22  ;;  %1620 = vst [vmem:[%s10991_s7 + $0x6b8] sm:$0xff] %v1619_v23  ;;  %v1621_v24 = vld [vmem:[%s10986_s6 + $0xd80] sm:$0xff]  ;;  %v1623_v25 = vld [vmem:[%s10986_s6 + $0xd90] sm:$0xff] }
  0x88   : > { %v1625_v26 = vld [vmem:[%s10986_s6 + $0xda0] sm:$0xff]  ;;  %1622 = vst [vmem:[%s10991_s7 + $0x6c0] sm:$0xff] %v1621_v24  ;;  %1624 = vst [vmem:[%s10991_s7 + $0x6c8] sm:$0xff] %v1623_v25  ;;  %v1627_v27 = vld [vmem:[%s10986_s6 + $0xdb0] sm:$0xff] }
  0x89   : > { %1626 = vst [vmem:[%s10991_s7 + $0x6d0] sm:$0xff] %v1625_v26  ;;  %v1629_v28 = vld [vmem:[%s10986_s6 + $0xdc0] sm:$0xff]  ;;  %v1631_v29 = vld [vmem:[%s10986_s6 + $0xdd0] sm:$0xff]  ;;  %1628 = vst [vmem:[%s10991_s7 + $0x6d8] sm:$0xff] %v1627_v27 }
  0x8a   : > { %1630 = vst [vmem:[%s10991_s7 + $0x6e0] sm:$0xff] %v1629_v28  ;;  %1632 = vst [vmem:[%s10991_s7 + $0x6e8] sm:$0xff] %v1631_v29  ;;  %v1633_v30 = vld [vmem:[%s10986_s6 + $0xde0] sm:$0xff]  ;;  %v1635_v31 = vld [vmem:[%s10986_s6 + $0xdf0] sm:$0xff] }
  0x8b   : > { %v1637_v32 = vld [vmem:[%s10986_s6 + $0xe00] sm:$0xff]  ;;  %1634 = vst [vmem:[%s10991_s7 + $0x6f0] sm:$0xff] %v1633_v30  ;;  %1636 = vst [vmem:[%s10991_s7 + $0x6f8] sm:$0xff] %v1635_v31  ;;  %v1639_v33 = vld [vmem:[%s10986_s6 + $0xe10] sm:$0xff] }
  0x8c   : > { %1638 = vst [vmem:[%s10991_s7 + $0x700] sm:$0xff] %v1637_v32  ;;  %v1641_v34 = vld [vmem:[%s10986_s6 + $0xe20] sm:$0xff]  ;;  %v1643_v35 = vld [vmem:[%s10986_s6 + $0xe30] sm:$0xff]  ;;  %1640 = vst [vmem:[%s10991_s7 + $0x708] sm:$0xff] %v1639_v33 }
  0x8d   : > { %1642 = vst [vmem:[%s10991_s7 + $0x710] sm:$0xff] %v1641_v34  ;;  %1644 = vst [vmem:[%s10991_s7 + $0x718] sm:$0xff] %v1643_v35  ;;  %v1645_v36 = vld [vmem:[%s10986_s6 + $0xe40] sm:$0xff]  ;;  %v1647_v37 = vld [vmem:[%s10986_s6 + $0xe50] sm:$0xff] }
  0x8e   : > { %v1649_v38 = vld [vmem:[%s10986_s6 + $0xe60] sm:$0xff]  ;;  %1646 = vst [vmem:[%s10991_s7 + $0x720] sm:$0xff] %v1645_v36  ;;  %1648 = vst [vmem:[%s10991_s7 + $0x728] sm:$0xff] %v1647_v37  ;;  %v1651_v39 = vld [vmem:[%s10986_s6 + $0xe70] sm:$0xff] }
  0x8f   : > { %1650 = vst [vmem:[%s10991_s7 + $0x730] sm:$0xff] %v1649_v38  ;;  %v1653_v40 = vld [vmem:[%s10986_s6 + $0xe80] sm:$0xff]  ;;  %v1655_v41 = vld [vmem:[%s10986_s6 + $0xe90] sm:$0xff]  ;;  %1652 = vst [vmem:[%s10991_s7 + $0x738] sm:$0xff] %v1651_v39 }
  0x90   : > { %1654 = vst [vmem:[%s10991_s7 + $0x740] sm:$0xff] %v1653_v40  ;;  %1656 = vst [vmem:[%s10991_s7 + $0x748] sm:$0xff] %v1655_v41  ;;  %v1657_v42 = vld [vmem:[%s10986_s6 + $0xea0] sm:$0xff]  ;;  %v1659_v43 = vld [vmem:[%s10986_s6 + $0xeb0] sm:$0xff] }
  0x91   : > { %v1661_v44 = vld [vmem:[%s10986_s6 + $0xec0] sm:$0xff]  ;;  %1658 = vst [vmem:[%s10991_s7 + $0x750] sm:$0xff] %v1657_v42  ;;  %1660 = vst [vmem:[%s10991_s7 + $0x758] sm:$0xff] %v1659_v43  ;;  %v1663_v45 = vld [vmem:[%s10986_s6 + $0xed0] sm:$0xff] }
  0x92   : > { %1662 = vst [vmem:[%s10991_s7 + $0x760] sm:$0xff] %v1661_v44  ;;  %v1665_v46 = vld [vmem:[%s10986_s6 + $0xee0] sm:$0xff]  ;;  %v1667_v47 = vld [vmem:[%s10986_s6 + $0xef0] sm:$0xff]  ;;  %1664 = vst [vmem:[%s10991_s7 + $0x768] sm:$0xff] %v1663_v45 }
  0x93   : > { %1666 = vst [vmem:[%s10991_s7 + $0x770] sm:$0xff] %v1665_v46  ;;  %1668 = vst [vmem:[%s10991_s7 + $0x778] sm:$0xff] %v1667_v47  ;;  %v1669_v48 = vld [vmem:[%s10986_s6 + $0xf00] sm:$0xff]  ;;  %v1671_v49 = vld [vmem:[%s10986_s6 + $0xf10] sm:$0xff] }
  0x94   : > { %v1673_v50 = vld [vmem:[%s10986_s6 + $0xf20] sm:$0xff]  ;;  %1670 = vst [vmem:[%s10991_s7 + $0x780] sm:$0xff] %v1669_v48  ;;  %1672 = vst [vmem:[%s10991_s7 + $0x788] sm:$0xff] %v1671_v49  ;;  %v1675_v51 = vld [vmem:[%s10986_s6 + $0xf30] sm:$0xff] }
  0x95   : > { %1674 = vst [vmem:[%s10991_s7 + $0x790] sm:$0xff] %v1673_v50  ;;  %v1677_v52 = vld [vmem:[%s10986_s6 + $0xf40] sm:$0xff]  ;;  %v1679_v53 = vld [vmem:[%s10986_s6 + $0xf50] sm:$0xff]  ;;  %1676 = vst [vmem:[%s10991_s7 + $0x798] sm:$0xff] %v1675_v51 }
  0x96   : > { %1678 = vst [vmem:[%s10991_s7 + $0x7a0] sm:$0xff] %v1677_v52  ;;  %1680 = vst [vmem:[%s10991_s7 + $0x7a8] sm:$0xff] %v1679_v53  ;;  %v1681_v54 = vld [vmem:[%s10986_s6 + $0xf60] sm:$0xff]  ;;  %v1683_v55 = vld [vmem:[%s10986_s6 + $0xf70] sm:$0xff] }
  0x97   : > { %v1685_v56 = vld [vmem:[%s10986_s6 + $0xf80] sm:$0xff]  ;;  %1682 = vst [vmem:[%s10991_s7 + $0x7b0] sm:$0xff] %v1681_v54  ;;  %1684 = vst [vmem:[%s10991_s7 + $0x7b8] sm:$0xff] %v1683_v55  ;;  %v1687_v57 = vld [vmem:[%s10986_s6 + $0xf90] sm:$0xff] }
  0x98   : > { %1686 = vst [vmem:[%s10991_s7 + $0x7c0] sm:$0xff] %v1685_v56  ;;  %v1689_v58 = vld [vmem:[%s10986_s6 + $0xfa0] sm:$0xff]  ;;  %v1691_v59 = vld [vmem:[%s10986_s6 + $0xfb0] sm:$0xff]  ;;  %1688 = vst [vmem:[%s10991_s7 + $0x7c8] sm:$0xff] %v1687_v57 }
  0x99   : > { %1690 = vst [vmem:[%s10991_s7 + $0x7d0] sm:$0xff] %v1689_v58  ;;  %1692 = vst [vmem:[%s10991_s7 + $0x7d8] sm:$0xff] %v1691_v59  ;;  %v1693_v60 = vld [vmem:[%s10986_s6 + $0xfc0] sm:$0xff]  ;;  %v1695_v61 = vld [vmem:[%s10986_s6 + $0xfd0] sm:$0xff] }
  0x9a   : > { %v1697_v62 = vld [vmem:[%s10986_s6 + $0xfe0] sm:$0xff]  ;;  %1694 = vst [vmem:[%s10991_s7 + $0x7e0] sm:$0xff] %v1693_v60  ;;  %1696 = vst [vmem:[%s10991_s7 + $0x7e8] sm:$0xff] %v1695_v61  ;;  %v1699_v63 = vld [vmem:[%s10986_s6 + $0xff0] sm:$0xff] }
  0x9b   : > { %1698 = vst [vmem:[%s10991_s7 + $0x7f0] sm:$0xff] %v1697_v62  ;;  %v1701_v0 = vld [vmem:[%s10986_s6 + $0x1000] sm:$0xff]  ;;  %v1703_v1 = vld [vmem:[%s10986_s6 + $0x1010] sm:$0xff]  ;;  %1700 = vst [vmem:[%s10991_s7 + $0x7f8] sm:$0xff] %v1699_v63 }
  0x9c   : > { %1702 = vst [vmem:[%s10991_s7 + $0x800] sm:$0xff] %v1701_v0  ;;  %1704 = vst [vmem:[%s10991_s7 + $0x808] sm:$0xff] %v1703_v1  ;;  %v1705_v2 = vld [vmem:[%s10986_s6 + $0x1020] sm:$0xff]  ;;  %v1707_v3 = vld [vmem:[%s10986_s6 + $0x1030] sm:$0xff] }
  0x9d   : > { %v1709_v4 = vld [vmem:[%s10986_s6 + $0x1040] sm:$0xff]  ;;  %1706 = vst [vmem:[%s10991_s7 + $0x810] sm:$0xff] %v1705_v2  ;;  %1708 = vst [vmem:[%s10991_s7 + $0x818] sm:$0xff] %v1707_v3  ;;  %v1711_v5 = vld [vmem:[%s10986_s6 + $0x1050] sm:$0xff] }
  0x9e   : > { %1710 = vst [vmem:[%s10991_s7 + $0x820] sm:$0xff] %v1709_v4  ;;  %v1713_v6 = vld [vmem:[%s10986_s6 + $0x1060] sm:$0xff]  ;;  %v1715_v7 = vld [vmem:[%s10986_s6 + $0x1070] sm:$0xff]  ;;  %1712 = vst [vmem:[%s10991_s7 + $0x828] sm:$0xff] %v1711_v5 }
  0x9f   : > { %1714 = vst [vmem:[%s10991_s7 + $0x830] sm:$0xff] %v1713_v6  ;;  %1716 = vst [vmem:[%s10991_s7 + $0x838] sm:$0xff] %v1715_v7  ;;  %v1717_v8 = vld [vmem:[%s10986_s6 + $0x1080] sm:$0xff]  ;;  %v1719_v9 = vld [vmem:[%s10986_s6 + $0x1090] sm:$0xff] }
  0xa0   : > { %v1721_v10 = vld [vmem:[%s10986_s6 + $0x10a0] sm:$0xff]  ;;  %1718 = vst [vmem:[%s10991_s7 + $0x840] sm:$0xff] %v1717_v8  ;;  %1720 = vst [vmem:[%s10991_s7 + $0x848] sm:$0xff] %v1719_v9  ;;  %v1723_v11 = vld [vmem:[%s10986_s6 + $0x10b0] sm:$0xff] }
  0xa1   : > { %1722 = vst [vmem:[%s10991_s7 + $0x850] sm:$0xff] %v1721_v10  ;;  %v1725_v12 = vld [vmem:[%s10986_s6 + $0x10c0] sm:$0xff]  ;;  %v1727_v13 = vld [vmem:[%s10986_s6 + $0x10d0] sm:$0xff]  ;;  %1724 = vst [vmem:[%s10991_s7 + $0x858] sm:$0xff] %v1723_v11 }
  0xa2   : > { %1726 = vst [vmem:[%s10991_s7 + $0x860] sm:$0xff] %v1725_v12  ;;  %1728 = vst [vmem:[%s10991_s7 + $0x868] sm:$0xff] %v1727_v13  ;;  %v1729_v14 = vld [vmem:[%s10986_s6 + $0x10e0] sm:$0xff]  ;;  %v1731_v15 = vld [vmem:[%s10986_s6 + $0x10f0] sm:$0xff] }
  0xa3   : > { %v1733_v16 = vld [vmem:[%s10986_s6 + $0x1100] sm:$0xff]  ;;  %1730 = vst [vmem:[%s10991_s7 + $0x870] sm:$0xff] %v1729_v14  ;;  %1732 = vst [vmem:[%s10991_s7 + $0x878] sm:$0xff] %v1731_v15  ;;  %v1735_v17 = vld [vmem:[%s10986_s6 + $0x1110] sm:$0xff] }
  0xa4   : > { %1734 = vst [vmem:[%s10991_s7 + $0x880] sm:$0xff] %v1733_v16  ;;  %v1737_v18 = vld [vmem:[%s10986_s6 + $0x1120] sm:$0xff]  ;;  %v1739_v19 = vld [vmem:[%s10986_s6 + $0x1130] sm:$0xff]  ;;  %1736 = vst [vmem:[%s10991_s7 + $0x888] sm:$0xff] %v1735_v17 }
  0xa5   : > { %1738 = vst [vmem:[%s10991_s7 + $0x890] sm:$0xff] %v1737_v18  ;;  %1740 = vst [vmem:[%s10991_s7 + $0x898] sm:$0xff] %v1739_v19  ;;  %v1741_v20 = vld [vmem:[%s10986_s6 + $0x1140] sm:$0xff]  ;;  %v1743_v21 = vld [vmem:[%s10986_s6 + $0x1150] sm:$0xff] }
  0xa6   : > { %v1745_v22 = vld [vmem:[%s10986_s6 + $0x1160] sm:$0xff]  ;;  %1742 = vst [vmem:[%s10991_s7 + $0x8a0] sm:$0xff] %v1741_v20  ;;  %1744 = vst [vmem:[%s10991_s7 + $0x8a8] sm:$0xff] %v1743_v21  ;;  %v1747_v23 = vld [vmem:[%s10986_s6 + $0x1170] sm:$0xff] }
  0xa7   : > { %1746 = vst [vmem:[%s10991_s7 + $0x8b0] sm:$0xff] %v1745_v22  ;;  %v1749_v24 = vld [vmem:[%s10986_s6 + $0x1180] sm:$0xff]  ;;  %v1751_v25 = vld [vmem:[%s10986_s6 + $0x1190] sm:$0xff]  ;;  %1748 = vst [vmem:[%s10991_s7 + $0x8b8] sm:$0xff] %v1747_v23 }
  0xa8   : > { %1750 = vst [vmem:[%s10991_s7 + $0x8c0] sm:$0xff] %v1749_v24  ;;  %1752 = vst [vmem:[%s10991_s7 + $0x8c8] sm:$0xff] %v1751_v25  ;;  %v1753_v26 = vld [vmem:[%s10986_s6 + $0x11a0] sm:$0xff]  ;;  %v1755_v27 = vld [vmem:[%s10986_s6 + $0x11b0] sm:$0xff] }
  0xa9   : > { %v1757_v28 = vld [vmem:[%s10986_s6 + $0x11c0] sm:$0xff]  ;;  %1754 = vst [vmem:[%s10991_s7 + $0x8d0] sm:$0xff] %v1753_v26  ;;  %1756 = vst [vmem:[%s10991_s7 + $0x8d8] sm:$0xff] %v1755_v27  ;;  %v1759_v29 = vld [vmem:[%s10986_s6 + $0x11d0] sm:$0xff] }
  0xaa   : > { %1758 = vst [vmem:[%s10991_s7 + $0x8e0] sm:$0xff] %v1757_v28  ;;  %v1761_v30 = vld [vmem:[%s10986_s6 + $0x11e0] sm:$0xff]  ;;  %v1763_v31 = vld [vmem:[%s10986_s6 + $0x11f0] sm:$0xff]  ;;  %1760 = vst [vmem:[%s10991_s7 + $0x8e8] sm:$0xff] %v1759_v29 }
  0xab   : > { %1762 = vst [vmem:[%s10991_s7 + $0x8f0] sm:$0xff] %v1761_v30  ;;  %1764 = vst [vmem:[%s10991_s7 + $0x8f8] sm:$0xff] %v1763_v31  ;;  %v1765_v32 = vld [vmem:[%s10986_s6 + $0x1200] sm:$0xff]  ;;  %v1767_v33 = vld [vmem:[%s10986_s6 + $0x1210] sm:$0xff] }
  0xac   : > { %v1769_v34 = vld [vmem:[%s10986_s6 + $0x1220] sm:$0xff]  ;;  %1766 = vst [vmem:[%s10991_s7 + $0x900] sm:$0xff] %v1765_v32  ;;  %1768 = vst [vmem:[%s10991_s7 + $0x908] sm:$0xff] %v1767_v33  ;;  %v1771_v35 = vld [vmem:[%s10986_s6 + $0x1230] sm:$0xff] }
  0xad   : > { %1770 = vst [vmem:[%s10991_s7 + $0x910] sm:$0xff] %v1769_v34  ;;  %v1773_v36 = vld [vmem:[%s10986_s6 + $0x1240] sm:$0xff]  ;;  %v1775_v37 = vld [vmem:[%s10986_s6 + $0x1250] sm:$0xff]  ;;  %1772 = vst [vmem:[%s10991_s7 + $0x918] sm:$0xff] %v1771_v35 }
  0xae   : > { %1774 = vst [vmem:[%s10991_s7 + $0x920] sm:$0xff] %v1773_v36  ;;  %1776 = vst [vmem:[%s10991_s7 + $0x928] sm:$0xff] %v1775_v37  ;;  %v1777_v38 = vld [vmem:[%s10986_s6 + $0x1260] sm:$0xff]  ;;  %v1779_v39 = vld [vmem:[%s10986_s6 + $0x1270] sm:$0xff] }
  0xaf   : > { %v1781_v40 = vld [vmem:[%s10986_s6 + $0x1280] sm:$0xff]  ;;  %1778 = vst [vmem:[%s10991_s7 + $0x930] sm:$0xff] %v1777_v38  ;;  %1780 = vst [vmem:[%s10991_s7 + $0x938] sm:$0xff] %v1779_v39  ;;  %v1783_v41 = vld [vmem:[%s10986_s6 + $0x1290] sm:$0xff] }
  0xb0   : > { %1782 = vst [vmem:[%s10991_s7 + $0x940] sm:$0xff] %v1781_v40  ;;  %v1785_v42 = vld [vmem:[%s10986_s6 + $0x12a0] sm:$0xff]  ;;  %v1787_v43 = vld [vmem:[%s10986_s6 + $0x12b0] sm:$0xff]  ;;  %1784 = vst [vmem:[%s10991_s7 + $0x948] sm:$0xff] %v1783_v41 }
  0xb1   : > { %1786 = vst [vmem:[%s10991_s7 + $0x950] sm:$0xff] %v1785_v42  ;;  %1788 = vst [vmem:[%s10991_s7 + $0x958] sm:$0xff] %v1787_v43  ;;  %v1789_v44 = vld [vmem:[%s10986_s6 + $0x12c0] sm:$0xff]  ;;  %v1791_v45 = vld [vmem:[%s10986_s6 + $0x12d0] sm:$0xff] }
  0xb2   : > { %v1793_v46 = vld [vmem:[%s10986_s6 + $0x12e0] sm:$0xff]  ;;  %1790 = vst [vmem:[%s10991_s7 + $0x960] sm:$0xff] %v1789_v44  ;;  %1792 = vst [vmem:[%s10991_s7 + $0x968] sm:$0xff] %v1791_v45  ;;  %v1795_v47 = vld [vmem:[%s10986_s6 + $0x12f0] sm:$0xff] }
  0xb3   : > { %1794 = vst [vmem:[%s10991_s7 + $0x970] sm:$0xff] %v1793_v46  ;;  %v1797_v48 = vld [vmem:[%s10986_s6 + $0x1300] sm:$0xff]  ;;  %v1799_v49 = vld [vmem:[%s10986_s6 + $0x1310] sm:$0xff]  ;;  %1796 = vst [vmem:[%s10991_s7 + $0x978] sm:$0xff] %v1795_v47 }
  0xb4   : > { %1798 = vst [vmem:[%s10991_s7 + $0x980] sm:$0xff] %v1797_v48  ;;  %1800 = vst [vmem:[%s10991_s7 + $0x988] sm:$0xff] %v1799_v49  ;;  %v1801_v50 = vld [vmem:[%s10986_s6 + $0x1320] sm:$0xff]  ;;  %v1803_v51 = vld [vmem:[%s10986_s6 + $0x1330] sm:$0xff] }
  0xb5   : > { %v1805_v52 = vld [vmem:[%s10986_s6 + $0x1340] sm:$0xff]  ;;  %1802 = vst [vmem:[%s10991_s7 + $0x990] sm:$0xff] %v1801_v50  ;;  %1804 = vst [vmem:[%s10991_s7 + $0x998] sm:$0xff] %v1803_v51  ;;  %v1807_v53 = vld [vmem:[%s10986_s6 + $0x1350] sm:$0xff] }
  0xb6   : > { %1806 = vst [vmem:[%s10991_s7 + $0x9a0] sm:$0xff] %v1805_v52  ;;  %v1809_v54 = vld [vmem:[%s10986_s6 + $0x1360] sm:$0xff]  ;;  %v1811_v55 = vld [vmem:[%s10986_s6 + $0x1370] sm:$0xff]  ;;  %1808 = vst [vmem:[%s10991_s7 + $0x9a8] sm:$0xff] %v1807_v53 }
  0xb7   : > { %1810 = vst [vmem:[%s10991_s7 + $0x9b0] sm:$0xff] %v1809_v54  ;;  %1812 = vst [vmem:[%s10991_s7 + $0x9b8] sm:$0xff] %v1811_v55  ;;  %v1813_v56 = vld [vmem:[%s10986_s6 + $0x1380] sm:$0xff]  ;;  %v1815_v57 = vld [vmem:[%s10986_s6 + $0x1390] sm:$0xff] }
  0xb8   : > { %v1817_v58 = vld [vmem:[%s10986_s6 + $0x13a0] sm:$0xff]  ;;  %1814 = vst [vmem:[%s10991_s7 + $0x9c0] sm:$0xff] %v1813_v56  ;;  %1816 = vst [vmem:[%s10991_s7 + $0x9c8] sm:$0xff] %v1815_v57  ;;  %v1819_v59 = vld [vmem:[%s10986_s6 + $0x13b0] sm:$0xff] }
  0xb9   : > { %1818 = vst [vmem:[%s10991_s7 + $0x9d0] sm:$0xff] %v1817_v58  ;;  %v1821_v60 = vld [vmem:[%s10986_s6 + $0x13c0] sm:$0xff]  ;;  %v1823_v61 = vld [vmem:[%s10986_s6 + $0x13d0] sm:$0xff]  ;;  %1820 = vst [vmem:[%s10991_s7 + $0x9d8] sm:$0xff] %v1819_v59 }
  0xba   : > { %1822 = vst [vmem:[%s10991_s7 + $0x9e0] sm:$0xff] %v1821_v60  ;;  %1824 = vst [vmem:[%s10991_s7 + $0x9e8] sm:$0xff] %v1823_v61  ;;  %v1825_v62 = vld [vmem:[%s10986_s6 + $0x13e0] sm:$0xff]  ;;  %v1827_v63 = vld [vmem:[%s10986_s6 + $0x13f0] sm:$0xff] }
  0xbb   : > { %v1829_v0 = vld [vmem:[%s10986_s6 + $0x1400] sm:$0xff]  ;;  %1826 = vst [vmem:[%s10991_s7 + $0x9f0] sm:$0xff] %v1825_v62  ;;  %1828 = vst [vmem:[%s10991_s7 + $0x9f8] sm:$0xff] %v1827_v63  ;;  %v1831_v1 = vld [vmem:[%s10986_s6 + $0x1410] sm:$0xff] }
  0xbc   : > { %1830 = vst [vmem:[%s10991_s7 + $0xa00] sm:$0xff] %v1829_v0  ;;  %v1833_v2 = vld [vmem:[%s10986_s6 + $0x1420] sm:$0xff]  ;;  %v1835_v3 = vld [vmem:[%s10986_s6 + $0x1430] sm:$0xff]  ;;  %1832 = vst [vmem:[%s10991_s7 + $0xa08] sm:$0xff] %v1831_v1 }
  0xbd   : > { %1834 = vst [vmem:[%s10991_s7 + $0xa10] sm:$0xff] %v1833_v2  ;;  %1836 = vst [vmem:[%s10991_s7 + $0xa18] sm:$0xff] %v1835_v3  ;;  %v1837_v4 = vld [vmem:[%s10986_s6 + $0x1440] sm:$0xff]  ;;  %v1839_v5 = vld [vmem:[%s10986_s6 + $0x1450] sm:$0xff] }
  0xbe   : > { %v1841_v6 = vld [vmem:[%s10986_s6 + $0x1460] sm:$0xff]  ;;  %1838 = vst [vmem:[%s10991_s7 + $0xa20] sm:$0xff] %v1837_v4  ;;  %1840 = vst [vmem:[%s10991_s7 + $0xa28] sm:$0xff] %v1839_v5  ;;  %v1843_v7 = vld [vmem:[%s10986_s6 + $0x1470] sm:$0xff] }
  0xbf   : > { %1842 = vst [vmem:[%s10991_s7 + $0xa30] sm:$0xff] %v1841_v6  ;;  %v1845_v8 = vld [vmem:[%s10986_s6 + $0x1480] sm:$0xff]  ;;  %v1847_v9 = vld [vmem:[%s10986_s6 + $0x1490] sm:$0xff]  ;;  %1844 = vst [vmem:[%s10991_s7 + $0xa38] sm:$0xff] %v1843_v7 }
  0xc0   : > { %1846 = vst [vmem:[%s10991_s7 + $0xa40] sm:$0xff] %v1845_v8  ;;  %1848 = vst [vmem:[%s10991_s7 + $0xa48] sm:$0xff] %v1847_v9  ;;  %v1849_v10 = vld [vmem:[%s10986_s6 + $0x14a0] sm:$0xff]  ;;  %v1851_v11 = vld [vmem:[%s10986_s6 + $0x14b0] sm:$0xff] }
  0xc1   : > { %v1853_v12 = vld [vmem:[%s10986_s6 + $0x14c0] sm:$0xff]  ;;  %1850 = vst [vmem:[%s10991_s7 + $0xa50] sm:$0xff] %v1849_v10  ;;  %1852 = vst [vmem:[%s10991_s7 + $0xa58] sm:$0xff] %v1851_v11  ;;  %v1855_v13 = vld [vmem:[%s10986_s6 + $0x14d0] sm:$0xff] }
  0xc2   : > { %1854 = vst [vmem:[%s10991_s7 + $0xa60] sm:$0xff] %v1853_v12  ;;  %v1857_v14 = vld [vmem:[%s10986_s6 + $0x14e0] sm:$0xff]  ;;  %v1859_v15 = vld [vmem:[%s10986_s6 + $0x14f0] sm:$0xff]  ;;  %1856 = vst [vmem:[%s10991_s7 + $0xa68] sm:$0xff] %v1855_v13 }
  0xc3   : > { %1858 = vst [vmem:[%s10991_s7 + $0xa70] sm:$0xff] %v1857_v14  ;;  %1860 = vst [vmem:[%s10991_s7 + $0xa78] sm:$0xff] %v1859_v15  ;;  %v1861_v16 = vld [vmem:[%s10986_s6 + $0x1500] sm:$0xff]  ;;  %v1863_v17 = vld [vmem:[%s10986_s6 + $0x1510] sm:$0xff] }
  0xc4   : > { %v1865_v18 = vld [vmem:[%s10986_s6 + $0x1520] sm:$0xff]  ;;  %1862 = vst [vmem:[%s10991_s7 + $0xa80] sm:$0xff] %v1861_v16  ;;  %1864 = vst [vmem:[%s10991_s7 + $0xa88] sm:$0xff] %v1863_v17  ;;  %v1867_v19 = vld [vmem:[%s10986_s6 + $0x1530] sm:$0xff] }
  0xc5   : > { %1866 = vst [vmem:[%s10991_s7 + $0xa90] sm:$0xff] %v1865_v18  ;;  %v1869_v20 = vld [vmem:[%s10986_s6 + $0x1540] sm:$0xff]  ;;  %v1871_v21 = vld [vmem:[%s10986_s6 + $0x1550] sm:$0xff]  ;;  %1868 = vst [vmem:[%s10991_s7 + $0xa98] sm:$0xff] %v1867_v19 }
  0xc6   : > { %1870 = vst [vmem:[%s10991_s7 + $0xaa0] sm:$0xff] %v1869_v20  ;;  %1872 = vst [vmem:[%s10991_s7 + $0xaa8] sm:$0xff] %v1871_v21  ;;  %v1873_v22 = vld [vmem:[%s10986_s6 + $0x1560] sm:$0xff]  ;;  %v1875_v23 = vld [vmem:[%s10986_s6 + $0x1570] sm:$0xff] }
  0xc7   : > { %v1877_v24 = vld [vmem:[%s10986_s6 + $0x1580] sm:$0xff]  ;;  %1874 = vst [vmem:[%s10991_s7 + $0xab0] sm:$0xff] %v1873_v22  ;;  %1876 = vst [vmem:[%s10991_s7 + $0xab8] sm:$0xff] %v1875_v23  ;;  %v1879_v25 = vld [vmem:[%s10986_s6 + $0x1590] sm:$0xff] }
  0xc8   : > { %1878 = vst [vmem:[%s10991_s7 + $0xac0] sm:$0xff] %v1877_v24  ;;  %v1881_v26 = vld [vmem:[%s10986_s6 + $0x15a0] sm:$0xff]  ;;  %v1883_v27 = vld [vmem:[%s10986_s6 + $0x15b0] sm:$0xff]  ;;  %1880 = vst [vmem:[%s10991_s7 + $0xac8] sm:$0xff] %v1879_v25 }
  0xc9   : > { %1882 = vst [vmem:[%s10991_s7 + $0xad0] sm:$0xff] %v1881_v26  ;;  %1884 = vst [vmem:[%s10991_s7 + $0xad8] sm:$0xff] %v1883_v27  ;;  %v1885_v28 = vld [vmem:[%s10986_s6 + $0x15c0] sm:$0xff]  ;;  %v1887_v29 = vld [vmem:[%s10986_s6 + $0x15d0] sm:$0xff] }
  0xca   : > { %v1889_v30 = vld [vmem:[%s10986_s6 + $0x15e0] sm:$0xff]  ;;  %1886 = vst [vmem:[%s10991_s7 + $0xae0] sm:$0xff] %v1885_v28  ;;  %1888 = vst [vmem:[%s10991_s7 + $0xae8] sm:$0xff] %v1887_v29  ;;  %v1891_v31 = vld [vmem:[%s10986_s6 + $0x15f0] sm:$0xff] }
  0xcb   : > { %1890 = vst [vmem:[%s10991_s7 + $0xaf0] sm:$0xff] %v1889_v30  ;;  %v1893_v32 = vld [vmem:[%s10986_s6 + $0x1600] sm:$0xff]  ;;  %v1895_v33 = vld [vmem:[%s10986_s6 + $0x1610] sm:$0xff]  ;;  %1892 = vst [vmem:[%s10991_s7 + $0xaf8] sm:$0xff] %v1891_v31 }
  0xcc   : > { %1894 = vst [vmem:[%s10991_s7 + $0xb00] sm:$0xff] %v1893_v32  ;;  %1896 = vst [vmem:[%s10991_s7 + $0xb08] sm:$0xff] %v1895_v33  ;;  %v1897_v34 = vld [vmem:[%s10986_s6 + $0x1620] sm:$0xff]  ;;  %v1899_v35 = vld [vmem:[%s10986_s6 + $0x1630] sm:$0xff] }
  0xcd   : > { %v1901_v36 = vld [vmem:[%s10986_s6 + $0x1640] sm:$0xff]  ;;  %1898 = vst [vmem:[%s10991_s7 + $0xb10] sm:$0xff] %v1897_v34  ;;  %1900 = vst [vmem:[%s10991_s7 + $0xb18] sm:$0xff] %v1899_v35  ;;  %v1903_v37 = vld [vmem:[%s10986_s6 + $0x1650] sm:$0xff] }
  0xce   : > { %1902 = vst [vmem:[%s10991_s7 + $0xb20] sm:$0xff] %v1901_v36  ;;  %v1905_v38 = vld [vmem:[%s10986_s6 + $0x1660] sm:$0xff]  ;;  %v1907_v39 = vld [vmem:[%s10986_s6 + $0x1670] sm:$0xff]  ;;  %1904 = vst [vmem:[%s10991_s7 + $0xb28] sm:$0xff] %v1903_v37 }
  0xcf   : > { %1906 = vst [vmem:[%s10991_s7 + $0xb30] sm:$0xff] %v1905_v38  ;;  %1908 = vst [vmem:[%s10991_s7 + $0xb38] sm:$0xff] %v1907_v39  ;;  %v1909_v40 = vld [vmem:[%s10986_s6 + $0x1680] sm:$0xff]  ;;  %v1911_v41 = vld [vmem:[%s10986_s6 + $0x1690] sm:$0xff] }
  0xd0   : > { %v1913_v42 = vld [vmem:[%s10986_s6 + $0x16a0] sm:$0xff]  ;;  %1910 = vst [vmem:[%s10991_s7 + $0xb40] sm:$0xff] %v1909_v40  ;;  %1912 = vst [vmem:[%s10991_s7 + $0xb48] sm:$0xff] %v1911_v41  ;;  %v1915_v43 = vld [vmem:[%s10986_s6 + $0x16b0] sm:$0xff] }
  0xd1   : > { %1914 = vst [vmem:[%s10991_s7 + $0xb50] sm:$0xff] %v1913_v42  ;;  %v1917_v44 = vld [vmem:[%s10986_s6 + $0x16c0] sm:$0xff]  ;;  %v1919_v45 = vld [vmem:[%s10986_s6 + $0x16d0] sm:$0xff]  ;;  %1916 = vst [vmem:[%s10991_s7 + $0xb58] sm:$0xff] %v1915_v43 }
  0xd2   : > { %1918 = vst [vmem:[%s10991_s7 + $0xb60] sm:$0xff] %v1917_v44  ;;  %1920 = vst [vmem:[%s10991_s7 + $0xb68] sm:$0xff] %v1919_v45  ;;  %v1921_v46 = vld [vmem:[%s10986_s6 + $0x16e0] sm:$0xff]  ;;  %v1923_v47 = vld [vmem:[%s10986_s6 + $0x16f0] sm:$0xff] }
  0xd3   : > { %v1925_v48 = vld [vmem:[%s10986_s6 + $0x1700] sm:$0xff]  ;;  %1922 = vst [vmem:[%s10991_s7 + $0xb70] sm:$0xff] %v1921_v46  ;;  %1924 = vst [vmem:[%s10991_s7 + $0xb78] sm:$0xff] %v1923_v47  ;;  %v1927_v49 = vld [vmem:[%s10986_s6 + $0x1710] sm:$0xff] }
  0xd4   : > { %1926 = vst [vmem:[%s10991_s7 + $0xb80] sm:$0xff] %v1925_v48  ;;  %v1929_v50 = vld [vmem:[%s10986_s6 + $0x1720] sm:$0xff]  ;;  %v1931_v51 = vld [vmem:[%s10986_s6 + $0x1730] sm:$0xff]  ;;  %1928 = vst [vmem:[%s10991_s7 + $0xb88] sm:$0xff] %v1927_v49 }
  0xd5   : > { %1930 = vst [vmem:[%s10991_s7 + $0xb90] sm:$0xff] %v1929_v50  ;;  %1932 = vst [vmem:[%s10991_s7 + $0xb98] sm:$0xff] %v1931_v51  ;;  %v1933_v52 = vld [vmem:[%s10986_s6 + $0x1740] sm:$0xff]  ;;  %v1935_v53 = vld [vmem:[%s10986_s6 + $0x1750] sm:$0xff] }
  0xd6   : > { %v1937_v54 = vld [vmem:[%s10986_s6 + $0x1760] sm:$0xff]  ;;  %1934 = vst [vmem:[%s10991_s7 + $0xba0] sm:$0xff] %v1933_v52  ;;  %1936 = vst [vmem:[%s10991_s7 + $0xba8] sm:$0xff] %v1935_v53  ;;  %v1939_v55 = vld [vmem:[%s10986_s6 + $0x1770] sm:$0xff] }
  0xd7   : > { %1938 = vst [vmem:[%s10991_s7 + $0xbb0] sm:$0xff] %v1937_v54  ;;  %v1941_v56 = vld [vmem:[%s10986_s6 + $0x1780] sm:$0xff]  ;;  %v1943_v57 = vld [vmem:[%s10986_s6 + $0x1790] sm:$0xff]  ;;  %1940 = vst [vmem:[%s10991_s7 + $0xbb8] sm:$0xff] %v1939_v55 }
  0xd8   : > { %1942 = vst [vmem:[%s10991_s7 + $0xbc0] sm:$0xff] %v1941_v56  ;;  %1944 = vst [vmem:[%s10991_s7 + $0xbc8] sm:$0xff] %v1943_v57  ;;  %v1945_v58 = vld [vmem:[%s10986_s6 + $0x17a0] sm:$0xff]  ;;  %v1947_v59 = vld [vmem:[%s10986_s6 + $0x17b0] sm:$0xff] }
  0xd9   : > { %v1949_v60 = vld [vmem:[%s10986_s6 + $0x17c0] sm:$0xff]  ;;  %1946 = vst [vmem:[%s10991_s7 + $0xbd0] sm:$0xff] %v1945_v58  ;;  %1948 = vst [vmem:[%s10991_s7 + $0xbd8] sm:$0xff] %v1947_v59  ;;  %v1951_v61 = vld [vmem:[%s10986_s6 + $0x17d0] sm:$0xff] }
  0xda   : > { %1950 = vst [vmem:[%s10991_s7 + $0xbe0] sm:$0xff] %v1949_v60  ;;  %v1953_v62 = vld [vmem:[%s10986_s6 + $0x17e0] sm:$0xff]  ;;  %v1955_v63 = vld [vmem:[%s10986_s6 + $0x17f0] sm:$0xff]  ;;  %1952 = vst [vmem:[%s10991_s7 + $0xbe8] sm:$0xff] %v1951_v61 }
  0xdb   : > { %1954 = vst [vmem:[%s10991_s7 + $0xbf0] sm:$0xff] %v1953_v62  ;;  %1956 = vst [vmem:[%s10991_s7 + $0xbf8] sm:$0xff] %v1955_v63  ;;  %v1957_v0 = vld [vmem:[%s10986_s6 + $0x1800] sm:$0xff]  ;;  %v1959_v1 = vld [vmem:[%s10986_s6 + $0x1810] sm:$0xff] }
  0xdc   : > { %v1961_v2 = vld [vmem:[%s10986_s6 + $0x1820] sm:$0xff]  ;;  %1958 = vst [vmem:[%s10991_s7 + $0xc00] sm:$0xff] %v1957_v0  ;;  %1960 = vst [vmem:[%s10991_s7 + $0xc08] sm:$0xff] %v1959_v1  ;;  %v1963_v3 = vld [vmem:[%s10986_s6 + $0x1830] sm:$0xff] }
  0xdd   : > { %1962 = vst [vmem:[%s10991_s7 + $0xc10] sm:$0xff] %v1961_v2  ;;  %v1965_v4 = vld [vmem:[%s10986_s6 + $0x1840] sm:$0xff]  ;;  %v1967_v5 = vld [vmem:[%s10986_s6 + $0x1850] sm:$0xff]  ;;  %1964 = vst [vmem:[%s10991_s7 + $0xc18] sm:$0xff] %v1963_v3 }
  0xde   : > { %1966 = vst [vmem:[%s10991_s7 + $0xc20] sm:$0xff] %v1965_v4  ;;  %1968 = vst [vmem:[%s10991_s7 + $0xc28] sm:$0xff] %v1967_v5  ;;  %v1969_v6 = vld [vmem:[%s10986_s6 + $0x1860] sm:$0xff]  ;;  %v1971_v7 = vld [vmem:[%s10986_s6 + $0x1870] sm:$0xff] }
  0xdf   : > { %v1973_v8 = vld [vmem:[%s10986_s6 + $0x1880] sm:$0xff]  ;;  %1970 = vst [vmem:[%s10991_s7 + $0xc30] sm:$0xff] %v1969_v6  ;;  %1972 = vst [vmem:[%s10991_s7 + $0xc38] sm:$0xff] %v1971_v7  ;;  %v1975_v9 = vld [vmem:[%s10986_s6 + $0x1890] sm:$0xff] }
  0xe0   : > { %1974 = vst [vmem:[%s10991_s7 + $0xc40] sm:$0xff] %v1973_v8  ;;  %v1977_v10 = vld [vmem:[%s10986_s6 + $0x18a0] sm:$0xff]  ;;  %v1979_v11 = vld [vmem:[%s10986_s6 + $0x18b0] sm:$0xff]  ;;  %1976 = vst [vmem:[%s10991_s7 + $0xc48] sm:$0xff] %v1975_v9 }
  0xe1   : > { %1978 = vst [vmem:[%s10991_s7 + $0xc50] sm:$0xff] %v1977_v10  ;;  %1980 = vst [vmem:[%s10991_s7 + $0xc58] sm:$0xff] %v1979_v11  ;;  %v1981_v12 = vld [vmem:[%s10986_s6 + $0x18c0] sm:$0xff]  ;;  %v1983_v13 = vld [vmem:[%s10986_s6 + $0x18d0] sm:$0xff] }
  0xe2   : > { %v1985_v14 = vld [vmem:[%s10986_s6 + $0x18e0] sm:$0xff]  ;;  %1982 = vst [vmem:[%s10991_s7 + $0xc60] sm:$0xff] %v1981_v12  ;;  %1984 = vst [vmem:[%s10991_s7 + $0xc68] sm:$0xff] %v1983_v13  ;;  %v1987_v15 = vld [vmem:[%s10986_s6 + $0x18f0] sm:$0xff] }
  0xe3   : > { %1986 = vst [vmem:[%s10991_s7 + $0xc70] sm:$0xff] %v1985_v14  ;;  %v1989_v16 = vld [vmem:[%s10986_s6 + $0x1900] sm:$0xff]  ;;  %v1991_v17 = vld [vmem:[%s10986_s6 + $0x1910] sm:$0xff]  ;;  %1988 = vst [vmem:[%s10991_s7 + $0xc78] sm:$0xff] %v1987_v15 }
  0xe4   : > { %1990 = vst [vmem:[%s10991_s7 + $0xc80] sm:$0xff] %v1989_v16  ;;  %1992 = vst [vmem:[%s10991_s7 + $0xc88] sm:$0xff] %v1991_v17  ;;  %v1993_v18 = vld [vmem:[%s10986_s6 + $0x1920] sm:$0xff]  ;;  %v1995_v19 = vld [vmem:[%s10986_s6 + $0x1930] sm:$0xff] }
  0xe5   : > { %v1997_v20 = vld [vmem:[%s10986_s6 + $0x1940] sm:$0xff]  ;;  %1994 = vst [vmem:[%s10991_s7 + $0xc90] sm:$0xff] %v1993_v18  ;;  %1996 = vst [vmem:[%s10991_s7 + $0xc98] sm:$0xff] %v1995_v19  ;;  %v1999_v21 = vld [vmem:[%s10986_s6 + $0x1950] sm:$0xff] }
  0xe6   : > { %1998 = vst [vmem:[%s10991_s7 + $0xca0] sm:$0xff] %v1997_v20  ;;  %v2001_v22 = vld [vmem:[%s10986_s6 + $0x1960] sm:$0xff]  ;;  %v2003_v23 = vld [vmem:[%s10986_s6 + $0x1970] sm:$0xff]  ;;  %2000 = vst [vmem:[%s10991_s7 + $0xca8] sm:$0xff] %v1999_v21 }
  0xe7   : > { %2002 = vst [vmem:[%s10991_s7 + $0xcb0] sm:$0xff] %v2001_v22  ;;  %2004 = vst [vmem:[%s10991_s7 + $0xcb8] sm:$0xff] %v2003_v23  ;;  %v2005_v24 = vld [vmem:[%s10986_s6 + $0x1980] sm:$0xff]  ;;  %v2007_v25 = vld [vmem:[%s10986_s6 + $0x1990] sm:$0xff] }
  0xe8   : > { %v2009_v26 = vld [vmem:[%s10986_s6 + $0x19a0] sm:$0xff]  ;;  %2006 = vst [vmem:[%s10991_s7 + $0xcc0] sm:$0xff] %v2005_v24  ;;  %2008 = vst [vmem:[%s10991_s7 + $0xcc8] sm:$0xff] %v2007_v25  ;;  %v2011_v27 = vld [vmem:[%s10986_s6 + $0x19b0] sm:$0xff] }
  0xe9   : > { %2010 = vst [vmem:[%s10991_s7 + $0xcd0] sm:$0xff] %v2009_v26  ;;  %v2013_v28 = vld [vmem:[%s10986_s6 + $0x19c0] sm:$0xff]  ;;  %v2015_v29 = vld [vmem:[%s10986_s6 + $0x19d0] sm:$0xff]  ;;  %2012 = vst [vmem:[%s10991_s7 + $0xcd8] sm:$0xff] %v2011_v27 }
  0xea   : > { %2014 = vst [vmem:[%s10991_s7 + $0xce0] sm:$0xff] %v2013_v28  ;;  %2016 = vst [vmem:[%s10991_s7 + $0xce8] sm:$0xff] %v2015_v29  ;;  %v2017_v30 = vld [vmem:[%s10986_s6 + $0x19e0] sm:$0xff]  ;;  %v2019_v31 = vld [vmem:[%s10986_s6 + $0x19f0] sm:$0xff] }
  0xeb   : > { %v2021_v32 = vld [vmem:[%s10986_s6 + $0x1a00] sm:$0xff]  ;;  %2018 = vst [vmem:[%s10991_s7 + $0xcf0] sm:$0xff] %v2017_v30  ;;  %2020 = vst [vmem:[%s10991_s7 + $0xcf8] sm:$0xff] %v2019_v31  ;;  %v2023_v33 = vld [vmem:[%s10986_s6 + $0x1a10] sm:$0xff] }
  0xec   : > { %2022 = vst [vmem:[%s10991_s7 + $0xd00] sm:$0xff] %v2021_v32  ;;  %v2025_v34 = vld [vmem:[%s10986_s6 + $0x1a20] sm:$0xff]  ;;  %v2027_v35 = vld [vmem:[%s10986_s6 + $0x1a30] sm:$0xff]  ;;  %2024 = vst [vmem:[%s10991_s7 + $0xd08] sm:$0xff] %v2023_v33 }
  0xed   : > { %2026 = vst [vmem:[%s10991_s7 + $0xd10] sm:$0xff] %v2025_v34  ;;  %2028 = vst [vmem:[%s10991_s7 + $0xd18] sm:$0xff] %v2027_v35  ;;  %v2029_v36 = vld [vmem:[%s10986_s6 + $0x1a40] sm:$0xff]  ;;  %v2031_v37 = vld [vmem:[%s10986_s6 + $0x1a50] sm:$0xff] }
  0xee   : > { %v2033_v38 = vld [vmem:[%s10986_s6 + $0x1a60] sm:$0xff]  ;;  %2030 = vst [vmem:[%s10991_s7 + $0xd20] sm:$0xff] %v2029_v36  ;;  %2032 = vst [vmem:[%s10991_s7 + $0xd28] sm:$0xff] %v2031_v37  ;;  %v2035_v39 = vld [vmem:[%s10986_s6 + $0x1a70] sm:$0xff] }
  0xef   : > { %2034 = vst [vmem:[%s10991_s7 + $0xd30] sm:$0xff] %v2033_v38  ;;  %v2037_v40 = vld [vmem:[%s10986_s6 + $0x1a80] sm:$0xff]  ;;  %v2039_v41 = vld [vmem:[%s10986_s6 + $0x1a90] sm:$0xff]  ;;  %2036 = vst [vmem:[%s10991_s7 + $0xd38] sm:$0xff] %v2035_v39 }
  0xf0   : > { %2038 = vst [vmem:[%s10991_s7 + $0xd40] sm:$0xff] %v2037_v40  ;;  %2040 = vst [vmem:[%s10991_s7 + $0xd48] sm:$0xff] %v2039_v41  ;;  %v2041_v42 = vld [vmem:[%s10986_s6 + $0x1aa0] sm:$0xff]  ;;  %v2043_v43 = vld [vmem:[%s10986_s6 + $0x1ab0] sm:$0xff] }
  0xf1   : > { %v2045_v44 = vld [vmem:[%s10986_s6 + $0x1ac0] sm:$0xff]  ;;  %2042 = vst [vmem:[%s10991_s7 + $0xd50] sm:$0xff] %v2041_v42  ;;  %2044 = vst [vmem:[%s10991_s7 + $0xd58] sm:$0xff] %v2043_v43  ;;  %v2047_v45 = vld [vmem:[%s10986_s6 + $0x1ad0] sm:$0xff] }
  0xf2   : > { %2046 = vst [vmem:[%s10991_s7 + $0xd60] sm:$0xff] %v2045_v44  ;;  %v2049_v46 = vld [vmem:[%s10986_s6 + $0x1ae0] sm:$0xff]  ;;  %v2051_v47 = vld [vmem:[%s10986_s6 + $0x1af0] sm:$0xff]  ;;  %2048 = vst [vmem:[%s10991_s7 + $0xd68] sm:$0xff] %v2047_v45 }
  0xf3   : > { %2050 = vst [vmem:[%s10991_s7 + $0xd70] sm:$0xff] %v2049_v46  ;;  %2052 = vst [vmem:[%s10991_s7 + $0xd78] sm:$0xff] %v2051_v47  ;;  %v2053_v48 = vld [vmem:[%s10986_s6 + $0x1b00] sm:$0xff]  ;;  %v2055_v49 = vld [vmem:[%s10986_s6 + $0x1b10] sm:$0xff] }
  0xf4   : > { %v2057_v50 = vld [vmem:[%s10986_s6 + $0x1b20] sm:$0xff]  ;;  %2054 = vst [vmem:[%s10991_s7 + $0xd80] sm:$0xff] %v2053_v48  ;;  %2056 = vst [vmem:[%s10991_s7 + $0xd88] sm:$0xff] %v2055_v49  ;;  %v2059_v51 = vld [vmem:[%s10986_s6 + $0x1b30] sm:$0xff] }
  0xf5   : > { %2058 = vst [vmem:[%s10991_s7 + $0xd90] sm:$0xff] %v2057_v50  ;;  %v2061_v52 = vld [vmem:[%s10986_s6 + $0x1b40] sm:$0xff]  ;;  %v2063_v53 = vld [vmem:[%s10986_s6 + $0x1b50] sm:$0xff]  ;;  %2060 = vst [vmem:[%s10991_s7 + $0xd98] sm:$0xff] %v2059_v51 }
  0xf6   : > { %2062 = vst [vmem:[%s10991_s7 + $0xda0] sm:$0xff] %v2061_v52  ;;  %2064 = vst [vmem:[%s10991_s7 + $0xda8] sm:$0xff] %v2063_v53  ;;  %v2065_v54 = vld [vmem:[%s10986_s6 + $0x1b60] sm:$0xff]  ;;  %v2067_v55 = vld [vmem:[%s10986_s6 + $0x1b70] sm:$0xff] }
  0xf7   : > { %v2069_v56 = vld [vmem:[%s10986_s6 + $0x1b80] sm:$0xff]  ;;  %2066 = vst [vmem:[%s10991_s7 + $0xdb0] sm:$0xff] %v2065_v54  ;;  %2068 = vst [vmem:[%s10991_s7 + $0xdb8] sm:$0xff] %v2067_v55  ;;  %v2071_v57 = vld [vmem:[%s10986_s6 + $0x1b90] sm:$0xff] }
  0xf8   : > { %2070 = vst [vmem:[%s10991_s7 + $0xdc0] sm:$0xff] %v2069_v56  ;;  %v2073_v58 = vld [vmem:[%s10986_s6 + $0x1ba0] sm:$0xff]  ;;  %v2075_v59 = vld [vmem:[%s10986_s6 + $0x1bb0] sm:$0xff]  ;;  %2072 = vst [vmem:[%s10991_s7 + $0xdc8] sm:$0xff] %v2071_v57 }
  0xf9   : > { %2074 = vst [vmem:[%s10991_s7 + $0xdd0] sm:$0xff] %v2073_v58  ;;  %2076 = vst [vmem:[%s10991_s7 + $0xdd8] sm:$0xff] %v2075_v59  ;;  %v2077_v60 = vld [vmem:[%s10986_s6 + $0x1bc0] sm:$0xff]  ;;  %v2079_v61 = vld [vmem:[%s10986_s6 + $0x1bd0] sm:$0xff] }
  0xfa   : > { %v2081_v62 = vld [vmem:[%s10986_s6 + $0x1be0] sm:$0xff]  ;;  %2078 = vst [vmem:[%s10991_s7 + $0xde0] sm:$0xff] %v2077_v60  ;;  %2080 = vst [vmem:[%s10991_s7 + $0xde8] sm:$0xff] %v2079_v61  ;;  %v2083_v63 = vld [vmem:[%s10986_s6 + $0x1bf0] sm:$0xff] }
  0xfb   : > { %2082 = vst [vmem:[%s10991_s7 + $0xdf0] sm:$0xff] %v2081_v62  ;;  %v2085_v0 = vld [vmem:[%s10986_s6 + $0x1c00] sm:$0xff]  ;;  %v2087_v1 = vld [vmem:[%s10986_s6 + $0x1c10] sm:$0xff]  ;;  %2084 = vst [vmem:[%s10991_s7 + $0xdf8] sm:$0xff] %v2083_v63 }
  0xfc   : > { %2086 = vst [vmem:[%s10991_s7 + $0xe00] sm:$0xff] %v2085_v0  ;;  %2088 = vst [vmem:[%s10991_s7 + $0xe08] sm:$0xff] %v2087_v1  ;;  %v2089_v2 = vld [vmem:[%s10986_s6 + $0x1c20] sm:$0xff]  ;;  %v2091_v3 = vld [vmem:[%s10986_s6 + $0x1c30] sm:$0xff] }
  0xfd   : > { %v2093_v4 = vld [vmem:[%s10986_s6 + $0x1c40] sm:$0xff]  ;;  %2090 = vst [vmem:[%s10991_s7 + $0xe10] sm:$0xff] %v2089_v2  ;;  %2092 = vst [vmem:[%s10991_s7 + $0xe18] sm:$0xff] %v2091_v3  ;;  %v2095_v5 = vld [vmem:[%s10986_s6 + $0x1c50] sm:$0xff] }
  0xfe   : > { %2094 = vst [vmem:[%s10991_s7 + $0xe20] sm:$0xff] %v2093_v4  ;;  %v2097_v6 = vld [vmem:[%s10986_s6 + $0x1c60] sm:$0xff]  ;;  %v2099_v7 = vld [vmem:[%s10986_s6 + $0x1c70] sm:$0xff]  ;;  %2096 = vst [vmem:[%s10991_s7 + $0xe28] sm:$0xff] %v2095_v5 }
  0xff   : > { %2098 = vst [vmem:[%s10991_s7 + $0xe30] sm:$0xff] %v2097_v6  ;;  %2100 = vst [vmem:[%s10991_s7 + $0xe38] sm:$0xff] %v2099_v7  ;;  %v2101_v8 = vld [vmem:[%s10986_s6 + $0x1c80] sm:$0xff]  ;;  %v2103_v9 = vld [vmem:[%s10986_s6 + $0x1c90] sm:$0xff] }
 0x100   : > { %v2105_v10 = vld [vmem:[%s10986_s6 + $0x1ca0] sm:$0xff]  ;;  %2102 = vst [vmem:[%s10991_s7 + $0xe40] sm:$0xff] %v2101_v8  ;;  %2104 = vst [vmem:[%s10991_s7 + $0xe48] sm:$0xff] %v2103_v9  ;;  %v2107_v11 = vld [vmem:[%s10986_s6 + $0x1cb0] sm:$0xff] }
 0x101   : > { %2106 = vst [vmem:[%s10991_s7 + $0xe50] sm:$0xff] %v2105_v10  ;;  %v2109_v12 = vld [vmem:[%s10986_s6 + $0x1cc0] sm:$0xff]  ;;  %v2111_v13 = vld [vmem:[%s10986_s6 + $0x1cd0] sm:$0xff]  ;;  %2108 = vst [vmem:[%s10991_s7 + $0xe58] sm:$0xff] %v2107_v11 }
 0x102   : > { %2110 = vst [vmem:[%s10991_s7 + $0xe60] sm:$0xff] %v2109_v12  ;;  %2112 = vst [vmem:[%s10991_s7 + $0xe68] sm:$0xff] %v2111_v13  ;;  %v2113_v14 = vld [vmem:[%s10986_s6 + $0x1ce0] sm:$0xff]  ;;  %v2115_v15 = vld [vmem:[%s10986_s6 + $0x1cf0] sm:$0xff] }
 0x103   : > { %v2117_v16 = vld [vmem:[%s10986_s6 + $0x1d00] sm:$0xff]  ;;  %2114 = vst [vmem:[%s10991_s7 + $0xe70] sm:$0xff] %v2113_v14  ;;  %2116 = vst [vmem:[%s10991_s7 + $0xe78] sm:$0xff] %v2115_v15  ;;  %v2119_v17 = vld [vmem:[%s10986_s6 + $0x1d10] sm:$0xff] }
 0x104   : > { %2118 = vst [vmem:[%s10991_s7 + $0xe80] sm:$0xff] %v2117_v16  ;;  %v2121_v18 = vld [vmem:[%s10986_s6 + $0x1d20] sm:$0xff]  ;;  %v2123_v19 = vld [vmem:[%s10986_s6 + $0x1d30] sm:$0xff]  ;;  %2120 = vst [vmem:[%s10991_s7 + $0xe88] sm:$0xff] %v2119_v17 }
 0x105   : > { %2122 = vst [vmem:[%s10991_s7 + $0xe90] sm:$0xff] %v2121_v18  ;;  %2124 = vst [vmem:[%s10991_s7 + $0xe98] sm:$0xff] %v2123_v19  ;;  %v2125_v20 = vld [vmem:[%s10986_s6 + $0x1d40] sm:$0xff]  ;;  %v2127_v21 = vld [vmem:[%s10986_s6 + $0x1d50] sm:$0xff] }
 0x106   : > { %v2129_v22 = vld [vmem:[%s10986_s6 + $0x1d60] sm:$0xff]  ;;  %2126 = vst [vmem:[%s10991_s7 + $0xea0] sm:$0xff] %v2125_v20  ;;  %2128 = vst [vmem:[%s10991_s7 + $0xea8] sm:$0xff] %v2127_v21  ;;  %v2131_v23 = vld [vmem:[%s10986_s6 + $0x1d70] sm:$0xff] }
 0x107   : > { %2130 = vst [vmem:[%s10991_s7 + $0xeb0] sm:$0xff] %v2129_v22  ;;  %v2133_v24 = vld [vmem:[%s10986_s6 + $0x1d80] sm:$0xff]  ;;  %v2135_v25 = vld [vmem:[%s10986_s6 + $0x1d90] sm:$0xff]  ;;  %2132 = vst [vmem:[%s10991_s7 + $0xeb8] sm:$0xff] %v2131_v23 }
 0x108   : > { %2134 = vst [vmem:[%s10991_s7 + $0xec0] sm:$0xff] %v2133_v24  ;;  %2136 = vst [vmem:[%s10991_s7 + $0xec8] sm:$0xff] %v2135_v25  ;;  %v2137_v26 = vld [vmem:[%s10986_s6 + $0x1da0] sm:$0xff]  ;;  %v2139_v27 = vld [vmem:[%s10986_s6 + $0x1db0] sm:$0xff] }
 0x109   : > { %v2141_v28 = vld [vmem:[%s10986_s6 + $0x1dc0] sm:$0xff]  ;;  %2138 = vst [vmem:[%s10991_s7 + $0xed0] sm:$0xff] %v2137_v26  ;;  %2140 = vst [vmem:[%s10991_s7 + $0xed8] sm:$0xff] %v2139_v27  ;;  %v2143_v29 = vld [vmem:[%s10986_s6 + $0x1dd0] sm:$0xff] }
 0x10a   : > { %2142 = vst [vmem:[%s10991_s7 + $0xee0] sm:$0xff] %v2141_v28  ;;  %v2145_v30 = vld [vmem:[%s10986_s6 + $0x1de0] sm:$0xff]  ;;  %v2147_v31 = vld [vmem:[%s10986_s6 + $0x1df0] sm:$0xff]  ;;  %2144 = vst [vmem:[%s10991_s7 + $0xee8] sm:$0xff] %v2143_v29 }
 0x10b   : > { %2146 = vst [vmem:[%s10991_s7 + $0xef0] sm:$0xff] %v2145_v30  ;;  %2148 = vst [vmem:[%s10991_s7 + $0xef8] sm:$0xff] %v2147_v31  ;;  %v2149_v32 = vld [vmem:[%s10986_s6 + $0x1e00] sm:$0xff]  ;;  %v2151_v33 = vld [vmem:[%s10986_s6 + $0x1e10] sm:$0xff] }
 0x10c   : > { %v2153_v34 = vld [vmem:[%s10986_s6 + $0x1e20] sm:$0xff]  ;;  %2150 = vst [vmem:[%s10991_s7 + $0xf00] sm:$0xff] %v2149_v32  ;;  %2152 = vst [vmem:[%s10991_s7 + $0xf08] sm:$0xff] %v2151_v33  ;;  %v2155_v35 = vld [vmem:[%s10986_s6 + $0x1e30] sm:$0xff] }
 0x10d   : > { %2154 = vst [vmem:[%s10991_s7 + $0xf10] sm:$0xff] %v2153_v34  ;;  %v2157_v36 = vld [vmem:[%s10986_s6 + $0x1e40] sm:$0xff]  ;;  %v2159_v37 = vld [vmem:[%s10986_s6 + $0x1e50] sm:$0xff]  ;;  %2156 = vst [vmem:[%s10991_s7 + $0xf18] sm:$0xff] %v2155_v35 }
 0x10e   : > { %2158 = vst [vmem:[%s10991_s7 + $0xf20] sm:$0xff] %v2157_v36  ;;  %2160 = vst [vmem:[%s10991_s7 + $0xf28] sm:$0xff] %v2159_v37  ;;  %v2161_v38 = vld [vmem:[%s10986_s6 + $0x1e60] sm:$0xff]  ;;  %v2163_v39 = vld [vmem:[%s10986_s6 + $0x1e70] sm:$0xff] }
 0x10f   : > { %v2165_v40 = vld [vmem:[%s10986_s6 + $0x1e80] sm:$0xff]  ;;  %2162 = vst [vmem:[%s10991_s7 + $0xf30] sm:$0xff] %v2161_v38  ;;  %2164 = vst [vmem:[%s10991_s7 + $0xf38] sm:$0xff] %v2163_v39  ;;  %v2167_v41 = vld [vmem:[%s10986_s6 + $0x1e90] sm:$0xff] }
 0x110   : > { %2166 = vst [vmem:[%s10991_s7 + $0xf40] sm:$0xff] %v2165_v40  ;;  %v2169_v42 = vld [vmem:[%s10986_s6 + $0x1ea0] sm:$0xff]  ;;  %v2171_v43 = vld [vmem:[%s10986_s6 + $0x1eb0] sm:$0xff]  ;;  %2168 = vst [vmem:[%s10991_s7 + $0xf48] sm:$0xff] %v2167_v41 }
 0x111   : > { %2170 = vst [vmem:[%s10991_s7 + $0xf50] sm:$0xff] %v2169_v42  ;;  %2172 = vst [vmem:[%s10991_s7 + $0xf58] sm:$0xff] %v2171_v43  ;;  %v2173_v44 = vld [vmem:[%s10986_s6 + $0x1ec0] sm:$0xff]  ;;  %v2175_v45 = vld [vmem:[%s10986_s6 + $0x1ed0] sm:$0xff] }
 0x112   : > { %v2177_v46 = vld [vmem:[%s10986_s6 + $0x1ee0] sm:$0xff]  ;;  %2174 = vst [vmem:[%s10991_s7 + $0xf60] sm:$0xff] %v2173_v44  ;;  %2176 = vst [vmem:[%s10991_s7 + $0xf68] sm:$0xff] %v2175_v45  ;;  %v2179_v47 = vld [vmem:[%s10986_s6 + $0x1ef0] sm:$0xff] }
 0x113   : > { %2178 = vst [vmem:[%s10991_s7 + $0xf70] sm:$0xff] %v2177_v46  ;;  %v2181_v48 = vld [vmem:[%s10986_s6 + $0x1f00] sm:$0xff]  ;;  %v2183_v49 = vld [vmem:[%s10986_s6 + $0x1f10] sm:$0xff]  ;;  %2180 = vst [vmem:[%s10991_s7 + $0xf78] sm:$0xff] %v2179_v47 }
 0x114   : > { %2182 = vst [vmem:[%s10991_s7 + $0xf80] sm:$0xff] %v2181_v48  ;;  %2184 = vst [vmem:[%s10991_s7 + $0xf88] sm:$0xff] %v2183_v49  ;;  %v2185_v50 = vld [vmem:[%s10986_s6 + $0x1f20] sm:$0xff]  ;;  %v2187_v51 = vld [vmem:[%s10986_s6 + $0x1f30] sm:$0xff] }
 0x115   : > { %v2189_v52 = vld [vmem:[%s10986_s6 + $0x1f40] sm:$0xff]  ;;  %2186 = vst [vmem:[%s10991_s7 + $0xf90] sm:$0xff] %v2185_v50  ;;  %2188 = vst [vmem:[%s10991_s7 + $0xf98] sm:$0xff] %v2187_v51  ;;  %v2191_v53 = vld [vmem:[%s10986_s6 + $0x1f50] sm:$0xff] }
 0x116   : > { %2190 = vst [vmem:[%s10991_s7 + $0xfa0] sm:$0xff] %v2189_v52  ;;  %v2193_v54 = vld [vmem:[%s10986_s6 + $0x1f60] sm:$0xff]  ;;  %v2195_v55 = vld [vmem:[%s10986_s6 + $0x1f70] sm:$0xff]  ;;  %2192 = vst [vmem:[%s10991_s7 + $0xfa8] sm:$0xff] %v2191_v53 }
 0x117   : > { %2194 = vst [vmem:[%s10991_s7 + $0xfb0] sm:$0xff] %v2193_v54  ;;  %2196 = vst [vmem:[%s10991_s7 + $0xfb8] sm:$0xff] %v2195_v55  ;;  %v2197_v56 = vld [vmem:[%s10986_s6 + $0x1f80] sm:$0xff]  ;;  %v2199_v57 = vld [vmem:[%s10986_s6 + $0x1f90] sm:$0xff] }
 0x118   : > { %v2201_v58 = vld [vmem:[%s10986_s6 + $0x1fa0] sm:$0xff]  ;;  %2198 = vst [vmem:[%s10991_s7 + $0xfc0] sm:$0xff] %v2197_v56  ;;  %2200 = vst [vmem:[%s10991_s7 + $0xfc8] sm:$0xff] %v2199_v57  ;;  %v2203_v59 = vld [vmem:[%s10986_s6 + $0x1fb0] sm:$0xff] }
 0x119   : > { %2202 = vst [vmem:[%s10991_s7 + $0xfd0] sm:$0xff] %v2201_v58  ;;  %v2205_v60 = vld [vmem:[%s10986_s6 + $0x1fc0] sm:$0xff]  ;;  %v2207_v61 = vld [vmem:[%s10986_s6 + $0x1fd0] sm:$0xff]  ;;  %2204 = vst [vmem:[%s10991_s7 + $0xfd8] sm:$0xff] %v2203_v59 }
 0x11a   : > { %2206 = vst [vmem:[%s10991_s7 + $0xfe0] sm:$0xff] %v2205_v60  ;;  %2208 = vst [vmem:[%s10991_s7 + $0xfe8] sm:$0xff] %v2207_v61  ;;  %v2209_v62 = vld [vmem:[%s10986_s6 + $0x1fe0] sm:$0xff]  ;;  %v2211_v63 = vld [vmem:[%s10986_s6 + $0x1ff0] sm:$0xff] }
 0x11b   : > { %2210 = vst [vmem:[%s10991_s7 + $0xff0] sm:$0xff] %v2209_v62  ;;  %2212 = vst [vmem:[%s10991_s7 + $0xff8] sm:$0xff] %v2211_v63 }
 0x11c PF: > { %p8999_p11 = scmp.ge.s32.totalorder %s10888_s17, 1  ;;  %p4301_p12 = scmp.lt.s32.totalorder %s10888_s17, 5 }
 0x11e   : > { %p4302_p13 = pnand %p8999_p11, %p4301_p12 }
 0x11f   : > { %s4308_s8 = sand.u32 (!%p4302_p13), 1, %s10864_s11   ;;  %p4333_p0 = scmp.lt.s32.totalorder (!%p4302_p13), %s10876_s14, 1 }
 0x120   : > { %4305 = sbr.rel (%p4302_p13) target bundleno = 1085 (0x43d), region = 76  ;;  %s9000_s18 = sshll.u32 (!%p4302_p13), %s4308_s8, 12 }
 0x121   : > { %s12017_s21 = scalar_lea.vmem (!%p4302_p13), [#allocation2], %s9000_s18  ;;  %s4330_s29 = sand.u32 (!%p4302_p13), 1, %s10856_s9  }
 0x122   : > { %v10046_v0 = vld [vmem:[%s12017_s21 + $0x804] ss:$8 sps:$4 sm:$0xff] (!%p4302_p13)   ;;  %v10050_v2 = vld [vmem:[%s12017_s21 + $0x800] ss:$8 sps:$4 sm:$0xff] (!%p4302_p13)   ;;  %v10052_v4 = vld [vmem:[%s12017_s21 + $0x814] ss:$8 sps:$4 sm:$0xff] (!%p4302_p13)  }
 0x123   : > { %v10048_v1 = vld [vmem:[%s12017_s21 + $0x4] ss:$8 sps:$4 sm:$0xff] (!%p4302_p13)   ;;  %6357 = vmatprep.subr.bf16.mxu1 (!%p4302_p13), %v10046_v0  ;;  %v10051_v3 = vld [vmem:[%s12017_s21] ss:$8 sps:$4 sm:$0xff] (!%p4302_p13)   ;;  %v10054_v5 = vld [vmem:[%s12017_s21 + $0x14] ss:$8 sps:$4 sm:$0xff] (!%p4302_p13)  }
 0x124   : > { %8221 = vmatprep.subr.bf16.mxu0 (!%p4302_p13), %v10048_v1  ;;  %6358 = vmatpush1.bf16.msra.mxu1 (!%p4302_p13), %v10050_v2  ;;  %v10056_v6 = vld [vmem:[%s12017_s21 + $0x810] ss:$8 sps:$4 sm:$0xff] (!%p4302_p13)   ;;  %v10058_v8 = vld [vmem:[%s12017_s21 + $0x824] ss:$8 sps:$4 sm:$0xff] (!%p4302_p13)   ;;  %v10062_v10 = vld [vmem:[%s12017_s21 + $0x820] ss:$8 sps:$4 sm:$0xff] (!%p4302_p13)  }
 0x125   : > { %8222 = vmatpush1.bf16.msra.mxu0 (!%p4302_p13), %v10051_v3  ;;  %6359 = vmatprep.subr.bf16.mxu1 (!%p4302_p13), %v10052_v4  ;;  %v10057_v7 = vld [vmem:[%s12017_s21 + $0x10] ss:$8 sps:$4 sm:$0xff] (!%p4302_p13)   ;;  %v10060_v9 = vld [vmem:[%s12017_s21 + $0x24] ss:$8 sps:$4 sm:$0xff] (!%p4302_p13)   ;;  %v10063_v11 = vld [vmem:[%s12017_s21 + $0x20] ss:$8 sps:$4 sm:$0xff] (!%p4302_p13)  }
 0x126   : > { %8223 = vmatprep.subr.bf16.mxu0 (!%p4302_p13), %v10054_v5  ;;  %v10064_v12 = vld [vmem:[%s12017_s21 + $0x834] ss:$8 sps:$4 sm:$0xff] (!%p4302_p13)   ;;  %v10068_v14 = vld [vmem:[%s12017_s21 + $0x830] ss:$8 sps:$4 sm:$0xff] (!%p4302_p13)   ;;  %v10070_v16 = vld [vmem:[%s12017_s21 + $0x844] ss:$8 sps:$4 sm:$0xff] (!%p4302_p13)  }
 0x127   : > { %v10066_v13 = vld [vmem:[%s12017_s21 + $0x34] ss:$8 sps:$4 sm:$0xff]   ;;  %v10069_v15 = vld [vmem:[%s12017_s21 + $0x30] ss:$8 sps:$4 sm:$0xff]   ;;  %v10072_v17 = vld [vmem:[%s12017_s21 + $0x44] ss:$8 sps:$4 sm:$0xff]  }
 0x128   : > { %6360 = vmatpush1.bf16.msra.mxu1 %v10056_v6  ;;  %v10074_v18 = vld [vmem:[%s12017_s21 + $0x840] ss:$8 sps:$4 sm:$0xff]   ;;  %v10076_v20 = vld [vmem:[%s12017_s21 + $0x854] ss:$8 sps:$4 sm:$0xff]   ;;  %v10080_v22 = vld [vmem:[%s12017_s21 + $0x850] ss:$8 sps:$4 sm:$0xff]  }
 0x129   : > { %8224 = vmatpush1.bf16.msra.mxu0 %v10057_v7  ;;  %6361 = vmatprep.subr.bf16.mxu1 %v10058_v8  ;;  %v10075_v19 = vld [vmem:[%s12017_s21 + $0x40] ss:$8 sps:$4 sm:$0xff]   ;;  %v10078_v21 = vld [vmem:[%s12017_s21 + $0x54] ss:$8 sps:$4 sm:$0xff]   ;;  %v10081_v23 = vld [vmem:[%s12017_s21 + $0x50] ss:$8 sps:$4 sm:$0xff]  }
 0x12a   : > { %8225 = vmatprep.subr.bf16.mxu0 %v10060_v9  ;;  %v10082_v24 = vld [vmem:[%s12017_s21 + $0x864] ss:$8 sps:$4 sm:$0xff]   ;;  %v10086_v26 = vld [vmem:[%s12017_s21 + $0x860] ss:$8 sps:$4 sm:$0xff]   ;;  %v10088_v28 = vld [vmem:[%s12017_s21 + $0x874] ss:$8 sps:$4 sm:$0xff]  }
 0x12b   : > { %v10084_v25 = vld [vmem:[%s12017_s21 + $0x64] ss:$8 sps:$4 sm:$0xff]   ;;  %v10087_v27 = vld [vmem:[%s12017_s21 + $0x60] ss:$8 sps:$4 sm:$0xff]   ;;  %v10090_v29 = vld [vmem:[%s12017_s21 + $0x74] ss:$8 sps:$4 sm:$0xff]  }
 0x12c   : > { %6362 = vmatpush1.bf16.msra.mxu1 %v10062_v10  ;;  %v10092_v30 = vld [vmem:[%s12017_s21 + $0x870] ss:$8 sps:$4 sm:$0xff]   ;;  %v10094_v32 = vld [vmem:[%s12017_s21 + $0x884] ss:$8 sps:$4 sm:$0xff]   ;;  %v10098_v34 = vld [vmem:[%s12017_s21 + $0x880] ss:$8 sps:$4 sm:$0xff]  }
 0x12d   : > { %8226 = vmatpush1.bf16.msra.mxu0 %v10063_v11  ;;  %6363 = vmatprep.subr.bf16.mxu1 %v10064_v12  ;;  %v10093_v31 = vld [vmem:[%s12017_s21 + $0x70] ss:$8 sps:$4 sm:$0xff]   ;;  %v10096_v33 = vld [vmem:[%s12017_s21 + $0x84] ss:$8 sps:$4 sm:$0xff]   ;;  %v10099_v35 = vld [vmem:[%s12017_s21 + $0x80] ss:$8 sps:$4 sm:$0xff]  }
 0x12e   : > { %8227 = vmatprep.subr.bf16.mxu0 %v10066_v13  ;;  %s4334_s11 = scalar_select %p4333_p0, %s10876_s14, 1  ;;  %v10100_v36 = vld [vmem:[%s12017_s21 + $0x894] ss:$8 sps:$4 sm:$0xff]   ;;  %v10104_v38 = vld [vmem:[%s12017_s21 + $0x890] ss:$8 sps:$4 sm:$0xff]  }
 0x12f   : > { %v10102_v37 = vld [vmem:[%s12017_s21 + $0x94] ss:$8 sps:$4 sm:$0xff]   ;;  %v10105_v39 = vld [vmem:[%s12017_s21 + $0x90] ss:$8 sps:$4 sm:$0xff]   ;;  %v10106_v40 = vld [vmem:[%s12017_s21 + $0x8a4] ss:$8 sps:$4 sm:$0xff]  }
 0x130   : > { %6364 = vmatpush1.bf16.msra.mxu1 %v10068_v14  ;;  %s9972_s22 = smul.u32 384, %s4334_s11  ;;  %v10108_v41 = vld [vmem:[%s12017_s21 + $0xa4] ss:$8 sps:$4 sm:$0xff]   ;;  %v10110_v42 = vld [vmem:[%s12017_s21 + $0x8a0] ss:$8 sps:$4 sm:$0xff]   ;;  %s9001_s30 = sshll.u32 %s4330_s29, 5 }
 0x131   : > { %8228 = vmatpush1.bf16.msra.mxu0 %v10069_v15  ;;  %6365 = vmatprep.subr.bf16.mxu1 %v10070_v16  ;;  %v10111_v43 = vld [vmem:[%s12017_s21 + $0xa0] ss:$8 sps:$4 sm:$0xff]   ;;  %v10112_v44 = vld [vmem:[%s12017_s21 + $0x8b4] ss:$8 sps:$4 sm:$0xff]   ;;  %v10116_v46 = vld [vmem:[%s12017_s21 + $0x8b0] ss:$8 sps:$4 sm:$0xff]  }
 0x132   : > { %8229 = vmatprep.subr.bf16.mxu0 %v10072_v17  ;;  %s12068_s26 = scalar_lea.vmem %s12804_s0, %s9972_s22  ;;  %v10114_v45 = vld [vmem:[%s12017_s21 + $0xb4] ss:$8 sps:$4 sm:$0xff]   ;;  %v10117_v47 = vld [vmem:[%s12017_s21 + $0xb0] ss:$8 sps:$4 sm:$0xff]   ;;  %v10118_v50 = vld [vmem:[%s12017_s21 + $0x8c4] ss:$8 sps:$4 sm:$0xff]  }
 0x133   : > { %v4628_v48 = vld [vmem:[%s12068_s26 + $0x80] sm:$0xff]  ;;  %v10124_v58 = vld [vmem:[%s12017_s21 + $0x8d4] ss:$8 sps:$4 sm:$0xff]   ;;  %v10128_v60 = vld [vmem:[%s12017_s21 + $0x8d0] ss:$8 sps:$4 sm:$0xff]   ;;  %s4332_s9 = scalar_lea.vmem [#allocation3], %s9001_s30 }
 0x134   : > { %6366 = vmatpush1.bf16.msra.mxu1 %v10074_v18  ;;  %v4636_v49 = vld [vmem:[%s12068_s26 + $0xc0] sm:$0xff]  ;;  %v10126_v59 = vld [vmem:[%s12017_s21 + $0xd4] ss:$8 sps:$4 sm:$0xff]   ;;  %v10129_v61 = vld [vmem:[%s12017_s21 + $0xd0] ss:$8 sps:$4 sm:$0xff]   ;;  %s9842_s3 = sshll.u32 (%p10973_p9), %s10872_s13, 1 }
 0x135   : > { %8230 = vmatpush1.bf16.msra.mxu0 %v10075_v19  ;;  %6367 = vmatprep.subr.bf16.mxu1 %v10076_v20  ;;  %v10120_v51 = vld [vmem:[%s12017_s21 + $0xc4] ss:$8 sps:$4 sm:$0xff]   ;;  %v9260_v52 = vcombine.high %v4628_v48, %v4636_v49  ;;  %v10122_v56 = vld [vmem:[%s12017_s21 + $0x8c0] ss:$8 sps:$4 sm:$0xff]   ;;  %v10136_v2 = vld [vmem:[%s12017_s21 + $0x8f4] ss:$8 sps:$4 sm:$0xff]   ;;  %v9259_v8 = vcombine.low %v4628_v48, %v4636_v49 }
 0x136   : > { %8231 = vmatprep.subr.bf16.mxu0 %v10078_v21  ;;  %v4340_v53 = vld [vmem:[%s12068_s26] sm:$0xff]  ;;  %v10138_v3 = vld [vmem:[%s12017_s21 + $0xf4] ss:$8 sps:$4 sm:$0xff]   ;;  %v10140_v4 = vld [vmem:[%s12017_s21 + $0x8f0] ss:$8 sps:$4 sm:$0xff]   ;;  %s9843_s4 = sshll.u32 (%p10973_p9), %s10876_s14, 4 }
 0x137   : > { %v4348_v54 = vld [vmem:[%s12068_s26 + $0x40] sm:$0xff]  ;;  %6389 = vmatprep.mubr.bf16.mxu1 %v9260_v52  ;;  %v10141_v5 = vld [vmem:[%s12017_s21 + $0xf0] ss:$8 sps:$4 sm:$0xff]   ;;  %v10150_v12 = vld [vmem:[%s12017_s21 + $0x914] ss:$8 sps:$4 sm:$0xff]   ;;  %s8853_s5 = sadd.s32 (%p10973_p9), %s9843_s4, %s9842_s3 }
 0x138   : > { %6368 = vmatpush1.bf16.msra.mxu1 %v10080_v22  ;;  %v9548_v55 = vcombine.high %v4340_v53, %v4348_v54  ;;  %v10123_v57 = vld [vmem:[%s12017_s21 + $0xc0] ss:$8 sps:$4 sm:$0xff]   ;;  %v10130_v62 = vld [vmem:[%s12017_s21 + $0x8e4] ss:$8 sps:$4 sm:$0xff]   ;;  %v9547_v10 = vcombine.low %v4340_v53, %v4348_v54  ;;  %v10153_v13 = vld [vmem:[%s12017_s21 + $0x114] ss:$8 sps:$4 sm:$0xff]  }
 0x139   : > { %8232 = vmatpush1.bf16.msra.mxu0 %v10081_v23  ;;  %6369 = vmatprep.subr.bf16.mxu1 %v10082_v24  ;;  %v10132_v63 = vld [vmem:[%s12017_s21 + $0xe4] ss:$8 sps:$4 sm:$0xff]   ;;  %v10134_v0 = vld [vmem:[%s12017_s21 + $0x8e0] ss:$8 sps:$4 sm:$0xff]   ;;  %v10148_v14 = vld [vmem:[%s12017_s21 + $0x910] ss:$8 sps:$4 sm:$0xff]  }
 0x13a   : > { %8233 = vmatprep.subr.bf16.mxu0 %v10084_v25  ;;  %8253 = vmatprep.mubr.bf16.mxu0 %v9548_v55  ;;  %v10135_v1 = vld [vmem:[%s12017_s21 + $0xe0] ss:$8 sps:$4 sm:$0xff]   ;;  %v10144_v6 = vld [vmem:[%s12017_s21 + $0x904] ss:$8 sps:$4 sm:$0xff]   ;;  %v10151_v15 = vld [vmem:[%s12017_s21 + $0x110] ss:$8 sps:$4 sm:$0xff]  }
 0x13b   : > { %v10147_v7 = vld [vmem:[%s12017_s21 + $0x104] ss:$8 sps:$4 sm:$0xff]   ;;  %v10142_v9 = vld [vmem:[%s12017_s21 + $0x900] ss:$8 sps:$4 sm:$0xff]   ;;  %v10162_v20 = vld [vmem:[%s12017_s21 + $0x934] ss:$8 sps:$4 sm:$0xff]  }
 0x13c   : > { %6370 = vmatpush1.bf16.msra.mxu1 %v10086_v26  ;;  %v10145_v11 = vld [vmem:[%s12017_s21 + $0x100] ss:$8 sps:$4 sm:$0xff]   ;;  %v10156_v16 = vld [vmem:[%s12017_s21 + $0x924] ss:$8 sps:$4 sm:$0xff]   ;;  %v10165_v21 = vld [vmem:[%s12017_s21 + $0x134] ss:$8 sps:$4 sm:$0xff]  }
 0x13d   : > { %8234 = vmatpush1.bf16.msra.mxu0 %v10087_v27  ;;  %6371 = vmatprep.subr.bf16.mxu1 %v10088_v28  ;;  %v10159_v17 = vld [vmem:[%s12017_s21 + $0x124] ss:$8 sps:$4 sm:$0xff]   ;;  %v10154_v18 = vld [vmem:[%s12017_s21 + $0x920] ss:$8 sps:$4 sm:$0xff]   ;;  %v10160_v22 = vld [vmem:[%s12017_s21 + $0x930] ss:$8 sps:$4 sm:$0xff]  }
 0x13e   : > { %8235 = vmatprep.subr.bf16.mxu0 %v10090_v29  ;;  %v10157_v19 = vld [vmem:[%s12017_s21 + $0x120] ss:$8 sps:$4 sm:$0xff]   ;;  %v10163_v23 = vld [vmem:[%s12017_s21 + $0x130] ss:$8 sps:$4 sm:$0xff]   ;;  %v10168_v24 = vld [vmem:[%s12017_s21 + $0x944] ss:$8 sps:$4 sm:$0xff]  }
 0x13f   : > { %v10171_v25 = vld [vmem:[%s12017_s21 + $0x144] ss:$8 sps:$4 sm:$0xff]   ;;  %v10166_v26 = vld [vmem:[%s12017_s21 + $0x940] ss:$8 sps:$4 sm:$0xff]   ;;  %v10174_v28 = vld [vmem:[%s12017_s21 + $0x954] ss:$8 sps:$4 sm:$0xff]  }
 0x140   : > { %6372 = vmatpush1.bf16.msra.mxu1 %v10092_v30  ;;  %v10169_v27 = vld [vmem:[%s12017_s21 + $0x140] ss:$8 sps:$4 sm:$0xff]   ;;  %v10177_v29 = vld [vmem:[%s12017_s21 + $0x154] ss:$8 sps:$4 sm:$0xff]   ;;  %v10184_v48 = vld [vmem:[%s12017_s21 + $0x970] ss:$8 sps:$4 sm:$0xff]  }
 0x141   : > { %8236 = vmatpush1.bf16.msra.mxu0 %v10093_v31  ;;  %6373 = vmatprep.subr.bf16.mxu1 %v10094_v32  ;;  %v4644_v30 = vld [vmem:[%s12068_s26 + $0x100] sm:$0xff]  ;;  %v10187_v49 = vld [vmem:[%s12017_s21 + $0x170] ss:$8 sps:$4 sm:$0xff]   ;;  %v10198_v54 = vld [vmem:[%s12017_s21 + $0x994] ss:$8 sps:$4 sm:$0xff]   ;;  %s9844_s6 = sshll.u32 (%p10973_p9), %s8853_s5, 2 }
 0x142   : > { %8237 = vmatprep.subr.bf16.mxu0 %v10096_v33  ;;  %v4652_v31 = vld [vmem:[%s12068_s26 + $0x140] sm:$0xff]  ;;  %v10201_v55 = vld [vmem:[%s12017_s21 + $0x194] ss:$8 sps:$4 sm:$0xff]   ;;  %s8855_s18 = scalar_lea.vmem (%p10973_p9), %s12806_s2, %s9844_s6 }
 0x143   : > { %v9276_v32 = vcombine.high %v4644_v30, %v4652_v31  ;;  %v9275_v33 = vcombine.low %v4644_v30, %v4652_v31  ;;  %v10193_v53 = vld [vmem:[%s12017_s21 + $0x180] ss:$8 sps:$4 sm:$0xff]   ;;  %v10247_v30 = vld [vmem:[%s12017_s21 + $0x210] ss:$8 sps:$4 sm:$0xff]   ;;  %v10252_v31 = vld [vmem:[%s12017_s21 + $0xa24] ss:$8 sps:$4 sm:$0xff]  }
 0x144   : > { %6374 = vmatpush1.bf16.msra.mxu1 %v10098_v34  ;;  %v10172_v34 = vld [vmem:[%s12017_s21 + $0x950] ss:$8 sps:$4 sm:$0xff]  }
 0x145   : > { %8238 = vmatpush1.bf16.msra.mxu0 %v10099_v35  ;;  %6375 = vmatprep.subr.bf16.mxu1 %v10100_v36  ;;  %v10175_v35 = vld [vmem:[%s12017_s21 + $0x150] ss:$8 sps:$4 sm:$0xff]   ;;  %v10180_v36 = vld [vmem:[%s12017_s21 + $0x964] ss:$8 sps:$4 sm:$0xff]  }
 0x146   : > { %8239 = vmatprep.subr.bf16.mxu0 %v10102_v37  ;;  %v10183_v37 = vld [vmem:[%s12017_s21 + $0x164] ss:$8 sps:$4 sm:$0xff]  }
 0x148   : > { %6376 = vmatpush1.bf16.msra.mxu1 %v10104_v38  ;;  %v10178_v38 = vld [vmem:[%s12017_s21 + $0x960] ss:$8 sps:$4 sm:$0xff]  }
 0x149   : > { %8240 = vmatpush1.bf16.msra.mxu0 %v10105_v39  ;;  %6377 = vmatprep.subr.bf16.mxu1 %v10106_v40  ;;  %v10181_v39 = vld [vmem:[%s12017_s21 + $0x160] ss:$8 sps:$4 sm:$0xff]  }
 0x14a   : > { %8241 = vmatprep.subr.bf16.mxu0 %v10108_v41  ;;  %v12125_v40 = vld [vmem:[%s12068_s26 + $0x88] sm:$0xff] }
 0x14b   : > { %v12128_v41 = vld [vmem:[%s12068_s26 + $0xc8] sm:$0xff] }
 0x14c   : > { %6378 = vmatpush1.bf16.msra.mxu1 %v10110_v42  ;;  %v10186_v42 = vld [vmem:[%s12017_s21 + $0x974] ss:$8 sps:$4 sm:$0xff]  }
 0x14d   : > { %8242 = vmatpush1.bf16.msra.mxu0 %v10111_v43  ;;  %6379 = vmatprep.subr.bf16.mxu1 %v10112_v44  ;;  %v12133_v43 = vcombine.high %v12125_v40, %v12128_v41  ;;  %v10189_v44 = vld [vmem:[%s12017_s21 + $0x174] ss:$8 sps:$4 sm:$0xff]  }
 0x14e   : > { %8243 = vmatprep.subr.bf16.mxu0 %v10114_v45  ;;  %v12137_v45 = vld [vmem:[%s12068_s26 + $0x8] sm:$0xff] }
 0x150   : > { %6380 = vmatpush1.bf16.msra.mxu1 %v10116_v46  ;;  %v12140_v46 = vld [vmem:[%s12068_s26 + $0x48] sm:$0xff] }
 0x151   : > { %8244 = vmatpush1.bf16.msra.mxu0 %v10117_v47  ;;  %6381 = vmatprep.subr.bf16.mxu1 %v10118_v50  ;;  %v9550_v47 = vcombine.high %v12137_v45, %v12140_v46  ;;  %v10192_v50 = vld [vmem:[%s12017_s21 + $0x984] ss:$8 sps:$4 sm:$0xff]  }
 0x152   : > { %8245 = vmatprep.subr.bf16.mxu0 %v10120_v51  ;;  %v10195_v51 = vld [vmem:[%s12017_s21 + $0x184] ss:$8 sps:$4 sm:$0xff]  }
 0x154   : > { %6382 = vmatpush1.bf16.msra.mxu1 %v10122_v56  ;;  %v10196_v56 = vld [vmem:[%s12017_s21 + $0x990] ss:$8 sps:$4 sm:$0xff]  }
 0x155   : > { %8246 = vmatpush1.bf16.msra.mxu0 %v10123_v57  ;;  %6383 = vmatprep.subr.bf16.mxu1 %v10124_v58  ;;  %v10199_v57 = vld [vmem:[%s12017_s21 + $0x190] ss:$8 sps:$4 sm:$0xff]   ;;  %v10204_v58 = vld [vmem:[%s12017_s21 + $0x9a4] ss:$8 sps:$4 sm:$0xff]  }
 0x156   : > { %8247 = vmatprep.subr.bf16.mxu0 %v10126_v59  ;;  %v10207_v59 = vld [vmem:[%s12017_s21 + $0x1a4] ss:$8 sps:$4 sm:$0xff]  }
 0x158   : > { %6384 = vmatpush1.bf16.msra.mxu1 %v10128_v60  ;;  %v10202_v60 = vld [vmem:[%s12017_s21 + $0x9a0] ss:$8 sps:$4 sm:$0xff]  }
 0x159   : > { %8248 = vmatpush1.bf16.msra.mxu0 %v10129_v61  ;;  %6385 = vmatprep.subr.bf16.mxu1 %v10130_v62  ;;  %v10205_v61 = vld [vmem:[%s12017_s21 + $0x1a0] ss:$8 sps:$4 sm:$0xff]   ;;  %v10210_v62 = vld [vmem:[%s12017_s21 + $0x9b4] ss:$8 sps:$4 sm:$0xff]  }
 0x15a   : > { %8249 = vmatprep.subr.bf16.mxu0 %v10132_v63  ;;  %v10213_v63 = vld [vmem:[%s12017_s21 + $0x1b4] ss:$8 sps:$4 sm:$0xff]  }
 0x15c   : > { %6386 = vmatpush1.bf16.msra.mxu1 %v10134_v0  ;;  %v10208_v0 = vld [vmem:[%s12017_s21 + $0x9b0] ss:$8 sps:$4 sm:$0xff]  }
 0x15d   : > { %8250 = vmatpush1.bf16.msra.mxu0 %v10135_v1  ;;  %6387 = vmatprep.subr.bf16.mxu1 %v10136_v2  ;;  %v10211_v1 = vld [vmem:[%s12017_s21 + $0x1b0] ss:$8 sps:$4 sm:$0xff]   ;;  %v10216_v2 = vld [vmem:[%s12017_s21 + $0x9c4] ss:$8 sps:$4 sm:$0xff]  }
 0x15e   : > { %8251 = vmatprep.subr.bf16.mxu0 %v10138_v3  ;;  %v10219_v3 = vld [vmem:[%s12017_s21 + $0x1c4] ss:$8 sps:$4 sm:$0xff]  }
 0x160   : > { %6388 = vmatpush1.bf16.msra.mxu1 %v10140_v4  ;;  %v10214_v4 = vld [vmem:[%s12017_s21 + $0x9c0] ss:$8 sps:$4 sm:$0xff]  }
 0x161   : > { %8252 = vmatpush1.bf16.msra.mxu0 %v10141_v5  ;;  %6410 = vmatprep.subr.bf16.mxu1 %v10144_v6  ;;  %v10217_v5 = vld [vmem:[%s12017_s21 + $0x1c0] ss:$8 sps:$4 sm:$0xff]   ;;  %v10222_v6 = vld [vmem:[%s12017_s21 + $0x9d4] ss:$8 sps:$4 sm:$0xff]  }
 0x162   : > { %8274 = vmatprep.subr.bf16.mxu0 %v10147_v7  ;;  %v10225_v7 = vld [vmem:[%s12017_s21 + $0x1d4] ss:$8 sps:$4 sm:$0xff]  }
 0x163   : > { %6390 = vmatmul.mubr.bf16.vlgmr.msra.gmra.mrb[0].mxu1 %v9259_v8 }
 0x164   : > { %8254 = vmatmul.mubr.bf16.vlgmr.msra.gmra.mrb[0].mxu0 %v9547_v10  ;;  %6411 = vmatpush1.bf16.msra.mxu1 %v10142_v9  ;;  %v10223_v9 = vld [vmem:[%s12017_s21 + $0x1d0] ss:$8 sps:$4 sm:$0xff]   ;;  %v10228_v10 = vld [vmem:[%s12017_s21 + $0x9e4] ss:$8 sps:$4 sm:$0xff]  }
 0x165   : > { %8275 = vmatpush1.bf16.msra.mxu0 %v10145_v11  ;;  %6412 = vmatprep.subr.bf16.mxu1 %v10150_v12  ;;  %v10231_v11 = vld [vmem:[%s12017_s21 + $0x1e4] ss:$8 sps:$4 sm:$0xff]   ;;  %v10226_v12 = vld [vmem:[%s12017_s21 + $0x9e0] ss:$8 sps:$4 sm:$0xff]  }
 0x166   : > { %8276 = vmatprep.subr.bf16.mxu0 %v10153_v13  ;;  %8263 = vmatprep.mubr.bf16.mxu0 %v9260_v52  ;;  %v10190_v52 = vld [vmem:[%s12017_s21 + $0x980] ss:$8 sps:$4 sm:$0xff]  }
 0x167   : > { %6399 = vmatprep.mubr.bf16.mxu1 %v9276_v32  ;;  %v10229_v13 = vld [vmem:[%s12017_s21 + $0x1e0] ss:$8 sps:$4 sm:$0xff]   ;;  %v10255_v32 = vld [vmem:[%s12017_s21 + $0x224] ss:$8 sps:$4 sm:$0xff]  }
 0x168   : > { %6413 = vmatpush1.bf16.msra.mxu1 %v10148_v14  ;;  %v10234_v14 = vld [vmem:[%s12017_s21 + $0x9f4] ss:$8 sps:$4 sm:$0xff]  }
 0x169   : > { %8277 = vmatpush1.bf16.msra.mxu0 %v10151_v15  ;;  %6414 = vmatprep.subr.bf16.mxu1 %v10156_v16  ;;  %v10237_v15 = vld [vmem:[%s12017_s21 + $0x1f4] ss:$8 sps:$4 sm:$0xff]   ;;  %v10232_v16 = vld [vmem:[%s12017_s21 + $0x9f0] ss:$8 sps:$4 sm:$0xff]  }
 0x16a   : > { %8278 = vmatprep.subr.bf16.mxu0 %v10159_v17  ;;  %v10235_v17 = vld [vmem:[%s12017_s21 + $0x1f0] ss:$8 sps:$4 sm:$0xff]  }
 0x16b   : > { %6400 = vmatmul.mubr.bf16.gmra.mrb[4].mxu1 %v9275_v33  ;;  %v10250_v33 = vld [vmem:[%s12017_s21 + $0xa20] ss:$8 sps:$4 sm:$0xff]  }
 0x16c   : > { %8264 = vmatmul.mubr.bf16.gmra.mrb[4].mxu0 %v9259_v8  ;;  %6415 = vmatpush1.bf16.msra.mxu1 %v10154_v18  ;;  %v10220_v8 = vld [vmem:[%s12017_s21 + $0x9d0] ss:$8 sps:$4 sm:$0xff]   ;;  %v10240_v18 = vld [vmem:[%s12017_s21 + $0xa04] ss:$8 sps:$4 sm:$0xff]  }
 0x16d   : > { %8279 = vmatpush1.bf16.msra.mxu0 %v10157_v19  ;;  %6416 = vmatprep.subr.bf16.mxu1 %v10162_v20  ;;  %v10243_v19 = vld [vmem:[%s12017_s21 + $0x204] ss:$8 sps:$4 sm:$0xff]   ;;  %v10238_v20 = vld [vmem:[%s12017_s21 + $0xa00] ss:$8 sps:$4 sm:$0xff]  }
 0x16e   : > { %8280 = vmatprep.subr.bf16.mxu0 %v10165_v21  ;;  %6442 = vmatprep.mubr.bf16.mxu1 %v12133_v43  ;;  %v10241_v21 = vld [vmem:[%s12017_s21 + $0x200] ss:$8 sps:$4 sm:$0xff]  }
 0x16f   : > { %8306 = vmatprep.mubr.bf16.mxu0 %v9550_v47  ;;  %v10267_v47 = vld [vmem:[%s12017_s21 + $0x244] ss:$8 sps:$4 sm:$0xff]  }
 0x170   : > { %6417 = vmatpush1.bf16.msra.mxu1 %v10160_v22  ;;  %v9261_v22 = vcombine.low %v12125_v40, %v12128_v41  ;;  %v10258_v40 = vld [vmem:[%s12017_s21 + $0xa34] ss:$8 sps:$4 sm:$0xff]  }
 0x171   : > { %8281 = vmatpush1.bf16.msra.mxu0 %v10163_v23  ;;  %6418 = vmatprep.subr.bf16.mxu1 %v10168_v24  ;;  %v9549_v23 = vcombine.low %v12137_v45, %v12140_v46  ;;  %v4645_v24 = vld [vmem:[%s12068_s26 + $0x108] sm:$0xff]  ;;  %v10261_v41 = vld [vmem:[%s12017_s21 + $0x234] ss:$8 sps:$4 sm:$0xff]   ;;  %v10259_v45 = vld [vmem:[%s12017_s21 + $0x230] ss:$8 sps:$4 sm:$0xff]  }
 0x172   : > { %8282 = vmatprep.subr.bf16.mxu0 %v10171_v25  ;;  %v4653_v25 = vld [vmem:[%s12068_s26 + $0x148] sm:$0xff] }
 0x173   : > { %v10264_v46 = vld [vmem:[%s12017_s21 + $0xa44] ss:$8 sps:$4 sm:$0xff]  }
 0x174   : > { %6419 = vmatpush1.bf16.msra.mxu1 %v10166_v26  ;;  %v10246_v26 = vld [vmem:[%s12017_s21 + $0xa14] ss:$8 sps:$4 sm:$0xff]  }
 0x175   : > { %8283 = vmatpush1.bf16.msra.mxu0 %v10169_v27  ;;  %6420 = vmatprep.subr.bf16.mxu1 %v10174_v28  ;;  %v10249_v27 = vld [vmem:[%s12017_s21 + $0x214] ss:$8 sps:$4 sm:$0xff]   ;;  %v9278_v28 = vcombine.high %v4645_v24, %v4653_v25 }
 0x176   : > { %8284 = vmatprep.subr.bf16.mxu0 %v10177_v29  ;;  %v10244_v29 = vld [vmem:[%s12017_s21 + $0xa10] ss:$8 sps:$4 sm:$0xff]  }
 0x178   : > { %6421 = vmatpush1.bf16.msra.mxu1 %v10172_v34  ;;  %v10253_v34 = vld [vmem:[%s12017_s21 + $0x220] ss:$8 sps:$4 sm:$0xff]  }
 0x179   : > { %8285 = vmatpush1.bf16.msra.mxu0 %v10175_v35  ;;  %6422 = vmatprep.subr.bf16.mxu1 %v10180_v36  ;;  %v12199_v35 = vld [vmem:[%s12068_s26 + $0x90] sm:$0xff] }
 0x17a   : > { %8286 = vmatprep.subr.bf16.mxu0 %v10183_v37  ;;  %v12202_v36 = vld [vmem:[%s12068_s26 + $0xd0] sm:$0xff]  ;;  %v9277_v37 = vcombine.low %v4645_v24, %v4653_v25  ;;  %v10322_v24 = vld [vmem:[%s12017_s21 + $0xae0] ss:$8 sps:$4 sm:$0xff]  }
 0x17b   : > { %v10325_v25 = vld [vmem:[%s12017_s21 + $0x2e0] ss:$8 sps:$4 sm:$0xff]  }
 0x17c   : > { %6423 = vmatpush1.bf16.msra.mxu1 %v10178_v38  ;;  %v12205_v38 = vld [vmem:[%s12068_s26 + $0x10] sm:$0xff] }
 0x17d   : > { %8287 = vmatpush1.bf16.msra.mxu0 %v10181_v39  ;;  %6424 = vmatprep.subr.bf16.mxu1 %v10186_v42  ;;  %v12208_v39 = vld [vmem:[%s12068_s26 + $0x50] sm:$0xff]  ;;  %v12214_v42 = vcombine.high %v12199_v35, %v12202_v36 }
 0x17e   : > { %8288 = vmatprep.subr.bf16.mxu0 %v10189_v44  ;;  %v10256_v44 = vld [vmem:[%s12017_s21 + $0xa30] ss:$8 sps:$4 sm:$0xff]  }
 0x180   : > { %6425 = vmatpush1.bf16.msra.mxu1 %v10184_v48  ;;  %v10262_v48 = vld [vmem:[%s12017_s21 + $0xa40] ss:$8 sps:$4 sm:$0xff]  }
 0x181   : > { %8289 = vmatpush1.bf16.msra.mxu0 %v10187_v49  ;;  %6426 = vmatprep.subr.bf16.mxu1 %v10192_v50  ;;  %v10265_v49 = vld [vmem:[%s12017_s21 + $0x240] ss:$8 sps:$4 sm:$0xff]   ;;  %v10270_v50 = vld [vmem:[%s12017_s21 + $0xa54] ss:$8 sps:$4 sm:$0xff]  }
 0x182   : > { %8290 = vmatprep.subr.bf16.mxu0 %v10195_v51  ;;  %v10273_v51 = vld [vmem:[%s12017_s21 + $0x254] ss:$8 sps:$4 sm:$0xff]  }
 0x184   : > { %6427 = vmatpush1.bf16.msra.mxu1 %v10190_v52  ;;  %v10268_v52 = vld [vmem:[%s12017_s21 + $0xa50] ss:$8 sps:$4 sm:$0xff]  }
 0x185   : > { %8291 = vmatpush1.bf16.msra.mxu0 %v10193_v53  ;;  %6428 = vmatprep.subr.bf16.mxu1 %v10198_v54  ;;  %v10271_v53 = vld [vmem:[%s12017_s21 + $0x250] ss:$8 sps:$4 sm:$0xff]   ;;  %v10276_v54 = vld [vmem:[%s12017_s21 + $0xa64] ss:$8 sps:$4 sm:$0xff]  }
 0x186   : > { %8292 = vmatprep.subr.bf16.mxu0 %v10201_v55  ;;  %v10279_v55 = vld [vmem:[%s12017_s21 + $0x264] ss:$8 sps:$4 sm:$0xff]  }
 0x188   : > { %6429 = vmatpush1.bf16.msra.mxu1 %v10196_v56  ;;  %v10274_v56 = vld [vmem:[%s12017_s21 + $0xa60] ss:$8 sps:$4 sm:$0xff]  }
 0x189   : > { %8293 = vmatpush1.bf16.msra.mxu0 %v10199_v57  ;;  %6430 = vmatprep.subr.bf16.mxu1 %v10204_v58  ;;  %v10277_v57 = vld [vmem:[%s12017_s21 + $0x260] ss:$8 sps:$4 sm:$0xff]   ;;  %v10282_v58 = vld [vmem:[%s12017_s21 + $0xa74] ss:$8 sps:$4 sm:$0xff]  }
 0x18a   : > { %8294 = vmatprep.subr.bf16.mxu0 %v10207_v59  ;;  %v10285_v59 = vld [vmem:[%s12017_s21 + $0x274] ss:$8 sps:$4 sm:$0xff]  }
 0x18c   : > { %6431 = vmatpush1.bf16.msra.mxu1 %v10202_v60  ;;  %v10280_v60 = vld [vmem:[%s12017_s21 + $0xa70] ss:$8 sps:$4 sm:$0xff]  }
 0x18d   : > { %8295 = vmatpush1.bf16.msra.mxu0 %v10205_v61  ;;  %6432 = vmatprep.subr.bf16.mxu1 %v10210_v62  ;;  %v10283_v61 = vld [vmem:[%s12017_s21 + $0x270] ss:$8 sps:$4 sm:$0xff]   ;;  %v10288_v62 = vld [vmem:[%s12017_s21 + $0xa84] ss:$8 sps:$4 sm:$0xff]  }
 0x18e   : > { %8296 = vmatprep.subr.bf16.mxu0 %v10213_v63  ;;  %v10291_v63 = vld [vmem:[%s12017_s21 + $0x284] ss:$8 sps:$4 sm:$0xff]  }
 0x190   : > { %6433 = vmatpush1.bf16.msra.mxu1 %v10208_v0  ;;  %v10286_v0 = vld [vmem:[%s12017_s21 + $0xa80] ss:$8 sps:$4 sm:$0xff]  }
 0x191   : > { %8297 = vmatpush1.bf16.msra.mxu0 %v10211_v1  ;;  %6434 = vmatprep.subr.bf16.mxu1 %v10216_v2  ;;  %v10289_v1 = vld [vmem:[%s12017_s21 + $0x280] ss:$8 sps:$4 sm:$0xff]   ;;  %v10294_v2 = vld [vmem:[%s12017_s21 + $0xa94] ss:$8 sps:$4 sm:$0xff]  }
 0x192   : > { %8298 = vmatprep.subr.bf16.mxu0 %v10219_v3  ;;  %v10297_v3 = vld [vmem:[%s12017_s21 + $0x294] ss:$8 sps:$4 sm:$0xff]  }
 0x194   : > { %6435 = vmatpush1.bf16.msra.mxu1 %v10214_v4  ;;  %v10292_v4 = vld [vmem:[%s12017_s21 + $0xa90] ss:$8 sps:$4 sm:$0xff]  }
 0x195   : > { %8299 = vmatpush1.bf16.msra.mxu0 %v10217_v5  ;;  %6436 = vmatprep.subr.bf16.mxu1 %v10222_v6  ;;  %v10295_v5 = vld [vmem:[%s12017_s21 + $0x290] ss:$8 sps:$4 sm:$0xff]   ;;  %v10300_v6 = vld [vmem:[%s12017_s21 + $0xaa4] ss:$8 sps:$4 sm:$0xff]  }
 0x196   : > { %8300 = vmatprep.subr.bf16.mxu0 %v10225_v7  ;;  %v10303_v7 = vld [vmem:[%s12017_s21 + $0x2a4] ss:$8 sps:$4 sm:$0xff]  }
 0x198   : > { %6437 = vmatpush1.bf16.msra.mxu1 %v10220_v8  ;;  %v10298_v8 = vld [vmem:[%s12017_s21 + $0xaa0] ss:$8 sps:$4 sm:$0xff]  }
 0x199   : > { %8301 = vmatpush1.bf16.msra.mxu0 %v10223_v9  ;;  %6438 = vmatprep.subr.bf16.mxu1 %v10228_v10  ;;  %v10301_v9 = vld [vmem:[%s12017_s21 + $0x2a0] ss:$8 sps:$4 sm:$0xff]   ;;  %v10306_v10 = vld [vmem:[%s12017_s21 + $0xab4] ss:$8 sps:$4 sm:$0xff]  }
 0x19a   : > { %8302 = vmatprep.subr.bf16.mxu0 %v10231_v11  ;;  %v10309_v11 = vld [vmem:[%s12017_s21 + $0x2b4] ss:$8 sps:$4 sm:$0xff]  }
 0x19c   : > { %6439 = vmatpush1.bf16.msra.mxu1 %v10226_v12  ;;  %v10304_v12 = vld [vmem:[%s12017_s21 + $0xab0] ss:$8 sps:$4 sm:$0xff]  }
 0x19d   : > { %8303 = vmatpush1.bf16.msra.mxu0 %v10229_v13  ;;  %6440 = vmatprep.subr.bf16.mxu1 %v10234_v14  ;;  %v10307_v13 = vld [vmem:[%s12017_s21 + $0x2b0] ss:$8 sps:$4 sm:$0xff]   ;;  %v10312_v14 = vld [vmem:[%s12017_s21 + $0xac4] ss:$8 sps:$4 sm:$0xff]  }
 0x19e   : > { %8304 = vmatprep.subr.bf16.mxu0 %v10237_v15  ;;  %v10315_v15 = vld [vmem:[%s12017_s21 + $0x2c4] ss:$8 sps:$4 sm:$0xff]  }
 0x1a0   : > { %6441 = vmatpush1.bf16.msra.mxu1 %v10232_v16  ;;  %v10310_v16 = vld [vmem:[%s12017_s21 + $0xac0] ss:$8 sps:$4 sm:$0xff]  }
 0x1a1   : > { %8305 = vmatpush1.bf16.msra.mxu0 %v10235_v17  ;;  %6463 = vmatprep.subr.bf16.mxu1 %v10240_v18  ;;  %v10313_v17 = vld [vmem:[%s12017_s21 + $0x2c0] ss:$8 sps:$4 sm:$0xff]   ;;  %v10318_v18 = vld [vmem:[%s12017_s21 + $0xad4] ss:$8 sps:$4 sm:$0xff]  }
 0x1a2   : > { %8327 = vmatprep.subr.bf16.mxu0 %v10243_v19  ;;  %v10321_v19 = vld [vmem:[%s12017_s21 + $0x2d4] ss:$8 sps:$4 sm:$0xff]  }
 0x1a3   : > { %6443 = vmatmul.mubr.bf16.vlgmr.msra.gmra.mrb[0].mxu1 %v9261_v22 }
 0x1a4   : > { %8307 = vmatmul.mubr.bf16.vlgmr.msra.gmra.mrb[0].mxu0 %v9549_v23  ;;  %6464 = vmatpush1.bf16.msra.mxu1 %v10238_v20  ;;  %v10316_v20 = vld [vmem:[%s12017_s21 + $0xad0] ss:$8 sps:$4 sm:$0xff]   ;;  %v10327_v23 = vld [vmem:[%s12017_s21 + $0x2e4] ss:$8 sps:$4 sm:$0xff]  }
 0x1a5   : > { %8328 = vmatpush1.bf16.msra.mxu0 %v10241_v21  ;;  %6465 = vmatprep.subr.bf16.mxu1 %v10246_v26  ;;  %v10319_v21 = vld [vmem:[%s12017_s21 + $0x2d0] ss:$8 sps:$4 sm:$0xff]   ;;  %v10330_v26 = vld [vmem:[%s12017_s21 + $0xaf4] ss:$8 sps:$4 sm:$0xff]  }
 0x1a6   : > { %8329 = vmatprep.subr.bf16.mxu0 %v10249_v27  ;;  %6452 = vmatprep.mubr.bf16.mxu1 %v9278_v28  ;;  %v10333_v27 = vld [vmem:[%s12017_s21 + $0x2f4] ss:$8 sps:$4 sm:$0xff]   ;;  %v10328_v28 = vld [vmem:[%s12017_s21 + $0xaf0] ss:$8 sps:$4 sm:$0xff]  }
 0x1a7   : > { %8316 = vmatprep.mubr.bf16.mxu0 %v12133_v43  ;;  %v9552_v43 = vcombine.high %v12205_v38, %v12208_v39 }
 0x1a8   : > { %6466 = vmatpush1.bf16.msra.mxu1 %v10244_v29  ;;  %v10331_v29 = vld [vmem:[%s12017_s21 + $0x2f0] ss:$8 sps:$4 sm:$0xff]  }
 0x1a9   : > { %8330 = vmatpush1.bf16.msra.mxu0 %v10247_v30  ;;  %6467 = vmatprep.subr.bf16.mxu1 %v10252_v31  ;;  %v10336_v30 = vld [vmem:[%s12017_s21 + $0xb04] ss:$8 sps:$4 sm:$0xff]  }
 0x1aa   : > { %8331 = vmatprep.subr.bf16.mxu0 %v10255_v32  ;;  %v10339_v31 = vld [vmem:[%s12017_s21 + $0x304] ss:$8 sps:$4 sm:$0xff]   ;;  %v4646_v32 = vld [vmem:[%s12068_s26 + $0x110] sm:$0xff] }
 0x1ab   : > { %6453 = vmatmul.mubr.bf16.gmra.mrb[4].mxu1 %v9277_v37  ;;  %v4654_v37 = vld [vmem:[%s12068_s26 + $0x150] sm:$0xff] }
 0x1ac   : > { %8317 = vmatmul.mubr.bf16.gmra.mrb[4].mxu0 %v9261_v22  ;;  %6468 = vmatpush1.bf16.msra.mxu1 %v10250_v33  ;;  %v10324_v22 = vld [vmem:[%s12017_s21 + $0xae4] ss:$8 sps:$4 sm:$0xff]   ;;  %v9263_v33 = vcombine.low %v12199_v35, %v12202_v36  ;;  %v10343_v35 = vld [vmem:[%s12017_s21 + $0x310] ss:$8 sps:$4 sm:$0xff]  }
 0x1ad   : > { %8332 = vmatpush1.bf16.msra.mxu0 %v10253_v34  ;;  %6469 = vmatprep.subr.bf16.mxu1 %v10258_v40  ;;  %v9551_v34 = vcombine.low %v12205_v38, %v12208_v39  ;;  %v10334_v40 = vld [vmem:[%s12017_s21 + $0xb00] ss:$8 sps:$4 sm:$0xff]   ;;  %v10348_v36 = vld [vmem:[%s12017_s21 + $0xb24] ss:$8 sps:$4 sm:$0xff]   ;;  %v12286_v39 = vld [vmem:[%s12068_s26 + $0x98] sm:$0xff] }
 0x1ae   : > { %8333 = vmatprep.subr.bf16.mxu0 %v10261_v41  ;;  %6495 = vmatprep.mubr.bf16.mxu1 %v12214_v42  ;;  %v10337_v41 = vld [vmem:[%s12017_s21 + $0x300] ss:$8 sps:$4 sm:$0xff]   ;;  %v10351_v38 = vld [vmem:[%s12017_s21 + $0x324] ss:$8 sps:$4 sm:$0xff]  }
 0x1af   : > { %8359 = vmatprep.mubr.bf16.mxu0 %v9552_v43  ;;  %v10342_v43 = vld [vmem:[%s12017_s21 + $0xb14] ss:$8 sps:$4 sm:$0xff]  }
 0x1b0   : > { %6470 = vmatpush1.bf16.msra.mxu1 %v10256_v44  ;;  %v10345_v44 = vld [vmem:[%s12017_s21 + $0x314] ss:$8 sps:$4 sm:$0xff]  }
 0x1b1   : > { %8334 = vmatpush1.bf16.msra.mxu0 %v10259_v45  ;;  %6471 = vmatprep.subr.bf16.mxu1 %v10264_v46  ;;  %v10340_v45 = vld [vmem:[%s12017_s21 + $0xb10] ss:$8 sps:$4 sm:$0xff]   ;;  %v9280_v46 = vcombine.high %v4646_v32, %v4654_v37 }
 0x1b2   : > { %8335 = vmatprep.subr.bf16.mxu0 %v10267_v47  ;;  %v12289_v47 = vld [vmem:[%s12068_s26 + $0xd8] sm:$0xff] }
 0x1b4   : > { %6472 = vmatpush1.bf16.msra.mxu1 %v10262_v48  ;;  %v12293_v48 = vld [vmem:[%s12068_s26 + $0x18] sm:$0xff] }
 0x1b5   : > { %8336 = vmatpush1.bf16.msra.mxu0 %v10265_v49  ;;  %6473 = vmatprep.subr.bf16.mxu1 %v10270_v50  ;;  %v9279_v49 = vcombine.low %v4646_v32, %v4654_v37  ;;  %v12296_v50 = vld [vmem:[%s12068_s26 + $0x58] sm:$0xff]  ;;  %v10423_v37 = vld [vmem:[%s12017_s21 + $0x3e4] ss:$8 sps:$4 sm:$0xff]  }
 0x1b6   : > { %8337 = vmatprep.subr.bf16.mxu0 %v10273_v51  ;;  %v10346_v51 = vld [vmem:[%s12017_s21 + $0xb20] ss:$8 sps:$4 sm:$0xff]   ;;  %v10412_v32 = vld [vmem:[%s12017_s21 + $0xbd0] ss:$8 sps:$4 sm:$0xff]  }
 0x1b8   : > { %6474 = vmatpush1.bf16.msra.mxu1 %v10268_v52  ;;  %v10349_v52 = vld [vmem:[%s12017_s21 + $0x320] ss:$8 sps:$4 sm:$0xff]  }
 0x1b9   : > { %8338 = vmatpush1.bf16.msra.mxu0 %v10271_v53  ;;  %6475 = vmatprep.subr.bf16.mxu1 %v10276_v54  ;;  %v10354_v53 = vld [vmem:[%s12017_s21 + $0xb34] ss:$8 sps:$4 sm:$0xff]  }
 0x1ba   : > { %8339 = vmatprep.subr.bf16.mxu0 %v10279_v55  ;;  %v10357_v54 = vld [vmem:[%s12017_s21 + $0x334] ss:$8 sps:$4 sm:$0xff]   ;;  %v9554_v55 = vcombine.high %v12293_v48, %v12296_v50 }
 0x1bc   : > { %6476 = vmatpush1.bf16.msra.mxu1 %v10274_v56  ;;  %v10352_v56 = vld [vmem:[%s12017_s21 + $0xb30] ss:$8 sps:$4 sm:$0xff]  }
 0x1bd   : > { %8340 = vmatpush1.bf16.msra.mxu0 %v10277_v57  ;;  %6477 = vmatprep.subr.bf16.mxu1 %v10282_v58  ;;  %v10355_v57 = vld [vmem:[%s12017_s21 + $0x330] ss:$8 sps:$4 sm:$0xff]   ;;  %v10360_v58 = vld [vmem:[%s12017_s21 + $0xb44] ss:$8 sps:$4 sm:$0xff]  }
 0x1be   : > { %8341 = vmatprep.subr.bf16.mxu0 %v10285_v59  ;;  %v10363_v59 = vld [vmem:[%s12017_s21 + $0x344] ss:$8 sps:$4 sm:$0xff]  }
 0x1c0   : > { %6478 = vmatpush1.bf16.msra.mxu1 %v10280_v60  ;;  %v10358_v60 = vld [vmem:[%s12017_s21 + $0xb40] ss:$8 sps:$4 sm:$0xff]  }
 0x1c1   : > { %8342 = vmatpush1.bf16.msra.mxu0 %v10283_v61  ;;  %6479 = vmatprep.subr.bf16.mxu1 %v10288_v62  ;;  %v10361_v61 = vld [vmem:[%s12017_s21 + $0x340] ss:$8 sps:$4 sm:$0xff]   ;;  %v10366_v62 = vld [vmem:[%s12017_s21 + $0xb54] ss:$8 sps:$4 sm:$0xff]  }
 0x1c2   : > { %8343 = vmatprep.subr.bf16.mxu0 %v10291_v63  ;;  %v10369_v63 = vld [vmem:[%s12017_s21 + $0x354] ss:$8 sps:$4 sm:$0xff]  }
 0x1c4   : > { %6480 = vmatpush1.bf16.msra.mxu1 %v10286_v0  ;;  %v10364_v0 = vld [vmem:[%s12017_s21 + $0xb50] ss:$8 sps:$4 sm:$0xff]  }
 0x1c5   : > { %8344 = vmatpush1.bf16.msra.mxu0 %v10289_v1  ;;  %6481 = vmatprep.subr.bf16.mxu1 %v10294_v2  ;;  %v10367_v1 = vld [vmem:[%s12017_s21 + $0x350] ss:$8 sps:$4 sm:$0xff]   ;;  %v10372_v2 = vld [vmem:[%s12017_s21 + $0xb64] ss:$8 sps:$4 sm:$0xff]  }
 0x1c6   : > { %8345 = vmatprep.subr.bf16.mxu0 %v10297_v3  ;;  %v10375_v3 = vld [vmem:[%s12017_s21 + $0x364] ss:$8 sps:$4 sm:$0xff]  }
 0x1c8   : > { %6482 = vmatpush1.bf16.msra.mxu1 %v10292_v4  ;;  %v10370_v4 = vld [vmem:[%s12017_s21 + $0xb60] ss:$8 sps:$4 sm:$0xff]  }
 0x1c9   : > { %8346 = vmatpush1.bf16.msra.mxu0 %v10295_v5  ;;  %6483 = vmatprep.subr.bf16.mxu1 %v10300_v6  ;;  %v10373_v5 = vld [vmem:[%s12017_s21 + $0x360] ss:$8 sps:$4 sm:$0xff]   ;;  %v10378_v6 = vld [vmem:[%s12017_s21 + $0xb74] ss:$8 sps:$4 sm:$0xff]  }
 0x1ca   : > { %8347 = vmatprep.subr.bf16.mxu0 %v10303_v7  ;;  %v10381_v7 = vld [vmem:[%s12017_s21 + $0x374] ss:$8 sps:$4 sm:$0xff]  }
 0x1cc   : > { %6484 = vmatpush1.bf16.msra.mxu1 %v10298_v8  ;;  %v10376_v8 = vld [vmem:[%s12017_s21 + $0xb70] ss:$8 sps:$4 sm:$0xff]  }
 0x1cd   : > { %8348 = vmatpush1.bf16.msra.mxu0 %v10301_v9  ;;  %6485 = vmatprep.subr.bf16.mxu1 %v10306_v10  ;;  %v10379_v9 = vld [vmem:[%s12017_s21 + $0x370] ss:$8 sps:$4 sm:$0xff]   ;;  %v10384_v10 = vld [vmem:[%s12017_s21 + $0xb84] ss:$8 sps:$4 sm:$0xff]  }
 0x1ce   : > { %8349 = vmatprep.subr.bf16.mxu0 %v10309_v11  ;;  %v10387_v11 = vld [vmem:[%s12017_s21 + $0x384] ss:$8 sps:$4 sm:$0xff]  }
 0x1d0   : > { %6486 = vmatpush1.bf16.msra.mxu1 %v10304_v12  ;;  %v10382_v12 = vld [vmem:[%s12017_s21 + $0xb80] ss:$8 sps:$4 sm:$0xff]  }
 0x1d1   : > { %8350 = vmatpush1.bf16.msra.mxu0 %v10307_v13  ;;  %6487 = vmatprep.subr.bf16.mxu1 %v10312_v14  ;;  %v10385_v13 = vld [vmem:[%s12017_s21 + $0x380] ss:$8 sps:$4 sm:$0xff]   ;;  %v10390_v14 = vld [vmem:[%s12017_s21 + $0xb94] ss:$8 sps:$4 sm:$0xff]  }
 0x1d2   : > { %8351 = vmatprep.subr.bf16.mxu0 %v10315_v15  ;;  %v10393_v15 = vld [vmem:[%s12017_s21 + $0x394] ss:$8 sps:$4 sm:$0xff]  }
 0x1d4   : > { %6488 = vmatpush1.bf16.msra.mxu1 %v10310_v16  ;;  %v10388_v16 = vld [vmem:[%s12017_s21 + $0xb90] ss:$8 sps:$4 sm:$0xff]  }
 0x1d5   : > { %8352 = vmatpush1.bf16.msra.mxu0 %v10313_v17  ;;  %6489 = vmatprep.subr.bf16.mxu1 %v10318_v18  ;;  %v10391_v17 = vld [vmem:[%s12017_s21 + $0x390] ss:$8 sps:$4 sm:$0xff]   ;;  %v10396_v18 = vld [vmem:[%s12017_s21 + $0xba4] ss:$8 sps:$4 sm:$0xff]  }
 0x1d6   : > { %8353 = vmatprep.subr.bf16.mxu0 %v10321_v19  ;;  %v10399_v19 = vld [vmem:[%s12017_s21 + $0x3a4] ss:$8 sps:$4 sm:$0xff]  }
 0x1d8   : > { %6490 = vmatpush1.bf16.msra.mxu1 %v10316_v20  ;;  %v10394_v20 = vld [vmem:[%s12017_s21 + $0xba0] ss:$8 sps:$4 sm:$0xff]  }
 0x1d9   : > { %8354 = vmatpush1.bf16.msra.mxu0 %v10319_v21  ;;  %6491 = vmatprep.subr.bf16.mxu1 %v10324_v22  ;;  %v10397_v21 = vld [vmem:[%s12017_s21 + $0x3a0] ss:$8 sps:$4 sm:$0xff]   ;;  %v10402_v22 = vld [vmem:[%s12017_s21 + $0xbb4] ss:$8 sps:$4 sm:$0xff]  }
 0x1da   : > { %8355 = vmatprep.subr.bf16.mxu0 %v10327_v23  ;;  %v10405_v23 = vld [vmem:[%s12017_s21 + $0x3b4] ss:$8 sps:$4 sm:$0xff]  }
 0x1dc   : > { %6492 = vmatpush1.bf16.msra.mxu1 %v10322_v24  ;;  %v10400_v24 = vld [vmem:[%s12017_s21 + $0xbb0] ss:$8 sps:$4 sm:$0xff]  }
 0x1dd   : > { %8356 = vmatpush1.bf16.msra.mxu0 %v10325_v25  ;;  %6493 = vmatprep.subr.bf16.mxu1 %v10330_v26  ;;  %v10403_v25 = vld [vmem:[%s12017_s21 + $0x3b0] ss:$8 sps:$4 sm:$0xff]   ;;  %v10408_v26 = vld [vmem:[%s12017_s21 + $0xbc4] ss:$8 sps:$4 sm:$0xff]  }
 0x1de   : > { %8357 = vmatprep.subr.bf16.mxu0 %v10333_v27  ;;  %v10411_v27 = vld [vmem:[%s12017_s21 + $0x3c4] ss:$8 sps:$4 sm:$0xff]  }
 0x1e0   : > { %6494 = vmatpush1.bf16.msra.mxu1 %v10328_v28  ;;  %v10406_v28 = vld [vmem:[%s12017_s21 + $0xbc0] ss:$8 sps:$4 sm:$0xff]  }
 0x1e1   : > { %8358 = vmatpush1.bf16.msra.mxu0 %v10331_v29  ;;  %6516 = vmatprep.subr.bf16.mxu1 %v10336_v30  ;;  %v10409_v29 = vld [vmem:[%s12017_s21 + $0x3c0] ss:$8 sps:$4 sm:$0xff]   ;;  %v10414_v30 = vld [vmem:[%s12017_s21 + $0xbd4] ss:$8 sps:$4 sm:$0xff]  }
 0x1e2   : > { %8380 = vmatprep.subr.bf16.mxu0 %v10339_v31  ;;  %v10417_v31 = vld [vmem:[%s12017_s21 + $0x3d4] ss:$8 sps:$4 sm:$0xff]  }
 0x1e3   : > { %6496 = vmatmul.mubr.bf16.vlgmr.msra.gmra.mrb[0].mxu1 %v9263_v33 }
 0x1e4   : > { %8360 = vmatmul.mubr.bf16.vlgmr.msra.gmra.mrb[0].mxu0 %v9551_v34  ;;  %6517 = vmatpush1.bf16.msra.mxu1 %v10334_v40  ;;  %v10420_v34 = vld [vmem:[%s12017_s21 + $0xbe4] ss:$8 sps:$4 sm:$0xff]   ;;  %v10418_v40 = vld [vmem:[%s12017_s21 + $0xbe0] ss:$8 sps:$4 sm:$0xff]  }
 0x1e5   : > { %8381 = vmatpush1.bf16.msra.mxu0 %v10337_v41  ;;  %6518 = vmatprep.subr.bf16.mxu1 %v10342_v43  ;;  %v10421_v41 = vld [vmem:[%s12017_s21 + $0x3e0] ss:$8 sps:$4 sm:$0xff]   ;;  %v10426_v43 = vld [vmem:[%s12017_s21 + $0xbf4] ss:$8 sps:$4 sm:$0xff]  }
 0x1e6   : > { %8382 = vmatprep.subr.bf16.mxu0 %v10345_v44  ;;  %6505 = vmatprep.mubr.bf16.mxu1 %v9280_v46  ;;  %v10429_v44 = vld [vmem:[%s12017_s21 + $0x3f4] ss:$8 sps:$4 sm:$0xff]   ;;  %v10427_v46 = vld [vmem:[%s12017_s21 + $0x3f0] ss:$8 sps:$4 sm:$0xff]  }
 0x1e7   : > { %8369 = vmatprep.mubr.bf16.mxu0 %v12214_v42  ;;  %v12304_v42 = vcombine.high %v12286_v39, %v12289_v47 }
 0x1e8   : > { %6519 = vmatpush1.bf16.msra.mxu1 %v10340_v45  ;;  %v10424_v45 = vld [vmem:[%s12017_s21 + $0xbf0] ss:$8 sps:$4 sm:$0xff]  }
 0x1e9   : > { %8383 = vmatpush1.bf16.msra.mxu0 %v10343_v35  ;;  %6520 = vmatprep.subr.bf16.mxu1 %v10348_v36  ;;  %v10432_v35 = vld [vmem:[%s12017_s21 + $0xc04] ss:$8 sps:$4 sm:$0xff]  }
 0x1ea   : > { %8384 = vmatprep.subr.bf16.mxu0 %v10351_v38  ;;  %v10435_v36 = vld [vmem:[%s12017_s21 + $0x404] ss:$8 sps:$4 sm:$0xff]   ;;  %v10430_v38 = vld [vmem:[%s12017_s21 + $0xc00] ss:$8 sps:$4 sm:$0xff]  }
 0x1eb   : > { %6506 = vmatmul.mubr.bf16.gmra.mrb[4].mxu1 %v9279_v49  ;;  %v10433_v49 = vld [vmem:[%s12017_s21 + $0x400] ss:$8 sps:$4 sm:$0xff]  }
 0x1ec   : > { %8370 = vmatmul.mubr.bf16.gmra.mrb[4].mxu0 %v9263_v33  ;;  %6521 = vmatpush1.bf16.msra.mxu1 %v10346_v51  ;;  %v10415_v33 = vld [vmem:[%s12017_s21 + $0x3d0] ss:$8 sps:$4 sm:$0xff]   ;;  %v9265_v51 = vcombine.low %v12286_v39, %v12289_v47 }
 0x1ed   : > { %8385 = vmatpush1.bf16.msra.mxu0 %v10349_v52  ;;  %6522 = vmatprep.subr.bf16.mxu1 %v10354_v53  ;;  %v9553_v52 = vcombine.low %v12293_v48, %v12296_v50  ;;  %v4647_v53 = vld [vmem:[%s12068_s26 + $0x118] sm:$0xff]  ;;  %v10444_v48 = vld [vmem:[%s12017_s21 + $0xc24] ss:$8 sps:$4 sm:$0xff]  }
 0x1ee   : > { %8386 = vmatprep.subr.bf16.mxu0 %v10357_v54  ;;  %6548 = vmatprep.mubr.bf16.mxu1 %v12304_v42  ;;  %v4655_v54 = vld [vmem:[%s12068_s26 + $0x158] sm:$0xff]  ;;  %v10447_v50 = vld [vmem:[%s12017_s21 + $0x424] ss:$8 sps:$4 sm:$0xff]  }
 0x1ef   : > { %8412 = vmatprep.mubr.bf16.mxu0 %v9554_v55  ;;  %v10438_v55 = vld [vmem:[%s12017_s21 + $0xc14] ss:$8 sps:$4 sm:$0xff]   ;;  %v10436_v39 = vld [vmem:[%s12017_s21 + $0xc10] ss:$8 sps:$4 sm:$0xff]  }
 0x1f0   : > { %6523 = vmatpush1.bf16.msra.mxu1 %v10352_v56  ;;  %v10441_v56 = vld [vmem:[%s12017_s21 + $0x414] ss:$8 sps:$4 sm:$0xff]   ;;  %v10439_v47 = vld [vmem:[%s12017_s21 + $0x410] ss:$8 sps:$4 sm:$0xff]  }
 0x1f1   : > { %8387 = vmatpush1.bf16.msra.mxu0 %v10355_v57  ;;  %6524 = vmatprep.subr.bf16.mxu1 %v10360_v58  ;;  %v9282_v57 = vcombine.high %v4647_v53, %v4655_v54  ;;  %v12376_v58 = vld [vmem:[%s12068_s26 + $0xa0] sm:$0xff] }
 0x1f2   : > { %8388 = vmatprep.subr.bf16.mxu0 %v10363_v59  ;;  %v12379_v59 = vld [vmem:[%s12068_s26 + $0xe0] sm:$0xff] }
 0x1f4   : > { %6525 = vmatpush1.bf16.msra.mxu1 %v10358_v60  ;;  %v12383_v60 = vld [vmem:[%s12068_s26 + $0x20] sm:$0xff] }
 0x1f5   : > { %8389 = vmatpush1.bf16.msra.mxu0 %v10361_v61  ;;  %6526 = vmatprep.subr.bf16.mxu1 %v10366_v62  ;;  %v9281_v61 = vcombine.low %v4647_v53, %v4655_v54  ;;  %v12386_v62 = vld [vmem:[%s12068_s26 + $0x60] sm:$0xff] }
 0x1f6   : > { %8390 = vmatprep.subr.bf16.mxu0 %v10369_v63  ;;  %v10442_v63 = vld [vmem:[%s12017_s21 + $0xc20] ss:$8 sps:$4 sm:$0xff]  }
 0x1f7   : > { %v10514_v53 = vld [vmem:[%s12017_s21 + $0xce0] ss:$8 sps:$4 sm:$0xff]  }
 0x1f8   : > { %6527 = vmatpush1.bf16.msra.mxu1 %v10364_v0  ;;  %v10445_v0 = vld [vmem:[%s12017_s21 + $0x420] ss:$8 sps:$4 sm:$0xff]  }
 0x1f9   : > { %8391 = vmatpush1.bf16.msra.mxu0 %v10367_v1  ;;  %6528 = vmatprep.subr.bf16.mxu1 %v10372_v2  ;;  %v10450_v1 = vld [vmem:[%s12017_s21 + $0xc34] ss:$8 sps:$4 sm:$0xff]   ;;  %v10517_v54 = vld [vmem:[%s12017_s21 + $0x4e0] ss:$8 sps:$4 sm:$0xff]  }
 0x1fa   : > { %8392 = vmatprep.subr.bf16.mxu0 %v10375_v3  ;;  %v10453_v2 = vld [vmem:[%s12017_s21 + $0x434] ss:$8 sps:$4 sm:$0xff]   ;;  %v9556_v3 = vcombine.high %v12383_v60, %v12386_v62 }
 0x1fc   : > { %6529 = vmatpush1.bf16.msra.mxu1 %v10370_v4  ;;  %v10448_v4 = vld [vmem:[%s12017_s21 + $0xc30] ss:$8 sps:$4 sm:$0xff]  }
 0x1fd   : > { %8393 = vmatpush1.bf16.msra.mxu0 %v10373_v5  ;;  %6530 = vmatprep.subr.bf16.mxu1 %v10378_v6  ;;  %v10451_v5 = vld [vmem:[%s12017_s21 + $0x430] ss:$8 sps:$4 sm:$0xff]   ;;  %v10456_v6 = vld [vmem:[%s12017_s21 + $0xc44] ss:$8 sps:$4 sm:$0xff]  }
 0x1fe   : > { %8394 = vmatprep.subr.bf16.mxu0 %v10381_v7  ;;  %v10459_v7 = vld [vmem:[%s12017_s21 + $0x444] ss:$8 sps:$4 sm:$0xff]  }
 0x200   : > { %6531 = vmatpush1.bf16.msra.mxu1 %v10376_v8  ;;  %v10454_v8 = vld [vmem:[%s12017_s21 + $0xc40] ss:$8 sps:$4 sm:$0xff]  }
 0x201   : > { %8395 = vmatpush1.bf16.msra.mxu0 %v10379_v9  ;;  %6532 = vmatprep.subr.bf16.mxu1 %v10384_v10  ;;  %v10457_v9 = vld [vmem:[%s12017_s21 + $0x440] ss:$8 sps:$4 sm:$0xff]   ;;  %v10462_v10 = vld [vmem:[%s12017_s21 + $0xc54] ss:$8 sps:$4 sm:$0xff]  }
 0x202   : > { %8396 = vmatprep.subr.bf16.mxu0 %v10387_v11  ;;  %v10465_v11 = vld [vmem:[%s12017_s21 + $0x454] ss:$8 sps:$4 sm:$0xff]  }
 0x204   : > { %6533 = vmatpush1.bf16.msra.mxu1 %v10382_v12  ;;  %v10460_v12 = vld [vmem:[%s12017_s21 + $0xc50] ss:$8 sps:$4 sm:$0xff]  }
 0x205   : > { %8397 = vmatpush1.bf16.msra.mxu0 %v10385_v13  ;;  %6534 = vmatprep.subr.bf16.mxu1 %v10390_v14  ;;  %v10463_v13 = vld [vmem:[%s12017_s21 + $0x450] ss:$8 sps:$4 sm:$0xff]   ;;  %v10468_v14 = vld [vmem:[%s12017_s21 + $0xc64] ss:$8 sps:$4 sm:$0xff]  }
 0x206   : > { %8398 = vmatprep.subr.bf16.mxu0 %v10393_v15  ;;  %v10471_v15 = vld [vmem:[%s12017_s21 + $0x464] ss:$8 sps:$4 sm:$0xff]  }
 0x208   : > { %6535 = vmatpush1.bf16.msra.mxu1 %v10388_v16  ;;  %v10466_v16 = vld [vmem:[%s12017_s21 + $0xc60] ss:$8 sps:$4 sm:$0xff]  }
 0x209   : > { %8399 = vmatpush1.bf16.msra.mxu0 %v10391_v17  ;;  %6536 = vmatprep.subr.bf16.mxu1 %v10396_v18  ;;  %v10469_v17 = vld [vmem:[%s12017_s21 + $0x460] ss:$8 sps:$4 sm:$0xff]   ;;  %v10474_v18 = vld [vmem:[%s12017_s21 + $0xc74] ss:$8 sps:$4 sm:$0xff]  }
 0x20a   : > { %8400 = vmatprep.subr.bf16.mxu0 %v10399_v19  ;;  %v10477_v19 = vld [vmem:[%s12017_s21 + $0x474] ss:$8 sps:$4 sm:$0xff]  }
 0x20c   : > { %6537 = vmatpush1.bf16.msra.mxu1 %v10394_v20  ;;  %v10472_v20 = vld [vmem:[%s12017_s21 + $0xc70] ss:$8 sps:$4 sm:$0xff]  }
 0x20d   : > { %8401 = vmatpush1.bf16.msra.mxu0 %v10397_v21  ;;  %6538 = vmatprep.subr.bf16.mxu1 %v10402_v22  ;;  %v10475_v21 = vld [vmem:[%s12017_s21 + $0x470] ss:$8 sps:$4 sm:$0xff]   ;;  %v10480_v22 = vld [vmem:[%s12017_s21 + $0xc84] ss:$8 sps:$4 sm:$0xff]  }
 0x20e   : > { %8402 = vmatprep.subr.bf16.mxu0 %v10405_v23  ;;  %v10483_v23 = vld [vmem:[%s12017_s21 + $0x484] ss:$8 sps:$4 sm:$0xff]  }
 0x210   : > { %6539 = vmatpush1.bf16.msra.mxu1 %v10400_v24  ;;  %v10478_v24 = vld [vmem:[%s12017_s21 + $0xc80] ss:$8 sps:$4 sm:$0xff]  }
 0x211   : > { %8403 = vmatpush1.bf16.msra.mxu0 %v10403_v25  ;;  %6540 = vmatprep.subr.bf16.mxu1 %v10408_v26  ;;  %v10481_v25 = vld [vmem:[%s12017_s21 + $0x480] ss:$8 sps:$4 sm:$0xff]   ;;  %v10486_v26 = vld [vmem:[%s12017_s21 + $0xc94] ss:$8 sps:$4 sm:$0xff]  }
 0x212   : > { %8404 = vmatprep.subr.bf16.mxu0 %v10411_v27  ;;  %v10489_v27 = vld [vmem:[%s12017_s21 + $0x494] ss:$8 sps:$4 sm:$0xff]  }
 0x214   : > { %6541 = vmatpush1.bf16.msra.mxu1 %v10406_v28  ;;  %v10484_v28 = vld [vmem:[%s12017_s21 + $0xc90] ss:$8 sps:$4 sm:$0xff]  }
 0x215   : > { %8405 = vmatpush1.bf16.msra.mxu0 %v10409_v29  ;;  %6542 = vmatprep.subr.bf16.mxu1 %v10414_v30  ;;  %v10487_v29 = vld [vmem:[%s12017_s21 + $0x490] ss:$8 sps:$4 sm:$0xff]   ;;  %v10492_v30 = vld [vmem:[%s12017_s21 + $0xca4] ss:$8 sps:$4 sm:$0xff]  }
 0x216   : > { %8406 = vmatprep.subr.bf16.mxu0 %v10417_v31  ;;  %v10495_v31 = vld [vmem:[%s12017_s21 + $0x4a4] ss:$8 sps:$4 sm:$0xff]  }
 0x218   : > { %6543 = vmatpush1.bf16.msra.mxu1 %v10412_v32  ;;  %v10490_v32 = vld [vmem:[%s12017_s21 + $0xca0] ss:$8 sps:$4 sm:$0xff]  }
 0x219   : > { %8407 = vmatpush1.bf16.msra.mxu0 %v10415_v33  ;;  %6544 = vmatprep.subr.bf16.mxu1 %v10420_v34  ;;  %v10493_v33 = vld [vmem:[%s12017_s21 + $0x4a0] ss:$8 sps:$4 sm:$0xff]   ;;  %v10498_v34 = vld [vmem:[%s12017_s21 + $0xcb4] ss:$8 sps:$4 sm:$0xff]  }
 0x21a   : > { %8408 = vmatprep.subr.bf16.mxu0 %v10423_v37  ;;  %v10501_v37 = vld [vmem:[%s12017_s21 + $0x4b4] ss:$8 sps:$4 sm:$0xff]  }
 0x21c   : > { %6545 = vmatpush1.bf16.msra.mxu1 %v10418_v40  ;;  %v10496_v40 = vld [vmem:[%s12017_s21 + $0xcb0] ss:$8 sps:$4 sm:$0xff]  }
 0x21d   : > { %8409 = vmatpush1.bf16.msra.mxu0 %v10421_v41  ;;  %6546 = vmatprep.subr.bf16.mxu1 %v10426_v43  ;;  %v10499_v41 = vld [vmem:[%s12017_s21 + $0x4b0] ss:$8 sps:$4 sm:$0xff]   ;;  %v10504_v43 = vld [vmem:[%s12017_s21 + $0xcc4] ss:$8 sps:$4 sm:$0xff]  }
 0x21e   : > { %8410 = vmatprep.subr.bf16.mxu0 %v10429_v44  ;;  %v10507_v44 = vld [vmem:[%s12017_s21 + $0x4c4] ss:$8 sps:$4 sm:$0xff]  }
 0x220   : > { %6547 = vmatpush1.bf16.msra.mxu1 %v10424_v45  ;;  %v10502_v45 = vld [vmem:[%s12017_s21 + $0xcc0] ss:$8 sps:$4 sm:$0xff]  }
 0x221   : > { %8411 = vmatpush1.bf16.msra.mxu0 %v10427_v46  ;;  %6569 = vmatprep.subr.bf16.mxu1 %v10432_v35  ;;  %v10505_v46 = vld [vmem:[%s12017_s21 + $0x4c0] ss:$8 sps:$4 sm:$0xff]   ;;  %v10510_v35 = vld [vmem:[%s12017_s21 + $0xcd4] ss:$8 sps:$4 sm:$0xff]  }
 0x222   : > { %8433 = vmatprep.subr.bf16.mxu0 %v10435_v36  ;;  %v10513_v36 = vld [vmem:[%s12017_s21 + $0x4d4] ss:$8 sps:$4 sm:$0xff]  }
 0x223   : > { %6549 = vmatmul.mubr.bf16.vlgmr.msra.gmra.mrb[0].mxu1 %v9265_v51 }
 0x224   : > { %8413 = vmatmul.mubr.bf16.vlgmr.msra.gmra.mrb[0].mxu0 %v9553_v52  ;;  %6570 = vmatpush1.bf16.msra.mxu1 %v10430_v38  ;;  %v10508_v38 = vld [vmem:[%s12017_s21 + $0xcd0] ss:$8 sps:$4 sm:$0xff]   ;;  %v10519_v52 = vld [vmem:[%s12017_s21 + $0x4e4] ss:$8 sps:$4 sm:$0xff]  }
 0x225   : > { %8434 = vmatpush1.bf16.msra.mxu0 %v10433_v49  ;;  %6571 = vmatprep.subr.bf16.mxu1 %v10438_v55  ;;  %v10511_v49 = vld [vmem:[%s12017_s21 + $0x4d0] ss:$8 sps:$4 sm:$0xff]   ;;  %v10522_v55 = vld [vmem:[%s12017_s21 + $0xcf4] ss:$8 sps:$4 sm:$0xff]  }
 0x226   : > { %8435 = vmatprep.subr.bf16.mxu0 %v10441_v56  ;;  %6558 = vmatprep.mubr.bf16.mxu1 %v9282_v57  ;;  %v10525_v56 = vld [vmem:[%s12017_s21 + $0x4f4] ss:$8 sps:$4 sm:$0xff]   ;;  %v10520_v57 = vld [vmem:[%s12017_s21 + $0xcf0] ss:$8 sps:$4 sm:$0xff]  }
 0x227   : > { %8422 = vmatprep.mubr.bf16.mxu0 %v12304_v42  ;;  %v12394_v42 = vcombine.high %v12376_v58, %v12379_v59 }
 0x228   : > { %6572 = vmatpush1.bf16.msra.mxu1 %v10436_v39  ;;  %v10523_v39 = vld [vmem:[%s12017_s21 + $0x4f0] ss:$8 sps:$4 sm:$0xff]  }
 0x229   : > { %8436 = vmatpush1.bf16.msra.mxu0 %v10439_v47  ;;  %6573 = vmatprep.subr.bf16.mxu1 %v10444_v48  ;;  %v10528_v47 = vld [vmem:[%s12017_s21 + $0xd04] ss:$8 sps:$4 sm:$0xff]  }
 0x22a   : > { %8437 = vmatprep.subr.bf16.mxu0 %v10447_v50  ;;  %v10531_v48 = vld [vmem:[%s12017_s21 + $0x504] ss:$8 sps:$4 sm:$0xff]  }
 0x22b   : > { %6559 = vmatmul.mubr.bf16.gmra.mrb[4].mxu1 %v9281_v61  ;;  %v4648_v50 = vld [vmem:[%s12068_s26 + $0x120] sm:$0xff] }
 0x22c   : > { %8423 = vmatmul.mubr.bf16.gmra.mrb[4].mxu0 %v9265_v51  ;;  %6574 = vmatpush1.bf16.msra.mxu1 %v10442_v63  ;;  %v10516_v51 = vld [vmem:[%s12017_s21 + $0xce4] ss:$8 sps:$4 sm:$0xff]   ;;  %v9267_v63 = vcombine.low %v12376_v58, %v12379_v59 }
 0x22d   : > { %8438 = vmatpush1.bf16.msra.mxu0 %v10445_v0  ;;  %6575 = vmatprep.subr.bf16.mxu1 %v10450_v1  ;;  %v4656_v61 = vld [vmem:[%s12068_s26 + $0x160] sm:$0xff]  ;;  %v9555_v0 = vcombine.low %v12383_v60, %v12386_v62  ;;  %v12466_v62 = vld [vmem:[%s12068_s26 + $0xa8] sm:$0xff] }
 0x22e   : > { %8439 = vmatprep.subr.bf16.mxu0 %v10453_v2  ;;  %6601 = vmatprep.mubr.bf16.mxu1 %v12394_v42  ;;  %v10526_v1 = vld [vmem:[%s12017_s21 + $0xd00] ss:$8 sps:$4 sm:$0xff]   ;;  %v9284_v58 = vcombine.high %v4648_v50, %v4656_v61  ;;  %v10540_v59 = vld [vmem:[%s12017_s21 + $0xd24] ss:$8 sps:$4 sm:$0xff]  }
 0x22f   : > { %8465 = vmatprep.mubr.bf16.mxu0 %v9556_v3  ;;  %v10529_v2 = vld [vmem:[%s12017_s21 + $0x500] ss:$8 sps:$4 sm:$0xff]   ;;  %v10534_v3 = vld [vmem:[%s12017_s21 + $0xd14] ss:$8 sps:$4 sm:$0xff]   ;;  %v10543_v60 = vld [vmem:[%s12017_s21 + $0x524] ss:$8 sps:$4 sm:$0xff]  }
 0x230   : > { %6576 = vmatpush1.bf16.msra.mxu1 %v10448_v4  ;;  %v10537_v4 = vld [vmem:[%s12017_s21 + $0x514] ss:$8 sps:$4 sm:$0xff]  }
 0x231   : > { %8440 = vmatpush1.bf16.msra.mxu0 %v10451_v5  ;;  %6577 = vmatprep.subr.bf16.mxu1 %v10456_v6  ;;  %v10532_v5 = vld [vmem:[%s12017_s21 + $0xd10] ss:$8 sps:$4 sm:$0xff]  }
 0x232   : > { %8441 = vmatprep.subr.bf16.mxu0 %v10459_v7  ;;  %v10535_v6 = vld [vmem:[%s12017_s21 + $0x510] ss:$8 sps:$4 sm:$0xff]   ;;  %v12469_v7 = vld [vmem:[%s12068_s26 + $0xe8] sm:$0xff] }
 0x234   : > { %6578 = vmatpush1.bf16.msra.mxu1 %v10454_v8  ;;  %v12472_v8 = vld [vmem:[%s12068_s26 + $0x28] sm:$0xff] }
 0x235   : > { %8442 = vmatpush1.bf16.msra.mxu0 %v10457_v9  ;;  %6579 = vmatprep.subr.bf16.mxu1 %v10462_v10  ;;  %v12475_v9 = vld [vmem:[%s12068_s26 + $0x68] sm:$0xff]  ;;  %v9283_v10 = vcombine.low %v4648_v50, %v4656_v61  ;;  %v10604_v50 = vld [vmem:[%s12017_s21 + $0xdd0] ss:$8 sps:$4 sm:$0xff]  }
 0x236   : > { %8443 = vmatprep.subr.bf16.mxu0 %v10465_v11  ;;  %v10538_v11 = vld [vmem:[%s12017_s21 + $0xd20] ss:$8 sps:$4 sm:$0xff]   ;;  %v10607_v61 = vld [vmem:[%s12017_s21 + $0x5d0] ss:$8 sps:$4 sm:$0xff]  }
 0x238   : > { %6580 = vmatpush1.bf16.msra.mxu1 %v10460_v12  ;;  %v10541_v12 = vld [vmem:[%s12017_s21 + $0x520] ss:$8 sps:$4 sm:$0xff]  }
 0x239   : > { %8444 = vmatpush1.bf16.msra.mxu0 %v10463_v13  ;;  %6581 = vmatprep.subr.bf16.mxu1 %v10468_v14  ;;  %v10546_v13 = vld [vmem:[%s12017_s21 + $0xd34] ss:$8 sps:$4 sm:$0xff]  }
 0x23a   : > { %8445 = vmatprep.subr.bf16.mxu0 %v10471_v15  ;;  %v10549_v14 = vld [vmem:[%s12017_s21 + $0x534] ss:$8 sps:$4 sm:$0xff]   ;;  %v12484_v15 = vcombine.high %v12466_v62, %v12469_v7 }
 0x23c   : > { %6582 = vmatpush1.bf16.msra.mxu1 %v10466_v16  ;;  %v10544_v16 = vld [vmem:[%s12017_s21 + $0xd30] ss:$8 sps:$4 sm:$0xff]  }
 0x23d   : > { %8446 = vmatpush1.bf16.msra.mxu0 %v10469_v17  ;;  %6583 = vmatprep.subr.bf16.mxu1 %v10474_v18  ;;  %v10547_v17 = vld [vmem:[%s12017_s21 + $0x530] ss:$8 sps:$4 sm:$0xff]   ;;  %v10552_v18 = vld [vmem:[%s12017_s21 + $0xd44] ss:$8 sps:$4 sm:$0xff]  }
 0x23e   : > { %8447 = vmatprep.subr.bf16.mxu0 %v10477_v19  ;;  %v10555_v19 = vld [vmem:[%s12017_s21 + $0x544] ss:$8 sps:$4 sm:$0xff]  }
 0x240   : > { %6584 = vmatpush1.bf16.msra.mxu1 %v10472_v20  ;;  %v10550_v20 = vld [vmem:[%s12017_s21 + $0xd40] ss:$8 sps:$4 sm:$0xff]  }
 0x241   : > { %8448 = vmatpush1.bf16.msra.mxu0 %v10475_v21  ;;  %6585 = vmatprep.subr.bf16.mxu1 %v10480_v22  ;;  %v10553_v21 = vld [vmem:[%s12017_s21 + $0x540] ss:$8 sps:$4 sm:$0xff]   ;;  %v10558_v22 = vld [vmem:[%s12017_s21 + $0xd54] ss:$8 sps:$4 sm:$0xff]  }
 0x242   : > { %8449 = vmatprep.subr.bf16.mxu0 %v10483_v23  ;;  %v10561_v23 = vld [vmem:[%s12017_s21 + $0x554] ss:$8 sps:$4 sm:$0xff]  }
 0x244   : > { %6586 = vmatpush1.bf16.msra.mxu1 %v10478_v24  ;;  %v10556_v24 = vld [vmem:[%s12017_s21 + $0xd50] ss:$8 sps:$4 sm:$0xff]  }
 0x245   : > { %8450 = vmatpush1.bf16.msra.mxu0 %v10481_v25  ;;  %6587 = vmatprep.subr.bf16.mxu1 %v10486_v26  ;;  %v10559_v25 = vld [vmem:[%s12017_s21 + $0x550] ss:$8 sps:$4 sm:$0xff]   ;;  %v10564_v26 = vld [vmem:[%s12017_s21 + $0xd64] ss:$8 sps:$4 sm:$0xff]  }
 0x246   : > { %8451 = vmatprep.subr.bf16.mxu0 %v10489_v27  ;;  %v10567_v27 = vld [vmem:[%s12017_s21 + $0x564] ss:$8 sps:$4 sm:$0xff]  }
 0x248   : > { %6588 = vmatpush1.bf16.msra.mxu1 %v10484_v28  ;;  %v10562_v28 = vld [vmem:[%s12017_s21 + $0xd60] ss:$8 sps:$4 sm:$0xff]  }
 0x249   : > { %8452 = vmatpush1.bf16.msra.mxu0 %v10487_v29  ;;  %6589 = vmatprep.subr.bf16.mxu1 %v10492_v30  ;;  %v10565_v29 = vld [vmem:[%s12017_s21 + $0x560] ss:$8 sps:$4 sm:$0xff]   ;;  %v10570_v30 = vld [vmem:[%s12017_s21 + $0xd74] ss:$8 sps:$4 sm:$0xff]  }
 0x24a   : > { %8453 = vmatprep.subr.bf16.mxu0 %v10495_v31  ;;  %v10573_v31 = vld [vmem:[%s12017_s21 + $0x574] ss:$8 sps:$4 sm:$0xff]  }
 0x24c   : > { %6590 = vmatpush1.bf16.msra.mxu1 %v10490_v32  ;;  %v10568_v32 = vld [vmem:[%s12017_s21 + $0xd70] ss:$8 sps:$4 sm:$0xff]  }
 0x24d   : > { %8454 = vmatpush1.bf16.msra.mxu0 %v10493_v33  ;;  %6591 = vmatprep.subr.bf16.mxu1 %v10498_v34  ;;  %v10571_v33 = vld [vmem:[%s12017_s21 + $0x570] ss:$8 sps:$4 sm:$0xff]   ;;  %v10576_v34 = vld [vmem:[%s12017_s21 + $0xd84] ss:$8 sps:$4 sm:$0xff]  }
 0x24e   : > { %8455 = vmatprep.subr.bf16.mxu0 %v10501_v37  ;;  %v10579_v37 = vld [vmem:[%s12017_s21 + $0x584] ss:$8 sps:$4 sm:$0xff]  }
 0x250   : > { %6592 = vmatpush1.bf16.msra.mxu1 %v10496_v40  ;;  %v10574_v40 = vld [vmem:[%s12017_s21 + $0xd80] ss:$8 sps:$4 sm:$0xff]  }
 0x251   : > { %8456 = vmatpush1.bf16.msra.mxu0 %v10499_v41  ;;  %6593 = vmatprep.subr.bf16.mxu1 %v10504_v43  ;;  %v10577_v41 = vld [vmem:[%s12017_s21 + $0x580] ss:$8 sps:$4 sm:$0xff]   ;;  %v10582_v43 = vld [vmem:[%s12017_s21 + $0xd94] ss:$8 sps:$4 sm:$0xff]  }
 0x252   : > { %8457 = vmatprep.subr.bf16.mxu0 %v10507_v44  ;;  %v10585_v44 = vld [vmem:[%s12017_s21 + $0x594] ss:$8 sps:$4 sm:$0xff]  }
 0x254   : > { %6594 = vmatpush1.bf16.msra.mxu1 %v10502_v45  ;;  %v10580_v45 = vld [vmem:[%s12017_s21 + $0xd90] ss:$8 sps:$4 sm:$0xff]  }
 0x255   : > { %8458 = vmatpush1.bf16.msra.mxu0 %v10505_v46  ;;  %6595 = vmatprep.subr.bf16.mxu1 %v10510_v35  ;;  %v10583_v46 = vld [vmem:[%s12017_s21 + $0x590] ss:$8 sps:$4 sm:$0xff]   ;;  %v10588_v35 = vld [vmem:[%s12017_s21 + $0xda4] ss:$8 sps:$4 sm:$0xff]  }
 0x256   : > { %8459 = vmatprep.subr.bf16.mxu0 %v10513_v36  ;;  %v10591_v36 = vld [vmem:[%s12017_s21 + $0x5a4] ss:$8 sps:$4 sm:$0xff]  }
 0x258   : > { %6596 = vmatpush1.bf16.msra.mxu1 %v10508_v38  ;;  %v10586_v38 = vld [vmem:[%s12017_s21 + $0xda0] ss:$8 sps:$4 sm:$0xff]  }
 0x259   : > { %8460 = vmatpush1.bf16.msra.mxu0 %v10511_v49  ;;  %6597 = vmatprep.subr.bf16.mxu1 %v10516_v51  ;;  %v10589_v49 = vld [vmem:[%s12017_s21 + $0x5a0] ss:$8 sps:$4 sm:$0xff]   ;;  %v10594_v51 = vld [vmem:[%s12017_s21 + $0xdb4] ss:$8 sps:$4 sm:$0xff]  }
 0x25a   : > { %8461 = vmatprep.subr.bf16.mxu0 %v10519_v52  ;;  %v10597_v52 = vld [vmem:[%s12017_s21 + $0x5b4] ss:$8 sps:$4 sm:$0xff]  }
 0x25c   : > { %6598 = vmatpush1.bf16.msra.mxu1 %v10514_v53  ;;  %v10592_v53 = vld [vmem:[%s12017_s21 + $0xdb0] ss:$8 sps:$4 sm:$0xff]  }
 0x25d   : > { %8462 = vmatpush1.bf16.msra.mxu0 %v10517_v54  ;;  %6599 = vmatprep.subr.bf16.mxu1 %v10522_v55  ;;  %v10595_v54 = vld [vmem:[%s12017_s21 + $0x5b0] ss:$8 sps:$4 sm:$0xff]   ;;  %v10600_v55 = vld [vmem:[%s12017_s21 + $0xdc4] ss:$8 sps:$4 sm:$0xff]  }
 0x25e   : > { %8463 = vmatprep.subr.bf16.mxu0 %v10525_v56  ;;  %v10603_v56 = vld [vmem:[%s12017_s21 + $0x5c4] ss:$8 sps:$4 sm:$0xff]  }
 0x260   : > { %6600 = vmatpush1.bf16.msra.mxu1 %v10520_v57  ;;  %v10598_v57 = vld [vmem:[%s12017_s21 + $0xdc0] ss:$8 sps:$4 sm:$0xff]  }
 0x261   : > { %8464 = vmatpush1.bf16.msra.mxu0 %v10523_v39  ;;  %6622 = vmatprep.subr.bf16.mxu1 %v10528_v47  ;;  %v10601_v39 = vld [vmem:[%s12017_s21 + $0x5c0] ss:$8 sps:$4 sm:$0xff]   ;;  %v10606_v47 = vld [vmem:[%s12017_s21 + $0xdd4] ss:$8 sps:$4 sm:$0xff]  }
 0x262   : > { %8486 = vmatprep.subr.bf16.mxu0 %v10531_v48  ;;  %v10609_v48 = vld [vmem:[%s12017_s21 + $0x5d4] ss:$8 sps:$4 sm:$0xff]  }
 0x263   : > { %6602 = vmatmul.mubr.bf16.vlgmr.msra.gmra.mrb[0].mxu1 %v9267_v63 }
 0x264   : > { %8466 = vmatmul.mubr.bf16.vlgmr.msra.gmra.mrb[0].mxu0 %v9555_v0  ;;  %6623 = vmatpush1.bf16.msra.mxu1 %v10526_v1  ;;  %v10615_v0 = vld [vmem:[%s12017_s21 + $0x5e4] ss:$8 sps:$4 sm:$0xff]   ;;  %v10610_v1 = vld [vmem:[%s12017_s21 + $0xde0] ss:$8 sps:$4 sm:$0xff]  }
 0x265   : > { %8487 = vmatpush1.bf16.msra.mxu0 %v10529_v2  ;;  %6624 = vmatprep.subr.bf16.mxu1 %v10534_v3  ;;  %v10613_v2 = vld [vmem:[%s12017_s21 + $0x5e0] ss:$8 sps:$4 sm:$0xff]   ;;  %v10618_v3 = vld [vmem:[%s12017_s21 + $0xdf4] ss:$8 sps:$4 sm:$0xff]  }
 0x266   : > { %8488 = vmatprep.subr.bf16.mxu0 %v10537_v4  ;;  %6611 = vmatprep.mubr.bf16.mxu1 %v9284_v58  ;;  %v10621_v4 = vld [vmem:[%s12017_s21 + $0x5f4] ss:$8 sps:$4 sm:$0xff]   ;;  %v10624_v58 = vld [vmem:[%s12017_s21 + $0xe04] ss:$8 sps:$4 sm:$0xff]  }
 0x267   : > { %8475 = vmatprep.mubr.bf16.mxu0 %v12394_v42  ;;  %v9558_v42 = vcombine.high %v12472_v8, %v12475_v9 }
 0x268   : > { %6625 = vmatpush1.bf16.msra.mxu1 %v10532_v5  ;;  %v10616_v5 = vld [vmem:[%s12017_s21 + $0xdf0] ss:$8 sps:$4 sm:$0xff]  }
 0x269   : > { %8489 = vmatpush1.bf16.msra.mxu0 %v10535_v6  ;;  %6626 = vmatprep.subr.bf16.mxu1 %v10540_v59  ;;  %v10619_v6 = vld [vmem:[%s12017_s21 + $0x5f0] ss:$8 sps:$4 sm:$0xff]   ;;  %v10627_v59 = vld [vmem:[%s12017_s21 + $0x604] ss:$8 sps:$4 sm:$0xff]  }
 0x26a   : > { %8490 = vmatprep.subr.bf16.mxu0 %v10543_v60  ;;  %v9269_v60 = vcombine.low %v12466_v62, %v12469_v7  ;;  %v10628_v7 = vld [vmem:[%s12017_s21 + $0xe10] ss:$8 sps:$4 sm:$0xff]  }
 0x26b   : > { %6612 = vmatmul.mubr.bf16.gmra.mrb[4].mxu1 %v9283_v10  ;;  %v9557_v10 = vcombine.low %v12472_v8, %v12475_v9  ;;  %v10631_v8 = vld [vmem:[%s12017_s21 + $0x610] ss:$8 sps:$4 sm:$0xff]   ;;  %v10636_v9 = vld [vmem:[%s12017_s21 + $0xe24] ss:$8 sps:$4 sm:$0xff]  }
 0x26c   : > { %8476 = vmatmul.mubr.bf16.gmra.mrb[4].mxu0 %v9267_v63  ;;  %6627 = vmatpush1.bf16.msra.mxu1 %v10538_v11  ;;  %v10612_v63 = vld [vmem:[%s12017_s21 + $0xde4] ss:$8 sps:$4 sm:$0xff]  }
 0x26d   : > { %8491 = vmatpush1.bf16.msra.mxu0 %v10541_v12  ;;  %6628 = vmatprep.subr.bf16.mxu1 %v10546_v13  ;;  %v4649_v11 = vld [vmem:[%s12068_s26 + $0x128] sm:$0xff] }
 0x26e   : > { %8492 = vmatprep.subr.bf16.mxu0 %v10549_v14  ;;  %6654 = vmatprep.mubr.bf16.mxu1 %v12484_v15  ;;  %v4657_v12 = vld [vmem:[%s12068_s26 + $0x168] sm:$0xff] }
 0x26f   : > { %8518 = vmatprep.mubr.bf16.mxu0 %v9558_v42  ;;  %v10622_v13 = vld [vmem:[%s12017_s21 + $0xe00] ss:$8 sps:$4 sm:$0xff]   ;;  %v10630_v42 = vld [vmem:[%s12017_s21 + $0xe14] ss:$8 sps:$4 sm:$0xff]   ;;  %v9286_v62 = vcombine.high %v4649_v11, %v4657_v12 }
 0x270   : > { %6629 = vmatpush1.bf16.msra.mxu1 %v10544_v16  ;;  %v10625_v14 = vld [vmem:[%s12017_s21 + $0x600] ss:$8 sps:$4 sm:$0xff]   ;;  %v10633_v16 = vld [vmem:[%s12017_s21 + $0x614] ss:$8 sps:$4 sm:$0xff]  }
 0x271   : > { %8493 = vmatpush1.bf16.msra.mxu0 %v10547_v17  ;;  %6630 = vmatprep.subr.bf16.mxu1 %v10552_v18  ;;  %v10639_v17 = vld [vmem:[%s12017_s21 + $0x624] ss:$8 sps:$4 sm:$0xff]   ;;  %v12557_v18 = vld [vmem:[%s12068_s26 + $0xb0] sm:$0xff] }
 0x272   : > { %8494 = vmatprep.subr.bf16.mxu0 %v10555_v19  ;;  %v9285_v19 = vcombine.low %v4649_v11, %v4657_v12  ;;  %v10708_v11 = vld [vmem:[%s12017_s21 + $0xee4] ss:$8 sps:$4 sm:$0xff]  }
 0x273   : > { %v10711_v12 = vld [vmem:[%s12017_s21 + $0x6e4] ss:$8 sps:$4 sm:$0xff]  }
 0x274   : > { %6631 = vmatpush1.bf16.msra.mxu1 %v10550_v20  ;;  %v12560_v20 = vld [vmem:[%s12068_s26 + $0xf0] sm:$0xff] }
 0x275   : > { %8495 = vmatpush1.bf16.msra.mxu0 %v10553_v21  ;;  %6632 = vmatprep.subr.bf16.mxu1 %v10558_v22  ;;  %v12563_v21 = vld [vmem:[%s12068_s26 + $0x30] sm:$0xff] }
 0x276   : > { %8496 = vmatprep.subr.bf16.mxu0 %v10561_v23  ;;  %v12566_v22 = vld [vmem:[%s12068_s26 + $0x70] sm:$0xff]  ;;  %v10634_v23 = vld [vmem:[%s12017_s21 + $0xe20] ss:$8 sps:$4 sm:$0xff]  }
 0x278   : > { %6633 = vmatpush1.bf16.msra.mxu1 %v10556_v24  ;;  %v10637_v24 = vld [vmem:[%s12017_s21 + $0x620] ss:$8 sps:$4 sm:$0xff]  }
 0x279   : > { %8497 = vmatpush1.bf16.msra.mxu0 %v10559_v25  ;;  %6634 = vmatprep.subr.bf16.mxu1 %v10564_v26  ;;  %v10645_v25 = vld [vmem:[%s12017_s21 + $0x634] ss:$8 sps:$4 sm:$0xff]   ;;  %v12574_v26 = vcombine.high %v12557_v18, %v12560_v20 }
 0x27a   : > { %8498 = vmatprep.subr.bf16.mxu0 %v10567_v27  ;;  %v9560_v27 = vcombine.high %v12563_v21, %v12566_v22 }
 0x27c   : > { %6635 = vmatpush1.bf16.msra.mxu1 %v10562_v28  ;;  %v10640_v28 = vld [vmem:[%s12017_s21 + $0xe30] ss:$8 sps:$4 sm:$0xff]  }
 0x27d   : > { %8499 = vmatpush1.bf16.msra.mxu0 %v10565_v29  ;;  %6636 = vmatprep.subr.bf16.mxu1 %v10570_v30  ;;  %v10643_v29 = vld [vmem:[%s12017_s21 + $0x630] ss:$8 sps:$4 sm:$0xff]   ;;  %v10648_v30 = vld [vmem:[%s12017_s21 + $0xe44] ss:$8 sps:$4 sm:$0xff]  }
 0x27e   : > { %8500 = vmatprep.subr.bf16.mxu0 %v10573_v31  ;;  %v10651_v31 = vld [vmem:[%s12017_s21 + $0x644] ss:$8 sps:$4 sm:$0xff]  }
 0x280   : > { %6637 = vmatpush1.bf16.msra.mxu1 %v10568_v32  ;;  %v10646_v32 = vld [vmem:[%s12017_s21 + $0xe40] ss:$8 sps:$4 sm:$0xff]  }
 0x281   : > { %8501 = vmatpush1.bf16.msra.mxu0 %v10571_v33  ;;  %6638 = vmatprep.subr.bf16.mxu1 %v10576_v34  ;;  %v10649_v33 = vld [vmem:[%s12017_s21 + $0x640] ss:$8 sps:$4 sm:$0xff]   ;;  %v10654_v34 = vld [vmem:[%s12017_s21 + $0xe54] ss:$8 sps:$4 sm:$0xff]  }
 0x282   : > { %8502 = vmatprep.subr.bf16.mxu0 %v10579_v37  ;;  %v10657_v37 = vld [vmem:[%s12017_s21 + $0x654] ss:$8 sps:$4 sm:$0xff]  }
 0x284   : > { %6639 = vmatpush1.bf16.msra.mxu1 %v10574_v40  ;;  %v10652_v40 = vld [vmem:[%s12017_s21 + $0xe50] ss:$8 sps:$4 sm:$0xff]  }
 0x285   : > { %8503 = vmatpush1.bf16.msra.mxu0 %v10577_v41  ;;  %6640 = vmatprep.subr.bf16.mxu1 %v10582_v43  ;;  %v10655_v41 = vld [vmem:[%s12017_s21 + $0x650] ss:$8 sps:$4 sm:$0xff]   ;;  %v10660_v43 = vld [vmem:[%s12017_s21 + $0xe64] ss:$8 sps:$4 sm:$0xff]  }
 0x286   : > { %8504 = vmatprep.subr.bf16.mxu0 %v10585_v44  ;;  %v10663_v44 = vld [vmem:[%s12017_s21 + $0x664] ss:$8 sps:$4 sm:$0xff]  }
 0x288   : > { %6641 = vmatpush1.bf16.msra.mxu1 %v10580_v45  ;;  %v10658_v45 = vld [vmem:[%s12017_s21 + $0xe60] ss:$8 sps:$4 sm:$0xff]  }
 0x289   : > { %8505 = vmatpush1.bf16.msra.mxu0 %v10583_v46  ;;  %6642 = vmatprep.subr.bf16.mxu1 %v10588_v35  ;;  %v10661_v46 = vld [vmem:[%s12017_s21 + $0x660] ss:$8 sps:$4 sm:$0xff]   ;;  %v10666_v35 = vld [vmem:[%s12017_s21 + $0xe74] ss:$8 sps:$4 sm:$0xff]  }
 0x28a   : > { %8506 = vmatprep.subr.bf16.mxu0 %v10591_v36  ;;  %v10669_v36 = vld [vmem:[%s12017_s21 + $0x674] ss:$8 sps:$4 sm:$0xff]  }
 0x28c   : > { %6643 = vmatpush1.bf16.msra.mxu1 %v10586_v38  ;;  %v10664_v38 = vld [vmem:[%s12017_s21 + $0xe70] ss:$8 sps:$4 sm:$0xff]  }
 0x28d   : > { %8507 = vmatpush1.bf16.msra.mxu0 %v10589_v49  ;;  %6644 = vmatprep.subr.bf16.mxu1 %v10594_v51  ;;  %v10667_v49 = vld [vmem:[%s12017_s21 + $0x670] ss:$8 sps:$4 sm:$0xff]   ;;  %v10672_v51 = vld [vmem:[%s12017_s21 + $0xe84] ss:$8 sps:$4 sm:$0xff]  }
 0x28e   : > { %8508 = vmatprep.subr.bf16.mxu0 %v10597_v52  ;;  %v10675_v52 = vld [vmem:[%s12017_s21 + $0x684] ss:$8 sps:$4 sm:$0xff]  }
 0x290   : > { %6645 = vmatpush1.bf16.msra.mxu1 %v10592_v53  ;;  %v10670_v53 = vld [vmem:[%s12017_s21 + $0xe80] ss:$8 sps:$4 sm:$0xff]  }
 0x291   : > { %8509 = vmatpush1.bf16.msra.mxu0 %v10595_v54  ;;  %6646 = vmatprep.subr.bf16.mxu1 %v10600_v55  ;;  %v10673_v54 = vld [vmem:[%s12017_s21 + $0x680] ss:$8 sps:$4 sm:$0xff]   ;;  %v10678_v55 = vld [vmem:[%s12017_s21 + $0xe94] ss:$8 sps:$4 sm:$0xff]  }
 0x292   : > { %8510 = vmatprep.subr.bf16.mxu0 %v10603_v56  ;;  %v10681_v56 = vld [vmem:[%s12017_s21 + $0x694] ss:$8 sps:$4 sm:$0xff]  }
 0x294   : > { %6647 = vmatpush1.bf16.msra.mxu1 %v10598_v57  ;;  %v10676_v57 = vld [vmem:[%s12017_s21 + $0xe90] ss:$8 sps:$4 sm:$0xff]  }
 0x295   : > { %8511 = vmatpush1.bf16.msra.mxu0 %v10601_v39  ;;  %6648 = vmatprep.subr.bf16.mxu1 %v10606_v47  ;;  %v10679_v39 = vld [vmem:[%s12017_s21 + $0x690] ss:$8 sps:$4 sm:$0xff]   ;;  %v10684_v47 = vld [vmem:[%s12017_s21 + $0xea4] ss:$8 sps:$4 sm:$0xff]  }
 0x296   : > { %8512 = vmatprep.subr.bf16.mxu0 %v10609_v48  ;;  %v10687_v48 = vld [vmem:[%s12017_s21 + $0x6a4] ss:$8 sps:$4 sm:$0xff]  }
 0x298   : > { %6649 = vmatpush1.bf16.msra.mxu1 %v10604_v50  ;;  %v10682_v50 = vld [vmem:[%s12017_s21 + $0xea0] ss:$8 sps:$4 sm:$0xff]  }
 0x299   : > { %8513 = vmatpush1.bf16.msra.mxu0 %v10607_v61  ;;  %6650 = vmatprep.subr.bf16.mxu1 %v10612_v63  ;;  %v10685_v61 = vld [vmem:[%s12017_s21 + $0x6a0] ss:$8 sps:$4 sm:$0xff]   ;;  %v10690_v63 = vld [vmem:[%s12017_s21 + $0xeb4] ss:$8 sps:$4 sm:$0xff]  }
 0x29a   : > { %8514 = vmatprep.subr.bf16.mxu0 %v10615_v0  ;;  %v10693_v0 = vld [vmem:[%s12017_s21 + $0x6b4] ss:$8 sps:$4 sm:$0xff]  }
 0x29c   : > { %6651 = vmatpush1.bf16.msra.mxu1 %v10610_v1  ;;  %v10688_v1 = vld [vmem:[%s12017_s21 + $0xeb0] ss:$8 sps:$4 sm:$0xff]  }
 0x29d   : > { %8515 = vmatpush1.bf16.msra.mxu0 %v10613_v2  ;;  %6652 = vmatprep.subr.bf16.mxu1 %v10618_v3  ;;  %v10691_v2 = vld [vmem:[%s12017_s21 + $0x6b0] ss:$8 sps:$4 sm:$0xff]   ;;  %v10696_v3 = vld [vmem:[%s12017_s21 + $0xec4] ss:$8 sps:$4 sm:$0xff]  }
 0x29e   : > { %8516 = vmatprep.subr.bf16.mxu0 %v10621_v4  ;;  %v10699_v4 = vld [vmem:[%s12017_s21 + $0x6c4] ss:$8 sps:$4 sm:$0xff]  }
 0x2a0   : > { %6653 = vmatpush1.bf16.msra.mxu1 %v10616_v5  ;;  %v10694_v5 = vld [vmem:[%s12017_s21 + $0xec0] ss:$8 sps:$4 sm:$0xff]  }
 0x2a1   : > { %8517 = vmatpush1.bf16.msra.mxu0 %v10619_v6  ;;  %6675 = vmatprep.subr.bf16.mxu1 %v10624_v58  ;;  %v10697_v6 = vld [vmem:[%s12017_s21 + $0x6c0] ss:$8 sps:$4 sm:$0xff]   ;;  %v10702_v58 = vld [vmem:[%s12017_s21 + $0xed4] ss:$8 sps:$4 sm:$0xff]  }
 0x2a2   : > { %8539 = vmatprep.subr.bf16.mxu0 %v10627_v59  ;;  %v10705_v59 = vld [vmem:[%s12017_s21 + $0x6d4] ss:$8 sps:$4 sm:$0xff]  }
 0x2a3   : > { %6655 = vmatmul.mubr.bf16.vlgmr.msra.gmra.mrb[0].mxu1 %v9269_v60 }
 0x2a4   : > { %8519 = vmatmul.mubr.bf16.vlgmr.msra.gmra.mrb[0].mxu0 %v9557_v10  ;;  %6676 = vmatpush1.bf16.msra.mxu1 %v10622_v13  ;;  %v10703_v10 = vld [vmem:[%s12017_s21 + $0x6d0] ss:$8 sps:$4 sm:$0xff]   ;;  %v10706_v13 = vld [vmem:[%s12017_s21 + $0xee0] ss:$8 sps:$4 sm:$0xff]  }
 0x2a5   : > { %8540 = vmatpush1.bf16.msra.mxu0 %v10625_v14  ;;  %6677 = vmatprep.subr.bf16.mxu1 %v10630_v42  ;;  %v10709_v14 = vld [vmem:[%s12017_s21 + $0x6e0] ss:$8 sps:$4 sm:$0xff]   ;;  %v10714_v42 = vld [vmem:[%s12017_s21 + $0xef4] ss:$8 sps:$4 sm:$0xff]  }
 0x2a6   : > { %8541 = vmatprep.subr.bf16.mxu0 %v10633_v16  ;;  %6664 = vmatprep.mubr.bf16.mxu1 %v9286_v62  ;;  %v10717_v16 = vld [vmem:[%s12017_s21 + $0x6f4] ss:$8 sps:$4 sm:$0xff]   ;;  %v10712_v62 = vld [vmem:[%s12017_s21 + $0xef0] ss:$8 sps:$4 sm:$0xff]  }
 0x2a7   : > { %8528 = vmatprep.mubr.bf16.mxu0 %v12484_v15  ;;  %v10642_v15 = vld [vmem:[%s12017_s21 + $0xe34] ss:$8 sps:$4 sm:$0xff]  }
 0x2a8   : > { %6678 = vmatpush1.bf16.msra.mxu1 %v10628_v7  ;;  %v10715_v7 = vld [vmem:[%s12017_s21 + $0x6f0] ss:$8 sps:$4 sm:$0xff]  }
 0x2a9   : > { %8542 = vmatpush1.bf16.msra.mxu0 %v10631_v8  ;;  %6679 = vmatprep.subr.bf16.mxu1 %v10636_v9  ;;  %v10720_v8 = vld [vmem:[%s12017_s21 + $0xf04] ss:$8 sps:$4 sm:$0xff]  }
 0x2aa   : > { %8543 = vmatprep.subr.bf16.mxu0 %v10639_v17  ;;  %v10723_v9 = vld [vmem:[%s12017_s21 + $0x704] ss:$8 sps:$4 sm:$0xff]   ;;  %v9271_v17 = vcombine.low %v12557_v18, %v12560_v20  ;;  %v10724_v20 = vld [vmem:[%s12017_s21 + $0xf10] ss:$8 sps:$4 sm:$0xff]  }
 0x2ab   : > { %6665 = vmatmul.mubr.bf16.gmra.mrb[4].mxu1 %v9285_v19  ;;  %v9559_v19 = vcombine.low %v12563_v21, %v12566_v22  ;;  %v10727_v21 = vld [vmem:[%s12017_s21 + $0x710] ss:$8 sps:$4 sm:$0xff]   ;;  %v10732_v22 = vld [vmem:[%s12017_s21 + $0xf24] ss:$8 sps:$4 sm:$0xff]  }
 0x2ac   : > { %8529 = vmatmul.mubr.bf16.gmra.mrb[4].mxu0 %v9269_v60  ;;  %6680 = vmatpush1.bf16.msra.mxu1 %v10634_v23  ;;  %v10700_v60 = vld [vmem:[%s12017_s21 + $0xed0] ss:$8 sps:$4 sm:$0xff]  }
 0x2ad   : > { %8544 = vmatpush1.bf16.msra.mxu0 %v10637_v24  ;;  %6681 = vmatprep.subr.bf16.mxu1 %v10642_v15  ;;  %v4650_v23 = vld [vmem:[%s12068_s26 + $0x130] sm:$0xff]  ;;  %v10718_v15 = vld [vmem:[%s12017_s21 + $0xf00] ss:$8 sps:$4 sm:$0xff]  }
 0x2ae   : > { %8545 = vmatprep.subr.bf16.mxu0 %v10645_v25  ;;  %6707 = vmatprep.mubr.bf16.mxu1 %v12574_v26  ;;  %v4658_v24 = vld [vmem:[%s12068_s26 + $0x170] sm:$0xff]  ;;  %v10721_v25 = vld [vmem:[%s12017_s21 + $0x700] ss:$8 sps:$4 sm:$0xff]  }
 0x2af   : > { %8571 = vmatprep.mubr.bf16.mxu0 %v9560_v27  ;;  %v10726_v27 = vld [vmem:[%s12017_s21 + $0xf14] ss:$8 sps:$4 sm:$0xff]   ;;  %v9288_v18 = vcombine.high %v4650_v23, %v4658_v24 }
 0x2b0   : > { %6682 = vmatpush1.bf16.msra.mxu1 %v10640_v28  ;;  %v10729_v28 = vld [vmem:[%s12017_s21 + $0x714] ss:$8 sps:$4 sm:$0xff]  }
 0x2b1   : > { %8546 = vmatpush1.bf16.msra.mxu0 %v10643_v29  ;;  %6683 = vmatprep.subr.bf16.mxu1 %v10648_v30  ;;  %v10735_v29 = vld [vmem:[%s12017_s21 + $0x724] ss:$8 sps:$4 sm:$0xff]   ;;  %v12647_v30 = vld [vmem:[%s12068_s26 + $0xb8] sm:$0xff] }
 0x2b2   : > { %8547 = vmatprep.subr.bf16.mxu0 %v10651_v31  ;;  %v9287_v31 = vcombine.low %v4650_v23, %v4658_v24  ;;  %v10804_v23 = vld [vmem:[%s12017_s21 + $0xfe4] ss:$8 sps:$4 sm:$0xff]  }
 0x2b3   : > { %v10807_v24 = vld [vmem:[%s12017_s21 + $0x7e4] ss:$8 sps:$4 sm:$0xff]  }
 0x2b4   : > { %6684 = vmatpush1.bf16.msra.mxu1 %v10646_v32  ;;  %v12650_v32 = vld [vmem:[%s12068_s26 + $0xf8] sm:$0xff] }
 0x2b5   : > { %8548 = vmatpush1.bf16.msra.mxu0 %v10649_v33  ;;  %6685 = vmatprep.subr.bf16.mxu1 %v10654_v34  ;;  %v12653_v33 = vld [vmem:[%s12068_s26 + $0x38] sm:$0xff] }
 0x2b6   : > { %8549 = vmatprep.subr.bf16.mxu0 %v10657_v37  ;;  %v12656_v34 = vld [vmem:[%s12068_s26 + $0x78] sm:$0xff]  ;;  %v10730_v37 = vld [vmem:[%s12017_s21 + $0xf20] ss:$8 sps:$4 sm:$0xff]  }
 0x2b8   : > { %6686 = vmatpush1.bf16.msra.mxu1 %v10652_v40  ;;  %v10733_v40 = vld [vmem:[%s12017_s21 + $0x720] ss:$8 sps:$4 sm:$0xff]  }
 0x2b9   : > { %8550 = vmatpush1.bf16.msra.mxu0 %v10655_v41  ;;  %6687 = vmatprep.subr.bf16.mxu1 %v10660_v43  ;;  %v10741_v41 = vld [vmem:[%s12017_s21 + $0x734] ss:$8 sps:$4 sm:$0xff]   ;;  %v12664_v43 = vcombine.high %v12647_v30, %v12650_v32 }
 0x2ba   : > { %8551 = vmatprep.subr.bf16.mxu0 %v10663_v44  ;;  %v9562_v44 = vcombine.high %v12653_v33, %v12656_v34 }
 0x2bc   : > { %6688 = vmatpush1.bf16.msra.mxu1 %v10658_v45  ;;  %v10736_v45 = vld [vmem:[%s12017_s21 + $0xf30] ss:$8 sps:$4 sm:$0xff]  }
 0x2bd   : > { %8552 = vmatpush1.bf16.msra.mxu0 %v10661_v46  ;;  %6689 = vmatprep.subr.bf16.mxu1 %v10666_v35  ;;  %v10739_v46 = vld [vmem:[%s12017_s21 + $0x730] ss:$8 sps:$4 sm:$0xff]   ;;  %v10744_v35 = vld [vmem:[%s12017_s21 + $0xf44] ss:$8 sps:$4 sm:$0xff]  }
 0x2be   : > { %8553 = vmatprep.subr.bf16.mxu0 %v10669_v36  ;;  %v10747_v36 = vld [vmem:[%s12017_s21 + $0x744] ss:$8 sps:$4 sm:$0xff]  }
 0x2c0   : > { %6690 = vmatpush1.bf16.msra.mxu1 %v10664_v38  ;;  %v10742_v38 = vld [vmem:[%s12017_s21 + $0xf40] ss:$8 sps:$4 sm:$0xff]  }
 0x2c1   : > { %8554 = vmatpush1.bf16.msra.mxu0 %v10667_v49  ;;  %6691 = vmatprep.subr.bf16.mxu1 %v10672_v51  ;;  %v10745_v49 = vld [vmem:[%s12017_s21 + $0x740] ss:$8 sps:$4 sm:$0xff]   ;;  %v10750_v51 = vld [vmem:[%s12017_s21 + $0xf54] ss:$8 sps:$4 sm:$0xff]  }
 0x2c2   : > { %8555 = vmatprep.subr.bf16.mxu0 %v10675_v52  ;;  %v10753_v52 = vld [vmem:[%s12017_s21 + $0x754] ss:$8 sps:$4 sm:$0xff]  }
 0x2c4   : > { %6692 = vmatpush1.bf16.msra.mxu1 %v10670_v53  ;;  %v10748_v53 = vld [vmem:[%s12017_s21 + $0xf50] ss:$8 sps:$4 sm:$0xff]  }
 0x2c5   : > { %8556 = vmatpush1.bf16.msra.mxu0 %v10673_v54  ;;  %6693 = vmatprep.subr.bf16.mxu1 %v10678_v55  ;;  %v10751_v54 = vld [vmem:[%s12017_s21 + $0x750] ss:$8 sps:$4 sm:$0xff]   ;;  %v10756_v55 = vld [vmem:[%s12017_s21 + $0xf64] ss:$8 sps:$4 sm:$0xff]  }
 0x2c6   : > { %8557 = vmatprep.subr.bf16.mxu0 %v10681_v56  ;;  %v10759_v56 = vld [vmem:[%s12017_s21 + $0x764] ss:$8 sps:$4 sm:$0xff]  }
 0x2c8   : > { %6694 = vmatpush1.bf16.msra.mxu1 %v10676_v57  ;;  %v10754_v57 = vld [vmem:[%s12017_s21 + $0xf60] ss:$8 sps:$4 sm:$0xff]  }
 0x2c9   : > { %8558 = vmatpush1.bf16.msra.mxu0 %v10679_v39  ;;  %6695 = vmatprep.subr.bf16.mxu1 %v10684_v47  ;;  %v10757_v39 = vld [vmem:[%s12017_s21 + $0x760] ss:$8 sps:$4 sm:$0xff]   ;;  %v10762_v47 = vld [vmem:[%s12017_s21 + $0xf74] ss:$8 sps:$4 sm:$0xff]  }
 0x2ca   : > { %8559 = vmatprep.subr.bf16.mxu0 %v10687_v48  ;;  %v10765_v48 = vld [vmem:[%s12017_s21 + $0x774] ss:$8 sps:$4 sm:$0xff]  }
 0x2cc   : > { %6696 = vmatpush1.bf16.msra.mxu1 %v10682_v50  ;;  %v10760_v50 = vld [vmem:[%s12017_s21 + $0xf70] ss:$8 sps:$4 sm:$0xff]  }
 0x2cd   : > { %8560 = vmatpush1.bf16.msra.mxu0 %v10685_v61  ;;  %6697 = vmatprep.subr.bf16.mxu1 %v10690_v63  ;;  %v10763_v61 = vld [vmem:[%s12017_s21 + $0x770] ss:$8 sps:$4 sm:$0xff]   ;;  %v10768_v63 = vld [vmem:[%s12017_s21 + $0xf84] ss:$8 sps:$4 sm:$0xff]  }
 0x2ce   : > { %8561 = vmatprep.subr.bf16.mxu0 %v10693_v0  ;;  %v10771_v0 = vld [vmem:[%s12017_s21 + $0x784] ss:$8 sps:$4 sm:$0xff]  }
 0x2d0   : > { %6698 = vmatpush1.bf16.msra.mxu1 %v10688_v1  ;;  %v10766_v1 = vld [vmem:[%s12017_s21 + $0xf80] ss:$8 sps:$4 sm:$0xff]  }
 0x2d1   : > { %8562 = vmatpush1.bf16.msra.mxu0 %v10691_v2  ;;  %6699 = vmatprep.subr.bf16.mxu1 %v10696_v3  ;;  %v10769_v2 = vld [vmem:[%s12017_s21 + $0x780] ss:$8 sps:$4 sm:$0xff]   ;;  %v10774_v3 = vld [vmem:[%s12017_s21 + $0xf94] ss:$8 sps:$4 sm:$0xff]  }
 0x2d2   : > { %8563 = vmatprep.subr.bf16.mxu0 %v10699_v4  ;;  %v10777_v4 = vld [vmem:[%s12017_s21 + $0x794] ss:$8 sps:$4 sm:$0xff]  }
 0x2d4   : > { %6700 = vmatpush1.bf16.msra.mxu1 %v10694_v5  ;;  %v10772_v5 = vld [vmem:[%s12017_s21 + $0xf90] ss:$8 sps:$4 sm:$0xff]  }
 0x2d5   : > { %8564 = vmatpush1.bf16.msra.mxu0 %v10697_v6  ;;  %6701 = vmatprep.subr.bf16.mxu1 %v10702_v58  ;;  %v10775_v6 = vld [vmem:[%s12017_s21 + $0x790] ss:$8 sps:$4 sm:$0xff]   ;;  %v10780_v58 = vld [vmem:[%s12017_s21 + $0xfa4] ss:$8 sps:$4 sm:$0xff]  }
 0x2d6   : > { %8565 = vmatprep.subr.bf16.mxu0 %v10705_v59  ;;  %v10783_v59 = vld [vmem:[%s12017_s21 + $0x7a4] ss:$8 sps:$4 sm:$0xff]  }
 0x2d8   : > { %6702 = vmatpush1.bf16.msra.mxu1 %v10700_v60  ;;  %v10778_v60 = vld [vmem:[%s12017_s21 + $0xfa0] ss:$8 sps:$4 sm:$0xff]  }
 0x2d9   : > { %8566 = vmatpush1.bf16.msra.mxu0 %v10703_v10  ;;  %6703 = vmatprep.subr.bf16.mxu1 %v10708_v11  ;;  %v10781_v10 = vld [vmem:[%s12017_s21 + $0x7a0] ss:$8 sps:$4 sm:$0xff]   ;;  %v10786_v11 = vld [vmem:[%s12017_s21 + $0xfb4] ss:$8 sps:$4 sm:$0xff]  }
 0x2da   : > { %8567 = vmatprep.subr.bf16.mxu0 %v10711_v12  ;;  %v10789_v12 = vld [vmem:[%s12017_s21 + $0x7b4] ss:$8 sps:$4 sm:$0xff]  }
 0x2dc   : > { %6704 = vmatpush1.bf16.msra.mxu1 %v10706_v13  ;;  %v10784_v13 = vld [vmem:[%s12017_s21 + $0xfb0] ss:$8 sps:$4 sm:$0xff]  }
 0x2dd   : > { %8568 = vmatpush1.bf16.msra.mxu0 %v10709_v14  ;;  %6705 = vmatprep.subr.bf16.mxu1 %v10714_v42  ;;  %v10787_v14 = vld [vmem:[%s12017_s21 + $0x7b0] ss:$8 sps:$4 sm:$0xff]   ;;  %v10792_v42 = vld [vmem:[%s12017_s21 + $0xfc4] ss:$8 sps:$4 sm:$0xff]  }
 0x2de   : > { %8569 = vmatprep.subr.bf16.mxu0 %v10717_v16  ;;  %v10795_v16 = vld [vmem:[%s12017_s21 + $0x7c4] ss:$8 sps:$4 sm:$0xff]  }
 0x2e0   : > { %6706 = vmatpush1.bf16.msra.mxu1 %v10712_v62  ;;  %v10790_v62 = vld [vmem:[%s12017_s21 + $0xfc0] ss:$8 sps:$4 sm:$0xff]  }
 0x2e1   : > { %8570 = vmatpush1.bf16.msra.mxu0 %v10715_v7  ;;  %6728 = vmatprep.subr.bf16.mxu1 %v10720_v8  ;;  %v10793_v7 = vld [vmem:[%s12017_s21 + $0x7c0] ss:$8 sps:$4 sm:$0xff]   ;;  %v10798_v8 = vld [vmem:[%s12017_s21 + $0xfd4] ss:$8 sps:$4 sm:$0xff]  }
 0x2e2   : > { %8592 = vmatprep.subr.bf16.mxu0 %v10723_v9  ;;  %v10801_v9 = vld [vmem:[%s12017_s21 + $0x7d4] ss:$8 sps:$4 sm:$0xff]  }
 0x2e3   : > { %6708 = vmatmul.mubr.bf16.vlgmr.msra.gmra.mrb[0].mxu1 %v9271_v17 }
 0x2e4   : > { %8572 = vmatmul.mubr.bf16.vlgmr.msra.gmra.mrb[0].mxu0 %v9559_v19  ;;  %6729 = vmatpush1.bf16.msra.mxu1 %v10718_v15  ;;  %v10799_v19 = vld [vmem:[%s12017_s21 + $0x7d0] ss:$8 sps:$4 sm:$0xff]   ;;  %v10802_v15 = vld [vmem:[%s12017_s21 + $0xfe0] ss:$8 sps:$4 sm:$0xff]  }
 0x2e5   : > { %8593 = vmatpush1.bf16.msra.mxu0 %v10721_v25  ;;  %6730 = vmatprep.subr.bf16.mxu1 %v10726_v27  ;;  %v10805_v25 = vld [vmem:[%s12017_s21 + $0x7e0] ss:$8 sps:$4 sm:$0xff]   ;;  %v10810_v27 = vld [vmem:[%s12017_s21 + $0xff4] ss:$8 sps:$4 sm:$0xff]  }
 0x2e6   : > { %8594 = vmatprep.subr.bf16.mxu0 %v10729_v28  ;;  %6717 = vmatprep.mubr.bf16.mxu1 %v9288_v18  ;;  %v10813_v28 = vld [vmem:[%s12017_s21 + $0x7f4] ss:$8 sps:$4 sm:$0xff]   ;;  %v10808_v18 = vld [vmem:[%s12017_s21 + $0xff0] ss:$8 sps:$4 sm:$0xff]  }
 0x2e7   : > { %8581 = vmatprep.mubr.bf16.mxu0 %v12574_v26  ;;  %v10738_v26 = vld [vmem:[%s12017_s21 + $0xf34] ss:$8 sps:$4 sm:$0xff]  }
 0x2e8   : > { %6731 = vmatpush1.bf16.msra.mxu1 %v10724_v20  ;;  %v10811_v20 = vld [vmem:[%s12017_s21 + $0x7f0] ss:$8 sps:$4 sm:$0xff]  }
 0x2e9   : > { %8595 = vmatpush1.bf16.msra.mxu0 %v10727_v21  ;;  %6732 = vmatprep.subr.bf16.mxu1 %v10732_v22  ;;  %v4651_v21 = vld [vmem:[%s12068_s26 + $0x138] sm:$0xff] }
 0x2ea   : > { %8596 = vmatprep.subr.bf16.mxu0 %v10735_v29  ;;  %v4659_v22 = vld [vmem:[%s12068_s26 + $0x178] sm:$0xff]  ;;  %v9273_v29 = vcombine.low %v12647_v30, %v12650_v32 }
 0x2eb   : > { %6718 = vmatmul.mubr.bf16.gmra.mrb[4].mxu1 %v9287_v31  ;;  %v9561_v31 = vcombine.low %v12653_v33, %v12656_v34 }
 0x2ec   : > { %8582 = vmatmul.mubr.bf16.gmra.mrb[4].mxu0 %v9271_v17  ;;  %6733 = vmatpush1.bf16.msra.mxu1 %v10730_v37  ;;  %v10796_v17 = vld [vmem:[%s12017_s21 + $0xfd0] ss:$8 sps:$4 sm:$0xff]   ;;  %v9290_v37 = vcombine.high %v4651_v21, %v4659_v22 }
 0x2ed   : > { %8597 = vmatpush1.bf16.msra.mxu0 %v10733_v40  ;;  %6734 = vmatprep.subr.bf16.mxu1 %v10738_v26  ;;  %v9289_v40 = vcombine.low %v4651_v21, %v4659_v22  ;;  %v8645_v26 = vlaneseq }
 0x2ee   : > { %8598 = vmatprep.subr.bf16.mxu0 %v10741_v41  ;;  %6760 = vmatprep.mubr.bf16.mxu1 %v12664_v43 }
 0x2ef   : > { %8624 = vmatprep.mubr.bf16.mxu0 %v9562_v44  ;;  %v8646_v41 = vshrl.u32 %v8645_v26, 7 }
 0x2f0   : > { %6735 = vmatpush1.bf16.msra.mxu1 %v10736_v45 }
 0x2f1   : > { %8599 = vmatpush1.bf16.msra.mxu0 %v10739_v46  ;;  %6736 = vmatprep.subr.bf16.mxu1 %v10744_v35  ;;  %v8654_v44 = vand.u32 15, %v8646_v41  ;;  %v8648_v45 = vadd.s32 16, %v8646_v41  ;;  %v10890_v46 = vmov 0.0  }
 0x2f2   : > { %8600 = vmatprep.subr.bf16.mxu0 %v10747_v36 }
 0x2f3   : > { %vm8698_vm0 = vcmp.lt.s32.totalorder %v8654_v44, 2 }
 0x2f4   : > { %6737 = vmatpush1.bf16.msra.mxu1 %v10742_v38  ;;  %v9835_v33 = vsel %vm8698_vm0, 1.0, %v10890_v46  ;;  %v8668_v38 = vand.u32 15, %v8648_v45 }
 0x2f5   : > { %8601 = vmatpush1.bf16.msra.mxu0 %v10745_v49  ;;  %6738 = vmatprep.subr.bf16.mxu1 %v10750_v51 }
 0x2f6   : > { %8602 = vmatprep.subr.bf16.mxu0 %v10753_v52  ;;  %vm8700_vm1 = vcmp.lt.s32.totalorder %v8668_v38, 2 }
 0x2f8   : > { %6739 = vmatpush1.bf16.msra.mxu1 %v10748_v53 }
 0x2f9   : > { %8603 = vmatpush1.bf16.msra.mxu0 %v10751_v54  ;;  %6740 = vmatprep.subr.bf16.mxu1 %v10756_v55 }
 0x2fa   : > { %8604 = vmatprep.subr.bf16.mxu0 %v10759_v56 }
 0x2fc   : > { %6741 = vmatpush1.bf16.msra.mxu1 %v10754_v57 }
 0x2fd   : > { %8605 = vmatpush1.bf16.msra.mxu0 %v10757_v39  ;;  %6742 = vmatprep.subr.bf16.mxu1 %v10762_v47 }
 0x2fe   : > { %8606 = vmatprep.subr.bf16.mxu0 %v10765_v48 }
 0x300   : > { %6743 = vmatpush1.bf16.msra.mxu1 %v10760_v50 }
 0x301   : > { %8607 = vmatpush1.bf16.msra.mxu0 %v10763_v61  ;;  %6744 = vmatprep.subr.bf16.mxu1 %v10768_v63 }
 0x302   : > { %8608 = vmatprep.subr.bf16.mxu0 %v10771_v0 }
 0x304   : > { %6745 = vmatpush1.bf16.msra.mxu1 %v10766_v1 }
 0x305   : > { %8609 = vmatpush1.bf16.msra.mxu0 %v10769_v2  ;;  %6746 = vmatprep.subr.bf16.mxu1 %v10774_v3 }
 0x306   : > { %8610 = vmatprep.subr.bf16.mxu0 %v10777_v4  ;;  %v9836_v4 = vsel %vm8700_vm1, 1.0, %v10890_v46 }
 0x308   : > { %6747 = vmatpush1.bf16.msra.mxu1 %v10772_v5 }
 0x309   : > { %8611 = vmatpush1.bf16.msra.mxu0 %v10775_v6  ;;  %6748 = vmatprep.subr.bf16.mxu1 %v10780_v58 }
 0x30a   : > { %8612 = vmatprep.subr.bf16.mxu0 %v10783_v59 }
 0x30c   : > { %6749 = vmatpush1.bf16.msra.mxu1 %v10778_v60 }
 0x30d   : > { %8613 = vmatpush1.bf16.msra.mxu0 %v10781_v10  ;;  %6750 = vmatprep.subr.bf16.mxu1 %v10786_v11 }
 0x30e   : > { %8614 = vmatprep.subr.bf16.mxu0 %v10789_v12 }
 0x310   : > { %6751 = vmatpush1.bf16.msra.mxu1 %v10784_v13 }
 0x311   : > { %8615 = vmatpush1.bf16.msra.mxu0 %v10787_v14  ;;  %6752 = vmatprep.subr.bf16.mxu1 %v10792_v42 }
 0x312   : > { %8616 = vmatprep.subr.bf16.mxu0 %v10795_v16 }
 0x314   : > { %6753 = vmatpush1.bf16.msra.mxu1 %v10790_v62 }
 0x315   : > { %8617 = vmatpush1.bf16.msra.mxu0 %v10793_v7  ;;  %6754 = vmatprep.subr.bf16.mxu1 %v10798_v8 }
 0x316   : > { %8618 = vmatprep.subr.bf16.mxu0 %v10801_v9 }
 0x318   : > { %6755 = vmatpush1.bf16.msra.mxu1 %v10796_v17 }
 0x319   : > { %8619 = vmatpush1.bf16.msra.mxu0 %v10799_v19  ;;  %6756 = vmatprep.subr.bf16.mxu1 %v10804_v23 }
 0x31a   : > { %8620 = vmatprep.subr.bf16.mxu0 %v10807_v24 }
 0x31c   : > { %6757 = vmatpush1.bf16.msra.mxu1 %v10802_v15 }
 0x31d   : > { %8621 = vmatpush1.bf16.msra.mxu0 %v10805_v25  ;;  %6758 = vmatprep.subr.bf16.mxu1 %v10810_v27 }
 0x31e   : > { %8622 = vmatprep.subr.bf16.mxu0 %v10813_v28 }
 0x320   : > { %6759 = vmatpush1.bf16.msra.mxu1 %v10808_v18 }
 0x321   : > { %8623 = vmatpush1.bf16.msra.mxu0 %v10811_v20 }
 0x323   : > { %6761 = vmatmul.mubr.bf16.vlgmr.msra.gmra.mrb[0].mxu1 %v9273_v29 }
 0x324   : > { %8625 = vmatmul.mubr.bf16.vlgmr.msra.gmra.mrb[0].mxu0 %v9561_v31  ;;  %6770 = vmatprep.mubr.bf16.mxu1 %v9290_v37 }
 0x325   : > { %8634 = vmatprep.mubr.bf16.mxu0 %v12664_v43 }
 0x32b   : > { %6771 = vmatmul.mubr.bf16.gmra.mrb[4].mxu1 %v9289_v40 }
 0x32c   : > { %8635 = vmatmul.mubr.bf16.gmra.mrb[4].mxu0 %v9273_v29 }
 0x3f6   : > { %v6762_v30 = vpop.f32.mrb[0].mxu1 }
 0x3f7   : > { %v8626_v32 = vpop.f32.mrb[0].mxu0  ;;  %v6764_v35 = vpop.f32.mrb[1].mxu1 }
 0x3f8   : > { %v12726_v34 = vadd.f32 %v8626_v32, %v6762_v30  ;;  %v8628_v36 = vpop.f32.mrb[1].mxu0  ;;  %v6766_v43 = vpop.f32.mrb[2].mxu1 }
 0x3f9   : > { %v12728_v49 = vadd.f32 %v8628_v36, %v6764_v35  ;;  %v8630_v51 = vpop.f32.mrb[2].mxu0  ;;  %v6768_v54 = vpop.f32.mrb[3].mxu1 }
 0x3fa   : > { %v8710_v52 = vmul.f32 %v12726_v34, %v9835_v33  ;;  %v12731_v53 = vadd.f32 %v8630_v51, %v6766_v43  ;;  %v8632_v55 = vpop.f32.mrb[3].mxu0 }
 0x3fb   : > { %v8711_v56 = vmul.f32 %v12728_v49, %v9835_v33  ;;  %v12734_v57 = vadd.f32 %v8632_v55, %v6768_v54 }
 0x3fc   : > { %v8712_v39 = vmul.f32 0.0, %v12731_v53  ;;  %v8738_v48 = vmul.f32 %v12726_v34, %v8710_v52 }
 0x3fd   : > { %v8713_v47 = vmul.f32 0.0, %v12734_v57  ;;  %v8739_v63 = vmul.f32 %v12728_v49, %v8711_v56 }
 0x3fe   : > { %v8718_v50 = vadd.f32 %v8712_v39, %v8710_v52  ;;  %v8740_v61 = vmul.f32 %v12731_v53, %v8712_v39  ;;  %v6772_v2 = vpop.f32.mrb[4].mxu1 }
 0x3ff   : > { %v8727_v0 = vadd.f32 %v8713_v47, %v8711_v56  ;;  %v8741_v1 = vmul.f32 %v12734_v57, %v8713_v47  ;;  %v8636_v3 = vpop.f32.mrb[4].mxu0  ;;  %v6774_v58 = vpop.f32.mrb[5].mxu1 }
 0x400   : > { %v8746_v5 = vadd.f32 %v8740_v61, %v8738_v48  ;;  %v12742_v6 = vadd.f32 %v8636_v3, %v6772_v2  ;;  %v8638_v59 = vpop.f32.mrb[5].mxu0  ;;  %v6776_v11 = vpop.f32.mrb[6].mxu1 }
 0x401   : > { %v8755_v60 = vadd.f32 %v8741_v1, %v8739_v63  ;;  %v12744_v10 = vadd.f32 %v8638_v59, %v6774_v58  ;;  %v8640_v12 = vpop.f32.mrb[6].mxu0  ;;  %v6778_v42 = vpop.f32.mrb[7].mxu1 }
 0x402   : > { %v8714_v13 = vmul.f32 %v12742_v6, %v9836_v4  ;;  %v12747_v14 = vadd.f32 %v8640_v12, %v6776_v11  ;;  %v8642_v16 = vpop.f32.mrb[7].mxu0 }
 0x403   : > { %v8715_v62 = vmul.f32 %v12744_v10, %v9836_v4  ;;  %v12750_v7 = vadd.f32 %v8642_v16, %v6778_v42 }
 0x404   : > { %v8719_v8 = vadd.f32 %v8718_v50, %v8714_v13  ;;  %v8742_v9 = vmul.f32 %v12742_v6, %v8714_v13  ;;  %v8716_v17 = vmul.f32 0.0, %v12747_v14 }
 0x405   : > { %v8728_v19 = vadd.f32 %v8727_v0, %v8715_v62  ;;  %v8743_v23 = vmul.f32 %v12744_v10, %v8715_v62  ;;  %v8717_v24 = vmul.f32 0.0, %v12750_v7 }
 0x406   : > { %v8747_v15 = vadd.f32 %v8746_v5, %v8742_v9  ;;  %v8720_v25 = vadd.f32 %v8719_v8, %v8716_v17  ;;  %v8744_v27 = vmul.f32 %v12747_v14, %v8716_v17 }
 0x407   : > { %v8756_v28 = vadd.f32 %v8755_v60, %v8743_v23  ;;  %v8729_v18 = vadd.f32 %v8728_v19, %v8717_v24  ;;  %v8745_v20 = vmul.f32 %v12750_v7, %v8717_v24 }
 0x408   : > { %v8721_v21 = vrot.slane %v8720_v25, 4  ;;  %v8748_v22 = vadd.f32 %v8747_v15, %v8744_v27 }
 0x409   : > { %v8730_v29 = vrot.slane %v8729_v18, 4  ;;  %v8757_v31 = vadd.f32 %v8756_v28, %v8745_v20 }
 0x40a   : > { %v8722_v37 = vadd.f32 %v8721_v21, %v8720_v25  ;;  %v8749_v40 = vrot.slane %v8748_v22, 4 }
 0x40b   : > { %v8731_v26 = vadd.f32 %v8730_v29, %v8729_v18  ;;  %v8758_v41 = vrot.slane %v8757_v31, 4 }
 0x40c   : > { %v8723_v44 = vrot.slane %v8722_v37, 2  ;;  %v8750_v45 = vadd.f32 %v8749_v40, %v8748_v22 }
 0x40d   : > { %v8732_v30 = vrot.slane %v8731_v26, 2  ;;  %v8759_v32 = vadd.f32 %v8758_v41, %v8757_v31 }
 0x40e   : > { %v8724_v46 = vadd.f32 %v8723_v44, %v8722_v37  ;;  %v8751_v33 = vrot.slane %v8750_v45, 2 }
 0x40f   : > { %v8733_v35 = vadd.f32 %v8732_v30, %v8731_v26  ;;  %v8760_v36 = vrot.slane %v8759_v32, 2 }
 0x410   : > { %v8725_v38 = vrot.slane %v8724_v46, 1  ;;  %v8752_v43 = vadd.f32 %v8751_v33, %v8750_v45 }
 0x411   : > { %v8734_v51 = vrot.slane %v8733_v35, 1  ;;  %v8761_v52 = vadd.f32 %v8760_v36, %v8759_v32 }
 0x412   : > { %v8726_v54 = vadd.f32 %v8725_v38, %v8724_v46  ;;  %v8753_v55 = vrot.slane %v8752_v43, 1 }
 0x413   : > { %v8735_v56 = vadd.f32 %v8734_v51, %v8733_v35  ;;  %v8762_v39 = vrot.slane %v8761_v52, 1 }
 0x414   : > { %v8736_v47 = vmul.f32 0.25, %v8726_v54  ;;  %v8754_v48 = vadd.f32 %v8753_v55, %v8752_v43 }
 0x415   : > { %v8737_v50 = vmul.f32 0.25, %v8735_v56  ;;  %v8763_v61 = vadd.f32 %v8762_v39, %v8761_v52 }
 0x416   : > { %v8764_v63 = vmul.f32 0.25, %v8754_v48  ;;  %v8766_v0 = vmul.f32 %v8736_v47, %v8736_v47  ;;  %v8772_v1 = vsub.f32 %v12726_v34, %v8736_v47  ;;  %v8774_v2 = vsub.f32 %v12731_v53, %v8736_v47 }
 0x417   : > { %v8776_v3 = vsub.f32 %v12742_v6, %v8736_v47  ;;  %v8778_v4 = vsub.f32 %v12747_v14, %v8736_v47  ;;  %v8765_v5 = vmul.f32 0.25, %v8763_v61  ;;  %v8767_v58 = vmul.f32 %v8737_v50, %v8737_v50 }
 0x418   : > { %v8768_v59 = vsub.f32 %v8764_v63, %v8766_v0  ;;  %v8773_v60 = vsub.f32 %v12728_v49, %v8737_v50  ;;  %v8775_v11 = vsub.f32 %v12734_v57, %v8737_v50  ;;  %v8777_v12 = vsub.f32 %v12744_v10, %v8737_v50 }
 0x419   : > { %v8769_v13 = vsub.f32 %v8765_v5, %v8767_v58  ;;  %v8779_v42 = vsub.f32 %v12750_v7, %v8737_v50 }
 0x41a   : > { %v8770_v34 = vmax.f32 %v8768_v59, 0.0 }
 0x41b   : > { %v8771_v16 = vmax.f32 %v8769_v13, 0.0 }
 0x41c   : > { %v8780_v53 = vadd.f32 1e-05, %v8770_v34 }
 0x41d   : > { %v8781_v62 = vadd.f32 1e-05, %v8771_v16 }
 0x41e   : > { %10814 = vrsqrt.f32 %v8780_v53 }
 0x41f   : > { %10816 = vrsqrt.f32 %v8781_v62 }
 0x428   : > { %v10815_v6 = vpop.eup %10814 }
 0x429   : > { %v10817_v14 = vpop.eup %10816  ;;  %v8784_v8 = vmul.f32 %v10815_v6, %v8772_v1  ;;  %v8786_v9 = vmul.f32 %v10815_v6, %v8774_v2  ;;  %v8788_v17 = vmul.f32 %v10815_v6, %v8776_v3  ;;  %v8790_v49 = vmul.f32 %v10815_v6, %v8778_v4 }
 0x42a   : > { %v8785_v57 = vmul.f32 %v10817_v14, %v8773_v60  ;;  %v8787_v19 = vmul.f32 %v10817_v14, %v8775_v11  ;;  %v8789_v23 = vmul.f32 %v10817_v14, %v8777_v12  ;;  %v8791_v10 = vmul.f32 %v10817_v14, %v8779_v42 }
 0x42b   : > { %vm8798_vm2 = vcmp.ge.f32.partialorder %v8790_v49, 0.0  ;;  %v8806_v24 = vmul.f32 0.2, %v8790_v49  ;;  %vm8792_vm3 = vcmp.ge.f32.partialorder %v8784_v8, 0.0  ;;  %vm8794_vm5 = vcmp.ge.f32.partialorder %v8786_v9, 0.0 }
 0x42c   : > { %vm8793_vm4 = vcmp.ge.f32.partialorder %v8785_v57, 0.0  ;;  %vm8795_vm6 = vcmp.ge.f32.partialorder %v8787_v19, 0.0  ;;  %vm8796_vm7 = vcmp.ge.f32.partialorder %v8788_v17, 0.0  ;;  %vm8797_vm8 = vcmp.ge.f32.partialorder %v8789_v23, 0.0 }
 0x42d   : > { %vm8799_vm9 = vcmp.ge.f32.partialorder %v8791_v10, 0.0  ;;  %v8800_v7 = vmul.f32 0.2, %v8784_v8  ;;  %v8801_v15 = vmul.f32 0.2, %v8785_v57  ;;  %v8814_v25 = vsel %vm8798_vm2, %v8790_v49, %v8806_v24 }
 0x42e   : > { %v8802_v27 = vmul.f32 0.2, %v8786_v9  ;;  %v8803_v28 = vmul.f32 0.2, %v8787_v19  ;;  %v8804_v18 = vmul.f32 0.2, %v8788_v17 }
 0x42f   : > { %v8805_v20 = vmul.f32 0.2, %v8789_v23  ;;  %v8807_v21 = vmul.f32 0.2, %v8791_v10  ;;  %v8808_v22 = vsel %vm8792_vm3, %v8784_v8, %v8800_v7  ;;  %v8809_v29 = vsel %vm8793_vm4, %v8785_v57, %v8801_v15  ;;  %8850 = sbr.rel (!%p10973_p9) target bundleno = 1085 (0x43d), region = 84 }
 0x430   : > { %v8810_v31 = vsel %vm8794_vm5, %v8786_v9, %v8802_v27  ;;  %v8811_v37 = vsel %vm8795_vm6, %v8787_v19, %v8803_v28  ;;  %v8812_v40 = vsel %vm8796_vm7, %v8788_v17, %v8804_v18  ;;  %v9848_v26 = vpack.c.bf16 %v8809_v29, %v8808_v22 }
 0x431   : > { %v8813_v41 = vsel %vm8797_vm8, %v8789_v23, %v8805_v20  ;;  %v8815_v44 = vsel %vm8799_vm9, %v8791_v10, %v8807_v21  ;;  %v9849_v45 = vpack.c.bf16 %v8811_v37, %v8810_v31 }
 0x432   : > { %v9850_v30 = vpack.c.bf16 %v8813_v41, %v8812_v40  ;;  %v9851_v32 = vpack.c.bf16 %v8815_v44, %v8814_v25  ;;  %8840 = vst [vmem:[%s4332_s9] sm:$0xff] %v9848_v26 }
 0x433   : > { %8841 = vst [vmem:[%s4332_s9 + $0x8] sm:$0xff] %v9849_v45 }
 0x434   : > { %8842 = vst [vmem:[%s4332_s9 + $0x10] sm:$0xff] %v9850_v30  ;;  %8843 = vst [vmem:[%s4332_s9 + $0x18] sm:$0xff] %v9851_v32 }
 0x439   : > { %v8889_v46 = vld [vmem:[%s4332_s9] sm:$0xff] }
 0x43a   : > { %v8891_v33 = vld [vmem:[%s4332_s9 + $0x8] sm:$0xff]  ;;  %8890 = vst [vmem:[%s8855_s18] sm:$0xff] %v8889_v46 }
 0x43b   : > { %v8893_v35 = vld [vmem:[%s4332_s9 + $0x10] sm:$0xff]  ;;  %v8895_v36 = vld [vmem:[%s4332_s9 + $0x18] sm:$0xff]  ;;  %8892 = vst [vmem:[%s8855_s18 + $0x10] sm:$0xff] %v8891_v33 }
 0x43c   : > { %8894 = vst [vmem:[%s8855_s18 + $0x20] sm:$0xff] %v8893_v35  ;;  %8896 = vst [vmem:[%s8855_s18 + $0x30] sm:$0xff] %v8895_v36 }
 0x43d PF: > { %s12_s17 = sadd.s32 1, %s10888_s17   ;;  %s12808_s9 = smov %s10860_s10 }
 0x43e   : > { %p9_p1 = scmp.ge.s32.totalorder %s12_s17, 6   ;;  %s12809_s10 = smov %s10978_s28 }
 0x43f   : > { %s12810_s11 = smov %s10868_s12  ;;  %s12811_s12 = smov %s10967_s24 }
 0x440   : > { %s12812_s13 = smov %s10880_s15  ;;  %s12813_s14 = smov %s10884_s16 }
 0x441   : > { %s12814_s15 = smov %s12817_s19  ;;  %s12815_s16 = smov %s12821_s20 }
 0x442   :  { %11 = sbr.rel (!%p9_p1) target bundleno = 5 (0x5), region = 163 }

</bundles_post_ra>
